<compile_context>
chip_gen: v7x
topology: tpu7x:2x2x1
jax: 0.10.0
libtpu: 0.0.40
codegen_flags: <defaults>
</compile_context>

<pallas_src>
import functools

import jax
import jax.numpy as jnp
from jax.experimental import pallas as pl
from jax.experimental.pallas import tpu as pltpu

NEG_SLOPE = 0.01   # nn.LeakyReLU default
BN_EPS = 1e-5      # nn.BatchNorm2d default


def _lrelu(x):
    return jnp.where(x >= 0, x, NEG_SLOPE * x)


def _itemsize(dt):
    return jnp.finfo(dt).bits // 8


def _const_spec(shape):
    """Grid-invariant operand: constant index map + single buffering."""
    return pl.BlockSpec(shape, lambda *_: (0,) * len(shape),
                        pipeline_mode=pl.Buffered(1))


def _vmem_budget(*byte_counts):
    total = 2 * sum(int(b) for b in byte_counts) + (4 << 20)
    return int(min(100 << 20, max(16 << 20, total)))


def _pick_b_block(B, H, W, C):
    """Images per grid step: big enough M for the MXU, bounded VMEM footprint."""
    slab = (H + 2) * (W + 2) * max(C, 1) * 4
    best = 1
    for d in range(1, B + 1):
        if B % d:
            continue
        if d * H * W <= 4096 and d * slab <= (8 << 20):
            best = d
    return best


# ---------------------------------------------------------------------------
# Kernel 1: conv1 + bias -> padded y1, plus per-step partial BN statistics
# ---------------------------------------------------------------------------
def _conv1_kernel(H, W, Cin, Cout, Bblk, x_ref, w_ref, b_ref,
                  y_ref, st_ref, col_ref):
    M = Bblk * H * W
    # im2col into VMEM scratch -> ONE K=9*Cin matmul (MXU-side accumulation).
    # TODO(synk): a pltpu.roll-based extraction (3 rolls along W) would cut the
    # shifted-window relayout traffic further.
    for k in range(9):
        kh, kw = divmod(k, 3)
        win = x_ref[:, kh:kh + H, kw:kw + W, :].reshape(M, Cin)
        col_ref[:, k * Cin:(k + 1) * Cin] = win.astype(col_ref.dtype)
    y = jnp.dot(col_ref[...], w_ref[...],
                preferred_element_type=jnp.float32) + b_ref[...]

    # Store y1 already spatially zero-padded (saves an XLA pad round trip).
    y_ref[...] = jnp.zeros_like(y_ref)
    y_ref[:, 1:H + 1, 1:W + 1, :] = y.reshape(Bblk, H, W, Cout)

    # Per-step partial BN statistics: row 0 = sum, row 1 = sum of squares.
    st_ref[...] = jnp.zeros_like(st_ref)
    st_ref[0, 0:1, :] = jnp.sum(y, axis=0, keepdims=True)
    st_ref[0, 1:2, :] = jnp.sum(y * y, axis=0, keepdims=True)


# ---------------------------------------------------------------------------
# Kernel 2: BN1(scale/shift)+LeakyReLU folded in, conv2 + bias, partial stats,
#           lane-dense (Bblk, C, H*W) output (NCHW-ready)
# ---------------------------------------------------------------------------
def _conv2_kernel(H, W, C, Bblk, y1_ref, sc_ref, sh_ref, w_ref, b_ref,
                  y2_ref, st_ref, act_ref, col_ref):
    M = Bblk * H * W
    sc = sc_ref[...].reshape(1, 1, 1, C)
    sh = sh_ref[...].reshape(1, 1, 1, C)
    # Activate only the interior; the scratch border stays zero, which IS the
    # zero padding of the activated signal (no HBM mask, no full-slab multiply).
    act_ref[...] = jnp.zeros_like(act_ref)
    act_ref[:, 1:H + 1, 1:W + 1, :] = _lrelu(
        y1_ref[:, 1:H + 1, 1:W + 1, :] * sc + sh)

    for k in range(9):
        kh, kw = divmod(k, 3)
        win = act_ref[:, kh:kh + H, kw:kw + W, :].reshape(M, C)
        col_ref[:, k * C:(k + 1) * C] = win.astype(col_ref.dtype)
    y = jnp.dot(col_ref[...], w_ref[...],
                preferred_element_type=jnp.float32) + b_ref[...]

    st_ref[...] = jnp.zeros_like(st_ref)
    st_ref[0, 0:1, :] = jnp.sum(y, axis=0, keepdims=True)
    st_ref[0, 1:2, :] = jnp.sum(y * y, axis=0, keepdims=True)

    # Transpose in-kernel (XLU) -> lane-dense (C, H*W) per image, NCHW-ready.
    y3 = y.reshape(Bblk, H * W, C)
    for b in range(Bblk):
        y2_ref[b] = y3[b].T


# ---------------------------------------------------------------------------
# Kernel 3: BN2(scale/shift) + LeakyReLU (+ per-batch time-embedding add),
#           operating directly on the (B, C, H*W) layout.
# ---------------------------------------------------------------------------
def _bn_act_kernel(y_ref, sc_ref, sh_ref, o_ref):
    o_ref[...] = _lrelu(y_ref[...] * sc_ref[...] + sh_ref[...])


def _bn_act_time_kernel(y_ref, sc_ref, sh_ref, t_ref, o_ref):
    o_ref[...] = _lrelu(y_ref[...] * sc_ref[...] + sh_ref[...]) + t_ref[...]


# ---------------------------------------------------------------------------
# pallas_call wrappers
# ---------------------------------------------------------------------------
def _conv1_stats(x_pad, w9, b, *, H, W, Cin, Cout, bblk, mm_dtype):
    B = x_pad.shape[0]
    nsteps = B // bblk
    isz = _itemsize(mm_dtype)
    kernel = functools.partial(_conv1_kernel, H, W, Cin, Cout, bblk)
    flops = 2 * B * H * W * 9 * Cin * Cout
    bytes_accessed = int(x_pad.size * isz + w9.size * isz + b.size * 4
                         + B * (H + 2) * (W + 2) * Cout * 4
                         + nsteps * 8 * Cout * 4)
    x_blk = bblk * (H + 2) * (W + 2) * Cin * isz
    y_blk = bblk * (H + 2) * (W + 2) * Cout * 4
    col_blk = bblk * H * W * 9 * Cin * isz
    return pl.pallas_call(
        kernel,
        grid=(nsteps,),
        in_specs=[
            pl.BlockSpec((bblk, H + 2, W + 2, Cin), lambda bb: (bb, 0, 0, 0)),
            _const_spec((9 * Cin, Cout)),
            _const_spec((1, Cout)),
        ],
        out_specs=(
            pl.BlockSpec((bblk, H + 2, W + 2, Cout), lambda bb: (bb, 0, 0, 0)),
            pl.BlockSpec((1, 8, Cout), lambda bb: (bb, 0, 0)),
        ),
        out_shape=(
            jax.ShapeDtypeStruct((B, H + 2, W + 2, Cout), jnp.float32),
            jax.ShapeDtypeStruct((nsteps, 8, Cout), jnp.float32),
        ),
        scratch_shapes=[pltpu.VMEM((bblk * H * W, 9 * Cin), mm_dtype)],
        compiler_params=pltpu.CompilerParams(
            dimension_semantics=("parallel",),
            vmem_limit_bytes=_vmem_budget(x_blk, y_blk, col_blk,
                                          int(w9.size) * isz)),
        cost_estimate=pl.CostEstimate(flops=flops, transcendentals=0,
                                      bytes_accessed=bytes_accessed),
    )(x_pad, w9, b)


def _conv2_stats(y1_pad, scale1, shift1, w9, b, *, H, W, C, bblk, mm_dtype):
    B = y1_pad.shape[0]
    nsteps = B // bblk
    isz = _itemsize(mm_dtype)
    kernel = functools.partial(_conv2_kernel, H, W, C, bblk)
    flops = 2 * B * H * W * 9 * C * C
    bytes_accessed = int(y1_pad.size * 4 + w9.size * isz
                         + B * H * W * C * 4 + nsteps * 8 * C * 4)
    y1_blk = bblk * (H + 2) * (W + 2) * C * 4
    y2_blk = bblk * C * H * W * 4
    act_blk = bblk * (H + 2) * (W + 2) * C * 4
    col_blk = bblk * H * W * 9 * C * isz
    return pl.pallas_call(
        kernel,
        grid=(nsteps,),
        in_specs=[
            pl.BlockSpec((bblk, H + 2, W + 2, C), lambda bb: (bb, 0, 0, 0)),
            _const_spec((1, C)),
            _const_spec((1, C)),
            _const_spec((9 * C, C)),
            _const_spec((1, C)),
        ],
        out_specs=(
            pl.BlockSpec((bblk, C, H * W), lambda bb: (bb, 0, 0)),
            pl.BlockSpec((1, 8, C), lambda bb: (bb, 0, 0)),
        ),
        out_shape=(
            jax.ShapeDtypeStruct((B, C, H * W), jnp.float32),
            jax.ShapeDtypeStruct((nsteps, 8, C), jnp.float32),
        ),
        scratch_shapes=[pltpu.VMEM((bblk, H + 2, W + 2, C), jnp.float32),
                        pltpu.VMEM((bblk * H * W, 9 * C), mm_dtype)],
        compiler_params=pltpu.CompilerParams(
            dimension_semantics=("parallel",),
            vmem_limit_bytes=_vmem_budget(y1_blk, y2_blk, act_blk, col_blk,
                                          int(w9.size) * isz)),
        cost_estimate=pl.CostEstimate(flops=flops, transcendentals=0,
                                      bytes_accessed=bytes_accessed),
    )(y1_pad, scale1, shift1, w9, b)


def _bn_act(y2, scale2, shift2, tadd, *, H, W, C, bblk):
    B = y2.shape[0]
    nsteps = B // bblk
    HW = H * W
    y_blk = bblk * C * HW * 4
    common = dict(
        grid=(nsteps,),
        out_shape=jax.ShapeDtypeStruct((B, C, HW), jnp.float32),
        out_specs=pl.BlockSpec((bblk, C, HW), lambda bb: (bb, 0, 0)),
        compiler_params=pltpu.CompilerParams(
            dimension_semantics=("parallel",),
            vmem_limit_bytes=_vmem_budget(y_blk, y_blk)),
        cost_estimate=pl.CostEstimate(flops=6 * B * C * HW, transcendentals=0,
                                      bytes_accessed=8 * B * C * HW),
    )
    y_spec = pl.BlockSpec((bblk, C, HW), lambda bb: (bb, 0, 0))
    v_spec = _const_spec((1, C, 1))
    if tadd is None:
        return pl.pallas_call(_bn_act_kernel,
                              in_specs=[y_spec, v_spec, v_spec],
                              **common)(y2, scale2, shift2)
    t_spec = pl.BlockSpec((bblk, C, 1), lambda bb: (bb, 0, 0))
    return pl.pallas_call(_bn_act_time_kernel,
                          in_specs=[y_spec, v_spec, v_spec, t_spec],
                          **common)(y2, scale2, shift2, tadd)


# ---------------------------------------------------------------------------
# Plain-JAX glue
# ---------------------------------------------------------------------------
def _bn_fold(stats, count, gamma, beta):
    """Fold training-mode batch-norm (biased var, eps=1e-5) into scale/shift."""
    s = jnp.sum(stats[:, 0, :], axis=0)
    q = jnp.sum(stats[:, 1, :], axis=0)
    mean = s / count
    var = jnp.maximum(q / count - mean * mean, 0.0)
    # TODO(synk): for very large B*H*W use centered / Kahan partial sums to
    # avoid E[y^2]-E[y]^2 cancellation; fine at these magnitudes.
    scale = gamma * jax.lax.rsqrt(var + BN_EPS)
    shift = beta - mean * scale
    return scale, shift


def block_forward(x_nchw, t, params, *, matmul_dtype=jnp.float32):
    """Equivalent of Block.forward(x, t).  x: (B, Cin, H, W), t: (B, emb) or None."""
    B, Cin, H, W = x_nchw.shape
    Cout = params["w1"].shape[0]
    n = B * H * W
    bblk = _pick_b_block(B, H, W, Cout)

    # Input layout pass (NHWC + 1px halo) stays in XLA: one-time read of x.
    x = jnp.transpose(x_nchw, (0, 2, 3, 1)).astype(jnp.float32)
    x_pad = jnp.pad(x, ((0, 0), (1, 1), (1, 1), (0, 0))).astype(matmul_dtype)

    # PyTorch (O, I, 3, 3) -> (9*I, O), matching the in-kernel im2col order.
    w1 = jnp.transpose(params["w1"], (2, 3, 1, 0)).reshape(9 * Cin, Cout)
    w2 = jnp.transpose(params["w2"], (2, 3, 1, 0)).reshape(9 * Cout, Cout)
    w1 = w1.astype(matmul_dtype)
    w2 = w2.astype(matmul_dtype)
    b1 = params["b1"].reshape(1, Cout).astype(jnp.float32)
    b2 = params["b2"].reshape(1, Cout).astype(jnp.float32)

    # Stage 1: conv1 (+bias) -> padded y1 + per-step partial BN statistics.
    y1_pad, st1 = _conv1_stats(x_pad, w1, b1, H=H, W=W, Cin=Cin, Cout=Cout,
                               bblk=bblk, mm_dtype=matmul_dtype)
    scale1, shift1 = _bn_fold(st1, n, params["g1"], params["be1"])

    # Stage 2: BN1+LeakyReLU folded into conv2 (+bias) + partial statistics;
    # y2 comes out lane-dense / NCHW-ready as (B, Cout, H*W).
    y2, st2 = _conv2_stats(y1_pad, scale1.reshape(1, Cout),
                           shift1.reshape(1, Cout), w2, b2,
                           H=H, W=W, C=Cout, bblk=bblk, mm_dtype=matmul_dtype)
    scale2, shift2 = _bn_fold(st2, n, params["g2"], params["be2"])

    # Stage 3: BN2 + LeakyReLU (+ broadcast time-embedding add).
    # TODO(synk): in a full UNet this elementwise pass should be folded into the
    # next Block's conv1 (exactly like stage 1 -> 2 above) to save the HBM trip.
    if t is None:
        tadd = None
    else:
        tadd = (jnp.dot(t, params["wt"].T, precision=jax.lax.Precision.HIGHEST)
                + params["bt"]).reshape(B, Cout, 1).astype(jnp.float32)
    out = _bn_act(y2, scale2.reshape(1, Cout, 1), shift2.reshape(1, Cout, 1),
                  tadd, H=H, W=W, C=Cout, bblk=bblk)
    return out.reshape(B, Cout, H, W)   # free reshape: already channels-first


# ---------------------------------------------------------------------------
# Pure-JAX reference (for correctness check)
# ---------------------------------------------------------------------------
def _ref_forward(x, t, params):
    dn = ("NCHW", "OIHW", "NCHW")
    prec = jax.lax.Precision.HIGHEST

    def bn_lrelu(y, g, be):
        mean = jnp.mean(y, axis=(0, 2, 3), keepdims=True)
        var = jnp.mean((y - mean) ** 2, axis=(0, 2, 3), keepdims=True)
        yhat = (y - mean) / jnp.sqrt(var + BN_EPS)
        yhat = yhat * g[None, :, None, None] + be[None, :, None, None]
        return jnp.where(yhat >= 0, yhat, NEG_SLOPE * yhat)

    y = jax.lax.conv_general_dilated(x, params["w1"], (1, 1), ((1, 1), (1, 1)),
                                     dimension_numbers=dn, precision=prec)
    y = bn_lrelu(y + params["b1"][None, :, None, None], params["g1"], params["be1"])
    y = jax.lax.conv_general_dilated(y, params["w2"], (1, 1), ((1, 1), (1, 1)),
                                     dimension_numbers=dn, precision=prec)
    y = bn_lrelu(y + params["b2"][None, :, None, None], params["g2"], params["be2"])
    if t is None:
        return y
    time = jnp.dot(t, params["wt"].T, precision=prec) + params["bt"]
    return y + time[:, :, None, None]


# ---------------------------------------------------------------------------
if __name__ == "__main__":
    B, Cin, Cout, H, W, EMB = 2, 4, 8, 16, 16, 16

    key = jax.random.PRNGKey(0)
    ks = jax.random.split(key, 8)
    params = {
        # deterministic synthetic weights (PyTorch parameter shapes)
        "w1": jax.random.normal(ks[0], (Cout, Cin, 3, 3), jnp.float32) * 0.1,
        "b1": jax.random.normal(ks[1], (Cout,), jnp.float32) * 0.1,
        "w2": jax.random.normal(ks[2], (Cout, Cout, 3, 3), jnp.float32) * 0.1,
        "b2": jax.random.normal(ks[3], (Cout,), jnp.float32) * 0.1,
        "wt": jax.random.normal(ks[4], (Cout, EMB), jnp.float32) * 0.1,
        "bt": jax.random.normal(ks[5], (Cout,), jnp.float32) * 0.1,
        # BatchNorm2d affine defaults (weight=1, bias=0)
        "g1": jnp.ones((Cout,), jnp.float32),
        "be1": jnp.zeros((Cout,), jnp.float32),
        "g2": jnp.ones((Cout,), jnp.float32),
        "be2": jnp.zeros((Cout,), jnp.float32),
    }
    # TODO(synk): BatchNorm2d running_mean/running_var updates (training-mode
    # side effect) are not modeled; only the forward output is reproduced.

    x = jax.random.normal(ks[6], (B, Cin, H, W), jnp.float32)
    t = jax.random.normal(ks[7], (B, EMB), jnp.float32)

    fwd = jax.jit(block_forward)
    out = jax.block_until_ready(fwd(x, t, params))
    ref = jax.block_until_ready(_ref_forward(x, t, params))
    assert out.shape == (B, Cout, H, W)
    err = float(jnp.max(jnp.abs(out - ref)))
    assert jnp.allclose(out, ref, atol=1e-3, rtol=1e-3), f"max err {err}"

    # t = None branch: the time term is zero and no time operand/kernel exists.
    out0 = jax.block_until_ready(fwd(x, None, params))
    ref0 = jax.block_until_ready(_ref_forward(x, None, params))
    err0 = float(jnp.max(jnp.abs(out0 - ref0)))
    assert jnp.allclose(out0, ref0, atol=1e-3, rtol=1e-3), f"max err {err0}"

    # bf16 MXU-operand path (production setting for v6e/v7x): f32 accumulation
    # and f32 BN statistics, checked against the f32 reference loosely.
    fwd_bf16 = jax.jit(functools.partial(block_forward,
                                         matmul_dtype=jnp.bfloat16))
    out_bf16 = jax.block_until_ready(fwd_bf16(x, t, params))
    err_bf16 = float(jnp.max(jnp.abs(out_bf16 - ref)))
    assert err_bf16 < 0.25, f"bf16 max err {err_bf16}"

    print("KERNEL_OK")
</pallas_src>

<mosaic_0001>
module attributes {stable_mosaic.version = 11 : i64} {
  func.func @_conv1_kernel(%arg0: i32, %arg1: memref<2x18x18x4xf32, #tpu.memory_space<vmem>>, %arg2: memref<36x8xf32, #tpu.memory_space<vmem>>, %arg3: memref<1x8xf32, #tpu.memory_space<vmem>>, %arg4: memref<2x18x18x8xf32, #tpu.memory_space<vmem>>, %arg5: memref<1x8x8xf32, #tpu.memory_space<vmem>>, %arg6: memref<512x36xf32, #tpu.memory_space<vmem>>) attributes {dimension_semantics = [#tpu.dimension_semantics<parallel>], iteration_bounds = array<i64: 1>, scalar_prefetch = 0 : i64, scratch_operands = 1 : i64, tpu.core_type = #tpu.core_type<tc>, window_params = [{transform_indices = @transform_0, window_bounds = array<i64: 2, 18, 18, 4>}, {pipeline_mode = #tpu.pipeline_mode<synchronous>, transform_indices = @transform_1, window_bounds = array<i64: 36, 8>}, {pipeline_mode = #tpu.pipeline_mode<synchronous>, transform_indices = @transform_2, window_bounds = array<i64: 1, 8>}, {transform_indices = @transform_3, window_bounds = array<i64: 2, 18, 18, 8>}, {transform_indices = @transform_4, window_bounds = array<i64: 1, 8, 8>}]} {
    %c0 = arith.constant 0 : index
    %c0_0 = arith.constant 0 : index
    %c0_1 = arith.constant 0 : index
    %c0_2 = arith.constant 0 : index
    %0 = vector.load %arg1[%c0, %c0_0, %c0_1, %c0_2] : memref<2x18x18x4xf32, #tpu.memory_space<vmem>>, vector<2x16x16x4xf32>
    %1 = vector.shape_cast %0 : vector<2x16x16x4xf32> to vector<512x4xf32>
    %c0_3 = arith.constant 0 : index
    %c0_4 = arith.constant 0 : index
    %2 = vector.load %arg6[%c0_3, %c0_4] : memref<512x36xf32, #tpu.memory_space<vmem>>, vector<512x4xf32>
    tpu.vector_store %arg6[%c0_3, %c0_4], %1 {strides = array<i32>} : memref<512x36xf32, #tpu.memory_space<vmem>>, vector<512x4xf32>,
    %c0_5 = arith.constant 0 : index
    %c0_6 = arith.constant 0 : index
    %c1 = arith.constant 1 : index
    %c0_7 = arith.constant 0 : index
    %3 = vector.load %arg1[%c0_5, %c0_6, %c1, %c0_7] : memref<2x18x18x4xf32, #tpu.memory_space<vmem>>, vector<2x16x16x4xf32>
    %4 = vector.shape_cast %3 : vector<2x16x16x4xf32> to vector<512x4xf32>
    %c0_8 = arith.constant 0 : index
    %c4 = arith.constant 4 : index
    %5 = vector.load %arg6[%c0_8, %c4] : memref<512x36xf32, #tpu.memory_space<vmem>>, vector<512x4xf32>
    tpu.vector_store %arg6[%c0_8, %c4], %4 {strides = array<i32>} : memref<512x36xf32, #tpu.memory_space<vmem>>, vector<512x4xf32>,
    %c0_9 = arith.constant 0 : index
    %c0_10 = arith.constant 0 : index
    %c2 = arith.constant 2 : index
    %c0_11 = arith.constant 0 : index
    %6 = vector.load %arg1[%c0_9, %c0_10, %c2, %c0_11] : memref<2x18x18x4xf32, #tpu.memory_space<vmem>>, vector<2x16x16x4xf32>
    %7 = vector.shape_cast %6 : vector<2x16x16x4xf32> to vector<512x4xf32>
    %c0_12 = arith.constant 0 : index
    %c8 = arith.constant 8 : index
    %8 = vector.load %arg6[%c0_12, %c8] : memref<512x36xf32, #tpu.memory_space<vmem>>, vector<512x4xf32>
    tpu.vector_store %arg6[%c0_12, %c8], %7 {strides = array<i32>} : memref<512x36xf32, #tpu.memory_space<vmem>>, vector<512x4xf32>,
    %c0_13 = arith.constant 0 : index
    %c1_14 = arith.constant 1 : index
    %c0_15 = arith.constant 0 : index
    %c0_16 = arith.constant 0 : index
    %9 = vector.load %arg1[%c0_13, %c1_14, %c0_15, %c0_16] : memref<2x18x18x4xf32, #tpu.memory_space<vmem>>, vector<2x16x16x4xf32>
    %10 = vector.shape_cast %9 : vector<2x16x16x4xf32> to vector<512x4xf32>
    %c0_17 = arith.constant 0 : index
    %c12 = arith.constant 12 : index
    %11 = vector.load %arg6[%c0_17, %c12] : memref<512x36xf32, #tpu.memory_space<vmem>>, vector<512x4xf32>
    tpu.vector_store %arg6[%c0_17, %c12], %10 {strides = array<i32>} : memref<512x36xf32, #tpu.memory_space<vmem>>, vector<512x4xf32>,
    %c0_18 = arith.constant 0 : index
    %c1_19 = arith.constant 1 : index
    %c1_20 = arith.constant 1 : index
    %c0_21 = arith.constant 0 : index
    %12 = vector.load %arg1[%c0_18, %c1_19, %c1_20, %c0_21] : memref<2x18x18x4xf32, #tpu.memory_space<vmem>>, vector<2x16x16x4xf32>
    %13 = vector.shape_cast %12 : vector<2x16x16x4xf32> to vector<512x4xf32>
    %c0_22 = arith.constant 0 : index
    %c16 = arith.constant 16 : index
    %14 = vector.load %arg6[%c0_22, %c16] : memref<512x36xf32, #tpu.memory_space<vmem>>, vector<512x4xf32>
    tpu.vector_store %arg6[%c0_22, %c16], %13 {strides = array<i32>} : memref<512x36xf32, #tpu.memory_space<vmem>>, vector<512x4xf32>,
    %c0_23 = arith.constant 0 : index
    %c1_24 = arith.constant 1 : index
    %c2_25 = arith.constant 2 : index
    %c0_26 = arith.constant 0 : index
    %15 = vector.load %arg1[%c0_23, %c1_24, %c2_25, %c0_26] : memref<2x18x18x4xf32, #tpu.memory_space<vmem>>, vector<2x16x16x4xf32>
    %16 = vector.shape_cast %15 : vector<2x16x16x4xf32> to vector<512x4xf32>
    %c0_27 = arith.constant 0 : index
    %c20 = arith.constant 20 : index
    %17 = vector.load %arg6[%c0_27, %c20] : memref<512x36xf32, #tpu.memory_space<vmem>>, vector<512x4xf32>
    tpu.vector_store %arg6[%c0_27, %c20], %16 {strides = array<i32>} : memref<512x36xf32, #tpu.memory_space<vmem>>, vector<512x4xf32>,
    %c0_28 = arith.constant 0 : index
    %c2_29 = arith.constant 2 : index
    %c0_30 = arith.constant 0 : index
    %c0_31 = arith.constant 0 : index
    %18 = vector.load %arg1[%c0_28, %c2_29, %c0_30, %c0_31] : memref<2x18x18x4xf32, #tpu.memory_space<vmem>>, vector<2x16x16x4xf32>
    %19 = vector.shape_cast %18 : vector<2x16x16x4xf32> to vector<512x4xf32>
    %c0_32 = arith.constant 0 : index
    %c24 = arith.constant 24 : index
    %20 = vector.load %arg6[%c0_32, %c24] : memref<512x36xf32, #tpu.memory_space<vmem>>, vector<512x4xf32>
    tpu.vector_store %arg6[%c0_32, %c24], %19 {strides = array<i32>} : memref<512x36xf32, #tpu.memory_space<vmem>>, vector<512x4xf32>,
    %c0_33 = arith.constant 0 : index
    %c2_34 = arith.constant 2 : index
    %c1_35 = arith.constant 1 : index
    %c0_36 = arith.constant 0 : index
    %21 = vector.load %arg1[%c0_33, %c2_34, %c1_35, %c0_36] : memref<2x18x18x4xf32, #tpu.memory_space<vmem>>, vector<2x16x16x4xf32>
    %22 = vector.shape_cast %21 : vector<2x16x16x4xf32> to vector<512x4xf32>
    %c0_37 = arith.constant 0 : index
    %c28 = arith.constant 28 : index
    %23 = vector.load %arg6[%c0_37, %c28] : memref<512x36xf32, #tpu.memory_space<vmem>>, vector<512x4xf32>
    tpu.vector_store %arg6[%c0_37, %c28], %22 {strides = array<i32>} : memref<512x36xf32, #tpu.memory_space<vmem>>, vector<512x4xf32>,
    %c0_38 = arith.constant 0 : index
    %c2_39 = arith.constant 2 : index
    %c2_40 = arith.constant 2 : index
    %c0_41 = arith.constant 0 : index
    %24 = vector.load %arg1[%c0_38, %c2_39, %c2_40, %c0_41] : memref<2x18x18x4xf32, #tpu.memory_space<vmem>>, vector<2x16x16x4xf32>
    %25 = vector.shape_cast %24 : vector<2x16x16x4xf32> to vector<512x4xf32>
    %c0_42 = arith.constant 0 : index
    %c32 = arith.constant 32 : index
    %26 = vector.load %arg6[%c0_42, %c32] : memref<512x36xf32, #tpu.memory_space<vmem>>, vector<512x4xf32>
    tpu.vector_store %arg6[%c0_42, %c32], %25 {strides = array<i32>} : memref<512x36xf32, #tpu.memory_space<vmem>>, vector<512x4xf32>,
    %c0_43 = arith.constant 0 : index
    %c0_44 = arith.constant 0 : index
    %27 = vector.load %arg6[%c0_43, %c0_44] : memref<512x36xf32, #tpu.memory_space<vmem>>, vector<512x36xf32>
    %c0_45 = arith.constant 0 : index
    %c0_46 = arith.constant 0 : index
    %28 = vector.load %arg2[%c0_45, %c0_46] : memref<36x8xf32, #tpu.memory_space<vmem>>, vector<36x8xf32>
    %cst = arith.constant dense<0.000000e+00> : vector<512x8xf32>
    %29 = tpu.matmul %27, %28, %cst {dimension_numbers = #tpu.dot_dimension_numbers<[1], [0], [0], [1], [0, 0, 1, 1], [], []>} : vector<512x36xf32>, vector<36x8xf32>, vector<512x8xf32> -> vector<512x8xf32>
    %c0_47 = arith.constant 0 : index
    %c0_48 = arith.constant 0 : index
    %30 = vector.load %arg3[%c0_47, %c0_48] : memref<1x8xf32, #tpu.memory_space<vmem>>, vector<1x8xf32>
    %31 = vector.broadcast %30 : vector<1x8xf32> to vector<512x8xf32>
    %32 = arith.addf %29, %31 : vector<512x8xf32>
    %cst_49 = arith.constant 0.000000e+00 : f32
    %33 = vector.broadcast %cst_49 : f32 to vector<2x18x18x8xf32>
    %c0_50 = arith.constant 0 : index
    %c0_51 = arith.constant 0 : index
    %c0_52 = arith.constant 0 : index
    %c0_53 = arith.constant 0 : index
    %34 = vector.load %arg4[%c0_50, %c0_51, %c0_52, %c0_53] : memref<2x18x18x8xf32, #tpu.memory_space<vmem>>, vector<2x18x18x8xf32>
    tpu.vector_store %arg4[%c0_50, %c0_51, %c0_52, %c0_53], %33 {strides = array<i32>} : memref<2x18x18x8xf32, #tpu.memory_space<vmem>>, vector<2x18x18x8xf32>,
    %35 = vector.shape_cast %32 : vector<512x8xf32> to vector<2x16x16x8xf32>
    %c0_54 = arith.constant 0 : index
    %c1_55 = arith.constant 1 : index
    %c1_56 = arith.constant 1 : index
    %c0_57 = arith.constant 0 : index
    %36 = vector.load %arg4[%c0_54, %c1_55, %c1_56, %c0_57] : memref<2x18x18x8xf32, #tpu.memory_space<vmem>>, vector<2x16x16x8xf32>
    tpu.vector_store %arg4[%c0_54, %c1_55, %c1_56, %c0_57], %35 {strides = array<i32>} : memref<2x18x18x8xf32, #tpu.memory_space<vmem>>, vector<2x16x16x8xf32>,
    %cst_58 = arith.constant 0.000000e+00 : f32
    %37 = vector.broadcast %cst_58 : f32 to vector<1x8x8xf32>
    %c0_59 = arith.constant 0 : index
    %c0_60 = arith.constant 0 : index
    %c0_61 = arith.constant 0 : index
    %38 = vector.load %arg5[%c0_59, %c0_60, %c0_61] : memref<1x8x8xf32, #tpu.memory_space<vmem>>, vector<1x8x8xf32>
    tpu.vector_store %arg5[%c0_59, %c0_60, %c0_61], %37 {strides = array<i32>} : memref<1x8x8xf32, #tpu.memory_space<vmem>>, vector<1x8x8xf32>,
    %cst_62 = arith.constant dense<0.000000e+00> : vector<8xf32>
    %39 = vector.multi_reduction <add>, %32, %cst_62 [0] : vector<512x8xf32> to vector<8xf32>
    %40 = vector.shape_cast %39 : vector<8xf32> to vector<1x8xf32>
    %c0_63 = arith.constant 0 : index
    %c0_64 = arith.constant 0 : index
    %c0_65 = arith.constant 0 : index
    %41 = vector.load %arg5[%c0_63, %c0_64, %c0_65] : memref<1x8x8xf32, #tpu.memory_space<vmem>>, vector<1x1x8xf32>
    %42 = vector.shape_cast %41 : vector<1x1x8xf32> to vector<1x8xf32>
    %43 = vector.shape_cast %40 : vector<1x8xf32> to vector<1x1x8xf32>
    tpu.vector_store %arg5[%c0_63, %c0_64, %c0_65], %43 {strides = array<i32>} : memref<1x8x8xf32, #tpu.memory_space<vmem>>, vector<1x1x8xf32>,
    %44 = arith.mulf %32, %32 : vector<512x8xf32>
    %cst_66 = arith.constant dense<0.000000e+00> : vector<8xf32>
    %45 = vector.multi_reduction <add>, %44, %cst_66 [0] : vector<512x8xf32> to vector<8xf32>
    %46 = vector.shape_cast %45 : vector<8xf32> to vector<1x8xf32>
    %c0_67 = arith.constant 0 : index
    %c1_68 = arith.constant 1 : index
    %c0_69 = arith.constant 0 : index
    %47 = vector.load %arg5[%c0_67, %c1_68, %c0_69] : memref<1x8x8xf32, #tpu.memory_space<vmem>>, vector<1x1x8xf32>
    %48 = vector.shape_cast %47 : vector<1x1x8xf32> to vector<1x8xf32>
    %49 = vector.shape_cast %46 : vector<1x8xf32> to vector<1x1x8xf32>
    tpu.vector_store %arg5[%c0_67, %c1_68, %c0_69], %49 {strides = array<i32>} : memref<1x8x8xf32, #tpu.memory_space<vmem>>, vector<1x1x8xf32>,
    return
  }
  func.func @transform_0(%arg0: i32) -> (i32, i32, i32, i32) {
    %c0_i32 = arith.constant 0 : i32
    %c0_i32_0 = arith.constant 0 : i32
    %c0_i32_1 = arith.constant 0 : i32
    %c0_i32_2 = arith.constant 0 : i32
    return %arg0, %c0_i32, %c0_i32_0, %c0_i32_1 : i32, i32, i32, i32
  }
  func.func @transform_1(%arg0: i32) -> (i32, i32) {
    %c0_i32 = arith.constant 0 : i32
    %c0_i32_0 = arith.constant 0 : i32
    %c0_i32_1 = arith.constant 0 : i32
    return %c0_i32, %c0_i32_0 : i32, i32
  }
  func.func @transform_2(%arg0: i32) -> (i32, i32) {
    %c0_i32 = arith.constant 0 : i32
    %c0_i32_0 = arith.constant 0 : i32
    %c0_i32_1 = arith.constant 0 : i32
    return %c0_i32, %c0_i32_0 : i32, i32
  }
  func.func @transform_3(%arg0: i32) -> (i32, i32, i32, i32) {
    %c0_i32 = arith.constant 0 : i32
    %c0_i32_0 = arith.constant 0 : i32
    %c0_i32_1 = arith.constant 0 : i32
    %c0_i32_2 = arith.constant 0 : i32
    return %arg0, %c0_i32, %c0_i32_0, %c0_i32_1 : i32, i32, i32, i32
  }
  func.func @transform_4(%arg0: i32) -> (i32, i32, i32) {
    %c0_i32 = arith.constant 0 : i32
    %c0_i32_0 = arith.constant 0 : i32
    %c0_i32_1 = arith.constant 0 : i32
    return %arg0, %c0_i32, %c0_i32_0 : i32, i32, i32
  }
}

module attributes {stable_mosaic.version = 11 : i64} {
  func.func @_conv2_kernel(%arg0: i32, %arg1: memref<2x18x18x8xf32, #tpu.memory_space<vmem>>, %arg2: memref<1x8xf32, #tpu.memory_space<vmem>>, %arg3: memref<1x8xf32, #tpu.memory_space<vmem>>, %arg4: memref<72x8xf32, #tpu.memory_space<vmem>>, %arg5: memref<1x8xf32, #tpu.memory_space<vmem>>, %arg6: memref<2x8x256xf32, #tpu.memory_space<vmem>>, %arg7: memref<1x8x8xf32, #tpu.memory_space<vmem>>, %arg8: memref<2x18x18x8xf32, #tpu.memory_space<vmem>>, %arg9: memref<512x72xf32, #tpu.memory_space<vmem>>) attributes {dimension_semantics = [#tpu.dimension_semantics<parallel>], iteration_bounds = array<i64: 1>, scalar_prefetch = 0 : i64, scratch_operands = 2 : i64, tpu.core_type = #tpu.core_type<tc>, window_params = [{transform_indices = @transform_0, window_bounds = array<i64: 2, 18, 18, 8>}, {pipeline_mode = #tpu.pipeline_mode<synchronous>, transform_indices = @transform_1, window_bounds = array<i64: 1, 8>}, {pipeline_mode = #tpu.pipeline_mode<synchronous>, transform_indices = @transform_2, window_bounds = array<i64: 1, 8>}, {pipeline_mode = #tpu.pipeline_mode<synchronous>, transform_indices = @transform_3, window_bounds = array<i64: 72, 8>}, {pipeline_mode = #tpu.pipeline_mode<synchronous>, transform_indices = @transform_4, window_bounds = array<i64: 1, 8>}, {transform_indices = @transform_5, window_bounds = array<i64: 2, 8, 256>}, {transform_indices = @transform_6, window_bounds = array<i64: 1, 8, 8>}]} {
    %c0 = arith.constant 0 : index
    %c0_0 = arith.constant 0 : index
    %0 = vector.load %arg2[%c0, %c0_0] : memref<1x8xf32, #tpu.memory_space<vmem>>, vector<1x8xf32>
    %1 = vector.shape_cast %0 : vector<1x8xf32> to vector<1x1x1x8xf32>
    %c0_1 = arith.constant 0 : index
    %c0_2 = arith.constant 0 : index
    %2 = vector.load %arg3[%c0_1, %c0_2] : memref<1x8xf32, #tpu.memory_space<vmem>>, vector<1x8xf32>
    %3 = vector.shape_cast %2 : vector<1x8xf32> to vector<1x1x1x8xf32>
    %cst = arith.constant 0.000000e+00 : f32
    %4 = vector.broadcast %cst : f32 to vector<2x18x18x8xf32>
    %c0_3 = arith.constant 0 : index
    %c0_4 = arith.constant 0 : index
    %c0_5 = arith.constant 0 : index
    %c0_6 = arith.constant 0 : index
    %5 = vector.load %arg8[%c0_3, %c0_4, %c0_5, %c0_6] : memref<2x18x18x8xf32, #tpu.memory_space<vmem>>, vector<2x18x18x8xf32>
    tpu.vector_store %arg8[%c0_3, %c0_4, %c0_5, %c0_6], %4 {strides = array<i32>} : memref<2x18x18x8xf32, #tpu.memory_space<vmem>>, vector<2x18x18x8xf32>,
    %c0_7 = arith.constant 0 : index
    %c1 = arith.constant 1 : index
    %c1_8 = arith.constant 1 : index
    %c0_9 = arith.constant 0 : index
    %6 = vector.load %arg1[%c0_7, %c1, %c1_8, %c0_9] : memref<2x18x18x8xf32, #tpu.memory_space<vmem>>, vector<2x16x16x8xf32>
    %7 = vector.broadcast %1 : vector<1x1x1x8xf32> to vector<2x16x16x8xf32>
    %8 = arith.mulf %6, %7 : vector<2x16x16x8xf32>
    %9 = vector.broadcast %3 : vector<1x1x1x8xf32> to vector<2x16x16x8xf32>
    %10 = arith.addf %8, %9 : vector<2x16x16x8xf32>
    %cst_10 = arith.constant 0.000000e+00 : f32
    %11 = vector.broadcast %cst_10 : f32 to vector<2x16x16x8xf32>
    %12 = arith.cmpf oge, %10, %11 : vector<2x16x16x8xf32>
    %cst_11 = arith.constant 0.00999999977 : f32
    %13 = vector.broadcast %cst_11 : f32 to vector<2x16x16x8xf32>
    %14 = arith.mulf %13, %10 : vector<2x16x16x8xf32>
    %15 = arith.select %12, %10, %14 : vector<2x16x16x8xi1>, vector<2x16x16x8xf32>
    %c0_12 = arith.constant 0 : index
    %c1_13 = arith.constant 1 : index
    %c1_14 = arith.constant 1 : index
    %c0_15 = arith.constant 0 : index
    %16 = vector.load %arg8[%c0_12, %c1_13, %c1_14, %c0_15] : memref<2x18x18x8xf32, #tpu.memory_space<vmem>>, vector<2x16x16x8xf32>
    tpu.vector_store %arg8[%c0_12, %c1_13, %c1_14, %c0_15], %15 {strides = array<i32>} : memref<2x18x18x8xf32, #tpu.memory_space<vmem>>, vector<2x16x16x8xf32>,
    %c0_16 = arith.constant 0 : index
    %c0_17 = arith.constant 0 : index
    %c0_18 = arith.constant 0 : index
    %c0_19 = arith.constant 0 : index
    %17 = vector.load %arg8[%c0_16, %c0_17, %c0_18, %c0_19] : memref<2x18x18x8xf32, #tpu.memory_space<vmem>>, vector<2x16x16x8xf32>
    %18 = vector.shape_cast %17 : vector<2x16x16x8xf32> to vector<512x8xf32>
    %c0_20 = arith.constant 0 : index
    %c0_21 = arith.constant 0 : index
    %19 = vector.load %arg9[%c0_20, %c0_21] : memref<512x72xf32, #tpu.memory_space<vmem>>, vector<512x8xf32>
    tpu.vector_store %arg9[%c0_20, %c0_21], %18 {strides = array<i32>} : memref<512x72xf32, #tpu.memory_space<vmem>>, vector<512x8xf32>,
    %c0_22 = arith.constant 0 : index
    %c0_23 = arith.constant 0 : index
    %c1_24 = arith.constant 1 : index
    %c0_25 = arith.constant 0 : index
    %20 = vector.load %arg8[%c0_22, %c0_23, %c1_24, %c0_25] : memref<2x18x18x8xf32, #tpu.memory_space<vmem>>, vector<2x16x16x8xf32>
    %21 = vector.shape_cast %20 : vector<2x16x16x8xf32> to vector<512x8xf32>
    %c0_26 = arith.constant 0 : index
    %c8 = arith.constant 8 : index
    %22 = vector.load %arg9[%c0_26, %c8] : memref<512x72xf32, #tpu.memory_space<vmem>>, vector<512x8xf32>
    tpu.vector_store %arg9[%c0_26, %c8], %21 {strides = array<i32>} : memref<512x72xf32, #tpu.memory_space<vmem>>, vector<512x8xf32>,
    %c0_27 = arith.constant 0 : index
    %c0_28 = arith.constant 0 : index
    %c2 = arith.constant 2 : index
    %c0_29 = arith.constant 0 : index
    %23 = vector.load %arg8[%c0_27, %c0_28, %c2, %c0_29] : memref<2x18x18x8xf32, #tpu.memory_space<vmem>>, vector<2x16x16x8xf32>
    %24 = vector.shape_cast %23 : vector<2x16x16x8xf32> to vector<512x8xf32>
    %c0_30 = arith.constant 0 : index
    %c16 = arith.constant 16 : index
    %25 = vector.load %arg9[%c0_30, %c16] : memref<512x72xf32, #tpu.memory_space<vmem>>, vector<512x8xf32>
    tpu.vector_store %arg9[%c0_30, %c16], %24 {strides = array<i32>} : memref<512x72xf32, #tpu.memory_space<vmem>>, vector<512x8xf32>,
    %c0_31 = arith.constant 0 : index
    %c1_32 = arith.constant 1 : index
    %c0_33 = arith.constant 0 : index
    %c0_34 = arith.constant 0 : index
    %26 = vector.load %arg8[%c0_31, %c1_32, %c0_33, %c0_34] : memref<2x18x18x8xf32, #tpu.memory_space<vmem>>, vector<2x16x16x8xf32>
    %27 = vector.shape_cast %26 : vector<2x16x16x8xf32> to vector<512x8xf32>
    %c0_35 = arith.constant 0 : index
    %c24 = arith.constant 24 : index
    %28 = vector.load %arg9[%c0_35, %c24] : memref<512x72xf32, #tpu.memory_space<vmem>>, vector<512x8xf32>
    tpu.vector_store %arg9[%c0_35, %c24], %27 {strides = array<i32>} : memref<512x72xf32, #tpu.memory_space<vmem>>, vector<512x8xf32>,
    %c0_36 = arith.constant 0 : index
    %c1_37 = arith.constant 1 : index
    %c1_38 = arith.constant 1 : index
    %c0_39 = arith.constant 0 : index
    %29 = vector.load %arg8[%c0_36, %c1_37, %c1_38, %c0_39] : memref<2x18x18x8xf32, #tpu.memory_space<vmem>>, vector<2x16x16x8xf32>
    %30 = vector.shape_cast %29 : vector<2x16x16x8xf32> to vector<512x8xf32>
    %c0_40 = arith.constant 0 : index
    %c32 = arith.constant 32 : index
    %31 = vector.load %arg9[%c0_40, %c32] : memref<512x72xf32, #tpu.memory_space<vmem>>, vector<512x8xf32>
    tpu.vector_store %arg9[%c0_40, %c32], %30 {strides = array<i32>} : memref<512x72xf32, #tpu.memory_space<vmem>>, vector<512x8xf32>,
    %c0_41 = arith.constant 0 : index
    %c1_42 = arith.constant 1 : index
    %c2_43 = arith.constant 2 : index
    %c0_44 = arith.constant 0 : index
    %32 = vector.load %arg8[%c0_41, %c1_42, %c2_43, %c0_44] : memref<2x18x18x8xf32, #tpu.memory_space<vmem>>, vector<2x16x16x8xf32>
    %33 = vector.shape_cast %32 : vector<2x16x16x8xf32> to vector<512x8xf32>
    %c0_45 = arith.constant 0 : index
    %c40 = arith.constant 40 : index
    %34 = vector.load %arg9[%c0_45, %c40] : memref<512x72xf32, #tpu.memory_space<vmem>>, vector<512x8xf32>
    tpu.vector_store %arg9[%c0_45, %c40], %33 {strides = array<i32>} : memref<512x72xf32, #tpu.memory_space<vmem>>, vector<512x8xf32>,
    %c0_46 = arith.constant 0 : index
    %c2_47 = arith.constant 2 : index
    %c0_48 = arith.constant 0 : index
    %c0_49 = arith.constant 0 : index
    %35 = vector.load %arg8[%c0_46, %c2_47, %c0_48, %c0_49] : memref<2x18x18x8xf32, #tpu.memory_space<vmem>>, vector<2x16x16x8xf32>
    %36 = vector.shape_cast %35 : vector<2x16x16x8xf32> to vector<512x8xf32>
    %c0_50 = arith.constant 0 : index
    %c48 = arith.constant 48 : index
    %37 = vector.load %arg9[%c0_50, %c48] : memref<512x72xf32, #tpu.memory_space<vmem>>, vector<512x8xf32>
    tpu.vector_store %arg9[%c0_50, %c48], %36 {strides = array<i32>} : memref<512x72xf32, #tpu.memory_space<vmem>>, vector<512x8xf32>,
    %c0_51 = arith.constant 0 : index
    %c2_52 = arith.constant 2 : index
    %c1_53 = arith.constant 1 : index
    %c0_54 = arith.constant 0 : index
    %38 = vector.load %arg8[%c0_51, %c2_52, %c1_53, %c0_54] : memref<2x18x18x8xf32, #tpu.memory_space<vmem>>, vector<2x16x16x8xf32>
    %39 = vector.shape_cast %38 : vector<2x16x16x8xf32> to vector<512x8xf32>
    %c0_55 = arith.constant 0 : index
    %c56 = arith.constant 56 : index
    %40 = vector.load %arg9[%c0_55, %c56] : memref<512x72xf32, #tpu.memory_space<vmem>>, vector<512x8xf32>
    tpu.vector_store %arg9[%c0_55, %c56], %39 {strides = array<i32>} : memref<512x72xf32, #tpu.memory_space<vmem>>, vector<512x8xf32>,
    %c0_56 = arith.constant 0 : index
    %c2_57 = arith.constant 2 : index
    %c2_58 = arith.constant 2 : index
    %c0_59 = arith.constant 0 : index
    %41 = vector.load %arg8[%c0_56, %c2_57, %c2_58, %c0_59] : memref<2x18x18x8xf32, #tpu.memory_space<vmem>>, vector<2x16x16x8xf32>
    %42 = vector.shape_cast %41 : vector<2x16x16x8xf32> to vector<512x8xf32>
    %c0_60 = arith.constant 0 : index
    %c64 = arith.constant 64 : index
    %43 = vector.load %arg9[%c0_60, %c64] : memref<512x72xf32, #tpu.memory_space<vmem>>, vector<512x8xf32>
    tpu.vector_store %arg9[%c0_60, %c64], %42 {strides = array<i32>} : memref<512x72xf32, #tpu.memory_space<vmem>>, vector<512x8xf32>,
    %c0_61 = arith.constant 0 : index
    %c0_62 = arith.constant 0 : index
    %44 = vector.load %arg9[%c0_61, %c0_62] : memref<512x72xf32, #tpu.memory_space<vmem>>, vector<512x72xf32>
    %c0_63 = arith.constant 0 : index
    %c0_64 = arith.constant 0 : index
    %45 = vector.load %arg4[%c0_63, %c0_64] : memref<72x8xf32, #tpu.memory_space<vmem>>, vector<72x8xf32>
    %cst_65 = arith.constant dense<0.000000e+00> : vector<512x8xf32>
    %46 = tpu.matmul %44, %45, %cst_65 {dimension_numbers = #tpu.dot_dimension_numbers<[1], [0], [0], [1], [0, 0, 1, 1], [], []>} : vector<512x72xf32>, vector<72x8xf32>, vector<512x8xf32> -> vector<512x8xf32>
    %c0_66 = arith.constant 0 : index
    %c0_67 = arith.constant 0 : index
    %47 = vector.load %arg5[%c0_66, %c0_67] : memref<1x8xf32, #tpu.memory_space<vmem>>, vector<1x8xf32>
    %48 = vector.broadcast %47 : vector<1x8xf32> to vector<512x8xf32>
    %49 = arith.addf %46, %48 : vector<512x8xf32>
    %cst_68 = arith.constant 0.000000e+00 : f32
    %50 = vector.broadcast %cst_68 : f32 to vector<1x8x8xf32>
    %c0_69 = arith.constant 0 : index
    %c0_70 = arith.constant 0 : index
    %c0_71 = arith.constant 0 : index
    %51 = vector.load %arg7[%c0_69, %c0_70, %c0_71] : memref<1x8x8xf32, #tpu.memory_space<vmem>>, vector<1x8x8xf32>
    tpu.vector_store %arg7[%c0_69, %c0_70, %c0_71], %50 {strides = array<i32>} : memref<1x8x8xf32, #tpu.memory_space<vmem>>, vector<1x8x8xf32>,
    %cst_72 = arith.constant dense<0.000000e+00> : vector<8xf32>
    %52 = vector.multi_reduction <add>, %49, %cst_72 [0] : vector<512x8xf32> to vector<8xf32>
    %53 = vector.shape_cast %52 : vector<8xf32> to vector<1x8xf32>
    %c0_73 = arith.constant 0 : index
    %c0_74 = arith.constant 0 : index
    %c0_75 = arith.constant 0 : index
    %54 = vector.load %arg7[%c0_73, %c0_74, %c0_75] : memref<1x8x8xf32, #tpu.memory_space<vmem>>, vector<1x1x8xf32>
    %55 = vector.shape_cast %54 : vector<1x1x8xf32> to vector<1x8xf32>
    %56 = vector.shape_cast %53 : vector<1x8xf32> to vector<1x1x8xf32>
    tpu.vector_store %arg7[%c0_73, %c0_74, %c0_75], %56 {strides = array<i32>} : memref<1x8x8xf32, #tpu.memory_space<vmem>>, vector<1x1x8xf32>,
    %57 = arith.mulf %49, %49 : vector<512x8xf32>
    %cst_76 = arith.constant dense<0.000000e+00> : vector<8xf32>
    %58 = vector.multi_reduction <add>, %57, %cst_76 [0] : vector<512x8xf32> to vector<8xf32>
    %59 = vector.shape_cast %58 : vector<8xf32> to vector<1x8xf32>
    %c0_77 = arith.constant 0 : index
    %c1_78 = arith.constant 1 : index
    %c0_79 = arith.constant 0 : index
    %60 = vector.load %arg7[%c0_77, %c1_78, %c0_79] : memref<1x8x8xf32, #tpu.memory_space<vmem>>, vector<1x1x8xf32>
    %61 = vector.shape_cast %60 : vector<1x1x8xf32> to vector<1x8xf32>
    %62 = vector.shape_cast %59 : vector<1x8xf32> to vector<1x1x8xf32>
    tpu.vector_store %arg7[%c0_77, %c1_78, %c0_79], %62 {strides = array<i32>} : memref<1x8x8xf32, #tpu.memory_space<vmem>>, vector<1x1x8xf32>,
    %63 = vector.shape_cast %49 : vector<512x8xf32> to vector<2x256x8xf32>
    %64 = vector.extract_strided_slice %63 {offsets = [0, 0, 0], sizes = [1, 256, 8], strides = [1, 1, 1]} : vector<2x256x8xf32> to vector<1x256x8xf32>
    %65 = vector.shape_cast %64 : vector<1x256x8xf32> to vector<256x8xf32>
    %66 = tpu.transpose %65, [1, 0] : vector<256x8xf32> -> vector<8x256xf32>
    %c0_80 = arith.constant 0 : index
    %c0_81 = arith.constant 0 : index
    %c0_82 = arith.constant 0 : index
    %67 = vector.load %arg6[%c0_80, %c0_81, %c0_82] : memref<2x8x256xf32, #tpu.memory_space<vmem>>, vector<1x8x256xf32>
    %68 = vector.shape_cast %67 : vector<1x8x256xf32> to vector<8x256xf32>
    %69 = vector.shape_cast %66 : vector<8x256xf32> to vector<1x8x256xf32>
    tpu.vector_store %arg6[%c0_80, %c0_81, %c0_82], %69 {strides = array<i32>} : memref<2x8x256xf32, #tpu.memory_space<vmem>>, vector<1x8x256xf32>,
    %70 = vector.extract_strided_slice %63 {offsets = [1, 0, 0], sizes = [1, 256, 8], strides = [1, 1, 1]} : vector<2x256x8xf32> to vector<1x256x8xf32>
    %71 = vector.shape_cast %70 : vector<1x256x8xf32> to vector<256x8xf32>
    %72 = tpu.transpose %71, [1, 0] : vector<256x8xf32> -> vector<8x256xf32>
    %c1_83 = arith.constant 1 : index
    %c0_84 = arith.constant 0 : index
    %c0_85 = arith.constant 0 : index
    %73 = vector.load %arg6[%c1_83, %c0_84, %c0_85] : memref<2x8x256xf32, #tpu.memory_space<vmem>>, vector<1x8x256xf32>
    %74 = vector.shape_cast %73 : vector<1x8x256xf32> to vector<8x256xf32>
    %75 = vector.shape_cast %72 : vector<8x256xf32> to vector<1x8x256xf32>
    tpu.vector_store %arg6[%c1_83, %c0_84, %c0_85], %75 {strides = array<i32>} : memref<2x8x256xf32, #tpu.memory_space<vmem>>, vector<1x8x256xf32>,
    return
  }
  func.func @transform_0(%arg0: i32) -> (i32, i32, i32, i32) {
    %c0_i32 = arith.constant 0 : i32
    %c0_i32_0 = arith.constant 0 : i32
    %c0_i32_1 = arith.constant 0 : i32
    %c0_i32_2 = arith.constant 0 : i32
    return %arg0, %c0_i32, %c0_i32_0, %c0_i32_1 : i32, i32, i32, i32
  }
  func.func @transform_1(%arg0: i32) -> (i32, i32) {
    %c0_i32 = arith.constant 0 : i32
    %c0_i32_0 = arith.constant 0 : i32
    %c0_i32_1 = arith.constant 0 : i32
    return %c0_i32, %c0_i32_0 : i32, i32
  }
  func.func @transform_2(%arg0: i32) -> (i32, i32) {
    %c0_i32 = arith.constant 0 : i32
    %c0_i32_0 = arith.constant 0 : i32
    %c0_i32_1 = arith.constant 0 : i32
    return %c0_i32, %c0_i32_0 : i32, i32
  }
  func.func @transform_3(%arg0: i32) -> (i32, i32) {
    %c0_i32 = arith.constant 0 : i32
    %c0_i32_0 = arith.constant 0 : i32
    %c0_i32_1 = arith.constant 0 : i32
    return %c0_i32, %c0_i32_0 : i32, i32
  }
  func.func @transform_4(%arg0: i32) -> (i32, i32) {
    %c0_i32 = arith.constant 0 : i32
    %c0_i32_0 = arith.constant 0 : i32
    %c0_i32_1 = arith.constant 0 : i32
    return %c0_i32, %c0_i32_0 : i32, i32
  }
  func.func @transform_5(%arg0: i32) -> (i32, i32, i32) {
    %c0_i32 = arith.constant 0 : i32
    %c0_i32_0 = arith.constant 0 : i32
    %c0_i32_1 = arith.constant 0 : i32
    return %arg0, %c0_i32, %c0_i32_0 : i32, i32, i32
  }
  func.func @transform_6(%arg0: i32) -> (i32, i32, i32) {
    %c0_i32 = arith.constant 0 : i32
    %c0_i32_0 = arith.constant 0 : i32
    %c0_i32_1 = arith.constant 0 : i32
    return %arg0, %c0_i32, %c0_i32_0 : i32, i32, i32
  }
}

module attributes {stable_mosaic.version = 11 : i64} {
  func.func @_bn_act_time_kernel(%arg0: i32, %arg1: memref<2x8x256xf32, #tpu.memory_space<vmem>>, %arg2: memref<1x8x1xf32, #tpu.memory_space<vmem>>, %arg3: memref<1x8x1xf32, #tpu.memory_space<vmem>>, %arg4: memref<2x8x1xf32, #tpu.memory_space<vmem>>, %arg5: memref<2x8x256xf32, #tpu.memory_space<vmem>>) attributes {dimension_semantics = [#tpu.dimension_semantics<parallel>], iteration_bounds = array<i64: 1>, scalar_prefetch = 0 : i64, scratch_operands = 0 : i64, tpu.core_type = #tpu.core_type<tc>, window_params = [{transform_indices = @transform_0, window_bounds = array<i64: 2, 8, 256>}, {pipeline_mode = #tpu.pipeline_mode<synchronous>, transform_indices = @transform_1, window_bounds = array<i64: 1, 8, 1>}, {pipeline_mode = #tpu.pipeline_mode<synchronous>, transform_indices = @transform_2, window_bounds = array<i64: 1, 8, 1>}, {transform_indices = @transform_3, window_bounds = array<i64: 2, 8, 1>}, {transform_indices = @transform_4, window_bounds = array<i64: 2, 8, 256>}]} {
    %c0 = arith.constant 0 : index
    %c0_0 = arith.constant 0 : index
    %c0_1 = arith.constant 0 : index
    %0 = vector.load %arg1[%c0, %c0_0, %c0_1] : memref<2x8x256xf32, #tpu.memory_space<vmem>>, vector<2x8x256xf32>
    %c0_2 = arith.constant 0 : index
    %c0_3 = arith.constant 0 : index
    %c0_4 = arith.constant 0 : index
    %1 = vector.load %arg2[%c0_2, %c0_3, %c0_4] : memref<1x8x1xf32, #tpu.memory_space<vmem>>, vector<1x8x1xf32>
    %2 = vector.broadcast %1 : vector<1x8x1xf32> to vector<2x8x256xf32>
    %3 = arith.mulf %0, %2 : vector<2x8x256xf32>
    %c0_5 = arith.constant 0 : index
    %c0_6 = arith.constant 0 : index
    %c0_7 = arith.constant 0 : index
    %4 = vector.load %arg3[%c0_5, %c0_6, %c0_7] : memref<1x8x1xf32, #tpu.memory_space<vmem>>, vector<1x8x1xf32>
    %5 = vector.broadcast %4 : vector<1x8x1xf32> to vector<2x8x256xf32>
    %6 = arith.addf %3, %5 : vector<2x8x256xf32>
    %cst = arith.constant 0.000000e+00 : f32
    %7 = vector.broadcast %cst : f32 to vector<2x8x256xf32>
    %8 = arith.cmpf oge, %6, %7 : vector<2x8x256xf32>
    %cst_8 = arith.constant 0.00999999977 : f32
    %9 = vector.broadcast %cst_8 : f32 to vector<2x8x256xf32>
    %10 = arith.mulf %9, %6 : vector<2x8x256xf32>
    %11 = arith.select %8, %6, %10 : vector<2x8x256xi1>, vector<2x8x256xf32>
    %c0_9 = arith.constant 0 : index
    %c0_10 = arith.constant 0 : index
    %c0_11 = arith.constant 0 : index
    %12 = vector.load %arg4[%c0_9, %c0_10, %c0_11] : memref<2x8x1xf32, #tpu.memory_space<vmem>>, vector<2x8x1xf32>
    %13 = vector.broadcast %12 : vector<2x8x1xf32> to vector<2x8x256xf32>
    %14 = arith.addf %11, %13 : vector<2x8x256xf32>
    %c0_12 = arith.constant 0 : index
    %c0_13 = arith.constant 0 : index
    %c0_14 = arith.constant 0 : index
    %15 = vector.load %arg5[%c0_12, %c0_13, %c0_14] : memref<2x8x256xf32, #tpu.memory_space<vmem>>, vector<2x8x256xf32>
    tpu.vector_store %arg5[%c0_12, %c0_13, %c0_14], %14 {strides = array<i32>} : memref<2x8x256xf32, #tpu.memory_space<vmem>>, vector<2x8x256xf32>,
    return
  }
  func.func @transform_0(%arg0: i32) -> (i32, i32, i32) {
    %c0_i32 = arith.constant 0 : i32
    %c0_i32_0 = arith.constant 0 : i32
    %c0_i32_1 = arith.constant 0 : i32
    return %arg0, %c0_i32, %c0_i32_0 : i32, i32, i32
  }
  func.func @transform_1(%arg0: i32) -> (i32, i32, i32) {
    %c0_i32 = arith.constant 0 : i32
    %c0_i32_0 = arith.constant 0 : i32
    %c0_i32_1 = arith.constant 0 : i32
    %c0_i32_2 = arith.constant 0 : i32
    return %c0_i32, %c0_i32_0, %c0_i32_1 : i32, i32, i32
  }
  func.func @transform_2(%arg0: i32) -> (i32, i32, i32) {
    %c0_i32 = arith.constant 0 : i32
    %c0_i32_0 = arith.constant 0 : i32
    %c0_i32_1 = arith.constant 0 : i32
    %c0_i32_2 = arith.constant 0 : i32
    return %c0_i32, %c0_i32_0, %c0_i32_1 : i32, i32, i32
  }
  func.func @transform_3(%arg0: i32) -> (i32, i32, i32) {
    %c0_i32 = arith.constant 0 : i32
    %c0_i32_0 = arith.constant 0 : i32
    %c0_i32_1 = arith.constant 0 : i32
    return %arg0, %c0_i32, %c0_i32_0 : i32, i32, i32
  }
  func.func @transform_4(%arg0: i32) -> (i32, i32, i32) {
    %c0_i32 = arith.constant 0 : i32
    %c0_i32_0 = arith.constant 0 : i32
    %c0_i32_1 = arith.constant 0 : i32
    return %arg0, %c0_i32, %c0_i32_0 : i32, i32, i32
  }
}

</mosaic_0001>

<bundles_post_ra>
// kernel: block_forward.5
= control target key start
LH: loop header
LB: loop body
LE: loop exit
PB: predicated region body
PF: predicated region fallthrough
CT: control target
= control target key end

     0   :  { %v80_v0 = vmov 0   ;;  %s142_s1 = inlined_call_operand.vmem [shape: f32[1,8,1], index: 1, kind: input, shape index: {}]   ;;  %s143_s3 = inlined_call_operand.vmem [shape: f32[2,8,1], index: 3, kind: input, shape index: {}]   ;;  %s144_s2 = inlined_call_operand.vmem [shape: f32[1,8,1], index: 2, kind: input, shape index: {}]   ;;  %s145_s0 = inlined_call_operand.vmem [shape: f32[2,8,256], index: 0, kind: input, shape index: {}]   ;;  %s146_s4 = inlined_call_operand.vmem [shape: f32[2,8,256], index: 4, kind: output, shape index: {}]  }
   0x1   :  { %78 = vset.pattern.permute.xlu0 %v80_v0  ;;  %79 = vset.pattern.permute.xlu1 %v80_v0  ;;  %v21_v1 = vld [vmem:[%s142_s1] sm:$0xff]  ;;  %v54_v4 = vld [vmem:[%s143_s3 + $0x8] sm:$0xff]  ;;  %v19_v8 = vld [vmem:[%s145_s0 + $0x10] sm:$0xff] }
   0x2   :  { %v53_v2 = vld [vmem:[%s143_s3] sm:$0xff]  ;;  %24 = vperm.xlu0 %78, %v21_v1   ;;  %v18_v7 = vld [vmem:[%s145_s0 + $0x8] sm:$0xff]  ;;  %v20_v9 = vld [vmem:[%s145_s0 + $0x18] sm:$0xff] }
   0x3   :  { %57 = vperm.xlu1 %79, %v53_v2   ;;  %v31_v3 = vld [vmem:[%s144_s2] sm:$0xff] }
   0x4   :  { %v17_v5 = vld [vmem:[%s145_s0] sm:$0xff] }
   0x6   :  { %34 = vperm.xlu0 %78, %v31_v3  }
   0x7   :  { %62 = vperm.xlu1 %79, %v54_v4  }
  0x81   :  { %v25_v6 = vpop.permute.xlu0 %24 }
  0x82   :  { %v27_v10 = vmul.f32 %v25_v6, %v17_v5  ;;  %v28_v11 = vmul.f32 %v25_v6, %v18_v7  ;;  %v29_v12 = vmul.f32 %v25_v6, %v19_v8  ;;  %v30_v13 = vmul.f32 %v25_v6, %v20_v9  ;;  %v58_v14 = vpop.permute.xlu1 %57 }
  0x85   :  { %v35_v15 = vpop.permute.xlu0 %34 }
  0x86   :  { %v37_v16 = vadd.f32 %v35_v15, %v27_v10  ;;  %v38_v17 = vadd.f32 %v35_v15, %v28_v11  ;;  %v39_v18 = vadd.f32 %v35_v15, %v29_v12  ;;  %v40_v19 = vadd.f32 %v35_v15, %v30_v13  ;;  %v63_v28 = vpop.permute.xlu1 %62 }
  0x88   :  { %vm41_vm0 = vcmp.ge.f32.partialorder %v37_v16, 0.0  ;;  %vm42_vm1 = vcmp.ge.f32.partialorder %v38_v17, 0.0  ;;  %v45_v20 = vmul.f32 0.01, %v37_v16  ;;  %v46_v21 = vmul.f32 0.01, %v38_v17 }
  0x89   :  { %vm43_vm2 = vcmp.ge.f32.partialorder %v39_v18, 0.0  ;;  %vm44_vm3 = vcmp.ge.f32.partialorder %v40_v19, 0.0  ;;  %v47_v22 = vmul.f32 0.01, %v39_v18  ;;  %v48_v23 = vmul.f32 0.01, %v40_v19 }
  0x8a   :  { %v49_v24 = vsel %vm41_vm0, %v37_v16, %v45_v20  ;;  %v50_v25 = vsel %vm42_vm1, %v38_v17, %v46_v21 }
  0x8b   :  { %v65_v26 = vadd.f32 %v58_v14, %v49_v24  ;;  %v66_v27 = vadd.f32 %v58_v14, %v50_v25  ;;  %v51_v29 = vsel %vm43_vm2, %v39_v18, %v47_v22  ;;  %v52_v30 = vsel %vm44_vm3, %v40_v19, %v48_v23 }
  0x8c   :  { %v67_v31 = vadd.f32 %v63_v28, %v51_v29  ;;  %v68_v32 = vadd.f32 %v63_v28, %v52_v30 }
  0x8d   :  { %69 = vst [vmem:[%s146_s4] sm:$0xff] %v65_v26  ;;  %70 = vst [vmem:[%s146_s4 + $0x8] sm:$0xff] %v66_v27 }
  0x8e   :  { %71 = vst [vmem:[%s146_s4 + $0x10] sm:$0xff] %v67_v31  ;;  %72 = vst [vmem:[%s146_s4 + $0x18] sm:$0xff] %v68_v32 }

// kernel: block_forward.3
= control target key start
LH: loop header
LB: loop body
LE: loop exit
PB: predicated region body
PF: predicated region fallthrough
CT: control target
= control target key end

     0   :  { %s5116_s19 = smov 4   ;;  %vm80_vm0 = vcmask 31744   ;;  %vm465_vm1 = vcmask 64544   ;;  %s5117_s26 = smov 8   ;;  %vm850_vm2 = vcmask 97344   ;;  %vm1236_vm3 = vcmask 130144   ;;  %s9095_s0 = inlined_call_operand.vmem [shape: f32[2,18,18,4], index: 0, kind: input, shape index: {}]   ;;  %s9096_s1 = inlined_call_operand.vmem [shape: f32[36,8], index: 1, kind: input, shape index: {}]   ;;  %s9097_s3 = inlined_call_operand.vmem [shape: f32[2,18,18,8], index: 3, kind: output, shape index: {0}]   ;;  %s9098_s2 = inlined_call_operand.vmem [shape: f32[1,8], index: 2, kind: input, shape index: {}]   ;;  %s9099_s4 = inlined_call_operand.vmem [shape: f32[1,8,8], index: 4, kind: output, shape index: {1}]  }
   0x1   :  { %v145_v0 = vld [vmem:[%s9095_s0 + $0x1] sm:$0xff]  ;;  %v147_v1 = vld [vmem:[%s9095_s0 + $0x19] sm:$0xff]  ;;  %v146_v2 = vld [vmem:[%s9095_s0 + $0x9] sm:$0xff]  ;;  %s5118_s25 = smov 12   ;;  %s5119_s11 = smov 16   ;;  %vm1621_vm4 = vcmask 162944  }
   0x2   :  { %273 = vrot.lane.b32.xlu0 %v145_v0, %s5116_s19  ;;  %277 = vrot.lane.b32.xlu1 %v147_v1, %s5116_s19  ;;  %v148_v3 = vld [vmem:[%s9095_s0 + $0x21] sm:$0xff]  ;;  %v149_v4 = vld [vmem:[%s9095_s0 + $0x31] sm:$0xff]  ;;  %s5120_s15 = smov 20   ;;  %s5121_s6 = smov 24   ;;  %vm3496_vm5 = vcmask 1043456   ;;  %vm2006_vm6 = vcmask 195744  }
   0x3   :  { %v150_v5 = vld [vmem:[%s9095_s0 + $0x39] sm:$0xff]  ;;  %v151_v6 = vld [vmem:[%s9095_s0 + $0x49] sm:$0xff]  ;;  %v152_v7 = vld [vmem:[%s9095_s0 + $0x51] sm:$0xff]  ;;  %s5122_s9 = smov 28   ;;  %s5123_s13 = smov 32   ;;  %vm2392_vm7 = vcmask 228544  }
   0x4   :  { %v153_v8 = vld [vmem:[%s9095_s0 + $0x61] sm:$0xff]  ;;  %v154_v9 = vld [vmem:[%s9095_s0 + $0x69] sm:$0xff]  ;;  %v155_v10 = vld [vmem:[%s9095_s0 + $0x79] sm:$0xff]  ;;  %vm2777_vm8 = vcmask 261344   ;;  %vm3162_vm9 = vcmask 294144   ;;  %vm3303_vm10 = vcmask 293888  }
   0x5   :  { %v156_v11 = vld [vmem:[%s9095_s0 + $0x81] sm:$0xff]  ;;  %v5204_v13 = vld [vmem:[%s9095_s0 + $0x18] sm:$0xff]  ;;  %v5229_v18 = vld [vmem:[%s9095_s0 + $0x30] sm:$0xff]  ;;  %vm3885_vm11 = vcmask 64512   ;;  %vm3888_vm12 = vcmask 58368   ;;  %vm4194_vm13 = vcmask 57344  }
   0x6   :  { %275 = vrot.lane.b32.xlu0 %v146_v2, %s5116_s19  ;;  %279 = vrot.lane.b32.xlu1 %v148_v3, %s5116_s19  ;;  %v16_v12 = vld [vmem:[%s9095_s0] sm:$0xff]  ;;  %v157_v14 = vld [vmem:[%s9095_s0 + $0x91] sm:$0xff]  ;;  %83 = vst.msk [vmem:[#allocation2 + $0x10] sm:$0xff] %vm80_vm0, %v5204_v13  ;;  %85 = vst.msk [vmem:[#allocation2 + $0x20] sm:$0xff] %vm80_vm0, %v5229_v18 }
   0x7   :  { %v158_v15 = vld [vmem:[%s9095_s0 + $0x99] sm:$0xff]  ;;  %81 = vst.msk [vmem:[#allocation2] sm:$0xff] %vm80_vm0, %v16_v12  ;;  %v17_v16 = vld [vmem:[%s9095_s0 + $0x8] sm:$0xff]  ;;  %v160_v22 = vld [vmem:[%s9095_s0 + $0xb1] sm:$0xff] }
   0x8   :  { %82 = vst.msk [vmem:[#allocation2 + $0x8] sm:$0xff] %vm80_vm0, %v17_v16  ;;  %v5222_v17 = vld [vmem:[%s9095_s0 + $0x20] sm:$0xff]  ;;  %v5234_v19 = vld [vmem:[%s9095_s0 + $0x38] sm:$0xff]  ;;  %v5245_v20 = vld [vmem:[%s9095_s0 + $0x48] sm:$0xff] }
   0x9   :  { %84 = vst.msk [vmem:[#allocation2 + $0x18] sm:$0xff] %vm80_vm0, %v5222_v17  ;;  %86 = vst.msk [vmem:[#allocation2 + $0x28] sm:$0xff] %vm80_vm0, %v5234_v19  ;;  %v159_v21 = vld [vmem:[%s9095_s0 + $0xa9] sm:$0xff]  ;;  %v5265_v24 = vld [vmem:[%s9095_s0 + $0x60] sm:$0xff] }
   0xa   :  { %281 = vrot.lane.b32.xlu0 %v149_v4, %s5116_s19  ;;  %283 = vrot.lane.b32.xlu1 %v150_v5, %s5116_s19  ;;  %87 = vst.msk [vmem:[#allocation2 + $0x30] sm:$0xff] %vm80_vm0, %v5245_v20  ;;  %v5258_v23 = vld [vmem:[%s9095_s0 + $0x50] sm:$0xff]  ;;  %v5270_v25 = vld [vmem:[%s9095_s0 + $0x68] sm:$0xff]  ;;  %89 = vst.msk [vmem:[#allocation2 + $0x40] sm:$0xff] %vm80_vm0, %v5265_v24 }
   0xb   :  { %88 = vst.msk [vmem:[#allocation2 + $0x38] sm:$0xff] %vm80_vm0, %v5258_v23  ;;  %90 = vst.msk [vmem:[#allocation2 + $0x48] sm:$0xff] %vm80_vm0, %v5270_v25  ;;  %v5279_v26 = vld [vmem:[%s9095_s0 + $0x78] sm:$0xff]  ;;  %v5284_v27 = vld [vmem:[%s9095_s0 + $0x80] sm:$0xff] }
   0xc   :  { %v161_v28 = vld [vmem:[%s9095_s0 + $0xc1] sm:$0xff]  ;;  %91 = vst.msk [vmem:[#allocation2 + $0x50] sm:$0xff] %vm80_vm0, %v5279_v26  ;;  %92 = vst.msk [vmem:[#allocation2 + $0x58] sm:$0xff] %vm80_vm0, %v5284_v27  ;;  %v162_v29 = vld [vmem:[%s9095_s0 + $0xc9] sm:$0xff] }
   0xd   :  { %v5301_v30 = vld [vmem:[%s9095_s0 + $0x90] sm:$0xff]  ;;  %v5306_v31 = vld [vmem:[%s9095_s0 + $0x98] sm:$0xff]  ;;  %v5315_v32 = vld [vmem:[%s9095_s0 + $0xa8] sm:$0xff] }
   0xe   :  { %285 = vrot.lane.b32.xlu0 %v151_v6, %s5116_s19  ;;  %287 = vrot.lane.b32.xlu1 %v152_v7, %s5116_s19  ;;  %93 = vst.msk [vmem:[#allocation2 + $0x60] sm:$0xff] %vm80_vm0, %v5301_v30  ;;  %94 = vst.msk [vmem:[#allocation2 + $0x68] sm:$0xff] %vm80_vm0, %v5306_v31  ;;  %v5320_v33 = vld [vmem:[%s9095_s0 + $0xb0] sm:$0xff]  ;;  %v5329_v34 = vld [vmem:[%s9095_s0 + $0xc0] sm:$0xff] }
   0xf   :  { %95 = vst.msk [vmem:[#allocation2 + $0x70] sm:$0xff] %vm80_vm0, %v5315_v32  ;;  %96 = vst.msk [vmem:[#allocation2 + $0x78] sm:$0xff] %vm80_vm0, %v5320_v33  ;;  %v163_v35 = vld [vmem:[%s9095_s0 + $0xd9] sm:$0xff]  ;;  %v5341_v36 = vld [vmem:[%s9095_s0 + $0xc8] sm:$0xff] }
  0x10   :  { %97 = vst.msk [vmem:[#allocation2 + $0x80] sm:$0xff] %vm80_vm0, %v5329_v34  ;;  %v164_v37 = vld [vmem:[%s9095_s0 + $0xe1] sm:$0xff]  ;;  %98 = vst.msk [vmem:[#allocation2 + $0x88] sm:$0xff] %vm80_vm0, %v5341_v36  ;;  %v5351_v38 = vld [vmem:[%s9095_s0 + $0xd8] sm:$0xff] }
  0x11   :  { %v5356_v39 = vld [vmem:[%s9095_s0 + $0xe0] sm:$0xff]  ;;  %99 = vst.msk [vmem:[#allocation2 + $0x90] sm:$0xff] %vm80_vm0, %v5351_v38  ;;  %v5365_v40 = vld [vmem:[%s9095_s0 + $0xf0] sm:$0xff]  ;;  %v5372_v41 = vld [vmem:[%s9095_s0 + $0xf8] sm:$0xff] }
  0x12   :  { %289 = vrot.lane.b32.xlu0 %v153_v8, %s5116_s19  ;;  %291 = vrot.lane.b32.xlu1 %v154_v9, %s5116_s19  ;;  %100 = vst.msk [vmem:[#allocation2 + $0x98] sm:$0xff] %vm80_vm0, %v5356_v39  ;;  %101 = vst.msk [vmem:[#allocation2 + $0xa0] sm:$0xff] %vm80_vm0, %v5365_v40  ;;  %v5381_v42 = vld [vmem:[%s9095_s0 + $0x108] sm:$0xff]  ;;  %v5386_v43 = vld [vmem:[%s9095_s0 + $0x110] sm:$0xff] }
  0x13   :  { %102 = vst.msk [vmem:[#allocation2 + $0xa8] sm:$0xff] %vm80_vm0, %v5372_v41  ;;  %v165_v44 = vld [vmem:[%s9095_s0 + $0xf1] sm:$0xff]  ;;  %v166_v45 = vld [vmem:[%s9095_s0 + $0xf9] sm:$0xff]  ;;  %103 = vst.msk [vmem:[#allocation2 + $0xb0] sm:$0xff] %vm80_vm0, %v5381_v42 }
  0x14   :  { %104 = vst.msk [vmem:[#allocation2 + $0xb8] sm:$0xff] %vm80_vm0, %v5386_v43  ;;  %v5401_v46 = vld [vmem:[%s9095_s0 + $0x120] sm:$0xff]  ;;  %v5408_v47 = vld [vmem:[%s9095_s0 + $0x128] sm:$0xff]  ;;  %v5415_v48 = vld [vmem:[%s9095_s0 + $0x138] sm:$0xff] }
  0x15   :  { %105 = vst.msk [vmem:[#allocation2 + $0xc0] sm:$0xff] %vm80_vm0, %v5401_v46  ;;  %106 = vst.msk [vmem:[#allocation2 + $0xc8] sm:$0xff] %vm80_vm0, %v5408_v47  ;;  %v5420_v49 = vld [vmem:[%s9095_s0 + $0x140] sm:$0xff]  ;;  %v167_v50 = vld [vmem:[%s9095_s0 + $0x109] sm:$0xff] }
  0x16   :  { %293 = vrot.lane.b32.xlu0 %v155_v10, %s5116_s19  ;;  %295 = vrot.lane.b32.xlu1 %v156_v11, %s5116_s19  ;;  %107 = vst.msk [vmem:[#allocation2 + $0xd0] sm:$0xff] %vm80_vm0, %v5415_v48  ;;  %108 = vst.msk [vmem:[#allocation2 + $0xd8] sm:$0xff] %vm80_vm0, %v5420_v49  ;;  %v168_v51 = vld [vmem:[%s9095_s0 + $0x111] sm:$0xff]  ;;  %v169_v54 = vld [vmem:[%s9095_s0 + $0x121] sm:$0xff] }
  0x17   :  { %v5437_v52 = vld [vmem:[%s9095_s0 + $0x150] sm:$0xff]  ;;  %v5444_v53 = vld [vmem:[%s9095_s0 + $0x158] sm:$0xff]  ;;  %v5459_v56 = vld [vmem:[%s9095_s0 + $0x168] sm:$0xff] }
  0x18   :  { %109 = vst.msk [vmem:[#allocation2 + $0xe0] sm:$0xff] %vm80_vm0, %v5437_v52  ;;  %110 = vst.msk [vmem:[#allocation2 + $0xe8] sm:$0xff] %vm80_vm0, %v5444_v53  ;;  %v170_v55 = vld [vmem:[%s9095_s0 + $0x129] sm:$0xff]  ;;  %v171_v58 = vld [vmem:[%s9095_s0 + $0x139] sm:$0xff] }
  0x19   :  { %111 = vst.msk [vmem:[#allocation2 + $0xf0] sm:$0xff] %vm80_vm0, %v5459_v56  ;;  %v5466_v57 = vld [vmem:[%s9095_s0 + $0x170] sm:$0xff]  ;;  %v172_v59 = vld [vmem:[%s9095_s0 + $0x141] sm:$0xff]  ;;  %v49_v61 = vld [vmem:[%s9095_s0 + $0x1b8] sm:$0xff] }
  0x1a   :  { %297 = vrot.lane.b32.xlu0 %v157_v14, %s5116_s19  ;;  %299 = vrot.lane.b32.xlu1 %v158_v15, %s5116_s19  ;;  %112 = vst.msk [vmem:[#allocation2 + $0xf8] sm:$0xff] %vm80_vm0, %v5466_v57  ;;  %v48_v60 = vld [vmem:[%s9095_s0 + $0x1b0] sm:$0xff]  ;;  %114 = vst.msk [vmem:[#allocation2 + $0x108] sm:$0xff] %vm80_vm0, %v49_v61  ;;  %v174_v63 = vld [vmem:[%s9095_s0 + $0x159] sm:$0xff] }
  0x1b   :  { %113 = vst.msk [vmem:[#allocation2 + $0x100] sm:$0xff] %vm80_vm0, %v48_v60  ;;  %v173_v62 = vld [vmem:[%s9095_s0 + $0x151] sm:$0xff]  ;;  %v5497_v0 = vld [vmem:[%s9095_s0 + $0x1c8] sm:$0xff]  ;;  %v5519_v4 = vld [vmem:[%s9095_s0 + $0x1e0] sm:$0xff] }
  0x1c   :  { %115 = vst.msk [vmem:[#allocation2 + $0x110] sm:$0xff] %vm80_vm0, %v5497_v0  ;;  %v5504_v1 = vld [vmem:[%s9095_s0 + $0x1d0] sm:$0xff]  ;;  %117 = vst.msk [vmem:[#allocation2 + $0x120] sm:$0xff] %vm80_vm0, %v5519_v4  ;;  %v5526_v5 = vld [vmem:[%s9095_s0 + $0x1e8] sm:$0xff] }
  0x1d   :  { %116 = vst.msk [vmem:[#allocation2 + $0x118] sm:$0xff] %vm80_vm0, %v5504_v1  ;;  %v175_v2 = vld [vmem:[%s9095_s0 + $0x169] sm:$0xff]  ;;  %v176_v3 = vld [vmem:[%s9095_s0 + $0x171] sm:$0xff]  ;;  %118 = vst.msk [vmem:[#allocation2 + $0x128] sm:$0xff] %vm80_vm0, %v5526_v5 }
  0x1e   :  { %301 = vrot.lane.b32.xlu0 %v159_v21, %s5116_s19  ;;  %303 = vrot.lane.b32.xlu1 %v160_v22, %s5116_s19  ;;  %v177_v6 = vld [vmem:[%s9095_s0 + $0x1b1] sm:$0xff]  ;;  %v178_v7 = vld [vmem:[%s9095_s0 + $0x1b9] sm:$0xff] }
  0x1f   :  { %v5541_v8 = vld [vmem:[%s9095_s0 + $0x1f8] sm:$0xff]  ;;  %v5548_v9 = vld [vmem:[%s9095_s0 + $0x200] sm:$0xff]  ;;  %v179_v10 = vld [vmem:[%s9095_s0 + $0x1c9] sm:$0xff] }
  0x20   :  { %119 = vst.msk [vmem:[#allocation2 + $0x130] sm:$0xff] %vm80_vm0, %v5541_v8  ;;  %120 = vst.msk [vmem:[#allocation2 + $0x138] sm:$0xff] %vm80_vm0, %v5548_v9  ;;  %v180_v11 = vld [vmem:[%s9095_s0 + $0x1d1] sm:$0xff]  ;;  %v181_v15 = vld [vmem:[%s9095_s0 + $0x1e1] sm:$0xff] }
  0x21   :  { %v5563_v12 = vld [vmem:[%s9095_s0 + $0x210] sm:$0xff]  ;;  %v5570_v14 = vld [vmem:[%s9095_s0 + $0x218] sm:$0xff]  ;;  %v5585_v21 = vld [vmem:[%s9095_s0 + $0x228] sm:$0xff] }
  0x22   :  { %305 = vrot.lane.b32.xlu0 %v161_v28, %s5116_s19  ;;  %307 = vrot.lane.b32.xlu1 %v162_v29, %s5116_s19  ;;  %121 = vst.msk [vmem:[#allocation2 + $0x140] sm:$0xff] %vm80_vm0, %v5563_v12  ;;  %122 = vst.msk [vmem:[#allocation2 + $0x148] sm:$0xff] %vm80_vm0, %v5570_v14  ;;  %v182_v16 = vld [vmem:[%s9095_s0 + $0x1e9] sm:$0xff]  ;;  %v183_v28 = vld [vmem:[%s9095_s0 + $0x1f9] sm:$0xff] }
  0x23   :  { %123 = vst.msk [vmem:[#allocation2 + $0x150] sm:$0xff] %vm80_vm0, %v5585_v21  ;;  %v5592_v22 = vld [vmem:[%s9095_s0 + $0x230] sm:$0xff]  ;;  %v184_v29 = vld [vmem:[%s9095_s0 + $0x201] sm:$0xff] }
  0x24   :  { %124 = vst.msk [vmem:[#allocation2 + $0x158] sm:$0xff] %vm80_vm0, %v5592_v22  ;;  %v189_v60 = vld [vmem:[%s9095_s0 + $0x241] sm:$0xff]  ;;  %v190_v61 = vld [vmem:[%s9095_s0 + $0x249] sm:$0xff] }
  0x26   :  { %309 = vrot.lane.b32.xlu0 %v163_v35, %s5116_s19  ;;  %311 = vrot.lane.b32.xlu1 %v164_v37, %s5116_s19  ;;  %v5607_v35 = vld [vmem:[%s9095_s0 + $0x240] sm:$0xff]  ;;  %v5614_v37 = vld [vmem:[%s9095_s0 + $0x248] sm:$0xff] }
  0x27   :  { %125 = vst.msk [vmem:[#allocation2 + $0x160] sm:$0xff] %vm80_vm0, %v5607_v35  ;;  %126 = vst.msk [vmem:[#allocation2 + $0x168] sm:$0xff] %vm80_vm0, %v5614_v37 }
  0x2a   :  { %313 = vrot.lane.b32.xlu0 %v165_v44, %s5116_s19  ;;  %315 = vrot.lane.b32.xlu1 %v166_v45, %s5116_s19  ;;  %v185_v44 = vld [vmem:[%s9095_s0 + $0x211] sm:$0xff]  ;;  %v186_v45 = vld [vmem:[%s9095_s0 + $0x219] sm:$0xff] }
  0x2e   :  { %317 = vrot.lane.b32.xlu0 %v167_v50, %s5116_s19  ;;  %319 = vrot.lane.b32.xlu1 %v168_v51, %s5116_s19  ;;  %v5629_v50 = vld [vmem:[%s9095_s0 + $0x258] sm:$0xff]  ;;  %v5636_v51 = vld [vmem:[%s9095_s0 + $0x260] sm:$0xff] }
  0x2f   :  { %127 = vst.msk [vmem:[#allocation2 + $0x170] sm:$0xff] %vm80_vm0, %v5629_v50  ;;  %128 = vst.msk [vmem:[#allocation2 + $0x178] sm:$0xff] %vm80_vm0, %v5636_v51 }
  0x32   :  { %321 = vrot.lane.b32.xlu0 %v169_v54, %s5116_s19  ;;  %323 = vrot.lane.b32.xlu1 %v170_v55, %s5116_s19  ;;  %v187_v54 = vld [vmem:[%s9095_s0 + $0x229] sm:$0xff]  ;;  %v188_v55 = vld [vmem:[%s9095_s0 + $0x231] sm:$0xff] }
  0x36   :  { %325 = vrot.lane.b32.xlu0 %v171_v58, %s5116_s19  ;;  %327 = vrot.lane.b32.xlu1 %v172_v59, %s5116_s19  ;;  %v5651_v58 = vld [vmem:[%s9095_s0 + $0x270] sm:$0xff]  ;;  %v5658_v59 = vld [vmem:[%s9095_s0 + $0x278] sm:$0xff] }
  0x37   :  { %129 = vst.msk [vmem:[#allocation2 + $0x180] sm:$0xff] %vm80_vm0, %v5651_v58  ;;  %130 = vst.msk [vmem:[#allocation2 + $0x188] sm:$0xff] %vm80_vm0, %v5658_v59 }
  0x3a   :  { %329 = vrot.lane.b32.xlu0 %v173_v62, %s5116_s19  ;;  %331 = vrot.lane.b32.xlu1 %v174_v63, %s5116_s19  ;;  %v5673_v62 = vld [vmem:[%s9095_s0 + $0x288] sm:$0xff]  ;;  %v5680_v63 = vld [vmem:[%s9095_s0 + $0x290] sm:$0xff] }
  0x3b   :  { %131 = vst.msk [vmem:[#allocation2 + $0x190] sm:$0xff] %vm80_vm0, %v5673_v62  ;;  %132 = vst.msk [vmem:[#allocation2 + $0x198] sm:$0xff] %vm80_vm0, %v5680_v63 }
  0x3e   :  { %333 = vrot.lane.b32.xlu0 %v175_v2, %s5116_s19  ;;  %335 = vrot.lane.b32.xlu1 %v176_v3, %s5116_s19  ;;  %v191_v2 = vld [vmem:[%s9095_s0 + $0x259] sm:$0xff]  ;;  %v192_v3 = vld [vmem:[%s9095_s0 + $0x261] sm:$0xff] }
  0x42   :  { %337 = vrot.lane.b32.xlu0 %v177_v6, %s5116_s19  ;;  %339 = vrot.lane.b32.xlu1 %v178_v7, %s5116_s19  ;;  %v5695_v6 = vld [vmem:[%s9095_s0 + $0x2a0] sm:$0xff]  ;;  %v5702_v7 = vld [vmem:[%s9095_s0 + $0x2a8] sm:$0xff] }
  0x43   :  { %133 = vst.msk [vmem:[#allocation2 + $0x1a0] sm:$0xff] %vm80_vm0, %v5695_v6  ;;  %134 = vst.msk [vmem:[#allocation2 + $0x1a8] sm:$0xff] %vm80_vm0, %v5702_v7 }
  0x46   :  { %341 = vrot.lane.b32.xlu0 %v179_v10, %s5116_s19  ;;  %343 = vrot.lane.b32.xlu1 %v180_v11, %s5116_s19  ;;  %v193_v10 = vld [vmem:[%s9095_s0 + $0x271] sm:$0xff]  ;;  %v194_v11 = vld [vmem:[%s9095_s0 + $0x279] sm:$0xff] }
  0x4a   :  { %345 = vrot.lane.b32.xlu0 %v181_v15, %s5116_s19  ;;  %347 = vrot.lane.b32.xlu1 %v182_v16, %s5116_s19  ;;  %v5717_v15 = vld [vmem:[%s9095_s0 + $0x2b8] sm:$0xff]  ;;  %v5724_v16 = vld [vmem:[%s9095_s0 + $0x2c0] sm:$0xff] }
  0x4b   :  { %135 = vst.msk [vmem:[#allocation2 + $0x1b0] sm:$0xff] %vm80_vm0, %v5717_v15  ;;  %136 = vst.msk [vmem:[#allocation2 + $0x1b8] sm:$0xff] %vm80_vm0, %v5724_v16 }
  0x4e   :  { %349 = vrot.lane.b32.xlu0 %v183_v28, %s5116_s19  ;;  %351 = vrot.lane.b32.xlu1 %v184_v29, %s5116_s19  ;;  %v195_v28 = vld [vmem:[%s9095_s0 + $0x289] sm:$0xff]  ;;  %v196_v29 = vld [vmem:[%s9095_s0 + $0x291] sm:$0xff] }
  0x52   :  { %353 = vrot.lane.b32.xlu0 %v185_v44, %s5116_s19  ;;  %355 = vrot.lane.b32.xlu1 %v186_v45, %s5116_s19  ;;  %v5739_v44 = vld [vmem:[%s9095_s0 + $0x2d0] sm:$0xff]  ;;  %v5746_v45 = vld [vmem:[%s9095_s0 + $0x2d8] sm:$0xff] }
  0x53   :  { %137 = vst.msk [vmem:[#allocation2 + $0x1c0] sm:$0xff] %vm80_vm0, %v5739_v44  ;;  %138 = vst.msk [vmem:[#allocation2 + $0x1c8] sm:$0xff] %vm80_vm0, %v5746_v45 }
  0x56   :  { %357 = vrot.lane.b32.xlu0 %v187_v54, %s5116_s19  ;;  %359 = vrot.lane.b32.xlu1 %v188_v55, %s5116_s19  ;;  %v197_v54 = vld [vmem:[%s9095_s0 + $0x2a1] sm:$0xff]  ;;  %v198_v55 = vld [vmem:[%s9095_s0 + $0x2a9] sm:$0xff] }
  0x5a   :  { %361 = vrot.lane.b32.xlu0 %v189_v60, %s5116_s19  ;;  %363 = vrot.lane.b32.xlu1 %v190_v61, %s5116_s19  ;;  %v5761_v60 = vld [vmem:[%s9095_s0 + $0x2e8] sm:$0xff]  ;;  %v5768_v61 = vld [vmem:[%s9095_s0 + $0x2f0] sm:$0xff] }
  0x5b   :  { %139 = vst.msk [vmem:[#allocation2 + $0x1d0] sm:$0xff] %vm80_vm0, %v5761_v60  ;;  %140 = vst.msk [vmem:[#allocation2 + $0x1d8] sm:$0xff] %vm80_vm0, %v5768_v61 }
  0x5e   :  { %365 = vrot.lane.b32.xlu0 %v191_v2, %s5116_s19  ;;  %367 = vrot.lane.b32.xlu1 %v192_v3, %s5116_s19  ;;  %v199_v2 = vld [vmem:[%s9095_s0 + $0x2b9] sm:$0xff]  ;;  %v200_v3 = vld [vmem:[%s9095_s0 + $0x2c1] sm:$0xff] }
  0x62   :  { %369 = vrot.lane.b32.xlu0 %v193_v10, %s5116_s19  ;;  %371 = vrot.lane.b32.xlu1 %v194_v11, %s5116_s19  ;;  %v5783_v10 = vld [vmem:[%s9095_s0 + $0x300] sm:$0xff]  ;;  %v5790_v11 = vld [vmem:[%s9095_s0 + $0x308] sm:$0xff] }
  0x63   :  { %9104 = vst [vmem:[#allocation3_spill] sm:$0xff] %v5783_v10  ;;  %141 = vst.msk [vmem:[#allocation2 + $0x1e0] sm:$0xff] %vm80_vm0, %v5783_v10 }
  0x64   :  { %9105 = vst [vmem:[#allocation4_spill] sm:$0xff] %v5790_v11  ;;  %142 = vst.msk [vmem:[#allocation2 + $0x1e8] sm:$0xff] %vm80_vm0, %v5790_v11 }
  0x66   :  { %373 = vrot.lane.b32.xlu0 %v195_v28, %s5116_s19  ;;  %375 = vrot.lane.b32.xlu1 %v196_v29, %s5116_s19  ;;  %v201_v28 = vld [vmem:[%s9095_s0 + $0x2d1] sm:$0xff]  ;;  %v202_v29 = vld [vmem:[%s9095_s0 + $0x2d9] sm:$0xff] }
  0x6a   :  { %377 = vrot.lane.b32.xlu0 %v197_v54, %s5116_s19  ;;  %379 = vrot.lane.b32.xlu1 %v198_v55, %s5116_s19  ;;  %v5805_v54 = vld [vmem:[%s9095_s0 + $0x318] sm:$0xff]  ;;  %v5812_v55 = vld [vmem:[%s9095_s0 + $0x320] sm:$0xff] }
  0x6b   :  { %9106 = vst [vmem:[#allocation5_spill] sm:$0xff] %v5805_v54  ;;  %143 = vst.msk [vmem:[#allocation2 + $0x1f0] sm:$0xff] %vm80_vm0, %v5805_v54 }
  0x6c   :  { %9107 = vst [vmem:[#allocation6_spill] sm:$0xff] %v5812_v55  ;;  %144 = vst.msk [vmem:[#allocation2 + $0x1f8] sm:$0xff] %vm80_vm0, %v5812_v55 }
  0x6e   :  { %381 = vrot.lane.b32.xlu0 %v199_v2, %s5116_s19  ;;  %383 = vrot.lane.b32.xlu1 %v200_v3, %s5116_s19  ;;  %v203_v2 = vld [vmem:[%s9095_s0 + $0x2e9] sm:$0xff]  ;;  %v204_v3 = vld [vmem:[%s9095_s0 + $0x2f1] sm:$0xff] }
  0x72   :  { %385 = vrot.lane.b32.xlu0 %v201_v28, %s5116_s19  ;;  %387 = vrot.lane.b32.xlu1 %v202_v29, %s5116_s19  ;;  %v205_v28 = vld [vmem:[%s9095_s0 + $0x301] sm:$0xff]  ;;  %v206_v29 = vld [vmem:[%s9095_s0 + $0x309] sm:$0xff] }
  0x74   :  { %v274_v54 = vpop.permute.xlu0 %273  ;;  %v278_v11 = vpop.permute.xlu1 %277 }
  0x75   :  { %466 = vst.msk [vmem:[#allocation2] sm:$0xff] %vm465_vm1, %v274_v54  ;;  %468 = vst.msk [vmem:[#allocation2 + $0x10] sm:$0xff] %vm465_vm1, %v278_v11  ;;  %v207_v11 = vld [vmem:[%s9095_s0 + $0x319] sm:$0xff]  ;;  %v208_v54 = vld [vmem:[%s9095_s0 + $0x321] sm:$0xff] }
  0x76   :  { %389 = vrot.lane.b32.xlu0 %v203_v2, %s5116_s19  ;;  %391 = vrot.lane.b32.xlu1 %v204_v3, %s5116_s19 }
  0x78   :  { %v276_v55 = vpop.permute.xlu0 %275  ;;  %v280_v10 = vpop.permute.xlu1 %279 }
  0x79   :  { %467 = vst.msk [vmem:[#allocation2 + $0x8] sm:$0xff] %vm465_vm1, %v276_v55  ;;  %469 = vst.msk [vmem:[#allocation2 + $0x18] sm:$0xff] %vm465_vm1, %v280_v10  ;;  %v530_v10 = vld [vmem:[%s9095_s0 + $0x2] sm:$0xff]  ;;  %v531_v55 = vld [vmem:[%s9095_s0 + $0xa] sm:$0xff] }
  0x7a   :  { %393 = vrot.lane.b32.xlu0 %v205_v28, %s5116_s19  ;;  %395 = vrot.lane.b32.xlu1 %v206_v29, %s5116_s19 }
  0x7c   :  { %v282_v2 = vpop.permute.xlu0 %281  ;;  %v284_v3 = vpop.permute.xlu1 %283 }
  0x7d   :  { %470 = vst.msk [vmem:[#allocation2 + $0x20] sm:$0xff] %vm465_vm1, %v282_v2  ;;  %471 = vst.msk [vmem:[#allocation2 + $0x28] sm:$0xff] %vm465_vm1, %v284_v3 }
  0x7e   :  { %397 = vrot.lane.b32.xlu0 %v207_v11, %s5116_s19  ;;  %399 = vrot.lane.b32.xlu1 %v208_v54, %s5116_s19  ;;  %v532_v11 = vld [vmem:[%s9095_s0 + $0x1a] sm:$0xff]  ;;  %v533_v54 = vld [vmem:[%s9095_s0 + $0x22] sm:$0xff] }
  0x80   :  { %v286_v28 = vpop.permute.xlu0 %285  ;;  %v288_v29 = vpop.permute.xlu1 %287 }
  0x81   :  { %472 = vst.msk [vmem:[#allocation2 + $0x30] sm:$0xff] %vm465_vm1, %v286_v28  ;;  %473 = vst.msk [vmem:[#allocation2 + $0x38] sm:$0xff] %vm465_vm1, %v288_v29 }
  0x82   :  { %658 = vrot.lane.b32.xlu0 %v530_v10, %s5117_s26  ;;  %660 = vrot.lane.b32.xlu1 %v531_v55, %s5117_s26  ;;  %v534_v10 = vld [vmem:[%s9095_s0 + $0x32] sm:$0xff]  ;;  %v535_v55 = vld [vmem:[%s9095_s0 + $0x3a] sm:$0xff] }
  0x84   :  { %v290_v2 = vpop.permute.xlu0 %289  ;;  %v292_v3 = vpop.permute.xlu1 %291 }
  0x85   :  { %474 = vst.msk [vmem:[#allocation2 + $0x40] sm:$0xff] %vm465_vm1, %v290_v2  ;;  %475 = vst.msk [vmem:[#allocation2 + $0x48] sm:$0xff] %vm465_vm1, %v292_v3 }
  0x86   :  { %662 = vrot.lane.b32.xlu0 %v532_v11, %s5117_s26  ;;  %664 = vrot.lane.b32.xlu1 %v533_v54, %s5117_s26  ;;  %v536_v11 = vld [vmem:[%s9095_s0 + $0x4a] sm:$0xff]  ;;  %v537_v54 = vld [vmem:[%s9095_s0 + $0x52] sm:$0xff] }
  0x88   :  { %v294_v28 = vpop.permute.xlu0 %293  ;;  %v296_v29 = vpop.permute.xlu1 %295 }
  0x89   :  { %476 = vst.msk [vmem:[#allocation2 + $0x50] sm:$0xff] %vm465_vm1, %v294_v28  ;;  %477 = vst.msk [vmem:[#allocation2 + $0x58] sm:$0xff] %vm465_vm1, %v296_v29 }
  0x8a   :  { %666 = vrot.lane.b32.xlu0 %v534_v10, %s5117_s26  ;;  %668 = vrot.lane.b32.xlu1 %v535_v55, %s5117_s26  ;;  %v538_v10 = vld [vmem:[%s9095_s0 + $0x62] sm:$0xff]  ;;  %v539_v55 = vld [vmem:[%s9095_s0 + $0x6a] sm:$0xff] }
  0x8c   :  { %v298_v2 = vpop.permute.xlu0 %297  ;;  %v300_v3 = vpop.permute.xlu1 %299 }
  0x8d   :  { %478 = vst.msk [vmem:[#allocation2 + $0x60] sm:$0xff] %vm465_vm1, %v298_v2  ;;  %479 = vst.msk [vmem:[#allocation2 + $0x68] sm:$0xff] %vm465_vm1, %v300_v3 }
  0x8e   :  { %670 = vrot.lane.b32.xlu0 %v536_v11, %s5117_s26  ;;  %672 = vrot.lane.b32.xlu1 %v537_v54, %s5117_s26  ;;  %v540_v11 = vld [vmem:[%s9095_s0 + $0x7a] sm:$0xff]  ;;  %v541_v54 = vld [vmem:[%s9095_s0 + $0x82] sm:$0xff] }
  0x90   :  { %v302_v28 = vpop.permute.xlu0 %301  ;;  %v304_v29 = vpop.permute.xlu1 %303 }
  0x91   :  { %480 = vst.msk [vmem:[#allocation2 + $0x70] sm:$0xff] %vm465_vm1, %v302_v28  ;;  %481 = vst.msk [vmem:[#allocation2 + $0x78] sm:$0xff] %vm465_vm1, %v304_v29 }
  0x92   :  { %674 = vrot.lane.b32.xlu0 %v538_v10, %s5117_s26  ;;  %676 = vrot.lane.b32.xlu1 %v539_v55, %s5117_s26  ;;  %v542_v10 = vld [vmem:[%s9095_s0 + $0x92] sm:$0xff]  ;;  %v543_v55 = vld [vmem:[%s9095_s0 + $0x9a] sm:$0xff] }
  0x94   :  { %v306_v2 = vpop.permute.xlu0 %305  ;;  %v308_v3 = vpop.permute.xlu1 %307 }
  0x95   :  { %482 = vst.msk [vmem:[#allocation2 + $0x80] sm:$0xff] %vm465_vm1, %v306_v2  ;;  %483 = vst.msk [vmem:[#allocation2 + $0x88] sm:$0xff] %vm465_vm1, %v308_v3 }
  0x96   :  { %678 = vrot.lane.b32.xlu0 %v540_v11, %s5117_s26  ;;  %680 = vrot.lane.b32.xlu1 %v541_v54, %s5117_s26  ;;  %v544_v11 = vld [vmem:[%s9095_s0 + $0xaa] sm:$0xff]  ;;  %v545_v54 = vld [vmem:[%s9095_s0 + $0xb2] sm:$0xff] }
  0x98   :  { %v310_v28 = vpop.permute.xlu0 %309  ;;  %v312_v29 = vpop.permute.xlu1 %311 }
  0x99   :  { %484 = vst.msk [vmem:[#allocation2 + $0x90] sm:$0xff] %vm465_vm1, %v310_v28  ;;  %485 = vst.msk [vmem:[#allocation2 + $0x98] sm:$0xff] %vm465_vm1, %v312_v29 }
  0x9a   :  { %682 = vrot.lane.b32.xlu0 %v542_v10, %s5117_s26  ;;  %684 = vrot.lane.b32.xlu1 %v543_v55, %s5117_s26  ;;  %v546_v10 = vld [vmem:[%s9095_s0 + $0xc2] sm:$0xff]  ;;  %v547_v55 = vld [vmem:[%s9095_s0 + $0xca] sm:$0xff] }
  0x9c   :  { %v314_v2 = vpop.permute.xlu0 %313  ;;  %v316_v3 = vpop.permute.xlu1 %315 }
  0x9d   :  { %486 = vst.msk [vmem:[#allocation2 + $0xa0] sm:$0xff] %vm465_vm1, %v314_v2  ;;  %487 = vst.msk [vmem:[#allocation2 + $0xa8] sm:$0xff] %vm465_vm1, %v316_v3 }
  0x9e   :  { %686 = vrot.lane.b32.xlu0 %v544_v11, %s5117_s26  ;;  %688 = vrot.lane.b32.xlu1 %v545_v54, %s5117_s26  ;;  %v548_v11 = vld [vmem:[%s9095_s0 + $0xda] sm:$0xff]  ;;  %v549_v54 = vld [vmem:[%s9095_s0 + $0xe2] sm:$0xff] }
  0xa0   :  { %v318_v28 = vpop.permute.xlu0 %317  ;;  %v320_v29 = vpop.permute.xlu1 %319 }
  0xa1   :  { %488 = vst.msk [vmem:[#allocation2 + $0xb0] sm:$0xff] %vm465_vm1, %v318_v28  ;;  %489 = vst.msk [vmem:[#allocation2 + $0xb8] sm:$0xff] %vm465_vm1, %v320_v29 }
  0xa2   :  { %690 = vrot.lane.b32.xlu0 %v546_v10, %s5117_s26  ;;  %692 = vrot.lane.b32.xlu1 %v547_v55, %s5117_s26  ;;  %v550_v10 = vld [vmem:[%s9095_s0 + $0xf2] sm:$0xff]  ;;  %v551_v55 = vld [vmem:[%s9095_s0 + $0xfa] sm:$0xff] }
  0xa4   :  { %v322_v2 = vpop.permute.xlu0 %321  ;;  %v324_v3 = vpop.permute.xlu1 %323 }
  0xa5   :  { %490 = vst.msk [vmem:[#allocation2 + $0xc0] sm:$0xff] %vm465_vm1, %v322_v2  ;;  %491 = vst.msk [vmem:[#allocation2 + $0xc8] sm:$0xff] %vm465_vm1, %v324_v3 }
  0xa6   :  { %694 = vrot.lane.b32.xlu0 %v548_v11, %s5117_s26  ;;  %696 = vrot.lane.b32.xlu1 %v549_v54, %s5117_s26  ;;  %v552_v11 = vld [vmem:[%s9095_s0 + $0x10a] sm:$0xff]  ;;  %v553_v54 = vld [vmem:[%s9095_s0 + $0x112] sm:$0xff] }
  0xa8   :  { %v326_v28 = vpop.permute.xlu0 %325  ;;  %v328_v29 = vpop.permute.xlu1 %327 }
  0xa9   :  { %492 = vst.msk [vmem:[#allocation2 + $0xd0] sm:$0xff] %vm465_vm1, %v326_v28  ;;  %493 = vst.msk [vmem:[#allocation2 + $0xd8] sm:$0xff] %vm465_vm1, %v328_v29 }
  0xaa   :  { %698 = vrot.lane.b32.xlu0 %v550_v10, %s5117_s26  ;;  %700 = vrot.lane.b32.xlu1 %v551_v55, %s5117_s26  ;;  %v554_v10 = vld [vmem:[%s9095_s0 + $0x122] sm:$0xff]  ;;  %v555_v55 = vld [vmem:[%s9095_s0 + $0x12a] sm:$0xff] }
  0xac   :  { %v330_v2 = vpop.permute.xlu0 %329  ;;  %v332_v3 = vpop.permute.xlu1 %331 }
  0xad   :  { %494 = vst.msk [vmem:[#allocation2 + $0xe0] sm:$0xff] %vm465_vm1, %v330_v2  ;;  %495 = vst.msk [vmem:[#allocation2 + $0xe8] sm:$0xff] %vm465_vm1, %v332_v3 }
  0xae   :  { %702 = vrot.lane.b32.xlu0 %v552_v11, %s5117_s26  ;;  %704 = vrot.lane.b32.xlu1 %v553_v54, %s5117_s26  ;;  %v556_v11 = vld [vmem:[%s9095_s0 + $0x13a] sm:$0xff]  ;;  %v557_v54 = vld [vmem:[%s9095_s0 + $0x142] sm:$0xff] }
  0xb0   :  { %v334_v28 = vpop.permute.xlu0 %333  ;;  %v336_v29 = vpop.permute.xlu1 %335 }
  0xb1   :  { %496 = vst.msk [vmem:[#allocation2 + $0xf0] sm:$0xff] %vm465_vm1, %v334_v28  ;;  %497 = vst.msk [vmem:[#allocation2 + $0xf8] sm:$0xff] %vm465_vm1, %v336_v29 }
  0xb2   :  { %706 = vrot.lane.b32.xlu0 %v554_v10, %s5117_s26  ;;  %708 = vrot.lane.b32.xlu1 %v555_v55, %s5117_s26  ;;  %v558_v10 = vld [vmem:[%s9095_s0 + $0x152] sm:$0xff]  ;;  %v559_v55 = vld [vmem:[%s9095_s0 + $0x15a] sm:$0xff] }
  0xb4   :  { %v338_v2 = vpop.permute.xlu0 %337  ;;  %v340_v3 = vpop.permute.xlu1 %339 }
  0xb5   :  { %498 = vst.msk [vmem:[#allocation2 + $0x100] sm:$0xff] %vm465_vm1, %v338_v2  ;;  %499 = vst.msk [vmem:[#allocation2 + $0x108] sm:$0xff] %vm465_vm1, %v340_v3 }
  0xb6   :  { %710 = vrot.lane.b32.xlu0 %v556_v11, %s5117_s26  ;;  %712 = vrot.lane.b32.xlu1 %v557_v54, %s5117_s26  ;;  %v560_v11 = vld [vmem:[%s9095_s0 + $0x16a] sm:$0xff]  ;;  %v561_v54 = vld [vmem:[%s9095_s0 + $0x172] sm:$0xff] }
  0xb8   :  { %v342_v28 = vpop.permute.xlu0 %341  ;;  %v344_v29 = vpop.permute.xlu1 %343 }
  0xb9   :  { %500 = vst.msk [vmem:[#allocation2 + $0x110] sm:$0xff] %vm465_vm1, %v342_v28  ;;  %501 = vst.msk [vmem:[#allocation2 + $0x118] sm:$0xff] %vm465_vm1, %v344_v29 }
  0xba   :  { %714 = vrot.lane.b32.xlu0 %v558_v10, %s5117_s26  ;;  %716 = vrot.lane.b32.xlu1 %v559_v55, %s5117_s26  ;;  %v562_v10 = vld [vmem:[%s9095_s0 + $0x1b2] sm:$0xff]  ;;  %v563_v55 = vld [vmem:[%s9095_s0 + $0x1ba] sm:$0xff] }
  0xbc   :  { %v346_v2 = vpop.permute.xlu0 %345  ;;  %v348_v3 = vpop.permute.xlu1 %347 }
  0xbd   :  { %502 = vst.msk [vmem:[#allocation2 + $0x120] sm:$0xff] %vm465_vm1, %v346_v2  ;;  %503 = vst.msk [vmem:[#allocation2 + $0x128] sm:$0xff] %vm465_vm1, %v348_v3 }
  0xbe   :  { %718 = vrot.lane.b32.xlu0 %v560_v11, %s5117_s26  ;;  %720 = vrot.lane.b32.xlu1 %v561_v54, %s5117_s26  ;;  %v564_v11 = vld [vmem:[%s9095_s0 + $0x1ca] sm:$0xff]  ;;  %v565_v54 = vld [vmem:[%s9095_s0 + $0x1d2] sm:$0xff] }
  0xc0   :  { %v350_v28 = vpop.permute.xlu0 %349  ;;  %v352_v29 = vpop.permute.xlu1 %351 }
  0xc1   :  { %504 = vst.msk [vmem:[#allocation2 + $0x130] sm:$0xff] %vm465_vm1, %v350_v28  ;;  %505 = vst.msk [vmem:[#allocation2 + $0x138] sm:$0xff] %vm465_vm1, %v352_v29 }
  0xc2   :  { %722 = vrot.lane.b32.xlu0 %v562_v10, %s5117_s26  ;;  %724 = vrot.lane.b32.xlu1 %v563_v55, %s5117_s26  ;;  %v566_v10 = vld [vmem:[%s9095_s0 + $0x1e2] sm:$0xff]  ;;  %v567_v55 = vld [vmem:[%s9095_s0 + $0x1ea] sm:$0xff] }
  0xc4   :  { %v354_v2 = vpop.permute.xlu0 %353  ;;  %v356_v3 = vpop.permute.xlu1 %355 }
  0xc5   :  { %506 = vst.msk [vmem:[#allocation2 + $0x140] sm:$0xff] %vm465_vm1, %v354_v2  ;;  %507 = vst.msk [vmem:[#allocation2 + $0x148] sm:$0xff] %vm465_vm1, %v356_v3 }
  0xc6   :  { %726 = vrot.lane.b32.xlu0 %v564_v11, %s5117_s26  ;;  %728 = vrot.lane.b32.xlu1 %v565_v54, %s5117_s26  ;;  %v568_v11 = vld [vmem:[%s9095_s0 + $0x1fa] sm:$0xff]  ;;  %v569_v54 = vld [vmem:[%s9095_s0 + $0x202] sm:$0xff] }
  0xc8   :  { %v358_v28 = vpop.permute.xlu0 %357  ;;  %v360_v29 = vpop.permute.xlu1 %359 }
  0xc9   :  { %508 = vst.msk [vmem:[#allocation2 + $0x150] sm:$0xff] %vm465_vm1, %v358_v28  ;;  %509 = vst.msk [vmem:[#allocation2 + $0x158] sm:$0xff] %vm465_vm1, %v360_v29 }
  0xca   :  { %730 = vrot.lane.b32.xlu0 %v566_v10, %s5117_s26  ;;  %732 = vrot.lane.b32.xlu1 %v567_v55, %s5117_s26  ;;  %v570_v10 = vld [vmem:[%s9095_s0 + $0x212] sm:$0xff]  ;;  %v571_v55 = vld [vmem:[%s9095_s0 + $0x21a] sm:$0xff] }
  0xcc   :  { %v362_v2 = vpop.permute.xlu0 %361  ;;  %v364_v3 = vpop.permute.xlu1 %363 }
  0xcd   :  { %510 = vst.msk [vmem:[#allocation2 + $0x160] sm:$0xff] %vm465_vm1, %v362_v2  ;;  %511 = vst.msk [vmem:[#allocation2 + $0x168] sm:$0xff] %vm465_vm1, %v364_v3 }
  0xce   :  { %734 = vrot.lane.b32.xlu0 %v568_v11, %s5117_s26  ;;  %736 = vrot.lane.b32.xlu1 %v569_v54, %s5117_s26  ;;  %v572_v11 = vld [vmem:[%s9095_s0 + $0x22a] sm:$0xff]  ;;  %v573_v54 = vld [vmem:[%s9095_s0 + $0x232] sm:$0xff] }
  0xd0   :  { %v366_v28 = vpop.permute.xlu0 %365  ;;  %v368_v29 = vpop.permute.xlu1 %367 }
  0xd1   :  { %512 = vst.msk [vmem:[#allocation2 + $0x170] sm:$0xff] %vm465_vm1, %v366_v28  ;;  %513 = vst.msk [vmem:[#allocation2 + $0x178] sm:$0xff] %vm465_vm1, %v368_v29 }
  0xd2   :  { %738 = vrot.lane.b32.xlu0 %v570_v10, %s5117_s26  ;;  %740 = vrot.lane.b32.xlu1 %v571_v55, %s5117_s26  ;;  %v574_v10 = vld [vmem:[%s9095_s0 + $0x242] sm:$0xff]  ;;  %v575_v55 = vld [vmem:[%s9095_s0 + $0x24a] sm:$0xff] }
  0xd4   :  { %v370_v2 = vpop.permute.xlu0 %369  ;;  %v372_v3 = vpop.permute.xlu1 %371 }
  0xd5   :  { %514 = vst.msk [vmem:[#allocation2 + $0x180] sm:$0xff] %vm465_vm1, %v370_v2  ;;  %515 = vst.msk [vmem:[#allocation2 + $0x188] sm:$0xff] %vm465_vm1, %v372_v3 }
  0xd6   :  { %742 = vrot.lane.b32.xlu0 %v572_v11, %s5117_s26  ;;  %744 = vrot.lane.b32.xlu1 %v573_v54, %s5117_s26  ;;  %v576_v11 = vld [vmem:[%s9095_s0 + $0x25a] sm:$0xff]  ;;  %v577_v54 = vld [vmem:[%s9095_s0 + $0x262] sm:$0xff] }
  0xd8   :  { %v374_v28 = vpop.permute.xlu0 %373  ;;  %v376_v29 = vpop.permute.xlu1 %375 }
  0xd9   :  { %516 = vst.msk [vmem:[#allocation2 + $0x190] sm:$0xff] %vm465_vm1, %v374_v28  ;;  %517 = vst.msk [vmem:[#allocation2 + $0x198] sm:$0xff] %vm465_vm1, %v376_v29 }
  0xda   :  { %746 = vrot.lane.b32.xlu0 %v574_v10, %s5117_s26  ;;  %748 = vrot.lane.b32.xlu1 %v575_v55, %s5117_s26  ;;  %v578_v10 = vld [vmem:[%s9095_s0 + $0x272] sm:$0xff]  ;;  %v579_v55 = vld [vmem:[%s9095_s0 + $0x27a] sm:$0xff] }
  0xdc   :  { %v378_v2 = vpop.permute.xlu0 %377  ;;  %v380_v3 = vpop.permute.xlu1 %379 }
  0xdd   :  { %518 = vst.msk [vmem:[#allocation2 + $0x1a0] sm:$0xff] %vm465_vm1, %v378_v2  ;;  %519 = vst.msk [vmem:[#allocation2 + $0x1a8] sm:$0xff] %vm465_vm1, %v380_v3 }
  0xde   :  { %750 = vrot.lane.b32.xlu0 %v576_v11, %s5117_s26  ;;  %752 = vrot.lane.b32.xlu1 %v577_v54, %s5117_s26  ;;  %v580_v11 = vld [vmem:[%s9095_s0 + $0x28a] sm:$0xff]  ;;  %v581_v54 = vld [vmem:[%s9095_s0 + $0x292] sm:$0xff] }
  0xe0   :  { %v382_v28 = vpop.permute.xlu0 %381  ;;  %v384_v29 = vpop.permute.xlu1 %383 }
  0xe1   :  { %520 = vst.msk [vmem:[#allocation2 + $0x1b0] sm:$0xff] %vm465_vm1, %v382_v28  ;;  %521 = vst.msk [vmem:[#allocation2 + $0x1b8] sm:$0xff] %vm465_vm1, %v384_v29 }
  0xe2   :  { %754 = vrot.lane.b32.xlu0 %v578_v10, %s5117_s26  ;;  %756 = vrot.lane.b32.xlu1 %v579_v55, %s5117_s26  ;;  %v582_v10 = vld [vmem:[%s9095_s0 + $0x2a2] sm:$0xff]  ;;  %v583_v55 = vld [vmem:[%s9095_s0 + $0x2aa] sm:$0xff] }
  0xe4   :  { %v386_v2 = vpop.permute.xlu0 %385  ;;  %v388_v3 = vpop.permute.xlu1 %387 }
  0xe5   :  { %522 = vst.msk [vmem:[#allocation2 + $0x1c0] sm:$0xff] %vm465_vm1, %v386_v2  ;;  %523 = vst.msk [vmem:[#allocation2 + $0x1c8] sm:$0xff] %vm465_vm1, %v388_v3 }
  0xe6   :  { %758 = vrot.lane.b32.xlu0 %v580_v11, %s5117_s26  ;;  %760 = vrot.lane.b32.xlu1 %v581_v54, %s5117_s26  ;;  %v584_v11 = vld [vmem:[%s9095_s0 + $0x2ba] sm:$0xff]  ;;  %v585_v54 = vld [vmem:[%s9095_s0 + $0x2c2] sm:$0xff] }
  0xe8   :  { %v390_v28 = vpop.permute.xlu0 %389  ;;  %v392_v29 = vpop.permute.xlu1 %391 }
  0xe9   :  { %524 = vst.msk [vmem:[#allocation2 + $0x1d0] sm:$0xff] %vm465_vm1, %v390_v28  ;;  %525 = vst.msk [vmem:[#allocation2 + $0x1d8] sm:$0xff] %vm465_vm1, %v392_v29 }
  0xea   :  { %762 = vrot.lane.b32.xlu0 %v582_v10, %s5117_s26  ;;  %764 = vrot.lane.b32.xlu1 %v583_v55, %s5117_s26  ;;  %v586_v10 = vld [vmem:[%s9095_s0 + $0x2d2] sm:$0xff]  ;;  %v587_v55 = vld [vmem:[%s9095_s0 + $0x2da] sm:$0xff] }
  0xec   :  { %v394_v2 = vpop.permute.xlu0 %393  ;;  %v396_v3 = vpop.permute.xlu1 %395 }
  0xed   :  { %526 = vst.msk [vmem:[#allocation2 + $0x1e0] sm:$0xff] %vm465_vm1, %v394_v2  ;;  %527 = vst.msk [vmem:[#allocation2 + $0x1e8] sm:$0xff] %vm465_vm1, %v396_v3 }
  0xee   :  { %766 = vrot.lane.b32.xlu0 %v584_v11, %s5117_s26  ;;  %768 = vrot.lane.b32.xlu1 %v585_v54, %s5117_s26  ;;  %v588_v11 = vld [vmem:[%s9095_s0 + $0x2ea] sm:$0xff]  ;;  %v589_v54 = vld [vmem:[%s9095_s0 + $0x2f2] sm:$0xff] }
  0xf0   :  { %v398_v28 = vpop.permute.xlu0 %397  ;;  %v400_v29 = vpop.permute.xlu1 %399 }
  0xf1   :  { %528 = vst.msk [vmem:[#allocation2 + $0x1f0] sm:$0xff] %vm465_vm1, %v398_v28  ;;  %529 = vst.msk [vmem:[#allocation2 + $0x1f8] sm:$0xff] %vm465_vm1, %v400_v29 }
  0xf2   :  { %770 = vrot.lane.b32.xlu0 %v586_v10, %s5117_s26  ;;  %772 = vrot.lane.b32.xlu1 %v587_v55, %s5117_s26  ;;  %v590_v10 = vld [vmem:[%s9095_s0 + $0x302] sm:$0xff]  ;;  %v591_v55 = vld [vmem:[%s9095_s0 + $0x30a] sm:$0xff] }
  0xf4   :  { %v659_v2 = vpop.permute.xlu0 %658  ;;  %v661_v3 = vpop.permute.xlu1 %660 }
  0xf5   :  { %851 = vst.msk [vmem:[#allocation2] sm:$0xff] %vm850_vm2, %v659_v2  ;;  %852 = vst.msk [vmem:[#allocation2 + $0x8] sm:$0xff] %vm850_vm2, %v661_v3 }
  0xf6   :  { %774 = vrot.lane.b32.xlu0 %v588_v11, %s5117_s26  ;;  %776 = vrot.lane.b32.xlu1 %v589_v54, %s5117_s26  ;;  %v592_v11 = vld [vmem:[%s9095_s0 + $0x31a] sm:$0xff]  ;;  %v593_v54 = vld [vmem:[%s9095_s0 + $0x322] sm:$0xff] }
  0xf8   :  { %v663_v28 = vpop.permute.xlu0 %662  ;;  %v665_v29 = vpop.permute.xlu1 %664 }
  0xf9   :  { %853 = vst.msk [vmem:[#allocation2 + $0x10] sm:$0xff] %vm850_vm2, %v663_v28  ;;  %854 = vst.msk [vmem:[#allocation2 + $0x18] sm:$0xff] %vm850_vm2, %v665_v29 }
  0xfa   :  { %778 = vrot.lane.b32.xlu0 %v590_v10, %s5117_s26  ;;  %780 = vrot.lane.b32.xlu1 %v591_v55, %s5117_s26 }
  0xfc   :  { %v667_v2 = vpop.permute.xlu0 %666  ;;  %v669_v3 = vpop.permute.xlu1 %668 }
  0xfd   :  { %855 = vst.msk [vmem:[#allocation2 + $0x20] sm:$0xff] %vm850_vm2, %v667_v2  ;;  %856 = vst.msk [vmem:[#allocation2 + $0x28] sm:$0xff] %vm850_vm2, %v669_v3 }
  0xfe   :  { %782 = vrot.lane.b32.xlu0 %v592_v11, %s5117_s26  ;;  %784 = vrot.lane.b32.xlu1 %v593_v54, %s5117_s26 }
 0x100   :  { %v671_v10 = vpop.permute.xlu0 %670  ;;  %v673_v55 = vpop.permute.xlu1 %672 }
 0x101   :  { %857 = vst.msk [vmem:[#allocation2 + $0x30] sm:$0xff] %vm850_vm2, %v671_v10  ;;  %858 = vst.msk [vmem:[#allocation2 + $0x38] sm:$0xff] %vm850_vm2, %v673_v55 }
 0x102   :  { %1044 = vrot.lane.b32.xlu0 %v5204_v13, %s5118_s25  ;;  %1046 = vrot.lane.b32.xlu1 %v5222_v17, %s5118_s25 }
 0x104   :  { %v675_v28 = vpop.permute.xlu0 %674  ;;  %v677_v29 = vpop.permute.xlu1 %676 }
 0x105   :  { %859 = vst.msk [vmem:[#allocation2 + $0x40] sm:$0xff] %vm850_vm2, %v675_v28  ;;  %860 = vst.msk [vmem:[#allocation2 + $0x48] sm:$0xff] %vm850_vm2, %v677_v29 }
 0x106   :  { %1048 = vrot.lane.b32.xlu0 %v5229_v18, %s5118_s25  ;;  %1050 = vrot.lane.b32.xlu1 %v5234_v19, %s5118_s25 }
 0x108   :  { %v679_v11 = vpop.permute.xlu0 %678  ;;  %v681_v54 = vpop.permute.xlu1 %680 }
 0x109   :  { %861 = vst.msk [vmem:[#allocation2 + $0x50] sm:$0xff] %vm850_vm2, %v679_v11  ;;  %862 = vst.msk [vmem:[#allocation2 + $0x58] sm:$0xff] %vm850_vm2, %v681_v54  ;;  %v4464_v11 = vld [vmem:[%s9095_s0 + $0x330] sm:$0xff]  ;;  %v4465_v54 = vld [vmem:[%s9095_s0 + $0x338] sm:$0xff] }
 0x10a   :  { %1052 = vrot.lane.b32.xlu0 %v5245_v20, %s5118_s25  ;;  %1054 = vrot.lane.b32.xlu1 %v5258_v23, %s5118_s25 }
 0x10c   :  { %v683_v13 = vpop.permute.xlu0 %682  ;;  %v685_v17 = vpop.permute.xlu1 %684 }
 0x10d   :  { %863 = vst.msk [vmem:[#allocation2 + $0x60] sm:$0xff] %vm850_vm2, %v683_v13  ;;  %864 = vst.msk [vmem:[#allocation2 + $0x68] sm:$0xff] %vm850_vm2, %v685_v17 }
 0x10e   :  { %1056 = vrot.lane.b32.xlu0 %v5265_v24, %s5118_s25  ;;  %1058 = vrot.lane.b32.xlu1 %v5270_v25, %s5118_s25 }
 0x110   :  { %v687_v18 = vpop.permute.xlu0 %686  ;;  %v689_v19 = vpop.permute.xlu1 %688 }
 0x111   :  { %865 = vst.msk [vmem:[#allocation2 + $0x70] sm:$0xff] %vm850_vm2, %v687_v18  ;;  %866 = vst.msk [vmem:[#allocation2 + $0x78] sm:$0xff] %vm850_vm2, %v689_v19  ;;  %v4466_v18 = vld [vmem:[%s9095_s0 + $0x19] sm:$0xff]  ;;  %v4467_v19 = vld [vmem:[%s9095_s0 + $0x21] sm:$0xff] }
 0x112   :  { %1060 = vrot.lane.b32.xlu0 %v5279_v26, %s5118_s25  ;;  %1062 = vrot.lane.b32.xlu1 %v5284_v27, %s5118_s25 }
 0x114   :  { %v691_v20 = vpop.permute.xlu0 %690  ;;  %v693_v23 = vpop.permute.xlu1 %692 }
 0x115   :  { %867 = vst.msk [vmem:[#allocation2 + $0x80] sm:$0xff] %vm850_vm2, %v691_v20  ;;  %868 = vst.msk [vmem:[#allocation2 + $0x88] sm:$0xff] %vm850_vm2, %v693_v23 }
 0x116   :  { %1064 = vrot.lane.b32.xlu0 %v5301_v30, %s5118_s25  ;;  %1066 = vrot.lane.b32.xlu1 %v5306_v31, %s5118_s25 }
 0x118   :  { %v695_v24 = vpop.permute.xlu0 %694  ;;  %v697_v25 = vpop.permute.xlu1 %696 }
 0x119   :  { %869 = vst.msk [vmem:[#allocation2 + $0x90] sm:$0xff] %vm850_vm2, %v695_v24  ;;  %870 = vst.msk [vmem:[#allocation2 + $0x98] sm:$0xff] %vm850_vm2, %v697_v25  ;;  %v6381_v24 = vld [vmem:[%s9095_s0 + $0x31] sm:$0xff]  ;;  %v6386_v25 = vld [vmem:[%s9095_s0 + $0x39] sm:$0xff] }
 0x11a   :  { %1068 = vrot.lane.b32.xlu0 %v5315_v32, %s5118_s25  ;;  %1070 = vrot.lane.b32.xlu1 %v5320_v33, %s5118_s25 }
 0x11c   :  { %v699_v26 = vpop.permute.xlu0 %698  ;;  %v701_v27 = vpop.permute.xlu1 %700 }
 0x11d   :  { %871 = vst.msk [vmem:[#allocation2 + $0xa0] sm:$0xff] %vm850_vm2, %v699_v26  ;;  %872 = vst.msk [vmem:[#allocation2 + $0xa8] sm:$0xff] %vm850_vm2, %v701_v27 }
 0x11e   :  { %1072 = vrot.lane.b32.xlu0 %v5329_v34, %s5118_s25  ;;  %1074 = vrot.lane.b32.xlu1 %v5341_v36, %s5118_s25 }
 0x120   :  { %v703_v30 = vpop.permute.xlu0 %702  ;;  %v705_v31 = vpop.permute.xlu1 %704 }
 0x121   :  { %873 = vst.msk [vmem:[#allocation2 + $0xb0] sm:$0xff] %vm850_vm2, %v703_v30  ;;  %874 = vst.msk [vmem:[#allocation2 + $0xb8] sm:$0xff] %vm850_vm2, %v705_v31  ;;  %v6397_v30 = vld [vmem:[%s9095_s0 + $0x49] sm:$0xff]  ;;  %v6402_v31 = vld [vmem:[%s9095_s0 + $0x51] sm:$0xff] }
 0x122   :  { %1076 = vrot.lane.b32.xlu0 %v5351_v38, %s5118_s25  ;;  %1078 = vrot.lane.b32.xlu1 %v5356_v39, %s5118_s25 }
 0x124   :  { %v707_v32 = vpop.permute.xlu0 %706  ;;  %v709_v33 = vpop.permute.xlu1 %708 }
 0x125   :  { %875 = vst.msk [vmem:[#allocation2 + $0xc0] sm:$0xff] %vm850_vm2, %v707_v32  ;;  %876 = vst.msk [vmem:[#allocation2 + $0xc8] sm:$0xff] %vm850_vm2, %v709_v33 }
 0x126   :  { %1080 = vrot.lane.b32.xlu0 %v5365_v40, %s5118_s25  ;;  %1082 = vrot.lane.b32.xlu1 %v5372_v41, %s5118_s25 }
 0x128   :  { %v711_v34 = vpop.permute.xlu0 %710  ;;  %v713_v36 = vpop.permute.xlu1 %712 }
 0x129   :  { %877 = vst.msk [vmem:[#allocation2 + $0xd0] sm:$0xff] %vm850_vm2, %v711_v34  ;;  %878 = vst.msk [vmem:[#allocation2 + $0xd8] sm:$0xff] %vm850_vm2, %v713_v36  ;;  %v6413_v34 = vld [vmem:[%s9095_s0 + $0x61] sm:$0xff]  ;;  %v6418_v36 = vld [vmem:[%s9095_s0 + $0x69] sm:$0xff] }
 0x12a   :  { %1084 = vrot.lane.b32.xlu0 %v5381_v42, %s5118_s25  ;;  %1086 = vrot.lane.b32.xlu1 %v5386_v43, %s5118_s25 }
 0x12c   :  { %v715_v38 = vpop.permute.xlu0 %714  ;;  %v717_v39 = vpop.permute.xlu1 %716 }
 0x12d   :  { %879 = vst.msk [vmem:[#allocation2 + $0xe0] sm:$0xff] %vm850_vm2, %v715_v38  ;;  %880 = vst.msk [vmem:[#allocation2 + $0xe8] sm:$0xff] %vm850_vm2, %v717_v39 }
 0x12e   :  { %1088 = vrot.lane.b32.xlu0 %v5401_v46, %s5118_s25  ;;  %1090 = vrot.lane.b32.xlu1 %v5408_v47, %s5118_s25 }
 0x130   :  { %v719_v40 = vpop.permute.xlu0 %718  ;;  %v721_v41 = vpop.permute.xlu1 %720 }
 0x131   :  { %881 = vst.msk [vmem:[#allocation2 + $0xf0] sm:$0xff] %vm850_vm2, %v719_v40  ;;  %882 = vst.msk [vmem:[#allocation2 + $0xf8] sm:$0xff] %vm850_vm2, %v721_v41  ;;  %v6429_v40 = vld [vmem:[%s9095_s0 + $0x79] sm:$0xff]  ;;  %v6434_v41 = vld [vmem:[%s9095_s0 + $0x81] sm:$0xff] }
 0x132   :  { %1092 = vrot.lane.b32.xlu0 %v5415_v48, %s5118_s25  ;;  %1094 = vrot.lane.b32.xlu1 %v5420_v49, %s5118_s25  ;;  %v4432_v48 = vld [vmem:[%s9095_s0 + $0x180] sm:$0xff]  ;;  %v4433_v49 = vld [vmem:[%s9095_s0 + $0x188] sm:$0xff] }
 0x134   :  { %v723_v42 = vpop.permute.xlu0 %722  ;;  %v725_v43 = vpop.permute.xlu1 %724 }
 0x135   :  { %883 = vst.msk [vmem:[#allocation2 + $0x100] sm:$0xff] %vm850_vm2, %v723_v42  ;;  %884 = vst.msk [vmem:[#allocation2 + $0x108] sm:$0xff] %vm850_vm2, %v725_v43 }
 0x136   :  { %1096 = vrot.lane.b32.xlu0 %v5437_v52, %s5118_s25  ;;  %1098 = vrot.lane.b32.xlu1 %v5444_v53, %s5118_s25 }
 0x138   :  { %v727_v46 = vpop.permute.xlu0 %726  ;;  %v729_v47 = vpop.permute.xlu1 %728 }
 0x139   :  { %885 = vst.msk [vmem:[#allocation2 + $0x110] sm:$0xff] %vm850_vm2, %v727_v46  ;;  %886 = vst.msk [vmem:[#allocation2 + $0x118] sm:$0xff] %vm850_vm2, %v729_v47  ;;  %v6445_v46 = vld [vmem:[%s9095_s0 + $0x91] sm:$0xff]  ;;  %v6450_v47 = vld [vmem:[%s9095_s0 + $0x99] sm:$0xff] }
 0x13a   :  { %1100 = vrot.lane.b32.xlu0 %v5459_v56, %s5118_s25  ;;  %1102 = vrot.lane.b32.xlu1 %v5466_v57, %s5118_s25 }
 0x13c   :  { %v731_v52 = vpop.permute.xlu0 %730  ;;  %v733_v53 = vpop.permute.xlu1 %732 }
 0x13d   :  { %887 = vst.msk [vmem:[#allocation2 + $0x120] sm:$0xff] %vm850_vm2, %v731_v52  ;;  %888 = vst.msk [vmem:[#allocation2 + $0x128] sm:$0xff] %vm850_vm2, %v733_v53  ;;  %v4478_v52 = vld [vmem:[%s9095_s0 + $0xa9] sm:$0xff]  ;;  %v4479_v53 = vld [vmem:[%s9095_s0 + $0xb1] sm:$0xff] }
 0x13e   :  { %1104 = vrot.lane.b32.xlu0 %v4432_v48, %s5118_s25  ;;  %1106 = vrot.lane.b32.xlu1 %v4433_v49, %s5118_s25 }
 0x140   :  { %v735_v56 = vpop.permute.xlu0 %734  ;;  %v737_v57 = vpop.permute.xlu1 %736 }
 0x141   :  { %889 = vst.msk [vmem:[#allocation2 + $0x130] sm:$0xff] %vm850_vm2, %v735_v56  ;;  %890 = vst.msk [vmem:[#allocation2 + $0x138] sm:$0xff] %vm850_vm2, %v737_v57 }
 0x142   :  { %1108 = vrot.lane.b32.xlu0 %v5497_v0, %s5118_s25  ;;  %1110 = vrot.lane.b32.xlu1 %v5504_v1, %s5118_s25 }
 0x144   :  { %v739_v2 = vpop.permute.xlu0 %738  ;;  %v741_v3 = vpop.permute.xlu1 %740 }
 0x145   :  { %891 = vst.msk [vmem:[#allocation2 + $0x140] sm:$0xff] %vm850_vm2, %v739_v2  ;;  %892 = vst.msk [vmem:[#allocation2 + $0x148] sm:$0xff] %vm850_vm2, %v741_v3  ;;  %v4480_v2 = vld [vmem:[%s9095_s0 + $0xc1] sm:$0xff]  ;;  %v4481_v3 = vld [vmem:[%s9095_s0 + $0xc9] sm:$0xff] }
 0x146   :  { %1112 = vrot.lane.b32.xlu0 %v5519_v4, %s5118_s25  ;;  %1114 = vrot.lane.b32.xlu1 %v5526_v5, %s5118_s25 }
 0x148   :  { %v743_v10 = vpop.permute.xlu0 %742  ;;  %v745_v55 = vpop.permute.xlu1 %744 }
 0x149   :  { %893 = vst.msk [vmem:[#allocation2 + $0x150] sm:$0xff] %vm850_vm2, %v743_v10  ;;  %894 = vst.msk [vmem:[#allocation2 + $0x158] sm:$0xff] %vm850_vm2, %v745_v55 }
 0x14a   :  { %1116 = vrot.lane.b32.xlu0 %v5541_v8, %s5118_s25  ;;  %1118 = vrot.lane.b32.xlu1 %v5548_v9, %s5118_s25 }
 0x14c   :  { %v747_v0 = vpop.permute.xlu0 %746  ;;  %v749_v1 = vpop.permute.xlu1 %748 }
 0x14d   :  { %895 = vst.msk [vmem:[#allocation2 + $0x160] sm:$0xff] %vm850_vm2, %v747_v0  ;;  %896 = vst.msk [vmem:[#allocation2 + $0x168] sm:$0xff] %vm850_vm2, %v749_v1  ;;  %v4482_v0 = vld [vmem:[%s9095_s0 + $0xd9] sm:$0xff]  ;;  %v4483_v1 = vld [vmem:[%s9095_s0 + $0xe1] sm:$0xff] }
 0x14e   :  { %1120 = vrot.lane.b32.xlu0 %v5563_v12, %s5118_s25  ;;  %1122 = vrot.lane.b32.xlu1 %v5570_v14, %s5118_s25 }
 0x150   :  { %v751_v4 = vpop.permute.xlu0 %750  ;;  %v753_v5 = vpop.permute.xlu1 %752 }
 0x151   :  { %897 = vst.msk [vmem:[#allocation2 + $0x170] sm:$0xff] %vm850_vm2, %v751_v4  ;;  %898 = vst.msk [vmem:[#allocation2 + $0x178] sm:$0xff] %vm850_vm2, %v753_v5 }
 0x152   :  { %1124 = vrot.lane.b32.xlu0 %v5585_v21, %s5118_s25  ;;  %1126 = vrot.lane.b32.xlu1 %v5592_v22, %s5118_s25 }
 0x154   :  { %v755_v8 = vpop.permute.xlu0 %754  ;;  %v757_v9 = vpop.permute.xlu1 %756 }
 0x155   :  { %899 = vst.msk [vmem:[#allocation2 + $0x180] sm:$0xff] %vm850_vm2, %v755_v8  ;;  %900 = vst.msk [vmem:[#allocation2 + $0x188] sm:$0xff] %vm850_vm2, %v757_v9  ;;  %v4484_v8 = vld [vmem:[%s9095_s0 + $0xf1] sm:$0xff]  ;;  %v4485_v9 = vld [vmem:[%s9095_s0 + $0xf9] sm:$0xff] }
 0x156   :  { %1128 = vrot.lane.b32.xlu0 %v5607_v35, %s5118_s25  ;;  %1130 = vrot.lane.b32.xlu1 %v5614_v37, %s5118_s25 }
 0x158   :  { %v759_v12 = vpop.permute.xlu0 %758  ;;  %v761_v14 = vpop.permute.xlu1 %760 }
 0x159   :  { %901 = vst.msk [vmem:[#allocation2 + $0x190] sm:$0xff] %vm850_vm2, %v759_v12  ;;  %902 = vst.msk [vmem:[#allocation2 + $0x198] sm:$0xff] %vm850_vm2, %v761_v14 }
 0x15a   :  { %1132 = vrot.lane.b32.xlu0 %v5629_v50, %s5118_s25  ;;  %1134 = vrot.lane.b32.xlu1 %v5636_v51, %s5118_s25 }
 0x15c   :  { %v763_v21 = vpop.permute.xlu0 %762  ;;  %v765_v22 = vpop.permute.xlu1 %764 }
 0x15d   :  { %903 = vst.msk [vmem:[#allocation2 + $0x1a0] sm:$0xff] %vm850_vm2, %v763_v21  ;;  %904 = vst.msk [vmem:[#allocation2 + $0x1a8] sm:$0xff] %vm850_vm2, %v765_v22  ;;  %v4486_v21 = vld [vmem:[%s9095_s0 + $0x109] sm:$0xff]  ;;  %v4487_v22 = vld [vmem:[%s9095_s0 + $0x111] sm:$0xff] }
 0x15e   :  { %1136 = vrot.lane.b32.xlu0 %v5651_v58, %s5118_s25  ;;  %1138 = vrot.lane.b32.xlu1 %v5658_v59, %s5118_s25 }
 0x160   :  { %v767_v35 = vpop.permute.xlu0 %766  ;;  %v769_v37 = vpop.permute.xlu1 %768 }
 0x161   :  { %905 = vst.msk [vmem:[#allocation2 + $0x1b0] sm:$0xff] %vm850_vm2, %v767_v35  ;;  %906 = vst.msk [vmem:[#allocation2 + $0x1b8] sm:$0xff] %vm850_vm2, %v769_v37 }
 0x162   :  { %1140 = vrot.lane.b32.xlu0 %v5673_v62, %s5118_s25  ;;  %1142 = vrot.lane.b32.xlu1 %v5680_v63, %s5118_s25 }
 0x164   :  { %v771_v50 = vpop.permute.xlu0 %770  ;;  %v773_v51 = vpop.permute.xlu1 %772 }
 0x165   :  { %907 = vst.msk [vmem:[#allocation2 + $0x1c0] sm:$0xff] %vm850_vm2, %v771_v50  ;;  %908 = vst.msk [vmem:[#allocation2 + $0x1c8] sm:$0xff] %vm850_vm2, %v773_v51  ;;  %v4488_v50 = vld [vmem:[%s9095_s0 + $0x121] sm:$0xff]  ;;  %v4489_v51 = vld [vmem:[%s9095_s0 + $0x129] sm:$0xff] }
 0x166   :  { %1144 = vrot.lane.b32.xlu0 %v5695_v6, %s5118_s25  ;;  %1146 = vrot.lane.b32.xlu1 %v5702_v7, %s5118_s25 }
 0x168   :  { %v775_v58 = vpop.permute.xlu0 %774  ;;  %v777_v59 = vpop.permute.xlu1 %776 }
 0x169   :  { %909 = vst.msk [vmem:[#allocation2 + $0x1d0] sm:$0xff] %vm850_vm2, %v775_v58  ;;  %910 = vst.msk [vmem:[#allocation2 + $0x1d8] sm:$0xff] %vm850_vm2, %v777_v59 }
 0x16a   :  { %1148 = vrot.lane.b32.xlu0 %v5717_v15, %s5118_s25  ;;  %1150 = vrot.lane.b32.xlu1 %v5724_v16, %s5118_s25 }
 0x16c   :  { %v779_v62 = vpop.permute.xlu0 %778  ;;  %v781_v63 = vpop.permute.xlu1 %780 }
 0x16d   :  { %911 = vst.msk [vmem:[#allocation2 + $0x1e0] sm:$0xff] %vm850_vm2, %v779_v62  ;;  %912 = vst.msk [vmem:[#allocation2 + $0x1e8] sm:$0xff] %vm850_vm2, %v781_v63  ;;  %v4490_v62 = vld [vmem:[%s9095_s0 + $0x139] sm:$0xff]  ;;  %v4491_v63 = vld [vmem:[%s9095_s0 + $0x141] sm:$0xff] }
 0x16e   :  { %1152 = vrot.lane.b32.xlu0 %v5739_v44, %s5118_s25  ;;  %1154 = vrot.lane.b32.xlu1 %v5746_v45, %s5118_s25  ;;  %v9108_v44 = vld [vmem:[#allocation3_spill] sm:$0xff]  ;;  %v9109_v45 = vld [vmem:[#allocation4_spill] sm:$0xff] }
 0x170   :  { %v783_v6 = vpop.permute.xlu0 %782  ;;  %v785_v7 = vpop.permute.xlu1 %784 }
 0x171   :  { %913 = vst.msk [vmem:[#allocation2 + $0x1f0] sm:$0xff] %vm850_vm2, %v783_v6  ;;  %914 = vst.msk [vmem:[#allocation2 + $0x1f8] sm:$0xff] %vm850_vm2, %v785_v7 }
 0x172   :  { %1156 = vrot.lane.b32.xlu0 %v5761_v60, %s5118_s25  ;;  %1158 = vrot.lane.b32.xlu1 %v5768_v61, %s5118_s25  ;;  %v9110_v60 = vld [vmem:[#allocation5_spill] sm:$0xff]  ;;  %v9111_v61 = vld [vmem:[#allocation6_spill] sm:$0xff] }
 0x174   :  { %v1045_v15 = vpop.permute.xlu0 %1044  ;;  %v1047_v16 = vpop.permute.xlu1 %1046 }
 0x175   :  { %1237 = vst.msk [vmem:[#allocation2] sm:$0xff] %vm1236_vm3, %v1045_v15  ;;  %1238 = vst.msk [vmem:[#allocation2 + $0x8] sm:$0xff] %vm1236_vm3, %v1047_v16  ;;  %v4492_v15 = vld [vmem:[%s9095_s0 + $0x151] sm:$0xff]  ;;  %v4493_v16 = vld [vmem:[%s9095_s0 + $0x159] sm:$0xff] }
 0x176   :  { %1160 = vrot.lane.b32.xlu0 %v9108_v44, %s5118_s25  ;;  %1162 = vrot.lane.b32.xlu1 %v9109_v45, %s5118_s25 }
 0x178   :  { %v1049_v28 = vpop.permute.xlu0 %1048  ;;  %v1051_v29 = vpop.permute.xlu1 %1050 }
 0x179   :  { %1239 = vst.msk [vmem:[#allocation2 + $0x10] sm:$0xff] %vm1236_vm3, %v1049_v28  ;;  %1240 = vst.msk [vmem:[#allocation2 + $0x18] sm:$0xff] %vm1236_vm3, %v1051_v29  ;;  %v4494_v28 = vld [vmem:[%s9095_s0 + $0x169] sm:$0xff]  ;;  %v4495_v29 = vld [vmem:[%s9095_s0 + $0x171] sm:$0xff] }
 0x17a   :  { %1164 = vrot.lane.b32.xlu0 %v9110_v60, %s5118_s25  ;;  %1166 = vrot.lane.b32.xlu1 %v9111_v61, %s5118_s25 }
 0x17c   :  { %v1053_v13 = vpop.permute.xlu0 %1052  ;;  %v1055_v17 = vpop.permute.xlu1 %1054 }
 0x17d   :  { %1241 = vst.msk [vmem:[#allocation2 + $0x20] sm:$0xff] %vm1236_vm3, %v1053_v13  ;;  %1242 = vst.msk [vmem:[#allocation2 + $0x28] sm:$0xff] %vm1236_vm3, %v1055_v17 }
 0x17e   :  { %1168 = vrot.lane.b32.xlu0 %v4464_v11, %s5118_s25  ;;  %1170 = vrot.lane.b32.xlu1 %v4465_v54, %s5118_s25  ;;  %v4496_v11 = vld [vmem:[%s9095_s0 + $0x181] sm:$0xff]  ;;  %v4497_v54 = vld [vmem:[%s9095_s0 + $0x189] sm:$0xff] }
 0x180   :  { %v1057_v20 = vpop.permute.xlu0 %1056  ;;  %v1059_v23 = vpop.permute.xlu1 %1058 }
 0x181   :  { %1243 = vst.msk [vmem:[#allocation2 + $0x30] sm:$0xff] %vm1236_vm3, %v1057_v20  ;;  %1244 = vst.msk [vmem:[#allocation2 + $0x38] sm:$0xff] %vm1236_vm3, %v1059_v23 }
 0x182   :  { %1429 = vrot.lane.b32.xlu0 %v4466_v18, %s5119_s11  ;;  %1431 = vrot.lane.b32.xlu1 %v4467_v19, %s5119_s11  ;;  %v4498_v18 = vld [vmem:[%s9095_s0 + $0x1c9] sm:$0xff]  ;;  %v4499_v19 = vld [vmem:[%s9095_s0 + $0x1d1] sm:$0xff] }
 0x184   :  { %v1061_v26 = vpop.permute.xlu0 %1060  ;;  %v1063_v27 = vpop.permute.xlu1 %1062 }
 0x185   :  { %1245 = vst.msk [vmem:[#allocation2 + $0x40] sm:$0xff] %vm1236_vm3, %v1061_v26  ;;  %1246 = vst.msk [vmem:[#allocation2 + $0x48] sm:$0xff] %vm1236_vm3, %v1063_v27  ;;  %v4500_v26 = vld [vmem:[%s9095_s0 + $0x1e1] sm:$0xff]  ;;  %v4501_v27 = vld [vmem:[%s9095_s0 + $0x1e9] sm:$0xff] }
 0x186   :  { %1433 = vrot.lane.b32.xlu0 %v6381_v24, %s5119_s11  ;;  %1435 = vrot.lane.b32.xlu1 %v6386_v25, %s5119_s11 }
 0x188   :  { %v1065_v32 = vpop.permute.xlu0 %1064  ;;  %v1067_v33 = vpop.permute.xlu1 %1066 }
 0x189   :  { %1247 = vst.msk [vmem:[#allocation2 + $0x50] sm:$0xff] %vm1236_vm3, %v1065_v32  ;;  %1248 = vst.msk [vmem:[#allocation2 + $0x58] sm:$0xff] %vm1236_vm3, %v1067_v33 }
 0x18a   :  { %1437 = vrot.lane.b32.xlu0 %v6397_v30, %s5119_s11  ;;  %1439 = vrot.lane.b32.xlu1 %v6402_v31, %s5119_s11 }
 0x18c   :  { %v1069_v38 = vpop.permute.xlu0 %1068  ;;  %v1071_v39 = vpop.permute.xlu1 %1070 }
 0x18d   :  { %1249 = vst.msk [vmem:[#allocation2 + $0x60] sm:$0xff] %vm1236_vm3, %v1069_v38  ;;  %1250 = vst.msk [vmem:[#allocation2 + $0x68] sm:$0xff] %vm1236_vm3, %v1071_v39  ;;  %v4502_v38 = vld [vmem:[%s9095_s0 + $0x1f9] sm:$0xff]  ;;  %v4503_v39 = vld [vmem:[%s9095_s0 + $0x201] sm:$0xff] }
 0x18e   :  { %1441 = vrot.lane.b32.xlu0 %v6413_v34, %s5119_s11  ;;  %1443 = vrot.lane.b32.xlu1 %v6418_v36, %s5119_s11 }
 0x190   :  { %v1073_v42 = vpop.permute.xlu0 %1072  ;;  %v1075_v43 = vpop.permute.xlu1 %1074 }
 0x191   :  { %1251 = vst.msk [vmem:[#allocation2 + $0x70] sm:$0xff] %vm1236_vm3, %v1073_v42  ;;  %1252 = vst.msk [vmem:[#allocation2 + $0x78] sm:$0xff] %vm1236_vm3, %v1075_v43 }
 0x192   :  { %1445 = vrot.lane.b32.xlu0 %v6429_v40, %s5119_s11  ;;  %1447 = vrot.lane.b32.xlu1 %v6434_v41, %s5119_s11 }
 0x194   :  { %v1077_v48 = vpop.permute.xlu0 %1076  ;;  %v1079_v49 = vpop.permute.xlu1 %1078 }
 0x195   :  { %1253 = vst.msk [vmem:[#allocation2 + $0x80] sm:$0xff] %vm1236_vm3, %v1077_v48  ;;  %1254 = vst.msk [vmem:[#allocation2 + $0x88] sm:$0xff] %vm1236_vm3, %v1079_v49  ;;  %v4504_v48 = vld [vmem:[%s9095_s0 + $0x211] sm:$0xff]  ;;  %v4505_v49 = vld [vmem:[%s9095_s0 + $0x219] sm:$0xff] }
 0x196   :  { %1449 = vrot.lane.b32.xlu0 %v6445_v46, %s5119_s11  ;;  %1451 = vrot.lane.b32.xlu1 %v6450_v47, %s5119_s11 }
 0x198   :  { %v1081_v56 = vpop.permute.xlu0 %1080  ;;  %v1083_v57 = vpop.permute.xlu1 %1082 }
 0x199   :  { %1255 = vst.msk [vmem:[#allocation2 + $0x90] sm:$0xff] %vm1236_vm3, %v1081_v56  ;;  %1256 = vst.msk [vmem:[#allocation2 + $0x98] sm:$0xff] %vm1236_vm3, %v1083_v57  ;;  %v4506_v56 = vld [vmem:[%s9095_s0 + $0x229] sm:$0xff]  ;;  %v4507_v57 = vld [vmem:[%s9095_s0 + $0x231] sm:$0xff] }
 0x19a   :  { %1453 = vrot.lane.b32.xlu0 %v4478_v52, %s5119_s11  ;;  %1455 = vrot.lane.b32.xlu1 %v4479_v53, %s5119_s11 }
 0x19c   :  { %v1085_v10 = vpop.permute.xlu0 %1084  ;;  %v1087_v55 = vpop.permute.xlu1 %1086 }
 0x19d   :  { %1257 = vst.msk [vmem:[#allocation2 + $0xa0] sm:$0xff] %vm1236_vm3, %v1085_v10  ;;  %1258 = vst.msk [vmem:[#allocation2 + $0xa8] sm:$0xff] %vm1236_vm3, %v1087_v55  ;;  %v4508_v10 = vld [vmem:[%s9095_s0 + $0x241] sm:$0xff]  ;;  %v4509_v55 = vld [vmem:[%s9095_s0 + $0x249] sm:$0xff] }
 0x19e   :  { %1457 = vrot.lane.b32.xlu0 %v4480_v2, %s5119_s11  ;;  %1459 = vrot.lane.b32.xlu1 %v4481_v3, %s5119_s11 }
 0x1a0   :  { %v1089_v4 = vpop.permute.xlu0 %1088  ;;  %v1091_v5 = vpop.permute.xlu1 %1090 }
 0x1a1   :  { %1259 = vst.msk [vmem:[#allocation2 + $0xb0] sm:$0xff] %vm1236_vm3, %v1089_v4  ;;  %1260 = vst.msk [vmem:[#allocation2 + $0xb8] sm:$0xff] %vm1236_vm3, %v1091_v5  ;;  %v4510_v4 = vld [vmem:[%s9095_s0 + $0x259] sm:$0xff]  ;;  %v4511_v5 = vld [vmem:[%s9095_s0 + $0x261] sm:$0xff] }
 0x1a2   :  { %1461 = vrot.lane.b32.xlu0 %v4482_v0, %s5119_s11  ;;  %1463 = vrot.lane.b32.xlu1 %v4483_v1, %s5119_s11 }
 0x1a4   :  { %v1093_v12 = vpop.permute.xlu0 %1092  ;;  %v1095_v14 = vpop.permute.xlu1 %1094 }
 0x1a5   :  { %1261 = vst.msk [vmem:[#allocation2 + $0xc0] sm:$0xff] %vm1236_vm3, %v1093_v12  ;;  %1262 = vst.msk [vmem:[#allocation2 + $0xc8] sm:$0xff] %vm1236_vm3, %v1095_v14  ;;  %v4512_v12 = vld [vmem:[%s9095_s0 + $0x271] sm:$0xff]  ;;  %v4513_v14 = vld [vmem:[%s9095_s0 + $0x279] sm:$0xff] }
 0x1a6   :  { %1465 = vrot.lane.b32.xlu0 %v4484_v8, %s5119_s11  ;;  %1467 = vrot.lane.b32.xlu1 %v4485_v9, %s5119_s11 }
 0x1a8   :  { %v1097_v35 = vpop.permute.xlu0 %1096  ;;  %v1099_v37 = vpop.permute.xlu1 %1098 }
 0x1a9   :  { %1263 = vst.msk [vmem:[#allocation2 + $0xd0] sm:$0xff] %vm1236_vm3, %v1097_v35  ;;  %1264 = vst.msk [vmem:[#allocation2 + $0xd8] sm:$0xff] %vm1236_vm3, %v1099_v37  ;;  %v4514_v35 = vld [vmem:[%s9095_s0 + $0x289] sm:$0xff]  ;;  %v4515_v37 = vld [vmem:[%s9095_s0 + $0x291] sm:$0xff] }
 0x1aa   :  { %1469 = vrot.lane.b32.xlu0 %v4486_v21, %s5119_s11  ;;  %1471 = vrot.lane.b32.xlu1 %v4487_v22, %s5119_s11 }
 0x1ac   :  { %v1101_v58 = vpop.permute.xlu0 %1100  ;;  %v1103_v59 = vpop.permute.xlu1 %1102 }
 0x1ad   :  { %1265 = vst.msk [vmem:[#allocation2 + $0xe0] sm:$0xff] %vm1236_vm3, %v1101_v58  ;;  %1266 = vst.msk [vmem:[#allocation2 + $0xe8] sm:$0xff] %vm1236_vm3, %v1103_v59  ;;  %v4516_v58 = vld [vmem:[%s9095_s0 + $0x2a1] sm:$0xff]  ;;  %v4517_v59 = vld [vmem:[%s9095_s0 + $0x2a9] sm:$0xff] }
 0x1ae   :  { %1473 = vrot.lane.b32.xlu0 %v4488_v50, %s5119_s11  ;;  %1475 = vrot.lane.b32.xlu1 %v4489_v51, %s5119_s11 }
 0x1b0   :  { %v1105_v6 = vpop.permute.xlu0 %1104  ;;  %v1107_v7 = vpop.permute.xlu1 %1106 }
 0x1b1   :  { %1267 = vst.msk [vmem:[#allocation2 + $0xf0] sm:$0xff] %vm1236_vm3, %v1105_v6  ;;  %1268 = vst.msk [vmem:[#allocation2 + $0xf8] sm:$0xff] %vm1236_vm3, %v1107_v7  ;;  %v4518_v6 = vld [vmem:[%s9095_s0 + $0x2b9] sm:$0xff]  ;;  %v4519_v7 = vld [vmem:[%s9095_s0 + $0x2c1] sm:$0xff] }
 0x1b2   :  { %1477 = vrot.lane.b32.xlu0 %v4490_v62, %s5119_s11  ;;  %1479 = vrot.lane.b32.xlu1 %v4491_v63, %s5119_s11 }
 0x1b4   :  { %v1109_v44 = vpop.permute.xlu0 %1108  ;;  %v1111_v45 = vpop.permute.xlu1 %1110 }
 0x1b5   :  { %1269 = vst.msk [vmem:[#allocation2 + $0x100] sm:$0xff] %vm1236_vm3, %v1109_v44  ;;  %1270 = vst.msk [vmem:[#allocation2 + $0x108] sm:$0xff] %vm1236_vm3, %v1111_v45  ;;  %v4520_v44 = vld [vmem:[%s9095_s0 + $0x2d1] sm:$0xff]  ;;  %v4521_v45 = vld [vmem:[%s9095_s0 + $0x2d9] sm:$0xff] }
 0x1b6   :  { %1481 = vrot.lane.b32.xlu0 %v4492_v15, %s5119_s11  ;;  %1483 = vrot.lane.b32.xlu1 %v4493_v16, %s5119_s11 }
 0x1b8   :  { %v1113_v60 = vpop.permute.xlu0 %1112  ;;  %v1115_v61 = vpop.permute.xlu1 %1114 }
 0x1b9   :  { %1271 = vst.msk [vmem:[#allocation2 + $0x110] sm:$0xff] %vm1236_vm3, %v1113_v60  ;;  %1272 = vst.msk [vmem:[#allocation2 + $0x118] sm:$0xff] %vm1236_vm3, %v1115_v61  ;;  %v4522_v60 = vld [vmem:[%s9095_s0 + $0x2e9] sm:$0xff]  ;;  %v4523_v61 = vld [vmem:[%s9095_s0 + $0x2f1] sm:$0xff] }
 0x1ba   :  { %1485 = vrot.lane.b32.xlu0 %v4494_v28, %s5119_s11  ;;  %1487 = vrot.lane.b32.xlu1 %v4495_v29, %s5119_s11 }
 0x1bc   :  { %v1117_v13 = vpop.permute.xlu0 %1116  ;;  %v1119_v17 = vpop.permute.xlu1 %1118 }
 0x1bd   :  { %1273 = vst.msk [vmem:[#allocation2 + $0x120] sm:$0xff] %vm1236_vm3, %v1117_v13  ;;  %1274 = vst.msk [vmem:[#allocation2 + $0x128] sm:$0xff] %vm1236_vm3, %v1119_v17  ;;  %v4524_v13 = vld [vmem:[%s9095_s0 + $0x301] sm:$0xff]  ;;  %v4525_v17 = vld [vmem:[%s9095_s0 + $0x309] sm:$0xff] }
 0x1be   :  { %1489 = vrot.lane.b32.xlu0 %v4496_v11, %s5119_s11  ;;  %1491 = vrot.lane.b32.xlu1 %v4497_v54, %s5119_s11 }
 0x1c0   :  { %v1121_v20 = vpop.permute.xlu0 %1120  ;;  %v1123_v23 = vpop.permute.xlu1 %1122 }
 0x1c1   :  { %1275 = vst.msk [vmem:[#allocation2 + $0x130] sm:$0xff] %vm1236_vm3, %v1121_v20  ;;  %1276 = vst.msk [vmem:[#allocation2 + $0x138] sm:$0xff] %vm1236_vm3, %v1123_v23  ;;  %v4526_v20 = vld [vmem:[%s9095_s0 + $0x319] sm:$0xff]  ;;  %v4527_v23 = vld [vmem:[%s9095_s0 + $0x321] sm:$0xff] }
 0x1c2   :  { %1493 = vrot.lane.b32.xlu0 %v4498_v18, %s5119_s11  ;;  %1495 = vrot.lane.b32.xlu1 %v4499_v19, %s5119_s11 }
 0x1c4   :  { %v1125_v32 = vpop.permute.xlu0 %1124  ;;  %v1127_v33 = vpop.permute.xlu1 %1126 }
 0x1c5   :  { %1277 = vst.msk [vmem:[#allocation2 + $0x140] sm:$0xff] %vm1236_vm3, %v1125_v32  ;;  %1278 = vst.msk [vmem:[#allocation2 + $0x148] sm:$0xff] %vm1236_vm3, %v1127_v33  ;;  %v4528_v32 = vld [vmem:[%s9095_s0 + $0x331] sm:$0xff]  ;;  %v4529_v33 = vld [vmem:[%s9095_s0 + $0x339] sm:$0xff] }
 0x1c6   :  { %1497 = vrot.lane.b32.xlu0 %v4500_v26, %s5119_s11  ;;  %1499 = vrot.lane.b32.xlu1 %v4501_v27, %s5119_s11 }
 0x1c8   :  { %v1129_v42 = vpop.permute.xlu0 %1128  ;;  %v1131_v43 = vpop.permute.xlu1 %1130 }
 0x1c9   :  { %1279 = vst.msk [vmem:[#allocation2 + $0x150] sm:$0xff] %vm1236_vm3, %v1129_v42  ;;  %1280 = vst.msk [vmem:[#allocation2 + $0x158] sm:$0xff] %vm1236_vm3, %v1131_v43  ;;  %v4530_v42 = vld [vmem:[%s9095_s0 + $0x1a] sm:$0xff]  ;;  %v4531_v43 = vld [vmem:[%s9095_s0 + $0x22] sm:$0xff] }
 0x1ca   :  { %1501 = vrot.lane.b32.xlu0 %v4502_v38, %s5119_s11  ;;  %1503 = vrot.lane.b32.xlu1 %v4503_v39, %s5119_s11 }
 0x1cc   :  { %v1133_v52 = vpop.permute.xlu0 %1132  ;;  %v1135_v53 = vpop.permute.xlu1 %1134 }
 0x1cd   :  { %1281 = vst.msk [vmem:[#allocation2 + $0x160] sm:$0xff] %vm1236_vm3, %v1133_v52  ;;  %1282 = vst.msk [vmem:[#allocation2 + $0x168] sm:$0xff] %vm1236_vm3, %v1135_v53  ;;  %v6731_v52 = vld [vmem:[%s9095_s0 + $0x32] sm:$0xff]  ;;  %v6736_v53 = vld [vmem:[%s9095_s0 + $0x3a] sm:$0xff] }
 0x1ce   :  { %1505 = vrot.lane.b32.xlu0 %v4504_v48, %s5119_s11  ;;  %1507 = vrot.lane.b32.xlu1 %v4505_v49, %s5119_s11 }
 0x1d0   :  { %v1137_v2 = vpop.permute.xlu0 %1136  ;;  %v1139_v3 = vpop.permute.xlu1 %1138 }
 0x1d1   :  { %1283 = vst.msk [vmem:[#allocation2 + $0x170] sm:$0xff] %vm1236_vm3, %v1137_v2  ;;  %1284 = vst.msk [vmem:[#allocation2 + $0x178] sm:$0xff] %vm1236_vm3, %v1139_v3  ;;  %v6747_v2 = vld [vmem:[%s9095_s0 + $0x4a] sm:$0xff]  ;;  %v6752_v3 = vld [vmem:[%s9095_s0 + $0x52] sm:$0xff] }
 0x1d2   :  { %1509 = vrot.lane.b32.xlu0 %v4506_v56, %s5119_s11  ;;  %1511 = vrot.lane.b32.xlu1 %v4507_v57, %s5119_s11 }
 0x1d4   :  { %v1141_v0 = vpop.permute.xlu0 %1140  ;;  %v1143_v1 = vpop.permute.xlu1 %1142 }
 0x1d5   :  { %1285 = vst.msk [vmem:[#allocation2 + $0x180] sm:$0xff] %vm1236_vm3, %v1141_v0  ;;  %1286 = vst.msk [vmem:[#allocation2 + $0x188] sm:$0xff] %vm1236_vm3, %v1143_v1  ;;  %v6763_v0 = vld [vmem:[%s9095_s0 + $0x62] sm:$0xff]  ;;  %v6768_v1 = vld [vmem:[%s9095_s0 + $0x6a] sm:$0xff] }
 0x1d6   :  { %1513 = vrot.lane.b32.xlu0 %v4508_v10, %s5119_s11  ;;  %1515 = vrot.lane.b32.xlu1 %v4509_v55, %s5119_s11 }
 0x1d8   :  { %v1145_v8 = vpop.permute.xlu0 %1144  ;;  %v1147_v9 = vpop.permute.xlu1 %1146 }
 0x1d9   :  { %1287 = vst.msk [vmem:[#allocation2 + $0x190] sm:$0xff] %vm1236_vm3, %v1145_v8  ;;  %1288 = vst.msk [vmem:[#allocation2 + $0x198] sm:$0xff] %vm1236_vm3, %v1147_v9  ;;  %v6779_v8 = vld [vmem:[%s9095_s0 + $0x7a] sm:$0xff]  ;;  %v6784_v9 = vld [vmem:[%s9095_s0 + $0x82] sm:$0xff] }
 0x1da   :  { %1517 = vrot.lane.b32.xlu0 %v4510_v4, %s5119_s11  ;;  %1519 = vrot.lane.b32.xlu1 %v4511_v5, %s5119_s11 }
 0x1dc   :  { %v1149_v21 = vpop.permute.xlu0 %1148  ;;  %v1151_v22 = vpop.permute.xlu1 %1150 }
 0x1dd   :  { %1289 = vst.msk [vmem:[#allocation2 + $0x1a0] sm:$0xff] %vm1236_vm3, %v1149_v21  ;;  %1290 = vst.msk [vmem:[#allocation2 + $0x1a8] sm:$0xff] %vm1236_vm3, %v1151_v22  ;;  %v6795_v21 = vld [vmem:[%s9095_s0 + $0x92] sm:$0xff]  ;;  %v6800_v22 = vld [vmem:[%s9095_s0 + $0x9a] sm:$0xff] }
 0x1de   :  { %1521 = vrot.lane.b32.xlu0 %v4512_v12, %s5119_s11  ;;  %1523 = vrot.lane.b32.xlu1 %v4513_v14, %s5119_s11 }
 0x1e0   :  { %v1153_v50 = vpop.permute.xlu0 %1152  ;;  %v1155_v51 = vpop.permute.xlu1 %1154 }
 0x1e1   :  { %1291 = vst.msk [vmem:[#allocation2 + $0x1b0] sm:$0xff] %vm1236_vm3, %v1153_v50  ;;  %1292 = vst.msk [vmem:[#allocation2 + $0x1b8] sm:$0xff] %vm1236_vm3, %v1155_v51  ;;  %v6811_v50 = vld [vmem:[%s9095_s0 + $0xaa] sm:$0xff]  ;;  %v6816_v51 = vld [vmem:[%s9095_s0 + $0xb2] sm:$0xff] }
 0x1e2   :  { %1525 = vrot.lane.b32.xlu0 %v4514_v35, %s5119_s11  ;;  %1527 = vrot.lane.b32.xlu1 %v4515_v37, %s5119_s11 }
 0x1e4   :  { %v1157_v62 = vpop.permute.xlu0 %1156  ;;  %v1159_v63 = vpop.permute.xlu1 %1158 }
 0x1e5   :  { %1293 = vst.msk [vmem:[#allocation2 + $0x1c0] sm:$0xff] %vm1236_vm3, %v1157_v62  ;;  %1294 = vst.msk [vmem:[#allocation2 + $0x1c8] sm:$0xff] %vm1236_vm3, %v1159_v63  ;;  %v6827_v62 = vld [vmem:[%s9095_s0 + $0xc2] sm:$0xff]  ;;  %v6832_v63 = vld [vmem:[%s9095_s0 + $0xca] sm:$0xff] }
 0x1e6   :  { %1529 = vrot.lane.b32.xlu0 %v4516_v58, %s5119_s11  ;;  %1531 = vrot.lane.b32.xlu1 %v4517_v59, %s5119_s11 }
 0x1e8   :  { %v1161_v15 = vpop.permute.xlu0 %1160  ;;  %v1163_v16 = vpop.permute.xlu1 %1162 }
 0x1e9   :  { %1295 = vst.msk [vmem:[#allocation2 + $0x1d0] sm:$0xff] %vm1236_vm3, %v1161_v15  ;;  %1296 = vst.msk [vmem:[#allocation2 + $0x1d8] sm:$0xff] %vm1236_vm3, %v1163_v16  ;;  %v6843_v15 = vld [vmem:[%s9095_s0 + $0xda] sm:$0xff]  ;;  %v6848_v16 = vld [vmem:[%s9095_s0 + $0xe2] sm:$0xff] }
 0x1ea   :  { %1533 = vrot.lane.b32.xlu0 %v4518_v6, %s5119_s11  ;;  %1535 = vrot.lane.b32.xlu1 %v4519_v7, %s5119_s11 }
 0x1ec   :  { %v1165_v28 = vpop.permute.xlu0 %1164  ;;  %v1167_v29 = vpop.permute.xlu1 %1166 }
 0x1ed   :  { %1297 = vst.msk [vmem:[#allocation2 + $0x1e0] sm:$0xff] %vm1236_vm3, %v1165_v28  ;;  %1298 = vst.msk [vmem:[#allocation2 + $0x1e8] sm:$0xff] %vm1236_vm3, %v1167_v29  ;;  %v6859_v28 = vld [vmem:[%s9095_s0 + $0xf2] sm:$0xff]  ;;  %v6864_v29 = vld [vmem:[%s9095_s0 + $0xfa] sm:$0xff] }
 0x1ee   :  { %1537 = vrot.lane.b32.xlu0 %v4520_v44, %s5119_s11  ;;  %1539 = vrot.lane.b32.xlu1 %v4521_v45, %s5119_s11 }
 0x1f0   :  { %v1169_v11 = vpop.permute.xlu0 %1168  ;;  %v1171_v54 = vpop.permute.xlu1 %1170 }
 0x1f1   :  { %1299 = vst.msk [vmem:[#allocation2 + $0x1f0] sm:$0xff] %vm1236_vm3, %v1169_v11  ;;  %1300 = vst.msk [vmem:[#allocation2 + $0x1f8] sm:$0xff] %vm1236_vm3, %v1171_v54  ;;  %v6875_v11 = vld [vmem:[%s9095_s0 + $0x10a] sm:$0xff]  ;;  %v6880_v54 = vld [vmem:[%s9095_s0 + $0x112] sm:$0xff] }
 0x1f2   :  { %1541 = vrot.lane.b32.xlu0 %v4522_v60, %s5119_s11  ;;  %1543 = vrot.lane.b32.xlu1 %v4523_v61, %s5119_s11 }
 0x1f4   :  { %v1430_v18 = vpop.permute.xlu0 %1429  ;;  %v1432_v19 = vpop.permute.xlu1 %1431 }
 0x1f5   :  { %1622 = vst.msk [vmem:[#allocation2] sm:$0xff] %vm1621_vm4, %v1430_v18  ;;  %1623 = vst.msk [vmem:[#allocation2 + $0x8] sm:$0xff] %vm1621_vm4, %v1432_v19  ;;  %v6891_v18 = vld [vmem:[%s9095_s0 + $0x122] sm:$0xff]  ;;  %v6896_v19 = vld [vmem:[%s9095_s0 + $0x12a] sm:$0xff] }
 0x1f6   :  { %1545 = vrot.lane.b32.xlu0 %v4524_v13, %s5119_s11  ;;  %1547 = vrot.lane.b32.xlu1 %v4525_v17, %s5119_s11 }
 0x1f8   :  { %v1434_v26 = vpop.permute.xlu0 %1433  ;;  %v1436_v27 = vpop.permute.xlu1 %1435 }
 0x1f9   :  { %1624 = vst.msk [vmem:[#allocation2 + $0x10] sm:$0xff] %vm1621_vm4, %v1434_v26  ;;  %1625 = vst.msk [vmem:[#allocation2 + $0x18] sm:$0xff] %vm1621_vm4, %v1436_v27  ;;  %v6907_v26 = vld [vmem:[%s9095_s0 + $0x13a] sm:$0xff]  ;;  %v6912_v27 = vld [vmem:[%s9095_s0 + $0x142] sm:$0xff] }
 0x1fa   :  { %1549 = vrot.lane.b32.xlu0 %v4526_v20, %s5119_s11  ;;  %1551 = vrot.lane.b32.xlu1 %v4527_v23, %s5119_s11 }
 0x1fc   :  { %v1438_v38 = vpop.permute.xlu0 %1437  ;;  %v1440_v39 = vpop.permute.xlu1 %1439 }
 0x1fd   :  { %1626 = vst.msk [vmem:[#allocation2 + $0x20] sm:$0xff] %vm1621_vm4, %v1438_v38  ;;  %1627 = vst.msk [vmem:[#allocation2 + $0x28] sm:$0xff] %vm1621_vm4, %v1440_v39  ;;  %v6923_v38 = vld [vmem:[%s9095_s0 + $0x152] sm:$0xff]  ;;  %v6928_v39 = vld [vmem:[%s9095_s0 + $0x15a] sm:$0xff] }
 0x1fe   :  { %1553 = vrot.lane.b32.xlu0 %v4528_v32, %s5119_s11  ;;  %1555 = vrot.lane.b32.xlu1 %v4529_v33, %s5119_s11 }
 0x200   :  { %v1442_v48 = vpop.permute.xlu0 %1441  ;;  %v1444_v49 = vpop.permute.xlu1 %1443 }
 0x201   :  { %1628 = vst.msk [vmem:[#allocation2 + $0x30] sm:$0xff] %vm1621_vm4, %v1442_v48  ;;  %1629 = vst.msk [vmem:[#allocation2 + $0x38] sm:$0xff] %vm1621_vm4, %v1444_v49  ;;  %v6939_v48 = vld [vmem:[%s9095_s0 + $0x16a] sm:$0xff]  ;;  %v6944_v49 = vld [vmem:[%s9095_s0 + $0x172] sm:$0xff] }
 0x202   :  { %1814 = vrot.lane.b32.xlu0 %v4530_v42, %s5120_s15  ;;  %1816 = vrot.lane.b32.xlu1 %v4531_v43, %s5120_s15 }
 0x204   :  { %v1446_v56 = vpop.permute.xlu0 %1445  ;;  %v1448_v57 = vpop.permute.xlu1 %1447 }
 0x205   :  { %1630 = vst.msk [vmem:[#allocation2 + $0x40] sm:$0xff] %vm1621_vm4, %v1446_v56  ;;  %1631 = vst.msk [vmem:[#allocation2 + $0x48] sm:$0xff] %vm1621_vm4, %v1448_v57 }
 0x206   :  { %1818 = vrot.lane.b32.xlu0 %v6731_v52, %s5120_s15  ;;  %1820 = vrot.lane.b32.xlu1 %v6736_v53, %s5120_s15 }
 0x208   :  { %v1450_v10 = vpop.permute.xlu0 %1449  ;;  %v1452_v55 = vpop.permute.xlu1 %1451 }
 0x209   :  { %1632 = vst.msk [vmem:[#allocation2 + $0x50] sm:$0xff] %vm1621_vm4, %v1450_v10  ;;  %1633 = vst.msk [vmem:[#allocation2 + $0x58] sm:$0xff] %vm1621_vm4, %v1452_v55  ;;  %v6955_v10 = vld [vmem:[%s9095_s0 + $0x182] sm:$0xff]  ;;  %v6960_v55 = vld [vmem:[%s9095_s0 + $0x18a] sm:$0xff] }
 0x20a   :  { %1822 = vrot.lane.b32.xlu0 %v6747_v2, %s5120_s15  ;;  %1824 = vrot.lane.b32.xlu1 %v6752_v3, %s5120_s15 }
 0x20c   :  { %v1454_v4 = vpop.permute.xlu0 %1453  ;;  %v1456_v5 = vpop.permute.xlu1 %1455 }
 0x20d   :  { %1634 = vst.msk [vmem:[#allocation2 + $0x60] sm:$0xff] %vm1621_vm4, %v1454_v4  ;;  %1635 = vst.msk [vmem:[#allocation2 + $0x68] sm:$0xff] %vm1621_vm4, %v1456_v5 }
 0x20e   :  { %1826 = vrot.lane.b32.xlu0 %v6763_v0, %s5120_s15  ;;  %1828 = vrot.lane.b32.xlu1 %v6768_v1, %s5120_s15 }
 0x210   :  { %v1458_v12 = vpop.permute.xlu0 %1457  ;;  %v1460_v14 = vpop.permute.xlu1 %1459 }
 0x211   :  { %1636 = vst.msk [vmem:[#allocation2 + $0x70] sm:$0xff] %vm1621_vm4, %v1458_v12  ;;  %1637 = vst.msk [vmem:[#allocation2 + $0x78] sm:$0xff] %vm1621_vm4, %v1460_v14  ;;  %v4562_v12 = vld [vmem:[%s9095_s0 + $0x1ca] sm:$0xff]  ;;  %v4563_v14 = vld [vmem:[%s9095_s0 + $0x1d2] sm:$0xff] }
 0x212   :  { %1830 = vrot.lane.b32.xlu0 %v6779_v8, %s5120_s15  ;;  %1832 = vrot.lane.b32.xlu1 %v6784_v9, %s5120_s15 }
 0x214   :  { %v1462_v35 = vpop.permute.xlu0 %1461  ;;  %v1464_v37 = vpop.permute.xlu1 %1463 }
 0x215   :  { %1638 = vst.msk [vmem:[#allocation2 + $0x80] sm:$0xff] %vm1621_vm4, %v1462_v35  ;;  %1639 = vst.msk [vmem:[#allocation2 + $0x88] sm:$0xff] %vm1621_vm4, %v1464_v37 }
 0x216   :  { %1834 = vrot.lane.b32.xlu0 %v6795_v21, %s5120_s15  ;;  %1836 = vrot.lane.b32.xlu1 %v6800_v22, %s5120_s15 }
 0x218   :  { %v1466_v58 = vpop.permute.xlu0 %1465  ;;  %v1468_v59 = vpop.permute.xlu1 %1467 }
 0x219   :  { %1640 = vst.msk [vmem:[#allocation2 + $0x90] sm:$0xff] %vm1621_vm4, %v1466_v58  ;;  %1641 = vst.msk [vmem:[#allocation2 + $0x98] sm:$0xff] %vm1621_vm4, %v1468_v59  ;;  %v6981_v58 = vld [vmem:[%s9095_s0 + $0x1e2] sm:$0xff]  ;;  %v6986_v59 = vld [vmem:[%s9095_s0 + $0x1ea] sm:$0xff] }
 0x21a   :  { %1838 = vrot.lane.b32.xlu0 %v6811_v50, %s5120_s15  ;;  %1840 = vrot.lane.b32.xlu1 %v6816_v51, %s5120_s15 }
 0x21c   :  { %v1470_v6 = vpop.permute.xlu0 %1469  ;;  %v1472_v7 = vpop.permute.xlu1 %1471 }
 0x21d   :  { %1642 = vst.msk [vmem:[#allocation2 + $0xa0] sm:$0xff] %vm1621_vm4, %v1470_v6  ;;  %1643 = vst.msk [vmem:[#allocation2 + $0xa8] sm:$0xff] %vm1621_vm4, %v1472_v7 }
 0x21e   :  { %1842 = vrot.lane.b32.xlu0 %v6827_v62, %s5120_s15  ;;  %1844 = vrot.lane.b32.xlu1 %v6832_v63, %s5120_s15 }
 0x220   :  { %v1474_v44 = vpop.permute.xlu0 %1473  ;;  %v1476_v45 = vpop.permute.xlu1 %1475 }
 0x221   :  { %1644 = vst.msk [vmem:[#allocation2 + $0xb0] sm:$0xff] %vm1621_vm4, %v1474_v44  ;;  %1645 = vst.msk [vmem:[#allocation2 + $0xb8] sm:$0xff] %vm1621_vm4, %v1476_v45  ;;  %v6997_v44 = vld [vmem:[%s9095_s0 + $0x1fa] sm:$0xff]  ;;  %v7002_v45 = vld [vmem:[%s9095_s0 + $0x202] sm:$0xff] }
 0x222   :  { %1846 = vrot.lane.b32.xlu0 %v6843_v15, %s5120_s15  ;;  %1848 = vrot.lane.b32.xlu1 %v6848_v16, %s5120_s15 }
 0x224   :  { %v1478_v60 = vpop.permute.xlu0 %1477  ;;  %v1480_v61 = vpop.permute.xlu1 %1479 }
 0x225   :  { %1646 = vst.msk [vmem:[#allocation2 + $0xc0] sm:$0xff] %vm1621_vm4, %v1478_v60  ;;  %1647 = vst.msk [vmem:[#allocation2 + $0xc8] sm:$0xff] %vm1621_vm4, %v1480_v61 }
 0x226   :  { %1850 = vrot.lane.b32.xlu0 %v6859_v28, %s5120_s15  ;;  %1852 = vrot.lane.b32.xlu1 %v6864_v29, %s5120_s15 }
 0x228   :  { %v1482_v13 = vpop.permute.xlu0 %1481  ;;  %v1484_v17 = vpop.permute.xlu1 %1483 }
 0x229   :  { %1648 = vst.msk [vmem:[#allocation2 + $0xd0] sm:$0xff] %vm1621_vm4, %v1482_v13  ;;  %1649 = vst.msk [vmem:[#allocation2 + $0xd8] sm:$0xff] %vm1621_vm4, %v1484_v17  ;;  %v4568_v13 = vld [vmem:[%s9095_s0 + $0x212] sm:$0xff]  ;;  %v4569_v17 = vld [vmem:[%s9095_s0 + $0x21a] sm:$0xff] }
 0x22a   :  { %1854 = vrot.lane.b32.xlu0 %v6875_v11, %s5120_s15  ;;  %1856 = vrot.lane.b32.xlu1 %v6880_v54, %s5120_s15 }
 0x22c   :  { %v1486_v20 = vpop.permute.xlu0 %1485  ;;  %v1488_v23 = vpop.permute.xlu1 %1487 }
 0x22d   :  { %1650 = vst.msk [vmem:[#allocation2 + $0xe0] sm:$0xff] %vm1621_vm4, %v1486_v20  ;;  %1651 = vst.msk [vmem:[#allocation2 + $0xe8] sm:$0xff] %vm1621_vm4, %v1488_v23 }
 0x22e   :  { %1858 = vrot.lane.b32.xlu0 %v6891_v18, %s5120_s15  ;;  %1860 = vrot.lane.b32.xlu1 %v6896_v19, %s5120_s15 }
 0x230   :  { %v1490_v32 = vpop.permute.xlu0 %1489  ;;  %v1492_v33 = vpop.permute.xlu1 %1491 }
 0x231   :  { %1652 = vst.msk [vmem:[#allocation2 + $0xf0] sm:$0xff] %vm1621_vm4, %v1490_v32  ;;  %1653 = vst.msk [vmem:[#allocation2 + $0xf8] sm:$0xff] %vm1621_vm4, %v1492_v33  ;;  %v4570_v32 = vld [vmem:[%s9095_s0 + $0x22a] sm:$0xff]  ;;  %v4571_v33 = vld [vmem:[%s9095_s0 + $0x232] sm:$0xff] }
 0x232   :  { %1862 = vrot.lane.b32.xlu0 %v6907_v26, %s5120_s15  ;;  %1864 = vrot.lane.b32.xlu1 %v6912_v27, %s5120_s15 }
 0x234   :  { %v1494_v42 = vpop.permute.xlu0 %1493  ;;  %v1496_v43 = vpop.permute.xlu1 %1495 }
 0x235   :  { %1654 = vst.msk [vmem:[#allocation2 + $0x100] sm:$0xff] %vm1621_vm4, %v1494_v42  ;;  %1655 = vst.msk [vmem:[#allocation2 + $0x108] sm:$0xff] %vm1621_vm4, %v1496_v43 }
 0x236   :  { %1866 = vrot.lane.b32.xlu0 %v6923_v38, %s5120_s15  ;;  %1868 = vrot.lane.b32.xlu1 %v6928_v39, %s5120_s15 }
 0x238   :  { %v1498_v56 = vpop.permute.xlu0 %1497  ;;  %v1500_v57 = vpop.permute.xlu1 %1499 }
 0x239   :  { %1656 = vst.msk [vmem:[#allocation2 + $0x110] sm:$0xff] %vm1621_vm4, %v1498_v56  ;;  %1657 = vst.msk [vmem:[#allocation2 + $0x118] sm:$0xff] %vm1621_vm4, %v1500_v57  ;;  %v3291_v56 = vld [vmem:[%s9096_s1] sm:$0xff]  ;;  %v3292_v57 = vld [vmem:[%s9096_s1 + $0x8] sm:$0xff] }
 0x23a   :  { %1870 = vrot.lane.b32.xlu0 %v6939_v48, %s5120_s15  ;;  %1872 = vrot.lane.b32.xlu1 %v6944_v49, %s5120_s15 }
 0x23c   :  { %v1502_v4 = vpop.permute.xlu0 %1501  ;;  %v1504_v5 = vpop.permute.xlu1 %1503 }
 0x23d   :  { %1658 = vst.msk [vmem:[#allocation2 + $0x120] sm:$0xff] %vm1621_vm4, %v1502_v4  ;;  %1659 = vst.msk [vmem:[#allocation2 + $0x128] sm:$0xff] %vm1621_vm4, %v1504_v5  ;;  %v5091_v4 = vpack.c.bf16 %v3292_v57, %v3291_v56  ;;  %v4572_v5 = vld [vmem:[%s9095_s0 + $0x242] sm:$0xff] }
 0x23e   :  { %1874 = vrot.lane.b32.xlu0 %v6955_v10, %s5120_s15  ;;  %1876 = vrot.lane.b32.xlu1 %v6960_v55, %s5120_s15 }
 0x23f   :  { %5092 = vmatprep.subr.bf16.mxu0 %v5091_v4  ;;  %5099 = vmatprep.subr.bf16.mxu1 %v5091_v4 }
 0x240   :  { %v1506_v35 = vpop.permute.xlu0 %1505  ;;  %v1508_v37 = vpop.permute.xlu1 %1507  ;;  %5094 = vmatpush3.bf16.msra.mxu0 %v5091_v4  ;;  %5102 = vmatpush3.bf16.msra.mxu1 %v5091_v4 }
 0x241   :  { %1660 = vst.msk [vmem:[#allocation2 + $0x130] sm:$0xff] %vm1621_vm4, %v1506_v35  ;;  %1661 = vst.msk [vmem:[#allocation2 + $0x138] sm:$0xff] %vm1621_vm4, %v1508_v37  ;;  %v3293_v37 = vld [vmem:[%s9096_s1 + $0x10] sm:$0xff] }
 0x242   :  { %1878 = vrot.lane.b32.xlu0 %v4562_v12, %s5120_s15  ;;  %1880 = vrot.lane.b32.xlu1 %v4563_v14, %s5120_s15  ;;  %v4594_v12 = vld [vmem:[%s9095_s0 + $0x30] sm:$0xff] }
 0x244   :  { %v1510_v6 = vpop.permute.xlu0 %1509  ;;  %v1512_v7 = vpop.permute.xlu1 %1511 }
 0x245   :  { %1662 = vst.msk [vmem:[#allocation2 + $0x140] sm:$0xff] %vm1621_vm4, %v1510_v6  ;;  %1663 = vst.msk [vmem:[#allocation2 + $0x148] sm:$0xff] %vm1621_vm4, %v1512_v7  ;;  %v3294_v6 = vld [vmem:[%s9096_s1 + $0x18] sm:$0xff] }
 0x246   :  { %1882 = vrot.lane.b32.xlu0 %v6981_v58, %s5120_s15  ;;  %1884 = vrot.lane.b32.xlu1 %v6986_v59, %s5120_s15  ;;  %v5095_v7 = vpack.c.bf16 %v3294_v6, %v3293_v37 }
 0x248   :  { %v1514_v60 = vpop.permute.xlu0 %1513  ;;  %v1516_v61 = vpop.permute.xlu1 %1515  ;;  %5096 = vmatprep.subr.bf16.mxu0 %v5095_v7  ;;  %5100 = vmatprep.subr.bf16.mxu1 %v5095_v7 }
 0x249   :  { %1664 = vst.msk [vmem:[#allocation2 + $0x150] sm:$0xff] %vm1621_vm4, %v1514_v60  ;;  %1665 = vst.msk [vmem:[#allocation2 + $0x158] sm:$0xff] %vm1621_vm4, %v1516_v61  ;;  %v4595_v60 = vld [vmem:[%s9095_s0 + $0x38] sm:$0xff]  ;;  %5098 = vmatpush3.bf16.msra.mxu0 %v5095_v7  ;;  %5103 = vmatpush3.bf16.msra.mxu1 %v5095_v7 }
 0x24a   :  { %1886 = vrot.lane.b32.xlu0 %v6997_v44, %s5120_s15  ;;  %1888 = vrot.lane.b32.xlu1 %v7002_v45, %s5120_s15 }
 0x24c   :  { %v1518_v20 = vpop.permute.xlu0 %1517  ;;  %v1520_v23 = vpop.permute.xlu1 %1519 }
 0x24d   :  { %1666 = vst.msk [vmem:[#allocation2 + $0x160] sm:$0xff] %vm1621_vm4, %v1518_v20  ;;  %1667 = vst.msk [vmem:[#allocation2 + $0x168] sm:$0xff] %vm1621_vm4, %v1520_v23 }
 0x24e   :  { %1890 = vrot.lane.b32.xlu0 %v4568_v13, %s5120_s15  ;;  %1892 = vrot.lane.b32.xlu1 %v4569_v17, %s5120_s15  ;;  %v3295_v17 = vld [vmem:[%s9096_s1 + $0x20] sm:$0xf] }
 0x24f   :  { %4993 = vmatprep.subr.msk.mxu0 %vm3496_vm5, %v3295_v17  ;;  %5101 = vmatprep.subr.msk.mxu1 %vm3496_vm5, %v3295_v17 }
 0x250   :  { %v1522_v42 = vpop.permute.xlu0 %1521  ;;  %v1524_v43 = vpop.permute.xlu1 %1523  ;;  %4994 = vmatpush3.msk.msra.mxu0 %vm3496_vm5, %v3295_v17  ;;  %5104 = vmatpush3.msk.msra.mxu1 %vm3496_vm5, %v3295_v17 }
 0x251   :  { %1668 = vst.msk [vmem:[#allocation2 + $0x170] sm:$0xff] %vm1621_vm4, %v1522_v42  ;;  %1669 = vst.msk [vmem:[#allocation2 + $0x178] sm:$0xff] %vm1621_vm4, %v1524_v43 }
 0x252   :  { %1894 = vrot.lane.b32.xlu0 %v4570_v32, %s5120_s15  ;;  %1896 = vrot.lane.b32.xlu1 %v4571_v33, %s5120_s15 }
 0x254   :  { %v1526_v14 = vpop.permute.xlu0 %1525  ;;  %v1528_v35 = vpop.permute.xlu1 %1527 }
 0x255   :  { %1670 = vst.msk [vmem:[#allocation2 + $0x180] sm:$0xff] %vm1621_vm4, %v1526_v14  ;;  %1671 = vst.msk [vmem:[#allocation2 + $0x188] sm:$0xff] %vm1621_vm4, %v1528_v35 }
 0x256   :  { %1898 = vrot.lane.b32.xlu0 %v4572_v5, %s5120_s15  ;;  %2200 = vrot.lane.b32.xlu1 %v4594_v12, %s5121_s6  ;;  %v4600_v12 = vld [vmem:[%s9095_s0 + $0x78] sm:$0xff] }
 0x258   :  { %v1530_v61 = vpop.permute.xlu0 %1529  ;;  %v1532_v13 = vpop.permute.xlu1 %1531 }
 0x259   :  { %1672 = vst.msk [vmem:[#allocation2 + $0x190] sm:$0xff] %vm1621_vm4, %v1530_v61  ;;  %1673 = vst.msk [vmem:[#allocation2 + $0x198] sm:$0xff] %vm1621_vm4, %v1532_v13 }
 0x25a   :  { %2202 = vrot.lane.b32.xlu0 %v4595_v60, %s5121_s6  ;;  %2585 = vrot.lane.b32.xlu1 %v6381_v24, %s5122_s9  ;;  %v4596_v24 = vld [vmem:[%s9095_s0 + $0x48] sm:$0xff] }
 0x25c   :  { %v1534_v20 = vpop.permute.xlu0 %1533  ;;  %v1536_v23 = vpop.permute.xlu1 %1535 }
 0x25d   :  { %1674 = vst.msk [vmem:[#allocation2 + $0x1a0] sm:$0xff] %vm1621_vm4, %v1534_v20  ;;  %1675 = vst.msk [vmem:[#allocation2 + $0x1a8] sm:$0xff] %vm1621_vm4, %v1536_v23  ;;  %v5114_v23 = vld [vmem:[%s9095_s0 + $0xa9] sm:$0xff] }
 0x25e   :  { %2587 = vrot.lane.b32.xlu0 %v6386_v25, %s5122_s9  ;;  %2970 = vrot.lane.b32.xlu1 %v6731_v52, %s5123_s13  ;;  %v4597_v25 = vld [vmem:[%s9095_s0 + $0x50] sm:$0xff] }
 0x260   :  { %v1538_v32 = vpop.permute.xlu0 %1537  ;;  %v1540_v33 = vpop.permute.xlu1 %1539 }
 0x261   :  { %1676 = vst.msk [vmem:[#allocation2 + $0x1b0] sm:$0xff] %vm1621_vm4, %v1538_v32  ;;  %1677 = vst.msk [vmem:[#allocation2 + $0x1b8] sm:$0xff] %vm1621_vm4, %v1540_v33  ;;  %v4606_v33 = vld [vmem:[%s9095_s0 + $0xc0] sm:$0xff] }
 0x262   :  { %2972 = vrot.lane.b32.xlu0 %v6736_v53, %s5123_s13  ;;  %2204 = vrot.lane.b32.xlu1 %v4596_v24, %s5121_s6  ;;  %v4598_v53 = vld [vmem:[%s9095_s0 + $0x60] sm:$0xff] }
 0x264   :  { %v1542_v52 = vpop.permute.xlu0 %1541  ;;  %v1544_v42 = vpop.permute.xlu1 %1543 }
 0x265   :  { %1678 = vst.msk [vmem:[#allocation2 + $0x1c0] sm:$0xff] %vm1621_vm4, %v1542_v52  ;;  %1679 = vst.msk [vmem:[#allocation2 + $0x1c8] sm:$0xff] %vm1621_vm4, %v1544_v42  ;;  %v4607_v42 = vld [vmem:[%s9095_s0 + $0xc8] sm:$0xff] }
 0x266   :  { %2206 = vrot.lane.b32.xlu0 %v4597_v25, %s5121_s6  ;;  %2589 = vrot.lane.b32.xlu1 %v6397_v30, %s5122_s9  ;;  %v4599_v30 = vld [vmem:[%s9095_s0 + $0x68] sm:$0xff] }
 0x268   :  { %v1546_v43 = vpop.permute.xlu0 %1545  ;;  %v1548_v56 = vpop.permute.xlu1 %1547 }
 0x269   :  { %1680 = vst.msk [vmem:[#allocation2 + $0x1d0] sm:$0xff] %vm1621_vm4, %v1546_v43  ;;  %1681 = vst.msk [vmem:[#allocation2 + $0x1d8] sm:$0xff] %vm1621_vm4, %v1548_v56 }
 0x26a   :  { %2591 = vrot.lane.b32.xlu0 %v6402_v31, %s5122_s9  ;;  %2974 = vrot.lane.b32.xlu1 %v6747_v2, %s5123_s13 }
 0x26c   :  { %v1550_v57 = vpop.permute.xlu0 %1549  ;;  %v1552_v4 = vpop.permute.xlu1 %1551 }
 0x26d   :  { %1682 = vst.msk [vmem:[#allocation2 + $0x1e0] sm:$0xff] %vm1621_vm4, %v1550_v57  ;;  %1683 = vst.msk [vmem:[#allocation2 + $0x1e8] sm:$0xff] %vm1621_vm4, %v1552_v4  ;;  %v4608_v4 = vld [vmem:[%s9095_s0 + $0xd8] sm:$0xff] }
 0x26e   :  { %2976 = vrot.lane.b32.xlu0 %v6752_v3, %s5123_s13  ;;  %2208 = vrot.lane.b32.xlu1 %v4598_v53, %s5121_s6 }
 0x270   :  { %v1554_v31 = vpop.permute.xlu0 %1553  ;;  %v1556_v2 = vpop.permute.xlu1 %1555 }
 0x271   :  { %1684 = vst.msk [vmem:[#allocation2 + $0x1f0] sm:$0xff] %vm1621_vm4, %v1554_v31  ;;  %1685 = vst.msk [vmem:[#allocation2 + $0x1f8] sm:$0xff] %vm1621_vm4, %v1556_v2  ;;  %v4609_v2 = vld [vmem:[%s9095_s0 + $0xe0] sm:$0xff] }
 0x272   :  { %2210 = vrot.lane.b32.xlu0 %v4599_v30, %s5121_s6  ;;  %2593 = vrot.lane.b32.xlu1 %v6413_v34, %s5122_s9  ;;  %v4601_v34 = vld [vmem:[%s9095_s0 + $0x80] sm:$0xff] }
 0x274   :  { %v1815_v5 = vpop.permute.xlu0 %1814  ;;  %v1817_v3 = vpop.permute.xlu1 %1816 }
 0x275   :  { %2007 = vst.msk [vmem:[#allocation2] sm:$0xff] %vm2006_vm6, %v1815_v5  ;;  %2008 = vst.msk [vmem:[#allocation2 + $0x8] sm:$0xff] %vm2006_vm6, %v1817_v3 }
 0x276   :  { %2595 = vrot.lane.b32.xlu0 %v6418_v36, %s5122_s9  ;;  %2978 = vrot.lane.b32.xlu1 %v6763_v0, %s5123_s13 }
 0x278   :  { %v1819_v14 = vpop.permute.xlu0 %1818  ;;  %v1821_v35 = vpop.permute.xlu1 %1820 }
 0x279   :  { %2009 = vst.msk [vmem:[#allocation2 + $0x10] sm:$0xff] %vm2006_vm6, %v1819_v14  ;;  %2010 = vst.msk [vmem:[#allocation2 + $0x18] sm:$0xff] %vm2006_vm6, %v1821_v35  ;;  %v4610_v35 = vld [vmem:[%s9095_s0 + $0xf0] sm:$0xff] }
 0x27a   :  { %2980 = vrot.lane.b32.xlu0 %v6768_v1, %s5123_s13  ;;  %2212 = vrot.lane.b32.xlu1 %v4600_v12, %s5121_s6  ;;  %v4602_v1 = vld [vmem:[%s9095_s0 + $0x90] sm:$0xff] }
 0x27c   :  { %v1823_v36 = vpop.permute.xlu0 %1822  ;;  %v1825_v0 = vpop.permute.xlu1 %1824 }
 0x27d   :  { %2011 = vst.msk [vmem:[#allocation2 + $0x20] sm:$0xff] %vm2006_vm6, %v1823_v36  ;;  %2012 = vst.msk [vmem:[#allocation2 + $0x28] sm:$0xff] %vm2006_vm6, %v1825_v0  ;;  %v4611_v0 = vld [vmem:[%s9095_s0 + $0xf8] sm:$0xff] }
 0x27e   :  { %2214 = vrot.lane.b32.xlu0 %v4601_v34, %s5121_s6  ;;  %2597 = vrot.lane.b32.xlu1 %v6429_v40, %s5122_s9  ;;  %v4603_v40 = vld [vmem:[%s9095_s0 + $0x98] sm:$0xff] }
 0x280   :  { %v1827_v37 = vpop.permute.xlu0 %1826  ;;  %v1829_v6 = vpop.permute.xlu1 %1828 }
 0x281   :  { %2013 = vst.msk [vmem:[#allocation2 + $0x30] sm:$0xff] %vm2006_vm6, %v1827_v37  ;;  %2014 = vst.msk [vmem:[#allocation2 + $0x38] sm:$0xff] %vm2006_vm6, %v1829_v6 }
 0x282   :  { %2599 = vrot.lane.b32.xlu0 %v6434_v41, %s5122_s9  ;;  %2982 = vrot.lane.b32.xlu1 %v6779_v8, %s5123_s13 }
 0x284   :  { %v1831_v7 = vpop.permute.xlu0 %1830  ;;  %v1833_v60 = vpop.permute.xlu1 %1832 }
 0x285   :  { %2015 = vst.msk [vmem:[#allocation2 + $0x40] sm:$0xff] %vm2006_vm6, %v1831_v7  ;;  %2016 = vst.msk [vmem:[#allocation2 + $0x48] sm:$0xff] %vm2006_vm6, %v1833_v60  ;;  %v4612_v60 = vld [vmem:[%s9095_s0 + $0x108] sm:$0xff] }
 0x286   :  { %2984 = vrot.lane.b32.xlu0 %v6784_v9, %s5123_s13  ;;  %2216 = vrot.lane.b32.xlu1 %v4602_v1, %s5121_s6  ;;  %v4604_v9 = vld [vmem:[%s9095_s0 + $0xa8] sm:$0xff] }
 0x288   :  { %v1835_v41 = vpop.permute.xlu0 %1834  ;;  %v1837_v8 = vpop.permute.xlu1 %1836 }
 0x289   :  { %2017 = vst.msk [vmem:[#allocation2 + $0x50] sm:$0xff] %vm2006_vm6, %v1835_v41  ;;  %2018 = vst.msk [vmem:[#allocation2 + $0x58] sm:$0xff] %vm2006_vm6, %v1837_v8  ;;  %v4613_v8 = vld [vmem:[%s9095_s0 + $0x110] sm:$0xff] }
 0x28a   :  { %2218 = vrot.lane.b32.xlu0 %v4603_v40, %s5121_s6  ;;  %2601 = vrot.lane.b32.xlu1 %v6445_v46, %s5122_s9  ;;  %v4605_v46 = vld [vmem:[%s9095_s0 + $0xb0] sm:$0xff] }
 0x28c   :  { %v1839_v61 = vpop.permute.xlu0 %1838  ;;  %v1841_v13 = vpop.permute.xlu1 %1840 }
 0x28d   :  { %2019 = vst.msk [vmem:[#allocation2 + $0x60] sm:$0xff] %vm2006_vm6, %v1839_v61  ;;  %2020 = vst.msk [vmem:[#allocation2 + $0x68] sm:$0xff] %vm2006_vm6, %v1841_v13 }
 0x28e   :  { %2603 = vrot.lane.b32.xlu0 %v6450_v47, %s5122_s9  ;;  %2986 = vrot.lane.b32.xlu1 %v6795_v21, %s5123_s13 }
 0x290   :  { %v1843_v17 = vpop.permute.xlu0 %1842  ;;  %v1845_v20 = vpop.permute.xlu1 %1844 }
 0x291   :  { %2021 = vst.msk [vmem:[#allocation2 + $0x70] sm:$0xff] %vm2006_vm6, %v1843_v17  ;;  %2022 = vst.msk [vmem:[#allocation2 + $0x78] sm:$0xff] %vm2006_vm6, %v1845_v20  ;;  %v4614_v20 = vld [vmem:[%s9095_s0 + $0x120] sm:$0xff] }
 0x292   :  { %2988 = vrot.lane.b32.xlu0 %v6800_v22, %s5123_s13  ;;  %2220 = vrot.lane.b32.xlu1 %v4604_v9, %s5121_s6  ;;  %v4669_v22 = vld [vmem:[%s9095_s0 + $0xb1] sm:$0xff] }
 0x294   :  { %v1847_v47 = vpop.permute.xlu0 %1846  ;;  %v1849_v21 = vpop.permute.xlu1 %1848 }
 0x295   :  { %2023 = vst.msk [vmem:[#allocation2 + $0x80] sm:$0xff] %vm2006_vm6, %v1847_v47  ;;  %2024 = vst.msk [vmem:[#allocation2 + $0x88] sm:$0xff] %vm2006_vm6, %v1849_v21  ;;  %v4678_v21 = vld [vmem:[%s9095_s0 + $0x121] sm:$0xff] }
 0x296   :  { %2222 = vrot.lane.b32.xlu0 %v4605_v46, %s5121_s6  ;;  %2605 = vrot.lane.b32.xlu1 %v5114_v23, %s5122_s9 }
 0x298   :  { %v1851_v24 = vpop.permute.xlu0 %1850  ;;  %v1853_v32 = vpop.permute.xlu1 %1852 }
 0x299   :  { %2025 = vst.msk [vmem:[#allocation2 + $0x90] sm:$0xff] %vm2006_vm6, %v1851_v24  ;;  %2026 = vst.msk [vmem:[#allocation2 + $0x98] sm:$0xff] %vm2006_vm6, %v1853_v32 }
 0x29a   :  { %2607 = vrot.lane.b32.xlu0 %v4669_v22, %s5122_s9  ;;  %2990 = vrot.lane.b32.xlu1 %v6811_v50, %s5123_s13  ;;  %v4670_v50 = vld [vmem:[%s9095_s0 + $0xc1] sm:$0xff] }
 0x29c   :  { %v1855_v25 = vpop.permute.xlu0 %1854  ;;  %v1857_v52 = vpop.permute.xlu1 %1856 }
 0x29d   :  { %2027 = vst.msk [vmem:[#allocation2 + $0xa0] sm:$0xff] %vm2006_vm6, %v1855_v25  ;;  %2028 = vst.msk [vmem:[#allocation2 + $0xa8] sm:$0xff] %vm2006_vm6, %v1857_v52 }
 0x29e   :  { %2992 = vrot.lane.b32.xlu0 %v6816_v51, %s5123_s13  ;;  %2224 = vrot.lane.b32.xlu1 %v4606_v33, %s5121_s6  ;;  %v4671_v51 = vld [vmem:[%s9095_s0 + $0xc9] sm:$0xff]  ;;  %v4616_v33 = vld [vmem:[%s9095_s0 + $0x138] sm:$0xff] }
 0x2a0   :  { %v1859_v43 = vpop.permute.xlu0 %1858  ;;  %v1861_v56 = vpop.permute.xlu1 %1860 }
 0x2a1   :  { %2029 = vst.msk [vmem:[#allocation2 + $0xb0] sm:$0xff] %vm2006_vm6, %v1859_v43  ;;  %2030 = vst.msk [vmem:[#allocation2 + $0xb8] sm:$0xff] %vm2006_vm6, %v1861_v56 }
 0x2a2   :  { %2226 = vrot.lane.b32.xlu0 %v4607_v42, %s5121_s6  ;;  %2609 = vrot.lane.b32.xlu1 %v4670_v50, %s5122_s9  ;;  %v4680_v50 = vld [vmem:[%s9095_s0 + $0x139] sm:$0xff] }
 0x2a4   :  { %v1863_v53 = vpop.permute.xlu0 %1862  ;;  %v1865_v57 = vpop.permute.xlu1 %1864 }
 0x2a5   :  { %2031 = vst.msk [vmem:[#allocation2 + $0xc0] sm:$0xff] %vm2006_vm6, %v1863_v53  ;;  %2032 = vst.msk [vmem:[#allocation2 + $0xc8] sm:$0xff] %vm2006_vm6, %v1865_v57 }
 0x2a6   :  { %2611 = vrot.lane.b32.xlu0 %v4671_v51, %s5122_s9  ;;  %2994 = vrot.lane.b32.xlu1 %v6827_v62, %s5123_s13  ;;  %v4672_v62 = vld [vmem:[%s9095_s0 + $0xd9] sm:$0xff] }
 0x2a8   :  { %v1867_v30 = vpop.permute.xlu0 %1866  ;;  %v1869_v31 = vpop.permute.xlu1 %1868 }
 0x2a9   :  { %2033 = vst.msk [vmem:[#allocation2 + $0xd0] sm:$0xff] %vm2006_vm6, %v1867_v30  ;;  %2034 = vst.msk [vmem:[#allocation2 + $0xd8] sm:$0xff] %vm2006_vm6, %v1869_v31 }
 0x2aa   :  { %2996 = vrot.lane.b32.xlu0 %v6832_v63, %s5123_s13  ;;  %2228 = vrot.lane.b32.xlu1 %v4608_v4, %s5121_s6  ;;  %v4673_v63 = vld [vmem:[%s9095_s0 + $0xe1] sm:$0xff]  ;;  %v4618_v4 = vld [vmem:[%s9095_s0 + $0x150] sm:$0xff] }
 0x2ac   :  { %v1871_v5 = vpop.permute.xlu0 %1870  ;;  %v1873_v3 = vpop.permute.xlu1 %1872 }
 0x2ad   :  { %2035 = vst.msk [vmem:[#allocation2 + $0xe0] sm:$0xff] %vm2006_vm6, %v1871_v5  ;;  %2036 = vst.msk [vmem:[#allocation2 + $0xe8] sm:$0xff] %vm2006_vm6, %v1873_v3 }
 0x2ae   :  { %2230 = vrot.lane.b32.xlu0 %v4609_v2, %s5121_s6  ;;  %2613 = vrot.lane.b32.xlu1 %v4672_v62, %s5122_s9  ;;  %v4682_v62 = vld [vmem:[%s9095_s0 + $0x151] sm:$0xff] }
 0x2b0   :  { %v1875_v12 = vpop.permute.xlu0 %1874  ;;  %v1877_v14 = vpop.permute.xlu1 %1876 }
 0x2b1   :  { %2037 = vst.msk [vmem:[#allocation2 + $0xf0] sm:$0xff] %vm2006_vm6, %v1875_v12  ;;  %2038 = vst.msk [vmem:[#allocation2 + $0xf8] sm:$0xff] %vm2006_vm6, %v1877_v14 }
 0x2b2   :  { %2615 = vrot.lane.b32.xlu0 %v4673_v63, %s5122_s9  ;;  %2998 = vrot.lane.b32.xlu1 %v6843_v15, %s5123_s13  ;;  %v4674_v15 = vld [vmem:[%s9095_s0 + $0xf1] sm:$0xff] }
 0x2b4   :  { %v1879_v34 = vpop.permute.xlu0 %1878  ;;  %v1881_v36 = vpop.permute.xlu1 %1880 }
 0x2b5   :  { %2039 = vst.msk [vmem:[#allocation2 + $0x100] sm:$0xff] %vm2006_vm6, %v1879_v34  ;;  %2040 = vst.msk [vmem:[#allocation2 + $0x108] sm:$0xff] %vm2006_vm6, %v1881_v36 }
 0x2b6   :  { %3000 = vrot.lane.b32.xlu0 %v6848_v16, %s5123_s13  ;;  %2232 = vrot.lane.b32.xlu1 %v4610_v35, %s5121_s6  ;;  %v4675_v16 = vld [vmem:[%s9095_s0 + $0xf9] sm:$0xff]  ;;  %v4620_v35 = vld [vmem:[%s9095_s0 + $0x168] sm:$0xff] }
 0x2b8   :  { %v1883_v37 = vpop.permute.xlu0 %1882  ;;  %v1885_v6 = vpop.permute.xlu1 %1884 }
 0x2b9   :  { %2041 = vst.msk [vmem:[#allocation2 + $0x110] sm:$0xff] %vm2006_vm6, %v1883_v37  ;;  %2042 = vst.msk [vmem:[#allocation2 + $0x118] sm:$0xff] %vm2006_vm6, %v1885_v6 }
 0x2ba   :  { %2234 = vrot.lane.b32.xlu0 %v4611_v0, %s5121_s6  ;;  %2617 = vrot.lane.b32.xlu1 %v4674_v15, %s5122_s9  ;;  %v4684_v15 = vld [vmem:[%s9095_s0 + $0x169] sm:$0xff] }
 0x2bc   :  { %v1887_v1 = vpop.permute.xlu0 %1886  ;;  %v1889_v7 = vpop.permute.xlu1 %1888 }
 0x2bd   :  { %2043 = vst.msk [vmem:[#allocation2 + $0x120] sm:$0xff] %vm2006_vm6, %v1887_v1  ;;  %2044 = vst.msk [vmem:[#allocation2 + $0x128] sm:$0xff] %vm2006_vm6, %v1889_v7 }
 0x2be   :  { %2619 = vrot.lane.b32.xlu0 %v4675_v16, %s5122_s9  ;;  %3002 = vrot.lane.b32.xlu1 %v6859_v28, %s5123_s13  ;;  %v4676_v28 = vld [vmem:[%s9095_s0 + $0x109] sm:$0xff] }
 0x2c0   :  { %v1891_v40 = vpop.permute.xlu0 %1890  ;;  %v1893_v41 = vpop.permute.xlu1 %1892 }
 0x2c1   :  { %2045 = vst.msk [vmem:[#allocation2 + $0x130] sm:$0xff] %vm2006_vm6, %v1891_v40  ;;  %2046 = vst.msk [vmem:[#allocation2 + $0x138] sm:$0xff] %vm2006_vm6, %v1893_v41 }
 0x2c2   :  { %3004 = vrot.lane.b32.xlu0 %v6864_v29, %s5123_s13  ;;  %2236 = vrot.lane.b32.xlu1 %v4612_v60, %s5121_s6  ;;  %v4677_v29 = vld [vmem:[%s9095_s0 + $0x111] sm:$0xff]  ;;  %v4622_v60 = vld [vmem:[%s9095_s0 + $0x180] sm:$0xff] }
 0x2c4   :  { %v1895_v61 = vpop.permute.xlu0 %1894  ;;  %v1897_v13 = vpop.permute.xlu1 %1896 }
 0x2c5   :  { %2047 = vst.msk [vmem:[#allocation2 + $0x140] sm:$0xff] %vm2006_vm6, %v1895_v61  ;;  %2048 = vst.msk [vmem:[#allocation2 + $0x148] sm:$0xff] %vm2006_vm6, %v1897_v13 }
 0x2c6   :  { %2238 = vrot.lane.b32.xlu0 %v4613_v8, %s5121_s6  ;;  %2621 = vrot.lane.b32.xlu1 %v4676_v28, %s5122_s9  ;;  %v4686_v28 = vld [vmem:[%s9095_s0 + $0x181] sm:$0xff] }
 0x2c8   :  { %v1899_v9 = vpop.permute.xlu0 %1898  ;;  %v2201_v17 = vpop.permute.xlu1 %2200 }
 0x2c9   :  { %2049 = vst.msk [vmem:[#allocation2 + $0x150] sm:$0xff] %vm2006_vm6, %v1899_v9 }
 0x2ca   :  { %2393 = vst.msk [vmem:[#allocation2] sm:$0xff] %vm2392_vm7, %v2201_v17  ;;  %2623 = vrot.lane.b32.xlu0 %v4677_v29, %s5122_s9  ;;  %3006 = vrot.lane.b32.xlu1 %v6875_v11, %s5123_s13  ;;  %v4615_v11 = vld [vmem:[%s9095_s0 + $0x128] sm:$0xff] }
 0x2cc   :  { %v2203_v46 = vpop.permute.xlu0 %2202  ;;  %v2586_v47 = vpop.permute.xlu1 %2585 }
 0x2cd   :  { %2394 = vst.msk [vmem:[#allocation2 + $0x8] sm:$0xff] %vm2392_vm7, %v2203_v46 }
 0x2ce   :  { %2778 = vst.msk [vmem:[#allocation2] sm:$0xff] %vm2777_vm8, %v2586_v47  ;;  %3008 = vrot.lane.b32.xlu0 %v6880_v54, %s5123_s13  ;;  %2240 = vrot.lane.b32.xlu1 %v4614_v20, %s5121_s6  ;;  %v4679_v54 = vld [vmem:[%s9095_s0 + $0x129] sm:$0xff]  ;;  %v4624_v20 = vld [vmem:[%s9095_s0 + $0x198] sm:$0xff] }
 0x2d0   :  { %v2588_v23 = vpop.permute.xlu0 %2587  ;;  %v2971_v22 = vpop.permute.xlu1 %2970 }
 0x2d1   :  { %2779 = vst.msk [vmem:[#allocation2 + $0x8] sm:$0xff] %vm2777_vm8, %v2588_v23 }
 0x2d2   :  { %3163 = vst.msk [vmem:[#allocation2] sm:$0xff] %vm3162_vm9, %v2971_v22  ;;  %2242 = vrot.lane.b32.xlu0 %v4615_v11, %s5121_s6  ;;  %2625 = vrot.lane.b32.xlu1 %v4678_v21, %s5122_s9  ;;  %v4688_v21 = vld [vmem:[%s9095_s0 + $0x199] sm:$0xff] }
 0x2d4   :  { %v2973_v24 = vpop.permute.xlu0 %2972  ;;  %v2205_v32 = vpop.permute.xlu1 %2204 }
 0x2d5   :  { %3164 = vst.msk [vmem:[#allocation2 + $0x8] sm:$0xff] %vm3162_vm9, %v2973_v24  ;;  %v4752_v24 = vld [vmem:[%s9095_s0 + $0x19a] sm:$0xff] }
 0x2d6   :  { %2395 = vst.msk [vmem:[#allocation2 + $0x10] sm:$0xff] %vm2392_vm7, %v2205_v32  ;;  %2627 = vrot.lane.b32.xlu0 %v4679_v54, %s5122_s9  ;;  %3010 = vrot.lane.b32.xlu1 %v6891_v18, %s5123_s13  ;;  %v4617_v18 = vld [vmem:[%s9095_s0 + $0x140] sm:$0xff] }
 0x2d8   :  { %v2207_v25 = vpop.permute.xlu0 %2206  ;;  %v2590_v52 = vpop.permute.xlu1 %2589 }
 0x2d9   :  { %v3227_v42 = vld [vmem:[#allocation2] sm:$0xff]  ;;  %2396 = vst.msk [vmem:[#allocation2 + $0x18] sm:$0xff] %vm2392_vm7, %v2207_v25 }
 0x2da   :  { %2780 = vst.msk [vmem:[#allocation2 + $0x10] sm:$0xff] %vm2777_vm8, %v2590_v52  ;;  %4995 = vmatprep.mubr.msk.f32.mxu0 %vm3303_vm10, %v3227_v42  ;;  %3012 = vrot.lane.b32.xlu0 %v6896_v19, %s5123_s13  ;;  %v4681_v19 = vld [vmem:[%s9095_s0 + $0x141] sm:$0xff] }
 0x2db   :  { %2244 = vrot.lane.b32.xlu1 %v4616_v33, %s5121_s6  ;;  %v4753_v25 = vld [vmem:[%s9095_s0 + $0x1a2] sm:$0xff] }
 0x2dc   :  { %v2592_v43 = vpop.permute.xlu0 %2591  ;;  %v2975_v56 = vpop.permute.xlu1 %2974  ;;  %v3228_v51 = vld [vmem:[#allocation2 + $0x8] sm:$0xff]  ;;  %v4626_v52 = vld [vmem:[%s9095_s0 + $0x1e0] sm:$0xff] }
 0x2dd   :  { %2781 = vst.msk [vmem:[#allocation2 + $0x18] sm:$0xff] %vm2777_vm8, %v2592_v43  ;;  %4996 = vmatmul.mubr.msk.f32.vlgmr.msra.gmra.mrb[0].mxu0 %vm3303_vm10, %v3228_v51  ;;  %v4627_v43 = vld [vmem:[%s9095_s0 + $0x1e8] sm:$0xff] }
 0x2de   :  { %3165 = vst.msk [vmem:[#allocation2 + $0x10] sm:$0xff] %vm3162_vm9, %v2975_v56  ;;  %2246 = vrot.lane.b32.xlu0 %v4617_v18, %s5121_s6  ;;  %v4690_v56 = vld [vmem:[%s9095_s0 + $0x1e1] sm:$0xff] }
 0x2df   :  { %2629 = vrot.lane.b32.xlu1 %v4680_v50, %s5122_s9 }
 0x2e0   :  { %v2977_v53 = vpop.permute.xlu0 %2976  ;;  %v2209_v57 = vpop.permute.xlu1 %2208 }
 0x2e1   :  { %3166 = vst.msk [vmem:[#allocation2 + $0x18] sm:$0xff] %vm3162_vm9, %v2977_v53 }
 0x2e2   :  { %2397 = vst.msk [vmem:[#allocation2 + $0x20] sm:$0xff] %vm2392_vm7, %v2209_v57  ;;  %2631 = vrot.lane.b32.xlu0 %v4681_v19, %s5122_s9  ;;  %v4691_v57 = vld [vmem:[%s9095_s0 + $0x1e9] sm:$0xff] }
 0x2e3   :  { %3014 = vrot.lane.b32.xlu1 %v6907_v26, %s5123_s13  ;;  %v4619_v26 = vld [vmem:[%s9095_s0 + $0x158] sm:$0xff] }
 0x2e4   :  { %v2211_v30 = vpop.permute.xlu0 %2210  ;;  %v2594_v31 = vpop.permute.xlu1 %2593 }
 0x2e5   :  { %v3229_v2 = vld [vmem:[#allocation2 + $0x10] sm:$0xff]  ;;  %2398 = vst.msk [vmem:[#allocation2 + $0x28] sm:$0xff] %vm2392_vm7, %v2211_v30 }
 0x2e6   :  { %2782 = vst.msk [vmem:[#allocation2 + $0x20] sm:$0xff] %vm2777_vm8, %v2594_v31  ;;  %4998 = vmatprep.mubr.msk.f32.mxu0 %vm3303_vm10, %v3229_v2  ;;  %3016 = vrot.lane.b32.xlu0 %v6912_v27, %s5123_s13  ;;  %v4683_v27 = vld [vmem:[%s9095_s0 + $0x159] sm:$0xff] }
 0x2e7   :  { %2248 = vrot.lane.b32.xlu1 %v4618_v4, %s5121_s6  ;;  %v4628_v31 = vld [vmem:[%s9095_s0 + $0x1f8] sm:$0xff] }
 0x2e8   :  { %v2596_v5 = vpop.permute.xlu0 %2595  ;;  %v2979_v3 = vpop.permute.xlu1 %2978  ;;  %v3230_v63 = vld [vmem:[#allocation2 + $0x18] sm:$0xff] }
 0x2e9   :  { %2783 = vst.msk [vmem:[#allocation2 + $0x28] sm:$0xff] %vm2777_vm8, %v2596_v5  ;;  %4999 = vmatmul.mubr.msk.f32.gmra.mrb[2].mxu0 %vm3303_vm10, %v3230_v63  ;;  %v4692_v5 = vld [vmem:[%s9095_s0 + $0x1f9] sm:$0xff] }
 0x2ea   :  { %3167 = vst.msk [vmem:[#allocation2 + $0x20] sm:$0xff] %vm3162_vm9, %v2979_v3  ;;  %2250 = vrot.lane.b32.xlu0 %v4619_v26, %s5121_s6 }
 0x2eb   :  { %2633 = vrot.lane.b32.xlu1 %v4682_v62, %s5122_s9 }
 0x2ec   :  { %v2981_v12 = vpop.permute.xlu0 %2980  ;;  %v2213_v14 = vpop.permute.xlu1 %2212 }
 0x2ed   :  { %3168 = vst.msk [vmem:[#allocation2 + $0x28] sm:$0xff] %vm3162_vm9, %v2981_v12 }
 0x2ee   :  { %2399 = vst.msk [vmem:[#allocation2 + $0x30] sm:$0xff] %vm2392_vm7, %v2213_v14  ;;  %2635 = vrot.lane.b32.xlu0 %v4683_v27, %s5122_s9 }
 0x2ef   :  { %3018 = vrot.lane.b32.xlu1 %v6923_v38, %s5123_s13  ;;  %v4621_v38 = vld [vmem:[%s9095_s0 + $0x170] sm:$0xff] }
 0x2f0   :  { %v2215_v34 = vpop.permute.xlu0 %2214  ;;  %v2598_v36 = vpop.permute.xlu1 %2597 }
 0x2f1   :  { %v3231_v0 = vld [vmem:[#allocation2 + $0x20] sm:$0xff]  ;;  %2400 = vst.msk [vmem:[#allocation2 + $0x38] sm:$0xff] %vm2392_vm7, %v2215_v34 }
 0x2f2   :  { %2784 = vst.msk [vmem:[#allocation2 + $0x30] sm:$0xff] %vm2777_vm8, %v2598_v36  ;;  %5001 = vmatprep.mubr.msk.f32.mxu0 %vm3303_vm10, %v3231_v0  ;;  %3020 = vrot.lane.b32.xlu0 %v6928_v39, %s5123_s13  ;;  %v4685_v39 = vld [vmem:[%s9095_s0 + $0x171] sm:$0xff] }
 0x2f3   :  { %2252 = vrot.lane.b32.xlu1 %v4620_v35, %s5121_s6  ;;  %v4630_v35 = vld [vmem:[%s9095_s0 + $0x210] sm:$0xff] }
 0x2f4   :  { %v2600_v37 = vpop.permute.xlu0 %2599  ;;  %v2983_v6 = vpop.permute.xlu1 %2982  ;;  %v3232_v16 = vld [vmem:[#allocation2 + $0x28] sm:$0xff] }
 0x2f5   :  { %2785 = vst.msk [vmem:[#allocation2 + $0x38] sm:$0xff] %vm2777_vm8, %v2600_v37  ;;  %5002 = vmatmul.mubr.msk.f32.gmra.mrb[4].mxu0 %vm3303_vm10, %v3232_v16  ;;  %v4695_v16 = vld [vmem:[%s9095_s0 + $0x219] sm:$0xff] }
 0x2f6   :  { %3169 = vst.msk [vmem:[#allocation2 + $0x30] sm:$0xff] %vm3162_vm9, %v2983_v6  ;;  %2254 = vrot.lane.b32.xlu0 %v4621_v38, %s5121_s6  ;;  %v4694_v38 = vld [vmem:[%s9095_s0 + $0x211] sm:$0xff] }
 0x2f7   :  { %2637 = vrot.lane.b32.xlu1 %v4684_v15, %s5122_s9 }
 0x2f8   :  { %v2985_v1 = vpop.permute.xlu0 %2984  ;;  %v2217_v7 = vpop.permute.xlu1 %2216 }
 0x2f9   :  { %3170 = vst.msk [vmem:[#allocation2 + $0x38] sm:$0xff] %vm3162_vm9, %v2985_v1 }
 0x2fa   :  { %2401 = vst.msk [vmem:[#allocation2 + $0x40] sm:$0xff] %vm2392_vm7, %v2217_v7  ;;  %2639 = vrot.lane.b32.xlu0 %v4685_v39, %s5122_s9  ;;  %v4758_v39 = vld [vmem:[%s9095_s0 + $0x212] sm:$0xff] }
 0x2fb   :  { %3022 = vrot.lane.b32.xlu1 %v6939_v48, %s5123_s13  ;;  %v4623_v48 = vld [vmem:[%s9095_s0 + $0x188] sm:$0xff] }
 0x2fc   :  { %v2219_v40 = vpop.permute.xlu0 %2218  ;;  %v2602_v41 = vpop.permute.xlu1 %2601 }
 0x2fd   :  { %v3233_v8 = vld [vmem:[#allocation2 + $0x30] sm:$0xff]  ;;  %2402 = vst.msk [vmem:[#allocation2 + $0x48] sm:$0xff] %vm2392_vm7, %v2219_v40  ;;  %v4632_v40 = vld [vmem:[%s9095_s0 + $0x228] sm:$0xff] }
 0x2fe   :  { %2786 = vst.msk [vmem:[#allocation2 + $0x40] sm:$0xff] %vm2777_vm8, %v2602_v41  ;;  %5004 = vmatprep.mubr.msk.f32.mxu0 %vm3303_vm10, %v3233_v8  ;;  %3024 = vrot.lane.b32.xlu0 %v6944_v49, %s5123_s13  ;;  %v4687_v49 = vld [vmem:[%s9095_s0 + $0x189] sm:$0xff] }
 0x2ff   :  { %2256 = vrot.lane.b32.xlu1 %v4622_v60, %s5121_s6  ;;  %v4759_v60 = vld [vmem:[%s9095_s0 + $0x21a] sm:$0xff] }
 0x300   :  { %v2604_v61 = vpop.permute.xlu0 %2603  ;;  %v2987_v13 = vpop.permute.xlu1 %2986  ;;  %v3234_v29 = vld [vmem:[#allocation2 + $0x38] sm:$0xff] }
 0x301   :  { %2787 = vst.msk [vmem:[#allocation2 + $0x48] sm:$0xff] %vm2777_vm8, %v2604_v61  ;;  %5005 = vmatmul.mubr.msk.f32.gmra.mrb[6].mxu0 %vm3303_vm10, %v3234_v29  ;;  %v4696_v61 = vld [vmem:[%s9095_s0 + $0x229] sm:$0xff] }
 0x302   :  { %3171 = vst.msk [vmem:[#allocation2 + $0x40] sm:$0xff] %vm3162_vm9, %v2987_v13  ;;  %2258 = vrot.lane.b32.xlu0 %v4623_v48, %s5121_s6 }
 0x303   :  { %2641 = vrot.lane.b32.xlu1 %v4686_v28, %s5122_s9  ;;  %v4633_v28 = vld [vmem:[%s9095_s0 + $0x230] sm:$0xff] }
 0x304   :  { %v2989_v9 = vpop.permute.xlu0 %2988  ;;  %v2221_v17 = vpop.permute.xlu1 %2220 }
 0x305   :  { %3172 = vst.msk [vmem:[#allocation2 + $0x48] sm:$0xff] %vm3162_vm9, %v2989_v9  ;;  %v4697_v9 = vld [vmem:[%s9095_s0 + $0x231] sm:$0xff] }
 0x306   :  { %2403 = vst.msk [vmem:[#allocation2 + $0x50] sm:$0xff] %vm2392_vm7, %v2221_v17  ;;  %2643 = vrot.lane.b32.xlu0 %v4687_v49, %s5122_s9  ;;  %v4760_v17 = vld [vmem:[%s9095_s0 + $0x22a] sm:$0xff] }
 0x307   :  { %3026 = vrot.lane.b32.xlu1 %v6955_v10, %s5123_s13  ;;  %v4625_v10 = vld [vmem:[%s9095_s0 + $0x1a0] sm:$0xff] }
 0x308   :  { %v2223_v46 = vpop.permute.xlu0 %2222  ;;  %v2606_v47 = vpop.permute.xlu1 %2605 }
 0x309   :  { %v3235_v11 = vld [vmem:[#allocation2 + $0x40] sm:$0xff]  ;;  %2404 = vst.msk [vmem:[#allocation2 + $0x58] sm:$0xff] %vm2392_vm7, %v2223_v46 }
 0x30a   :  { %2788 = vst.msk [vmem:[#allocation2 + $0x50] sm:$0xff] %vm2777_vm8, %v2606_v47  ;;  %5007 = vmatprep.mubr.msk.f32.mxu0 %vm3303_vm10, %v3235_v11  ;;  %3028 = vrot.lane.b32.xlu0 %v6960_v55, %s5123_s13  ;;  %v4689_v55 = vld [vmem:[%s9095_s0 + $0x1a1] sm:$0xff]  ;;  %v4761_v47 = vld [vmem:[%s9095_s0 + $0x232] sm:$0xff] }
 0x30b   :  { %2260 = vrot.lane.b32.xlu1 %v4624_v20, %s5121_s6  ;;  %v4634_v11 = vld [vmem:[%s9095_s0 + $0x240] sm:$0xff] }
 0x30c   :  { %v2608_v23 = vpop.permute.xlu0 %2607  ;;  %v2991_v22 = vpop.permute.xlu1 %2990  ;;  %v3236_v54 = vld [vmem:[#allocation2 + $0x48] sm:$0xff] }
 0x30d   :  { %2789 = vst.msk [vmem:[#allocation2 + $0x58] sm:$0xff] %vm2777_vm8, %v2608_v23  ;;  %5008 = vmatmul.mubr.msk.f32.gmra.mrb[8].mxu0 %vm3303_vm10, %v3236_v54  ;;  %v4698_v54 = vld [vmem:[%s9095_s0 + $0x241] sm:$0xff] }
 0x30e   :  { %3173 = vst.msk [vmem:[#allocation2 + $0x50] sm:$0xff] %vm3162_vm9, %v2991_v22  ;;  %2262 = vrot.lane.b32.xlu0 %v4625_v10, %s5121_s6  ;;  %v4635_v22 = vld [vmem:[%s9095_s0 + $0x248] sm:$0xff] }
 0x30f   :  { %2645 = vrot.lane.b32.xlu1 %v4688_v21, %s5122_s9 }
 0x310   :  { %v2993_v32 = vpop.permute.xlu0 %2992  ;;  %v2225_v33 = vpop.permute.xlu1 %2224 }
 0x311   :  { %3174 = vst.msk [vmem:[#allocation2 + $0x58] sm:$0xff] %vm3162_vm9, %v2993_v32 }
 0x312   :  { %2405 = vst.msk [vmem:[#allocation2 + $0x60] sm:$0xff] %vm2392_vm7, %v2225_v33  ;;  %2647 = vrot.lane.b32.xlu0 %v4689_v55, %s5122_s9  ;;  %v4699_v33 = vld [vmem:[%s9095_s0 + $0x249] sm:$0xff] }
 0x313   :  { %3030 = vrot.lane.b32.xlu1 %v4752_v24, %s5123_s13 }
 0x314   :  { %v2227_v42 = vpop.permute.xlu0 %2226  ;;  %v2610_v18 = vpop.permute.xlu1 %2609 }
 0x315   :  { %v3237_v50 = vld [vmem:[#allocation2 + $0x50] sm:$0xff]  ;;  %2406 = vst.msk [vmem:[#allocation2 + $0x68] sm:$0xff] %vm2392_vm7, %v2227_v42 }
 0x316   :  { %2790 = vst.msk [vmem:[#allocation2 + $0x60] sm:$0xff] %vm2777_vm8, %v2610_v18  ;;  %5010 = vmatprep.mubr.msk.f32.mxu0 %vm3303_vm10, %v3237_v50  ;;  %3032 = vrot.lane.b32.xlu0 %v4753_v25, %s5123_s13  ;;  %v4762_v25 = vld [vmem:[%s9095_s0 + $0x242] sm:$0xff]  ;;  %v4763_v18 = vld [vmem:[%s9095_s0 + $0x24a] sm:$0xff] }
 0x317   :  { %2264 = vrot.lane.b32.xlu1 %v4626_v52, %s5121_s6 }
 0x318   :  { %v2612_v51 = vpop.permute.xlu0 %2611  ;;  %v2995_v19 = vpop.permute.xlu1 %2994  ;;  %v3238_v53 = vld [vmem:[#allocation2 + $0x58] sm:$0xff] }
 0x319   :  { %2791 = vst.msk [vmem:[#allocation2 + $0x68] sm:$0xff] %vm2777_vm8, %v2612_v51  ;;  %5011 = vmatmul.mubr.msk.f32.gmra.mrb[10].mxu0 %vm3303_vm10, %v3238_v53  ;;  %v4636_v51 = vld [vmem:[%s9095_s0 + $0x258] sm:$0xff] }
 0x31a   :  { %3175 = vst.msk [vmem:[#allocation2 + $0x60] sm:$0xff] %vm3162_vm9, %v2995_v19  ;;  %2266 = vrot.lane.b32.xlu0 %v4627_v43, %s5121_s6  ;;  %v4637_v19 = vld [vmem:[%s9095_s0 + $0x260] sm:$0xff] }
 0x31b   :  { %2649 = vrot.lane.b32.xlu1 %v4690_v56, %s5122_s9 }
 0x31c   :  { %v2997_v4 = vpop.permute.xlu0 %2996  ;;  %v2229_v30 = vpop.permute.xlu1 %2228 }
 0x31d   :  { %3176 = vst.msk [vmem:[#allocation2 + $0x68] sm:$0xff] %vm3162_vm9, %v2997_v4 }
 0x31e   :  { %2407 = vst.msk [vmem:[#allocation2 + $0x70] sm:$0xff] %vm2392_vm7, %v2229_v30  ;;  %2651 = vrot.lane.b32.xlu0 %v4691_v57, %s5122_s9  ;;  %v4700_v30 = vld [vmem:[%s9095_s0 + $0x259] sm:$0xff] }
 0x31f   :  { %3034 = vrot.lane.b32.xlu1 %v6981_v58, %s5123_s13  ;;  %v4629_v58 = vld [vmem:[%s9095_s0 + $0x200] sm:$0xff] }
 0x320   :  { %v2231_v2 = vpop.permute.xlu0 %2230  ;;  %v2614_v26 = vpop.permute.xlu1 %2613 }
 0x321   :  { %v3239_v62 = vld [vmem:[#allocation2 + $0x60] sm:$0xff]  ;;  %2408 = vst.msk [vmem:[#allocation2 + $0x78] sm:$0xff] %vm2392_vm7, %v2231_v2 }
 0x322   :  { %2792 = vst.msk [vmem:[#allocation2 + $0x70] sm:$0xff] %vm2777_vm8, %v2614_v26  ;;  %5013 = vmatprep.mubr.msk.f32.mxu0 %vm3303_vm10, %v3239_v62  ;;  %3036 = vrot.lane.b32.xlu0 %v6986_v59, %s5123_s13  ;;  %v4693_v59 = vld [vmem:[%s9095_s0 + $0x201] sm:$0xff] }
 0x323   :  { %2268 = vrot.lane.b32.xlu1 %v4628_v31, %s5121_s6  ;;  %v4701_v31 = vld [vmem:[%s9095_s0 + $0x261] sm:$0xff] }
 0x324   :  { %v2616_v3 = vpop.permute.xlu0 %2615  ;;  %v2999_v63 = vpop.permute.xlu1 %2998  ;;  %v3240_v27 = vld [vmem:[#allocation2 + $0x68] sm:$0xff]  ;;  %v4764_v62 = vld [vmem:[%s9095_s0 + $0x25a] sm:$0xff] }
 0x325   :  { %2793 = vst.msk [vmem:[#allocation2 + $0x78] sm:$0xff] %vm2777_vm8, %v2616_v3  ;;  %5014 = vmatmul.mubr.msk.f32.gmra.mrb[12].mxu0 %vm3303_vm10, %v3240_v27 }
 0x326   :  { %3177 = vst.msk [vmem:[#allocation2 + $0x70] sm:$0xff] %vm3162_vm9, %v2999_v63  ;;  %2270 = vrot.lane.b32.xlu0 %v4629_v58, %s5121_s6  ;;  %v4765_v63 = vld [vmem:[%s9095_s0 + $0x262] sm:$0xff] }
 0x327   :  { %2653 = vrot.lane.b32.xlu1 %v4692_v5, %s5122_s9 }
 0x328   :  { %v3001_v12 = vpop.permute.xlu0 %3000  ;;  %v2233_v14 = vpop.permute.xlu1 %2232 }
 0x329   :  { %3178 = vst.msk [vmem:[#allocation2 + $0x78] sm:$0xff] %vm3162_vm9, %v3001_v12 }
 0x32a   :  { %2409 = vst.msk [vmem:[#allocation2 + $0x80] sm:$0xff] %vm2392_vm7, %v2233_v14  ;;  %2655 = vrot.lane.b32.xlu0 %v4693_v59, %s5122_s9  ;;  %v4638_v14 = vld [vmem:[%s9095_s0 + $0x270] sm:$0xff] }
 0x32b   :  { %3038 = vrot.lane.b32.xlu1 %v6997_v44, %s5123_s13  ;;  %v4631_v44 = vld [vmem:[%s9095_s0 + $0x218] sm:$0xff] }
 0x32c   :  { %v2235_v34 = vpop.permute.xlu0 %2234  ;;  %v2618_v36 = vpop.permute.xlu1 %2617 }
 0x32d   :  { %v3241_v0 = vld [vmem:[#allocation2 + $0x70] sm:$0xff]  ;;  %2410 = vst.msk [vmem:[#allocation2 + $0x88] sm:$0xff] %vm2392_vm7, %v2235_v34 }
 0x32e   :  { %2794 = vst.msk [vmem:[#allocation2 + $0x80] sm:$0xff] %vm2777_vm8, %v2618_v36  ;;  %5016 = vmatprep.mubr.msk.f32.mxu0 %vm3303_vm10, %v3241_v0  ;;  %3040 = vrot.lane.b32.xlu0 %v7002_v45, %s5123_s13  ;;  %v5124_v45 = vmov 0.0   ;;  %v4702_v0 = vld [vmem:[%s9095_s0 + $0x271] sm:$0xff] }
 0x32f   :  { %2272 = vrot.lane.b32.xlu1 %v4630_v35, %s5121_s6  ;;  %3891 = vst.msk [vmem:[%s9097_s3 + $0x20] sm:$0xff] %vm3885_vm11, %v5124_v45  ;;  %3886 = vst.msk [vmem:[%s9097_s3] sm:$0xff] %vm3885_vm11, %v5124_v45  ;;  %v4639_v35 = vld [vmem:[%s9095_s0 + $0x278] sm:$0xff] }
 0x330   :  { %v2620_v15 = vpop.permute.xlu0 %2619  ;;  %v3003_v37 = vpop.permute.xlu1 %3002  ;;  %v3242_v6 = vld [vmem:[#allocation2 + $0x78] sm:$0xff]  ;;  %3892 = vst.msk [vmem:[%s9097_s3 + $0x28] sm:$0x3] %vm3888_vm12, %v5124_v45  ;;  %3889 = vst.msk [vmem:[%s9097_s3 + $0x10] sm:$0x3] %vm3888_vm12, %v5124_v45 }
 0x331   :  { %2795 = vst.msk [vmem:[#allocation2 + $0x88] sm:$0xff] %vm2777_vm8, %v2620_v15  ;;  %5017 = vmatmul.mubr.msk.f32.gmra.mrb[14].mxu0 %vm3303_vm10, %v3242_v6  ;;  %v4766_v6 = vld [vmem:[%s9095_s0 + $0x272] sm:$0xff] }
 0x332   :  { %3179 = vst.msk [vmem:[#allocation2 + $0x80] sm:$0xff] %vm3162_vm9, %v3003_v37  ;;  %2274 = vrot.lane.b32.xlu0 %v4631_v44, %s5121_s6  ;;  %v4703_v44 = vld [vmem:[%s9095_s0 + $0x279] sm:$0xff] }
 0x333   :  { %2657 = vrot.lane.b32.xlu1 %v4694_v38, %s5122_s9  ;;  %3887 = vst.msk [vmem:[%s9097_s3 + $0x8] sm:$0xff] %vm3885_vm11, %v5124_v45  ;;  %3890 = vst.msk [vmem:[%s9097_s3 + $0x18] sm:$0xff] %vm3885_vm11, %v5124_v45 }
 0x334   :  { %3893 = vst.msk [vmem:[%s9097_s3 + $0x30] sm:$0xff] %vm3885_vm11, %v5124_v45  ;;  %3894 = vst.msk [vmem:[%s9097_s3 + $0x38] sm:$0xff] %vm3885_vm11, %v5124_v45  ;;  %v3005_v1 = vpop.permute.xlu0 %3004  ;;  %v2237_v7 = vpop.permute.xlu1 %2236 }
 0x335   :  { %3895 = vst.msk [vmem:[%s9097_s3 + $0x40] sm:$0x3] %vm3888_vm12, %v5124_v45  ;;  %3898 = vst.msk [vmem:[%s9097_s3 + $0x58] sm:$0x3] %vm3888_vm12, %v5124_v45 }
 0x336   :  { %3896 = vst.msk [vmem:[%s9097_s3 + $0x48] sm:$0xff] %vm3885_vm11, %v5124_v45  ;;  %3897 = vst.msk [vmem:[%s9097_s3 + $0x50] sm:$0xff] %vm3885_vm11, %v5124_v45  ;;  %2659 = vrot.lane.b32.xlu0 %v4695_v16, %s5122_s9 }
 0x337   :  { %3899 = vst.msk [vmem:[%s9097_s3 + $0x60] sm:$0xff] %vm3885_vm11, %v5124_v45  ;;  %3900 = vst.msk [vmem:[%s9097_s3 + $0x68] sm:$0xff] %vm3885_vm11, %v5124_v45  ;;  %3042 = vrot.lane.b32.xlu1 %v4758_v39, %s5123_s13 }
 0x338   :  { %3901 = vst.msk [vmem:[%s9097_s3 + $0x70] sm:$0x3] %vm3888_vm12, %v5124_v45  ;;  %3904 = vst.msk [vmem:[%s9097_s3 + $0x88] sm:$0x3] %vm3888_vm12, %v5124_v45  ;;  %v2239_v41 = vpop.permute.xlu0 %2238  ;;  %v2622_v8 = vpop.permute.xlu1 %2621 }
 0x339   :  { %3902 = vst.msk [vmem:[%s9097_s3 + $0x78] sm:$0xff] %vm3885_vm11, %v5124_v45  ;;  %3903 = vst.msk [vmem:[%s9097_s3 + $0x80] sm:$0xff] %vm3885_vm11, %v5124_v45  ;;  %v3243_v48 = vld [vmem:[#allocation2 + $0x80] sm:$0xff] }
 0x33a   :  { %3905 = vst.msk [vmem:[%s9097_s3 + $0x90] sm:$0xff] %vm3885_vm11, %v5124_v45  ;;  %3906 = vst.msk [vmem:[%s9097_s3 + $0x98] sm:$0xff] %vm3885_vm11, %v5124_v45  ;;  %5019 = vmatprep.mubr.msk.f32.mxu0 %vm3303_vm10, %v3243_v48  ;;  %3044 = vrot.lane.b32.xlu0 %v4759_v60, %s5123_s13 }
 0x33b   :  { %3907 = vst.msk [vmem:[%s9097_s3 + $0xa0] sm:$0x3] %vm3888_vm12, %v5124_v45  ;;  %3910 = vst.msk [vmem:[%s9097_s3 + $0xb8] sm:$0x3] %vm3888_vm12, %v5124_v45  ;;  %2276 = vrot.lane.b32.xlu1 %v4632_v40, %s5121_s6 }
 0x33c   :  { %3908 = vst.msk [vmem:[%s9097_s3 + $0xa8] sm:$0xff] %vm3885_vm11, %v5124_v45  ;;  %3909 = vst.msk [vmem:[%s9097_s3 + $0xb0] sm:$0xff] %vm3885_vm11, %v5124_v45  ;;  %v2624_v13 = vpop.permute.xlu0 %2623  ;;  %v3007_v29 = vpop.permute.xlu1 %3006 }
 0x33d   :  { %3911 = vst.msk [vmem:[%s9097_s3 + $0xc0] sm:$0xff] %vm3885_vm11, %v5124_v45  ;;  %3912 = vst.msk [vmem:[%s9097_s3 + $0xc8] sm:$0xff] %vm3885_vm11, %v5124_v45 }
 0x33e   :  { %3913 = vst.msk [vmem:[%s9097_s3 + $0xd0] sm:$0x3] %vm3888_vm12, %v5124_v45  ;;  %3916 = vst.msk [vmem:[%s9097_s3 + $0xe8] sm:$0x3] %vm3888_vm12, %v5124_v45  ;;  %2278 = vrot.lane.b32.xlu0 %v4633_v28, %s5121_s6 }
 0x33f   :  { %3914 = vst.msk [vmem:[%s9097_s3 + $0xd8] sm:$0xff] %vm3885_vm11, %v5124_v45  ;;  %3915 = vst.msk [vmem:[%s9097_s3 + $0xe0] sm:$0xff] %vm3885_vm11, %v5124_v45  ;;  %2661 = vrot.lane.b32.xlu1 %v4696_v61, %s5122_s9 }
 0x340   :  { %3917 = vst.msk [vmem:[%s9097_s3 + $0xf0] sm:$0xff] %vm3885_vm11, %v5124_v45  ;;  %3918 = vst.msk [vmem:[%s9097_s3 + $0xf8] sm:$0xff] %vm3885_vm11, %v5124_v45  ;;  %v3009_v20 = vpop.permute.xlu0 %3008  ;;  %v2241_v46 = vpop.permute.xlu1 %2240 }
 0x341   :  { %3919 = vst.msk [vmem:[%s9097_s3 + $0x100] sm:$0x3] %vm3888_vm12, %v5124_v45  ;;  %3922 = vst.msk [vmem:[%s9097_s3 + $0x118] sm:$0x3] %vm3888_vm12, %v5124_v45 }
 0x342   :  { %3920 = vst.msk [vmem:[%s9097_s3 + $0x108] sm:$0xff] %vm3885_vm11, %v5124_v45  ;;  %3921 = vst.msk [vmem:[%s9097_s3 + $0x110] sm:$0xff] %vm3885_vm11, %v5124_v45  ;;  %2663 = vrot.lane.b32.xlu0 %v4697_v9, %s5122_s9 }
 0x343   :  { %3923 = vst.msk [vmem:[%s9097_s3 + $0x120] sm:$0xff] %vm3885_vm11, %v5124_v45  ;;  %3924 = vst.msk [vmem:[%s9097_s3 + $0x128] sm:$0xff] %vm3885_vm11, %v5124_v45  ;;  %3046 = vrot.lane.b32.xlu1 %v4760_v17, %s5123_s13 }
 0x344   :  { %3925 = vst.msk [vmem:[%s9097_s3 + $0x130] sm:$0x3] %vm3888_vm12, %v5124_v45  ;;  %3928 = vst.msk [vmem:[%s9097_s3 + $0x148] sm:$0x3] %vm3888_vm12, %v5124_v45  ;;  %v2243_v10 = vpop.permute.xlu0 %2242  ;;  %v2626_v21 = vpop.permute.xlu1 %2625 }
 0x345   :  { %3926 = vst.msk [vmem:[%s9097_s3 + $0x138] sm:$0xff] %vm3885_vm11, %v5124_v45  ;;  %3927 = vst.msk [vmem:[%s9097_s3 + $0x140] sm:$0xff] %vm3885_vm11, %v5124_v45 }
 0x346   :  { %3929 = vst.msk [vmem:[%s9097_s3 + $0x150] sm:$0xff] %vm3885_vm11, %v5124_v45  ;;  %3930 = vst.msk [vmem:[%s9097_s3 + $0x158] sm:$0xff] %vm3885_vm11, %v5124_v45  ;;  %3048 = vrot.lane.b32.xlu0 %v4761_v47, %s5123_s13 }
 0x347   :  { %3931 = vst.msk [vmem:[%s9097_s3 + $0x160] sm:$0x3] %vm3888_vm12, %v5124_v45  ;;  %3934 = vst.msk [vmem:[%s9097_s3 + $0x178] sm:$0x3] %vm3888_vm12, %v5124_v45  ;;  %2280 = vrot.lane.b32.xlu1 %v4634_v11, %s5121_s6  ;;  %v4769_v11 = vld [vmem:[%s9095_s0 + $0x292] sm:$0xff] }
 0x348   :  { %3932 = vst.msk [vmem:[%s9097_s3 + $0x168] sm:$0xff] %vm3885_vm11, %v5124_v45  ;;  %3933 = vst.msk [vmem:[%s9097_s3 + $0x170] sm:$0xff] %vm3885_vm11, %v5124_v45  ;;  %v2628_v55 = vpop.permute.xlu0 %2627  ;;  %v3011_v24 = vpop.permute.xlu1 %3010 }
 0x349   :  { %3935 = vst.msk [vmem:[%s9097_s3 + $0x180] sm:$0xff] %vm3885_vm11, %v5124_v45  ;;  %3936 = vst.msk [vmem:[%s9097_s3 + $0x188] sm:$0xff] %vm3885_vm11, %v5124_v45 }
 0x34a   :  { %3937 = vst.msk [vmem:[%s9097_s3 + $0x190] sm:$0x3] %vm3888_vm12, %v5124_v45  ;;  %3940 = vst.msk [vmem:[%s9097_s3 + $0x1a8] sm:$0x3] %vm3888_vm12, %v5124_v45  ;;  %2282 = vrot.lane.b32.xlu0 %v4635_v22, %s5121_s6  ;;  %v4642_v22 = vld [vmem:[%s9095_s0 + $0x2a0] sm:$0xff] }
 0x34b   :  { %3938 = vst.msk [vmem:[%s9097_s3 + $0x198] sm:$0xff] %vm3885_vm11, %v5124_v45  ;;  %3939 = vst.msk [vmem:[%s9097_s3 + $0x1a0] sm:$0xff] %vm3885_vm11, %v5124_v45  ;;  %2665 = vrot.lane.b32.xlu1 %v4698_v54, %s5122_s9  ;;  %v4643_v54 = vld [vmem:[%s9095_s0 + $0x2a8] sm:$0xff] }
 0x34c   :  { %3941 = vst.msk [vmem:[%s9097_s3 + $0x1b0] sm:$0xff] %vm3885_vm11, %v5124_v45  ;;  %3942 = vst.msk [vmem:[%s9097_s3 + $0x1b8] sm:$0xff] %vm3885_vm11, %v5124_v45  ;;  %v3013_v52 = vpop.permute.xlu0 %3012 }
 0x34d   :  { %3943 = vst.msk [vmem:[%s9097_s3 + $0x1c0] sm:$0x3] %vm3888_vm12, %v5124_v45  ;;  %3946 = vst.msk [vmem:[%s9097_s3 + $0x1d8] sm:$0x3] %vm3888_vm12, %v5124_v45  ;;  %v2245_v42 = vpop.permute.xlu1 %2244 }
 0x34e   :  { %3944 = vst.msk [vmem:[%s9097_s3 + $0x1c8] sm:$0xff] %vm3885_vm11, %v5124_v45  ;;  %3945 = vst.msk [vmem:[%s9097_s3 + $0x1d0] sm:$0xff] %vm3885_vm11, %v5124_v45  ;;  %2667 = vrot.lane.b32.xlu0 %v4699_v33, %s5122_s9  ;;  %v4706_v33 = vld [vmem:[%s9095_s0 + $0x2a1] sm:$0xff] }
 0x34f   :  { %3947 = vst.msk [vmem:[%s9097_s3 + $0x1e0] sm:$0xff] %vm3885_vm11, %v5124_v45  ;;  %3948 = vst.msk [vmem:[%s9097_s3 + $0x1e8] sm:$0xff] %vm3885_vm11, %v5124_v45  ;;  %3050 = vrot.lane.b32.xlu1 %v4762_v25, %s5123_s13  ;;  %v4707_v25 = vld [vmem:[%s9095_s0 + $0x2a9] sm:$0xff] }
 0x350   :  { %3949 = vst.msk [vmem:[%s9097_s3 + $0x1f0] sm:$0x3] %vm3888_vm12, %v5124_v45  ;;  %3952 = vst.msk [vmem:[%s9097_s3 + $0x208] sm:$0x3] %vm3888_vm12, %v5124_v45  ;;  %v2247_v50 = vpop.permute.xlu0 %2246 }
 0x351   :  { %3950 = vst.msk [vmem:[%s9097_s3 + $0x1f8] sm:$0xff] %vm3885_vm11, %v5124_v45  ;;  %3951 = vst.msk [vmem:[%s9097_s3 + $0x200] sm:$0xff] %vm3885_vm11, %v5124_v45  ;;  %v2630_v43 = vpop.permute.xlu1 %2629 }
 0x352   :  { %3953 = vst.msk [vmem:[%s9097_s3 + $0x210] sm:$0xff] %vm3885_vm11, %v5124_v45  ;;  %3954 = vst.msk [vmem:[%s9097_s3 + $0x218] sm:$0xff] %vm3885_vm11, %v5124_v45  ;;  %3052 = vrot.lane.b32.xlu0 %v4763_v18, %s5123_s13 }
 0x353   :  { %3955 = vst.msk [vmem:[%s9097_s3 + $0x220] sm:$0x3] %vm3888_vm12, %v5124_v45  ;;  %3958 = vst.msk [vmem:[%s9097_s3 + $0x238] sm:$0x3] %vm3888_vm12, %v5124_v45  ;;  %1900 = vrot.lane.b32.xlu1 %v4763_v18, %s5120_s15  ;;  %v4770_v18 = vld [vmem:[%s9095_s0 + $0x2a2] sm:$0xff] }
 0x354   :  { %3956 = vst.msk [vmem:[%s9097_s3 + $0x228] sm:$0xff] %vm3885_vm11, %v5124_v45  ;;  %3957 = vst.msk [vmem:[%s9097_s3 + $0x230] sm:$0xff] %vm3885_vm11, %v5124_v45  ;;  %v2632_v53 = vpop.permute.xlu0 %2631 }
 0x355   :  { %3959 = vst.msk [vmem:[%s9097_s3 + $0x240] sm:$0xff] %vm3885_vm11, %v5124_v45  ;;  %3960 = vst.msk [vmem:[%s9097_s3 + $0x248] sm:$0xff] %vm3885_vm11, %v5124_v45  ;;  %v3015_v57 = vpop.permute.xlu1 %3014 }
 0x356   :  { %3961 = vst.msk [vmem:[%s9097_s3 + $0x250] sm:$0x3] %vm3888_vm12, %v5124_v45  ;;  %3964 = vst.msk [vmem:[%s9097_s3 + $0x268] sm:$0x3] %vm3888_vm12, %v5124_v45  ;;  %2284 = vrot.lane.b32.xlu0 %v4636_v51, %s5121_s6  ;;  %v4771_v51 = vld [vmem:[%s9095_s0 + $0x2aa] sm:$0xff] }
 0x357   :  { %3962 = vst.msk [vmem:[%s9097_s3 + $0x258] sm:$0xff] %vm3885_vm11, %v5124_v45  ;;  %3963 = vst.msk [vmem:[%s9097_s3 + $0x260] sm:$0xff] %vm3885_vm11, %v5124_v45  ;;  %2286 = vrot.lane.b32.xlu1 %v4637_v19, %s5121_s6 }
 0x358   :  { %3965 = vst.msk [vmem:[%s9097_s3 + $0x270] sm:$0xff] %vm3885_vm11, %v5124_v45  ;;  %3966 = vst.msk [vmem:[%s9097_s3 + $0x278] sm:$0xff] %vm3885_vm11, %v5124_v45  ;;  %v3017_v2 = vpop.permute.xlu0 %3016 }
 0x359   :  { %3967 = vst.msk [vmem:[%s9097_s3 + $0x280] sm:$0x3] %vm3888_vm12, %v5124_v45  ;;  %3970 = vst.msk [vmem:[%s9097_s3 + $0x298] sm:$0x3] %vm3888_vm12, %v5124_v45  ;;  %v2249_v26 = vpop.permute.xlu1 %2248 }
 0x35a   :  { %3968 = vst.msk [vmem:[%s9097_s3 + $0x288] sm:$0xff] %vm3885_vm11, %v5124_v45  ;;  %3969 = vst.msk [vmem:[%s9097_s3 + $0x290] sm:$0xff] %vm3885_vm11, %v5124_v45  ;;  %2669 = vrot.lane.b32.xlu0 %v4700_v30, %s5122_s9  ;;  %v4645_v30 = vld [vmem:[%s9095_s0 + $0x2c0] sm:$0xff] }
 0x35b   :  { %3971 = vst.msk [vmem:[%s9097_s3 + $0x2a0] sm:$0xff] %vm3885_vm11, %v5124_v45  ;;  %3972 = vst.msk [vmem:[%s9097_s3 + $0x2a8] sm:$0xff] %vm3885_vm11, %v5124_v45  ;;  %2671 = vrot.lane.b32.xlu1 %v4701_v31, %s5122_s9 }
 0x35c   :  { %3973 = vst.msk [vmem:[%s9097_s3 + $0x2b0] sm:$0x3] %vm3888_vm12, %v5124_v45  ;;  %3976 = vst.msk [vmem:[%s9097_s3 + $0x2c8] sm:$0x3] %vm3888_vm12, %v5124_v45  ;;  %v2251_v58 = vpop.permute.xlu0 %2250 }
 0x35d   :  { %3974 = vst.msk [vmem:[%s9097_s3 + $0x2b8] sm:$0xff] %vm3885_vm11, %v5124_v45  ;;  %3975 = vst.msk [vmem:[%s9097_s3 + $0x2c0] sm:$0xff] %vm3885_vm11, %v5124_v45  ;;  %v2634_v5 = vpop.permute.xlu1 %2633 }
 0x35e   :  { %3977 = vst.msk [vmem:[%s9097_s3 + $0x2d0] sm:$0xff] %vm3885_vm11, %v5124_v45  ;;  %3978 = vst.msk [vmem:[%s9097_s3 + $0x2d8] sm:$0xff] %vm3885_vm11, %v5124_v45  ;;  %3054 = vrot.lane.b32.xlu0 %v4764_v62, %s5123_s13 }
 0x35f   :  { %3979 = vst.msk [vmem:[%s9097_s3 + $0x2e0] sm:$0x3] %vm3888_vm12, %v5124_v45  ;;  %3982 = vst.msk [vmem:[%s9097_s3 + $0x2f8] sm:$0x3] %vm3888_vm12, %v5124_v45  ;;  %1902 = vrot.lane.b32.xlu1 %v4764_v62, %s5120_s15  ;;  %v4709_v62 = vld [vmem:[%s9095_s0 + $0x2c1] sm:$0xff] }
 0x360   :  { %3980 = vst.msk [vmem:[%s9097_s3 + $0x2e8] sm:$0xff] %vm3885_vm11, %v5124_v45  ;;  %3981 = vst.msk [vmem:[%s9097_s3 + $0x2f0] sm:$0xff] %vm3885_vm11, %v5124_v45  ;;  %v2636_v27 = vpop.permute.xlu0 %2635 }
 0x361   :  { %3983 = vst.msk [vmem:[%s9097_s3 + $0x300] sm:$0xff] %vm3885_vm11, %v5124_v45  ;;  %3984 = vst.msk [vmem:[%s9097_s3 + $0x308] sm:$0xff] %vm3885_vm11, %v5124_v45  ;;  %v3019_v59 = vpop.permute.xlu1 %3018 }
 0x362   :  { %3985 = vst.msk [vmem:[%s9097_s3 + $0x310] sm:$0x3] %vm3888_vm12, %v5124_v45  ;;  %3988 = vst.msk [vmem:[%s9097_s3 + $0x328] sm:$0x3] %vm3888_vm12, %v5124_v45  ;;  %3056 = vrot.lane.b32.xlu0 %v4765_v63, %s5123_s13 }
 0x363   :  { %3986 = vst.msk [vmem:[%s9097_s3 + $0x318] sm:$0xff] %vm3885_vm11, %v5124_v45  ;;  %3987 = vst.msk [vmem:[%s9097_s3 + $0x320] sm:$0xff] %vm3885_vm11, %v5124_v45  ;;  %1904 = vrot.lane.b32.xlu1 %v4765_v63, %s5120_s15  ;;  %v4772_v63 = vld [vmem:[%s9095_s0 + $0x2ba] sm:$0xff] }
 0x364   :  { %3989 = vst.msk [vmem:[%s9097_s3 + $0x330] sm:$0xff] %vm3885_vm11, %v5124_v45  ;;  %3990 = vst.msk [vmem:[%s9097_s3 + $0x338] sm:$0xff] %vm3885_vm11, %v5124_v45  ;;  %v3021_v34 = vpop.permute.xlu0 %3020 }
 0x365   :  { %3991 = vst.msk [vmem:[%s9097_s3 + $0x340] sm:$0x3] %vm3888_vm12, %v5124_v45  ;;  %3994 = vst.msk [vmem:[%s9097_s3 + $0x358] sm:$0x3] %vm3888_vm12, %v5124_v45  ;;  %v2253_v36 = vpop.permute.xlu1 %2252 }
 0x366   :  { %3992 = vst.msk [vmem:[%s9097_s3 + $0x348] sm:$0xff] %vm3885_vm11, %v5124_v45  ;;  %3993 = vst.msk [vmem:[%s9097_s3 + $0x350] sm:$0xff] %vm3885_vm11, %v5124_v45  ;;  %2288 = vrot.lane.b32.xlu0 %v4638_v14, %s5121_s6  ;;  %v4773_v14 = vld [vmem:[%s9095_s0 + $0x2c2] sm:$0xff] }
 0x367   :  { %3180 = vst.msk [vmem:[#allocation2 + $0x88] sm:$0xff] %vm3162_vm9, %v3005_v1  ;;  %2290 = vrot.lane.b32.xlu1 %v4639_v35, %s5121_s6 }
 0x368   :  { %2411 = vst.msk [vmem:[#allocation2 + $0x90] sm:$0xff] %vm2392_vm7, %v2237_v7  ;;  %2412 = vst.msk [vmem:[#allocation2 + $0x98] sm:$0xff] %vm2392_vm7, %v2239_v41  ;;  %v2255_v38 = vpop.permute.xlu0 %2254  ;;  %v4767_v7 = vld [vmem:[%s9095_s0 + $0x27a] sm:$0xff]  ;;  %v4640_v41 = vld [vmem:[%s9095_s0 + $0x288] sm:$0xff] }
 0x369   :  { %2796 = vst.msk [vmem:[#allocation2 + $0x90] sm:$0xff] %vm2777_vm8, %v2622_v8  ;;  %2797 = vst.msk [vmem:[#allocation2 + $0x98] sm:$0xff] %vm2777_vm8, %v2624_v13  ;;  %v2638_v15 = vpop.permute.xlu1 %2637  ;;  %v4641_v8 = vld [vmem:[%s9095_s0 + $0x290] sm:$0xff] }
 0x36a   :  { %3181 = vst.msk [vmem:[#allocation2 + $0x90] sm:$0xff] %vm3162_vm9, %v3007_v29  ;;  %3182 = vst.msk [vmem:[#allocation2 + $0x98] sm:$0xff] %vm3162_vm9, %v3009_v20  ;;  %2673 = vrot.lane.b32.xlu0 %v4702_v0, %s5122_s9  ;;  %v4704_v13 = vld [vmem:[%s9095_s0 + $0x289] sm:$0xff]  ;;  %v4705_v29 = vld [vmem:[%s9095_s0 + $0x291] sm:$0xff] }
 0x36b   :  { %2413 = vst.msk [vmem:[#allocation2 + $0xa0] sm:$0xff] %vm2392_vm7, %v2241_v46  ;;  %2414 = vst.msk [vmem:[#allocation2 + $0xa8] sm:$0xff] %vm2392_vm7, %v2243_v10  ;;  %2675 = vrot.lane.b32.xlu1 %v4703_v44, %s5122_s9  ;;  %v4768_v20 = vld [vmem:[%s9095_s0 + $0x28a] sm:$0xff]  ;;  %v4647_v0 = vld [vmem:[%s9095_s0 + $0x2d8] sm:$0xff] }
 0x36c   :  { %2798 = vst.msk [vmem:[#allocation2 + $0xa0] sm:$0xff] %vm2777_vm8, %v2626_v21  ;;  %2799 = vst.msk [vmem:[#allocation2 + $0xa8] sm:$0xff] %vm2777_vm8, %v2628_v55  ;;  %v2640_v16 = vpop.permute.xlu0 %2639 }
 0x36d   :  { %3183 = vst.msk [vmem:[#allocation2 + $0xa0] sm:$0xff] %vm3162_vm9, %v3011_v24  ;;  %3184 = vst.msk [vmem:[#allocation2 + $0xa8] sm:$0xff] %vm3162_vm9, %v3013_v52  ;;  %v3023_v39 = vpop.permute.xlu1 %3022 }
 0x36e   :  { %v3244_v49 = vld [vmem:[#allocation2 + $0x88] sm:$0xff]  ;;  %2415 = vst.msk [vmem:[#allocation2 + $0xb0] sm:$0xff] %vm2392_vm7, %v2245_v42  ;;  %2416 = vst.msk [vmem:[#allocation2 + $0xb8] sm:$0xff] %vm2392_vm7, %v2247_v50  ;;  %3058 = vrot.lane.b32.xlu0 %v4766_v6, %s5123_s13 }
 0x36f   :  { %5020 = vmatmul.mubr.msk.f32.gmra.mrb[16].mxu0 %vm3303_vm10, %v3244_v49  ;;  %2800 = vst.msk [vmem:[#allocation2 + $0xb0] sm:$0xff] %vm2777_vm8, %v2630_v43  ;;  %2801 = vst.msk [vmem:[#allocation2 + $0xb8] sm:$0xff] %vm2777_vm8, %v2632_v53  ;;  %1906 = vrot.lane.b32.xlu1 %v4766_v6, %s5120_s15  ;;  %v4711_v6 = vld [vmem:[%s9095_s0 + $0x2d9] sm:$0xff] }
 0x370   :  { %3185 = vst.msk [vmem:[#allocation2 + $0xb0] sm:$0xff] %vm3162_vm9, %v3015_v57  ;;  %3186 = vst.msk [vmem:[#allocation2 + $0xb8] sm:$0xff] %vm3162_vm9, %v3017_v2  ;;  %v3025_v60 = vpop.permute.xlu0 %3024 }
 0x371   :  { %v3245_v23 = vld [vmem:[#allocation2 + $0x90] sm:$0xff]  ;;  %v3246_v32 = vld [vmem:[#allocation2 + $0x98] sm:$0xff]  ;;  %2417 = vst.msk [vmem:[#allocation2 + $0xc0] sm:$0xff] %vm2392_vm7, %v2249_v26  ;;  %2418 = vst.msk [vmem:[#allocation2 + $0xc8] sm:$0xff] %vm2392_vm7, %v2251_v58  ;;  %v2257_v40 = vpop.permute.xlu1 %2256 }
 0x372   :  { %5022 = vmatprep.mubr.msk.f32.mxu0 %vm3303_vm10, %v3245_v23  ;;  %2802 = vst.msk [vmem:[#allocation2 + $0xc0] sm:$0xff] %vm2777_vm8, %v2634_v5  ;;  %2803 = vst.msk [vmem:[#allocation2 + $0xc8] sm:$0xff] %vm2777_vm8, %v2636_v27  ;;  %3060 = vrot.lane.b32.xlu0 %v4767_v7, %s5123_s13  ;;  %v4708_v26 = vld [vmem:[%s9095_s0 + $0x2b9] sm:$0xff] }
 0x373   :  { %5023 = vmatmul.mubr.msk.f32.gmra.mrb[18].mxu0 %vm3303_vm10, %v3246_v32  ;;  %3187 = vst.msk [vmem:[#allocation2 + $0xc0] sm:$0xff] %vm3162_vm9, %v3019_v59  ;;  %3188 = vst.msk [vmem:[#allocation2 + $0xc8] sm:$0xff] %vm3162_vm9, %v3021_v34  ;;  %1908 = vrot.lane.b32.xlu1 %v4767_v7, %s5120_s15  ;;  %v4774_v7 = vld [vmem:[%s9095_s0 + $0x2d2] sm:$0xff] }
 0x374   :  { %v3247_v56 = vld [vmem:[#allocation2 + $0xa0] sm:$0xff]  ;;  %v3248_v4 = vld [vmem:[#allocation2 + $0xa8] sm:$0xff]  ;;  %2419 = vst.msk [vmem:[#allocation2 + $0xd0] sm:$0xff] %vm2392_vm7, %v2253_v36  ;;  %2420 = vst.msk [vmem:[#allocation2 + $0xd8] sm:$0xff] %vm2392_vm7, %v2255_v38  ;;  %v2259_v48 = vpop.permute.xlu0 %2258 }
 0x375   :  { %5025 = vmatprep.mubr.msk.f32.mxu0 %vm3303_vm10, %v3247_v56  ;;  %2804 = vst.msk [vmem:[#allocation2 + $0xd0] sm:$0xff] %vm2777_vm8, %v2638_v15  ;;  %2805 = vst.msk [vmem:[#allocation2 + $0xd8] sm:$0xff] %vm2777_vm8, %v2640_v16  ;;  %v2642_v28 = vpop.permute.xlu1 %2641  ;;  %v4646_v36 = vld [vmem:[%s9095_s0 + $0x2d0] sm:$0xff] }
 0x376   :  { %3189 = vst.msk [vmem:[#allocation2 + $0xd0] sm:$0xff] %vm3162_vm9, %v3023_v39  ;;  %3190 = vst.msk [vmem:[#allocation2 + $0xd8] sm:$0xff] %vm3162_vm9, %v3025_v60  ;;  %2292 = vrot.lane.b32.xlu0 %v4640_v41, %s5121_s6  ;;  %v8370_v41 = vld [vmem:[%s9098_s2] ss:$0 sm:$0xff] }
 0x377   :  { %5026 = vmatmul.mubr.msk.f32.gmra.mrb[20].mxu0 %vm3303_vm10, %v3248_v4  ;;  %v3249_v3 = vld [vmem:[#allocation2 + $0xb0] sm:$0xff]  ;;  %v3250_v12 = vld [vmem:[#allocation2 + $0xb8] sm:$0xff]  ;;  %2421 = vst.msk [vmem:[#allocation2 + $0xe0] sm:$0xff] %vm2392_vm7, %v2257_v40  ;;  %2422 = vst.msk [vmem:[#allocation2 + $0xe8] sm:$0xff] %vm2392_vm7, %v2259_v48  ;;  %2294 = vrot.lane.b32.xlu1 %v4641_v8, %s5121_s6 }
 0x378   :  { %5028 = vmatprep.mubr.msk.f32.mxu0 %vm3303_vm10, %v3249_v3  ;;  %2806 = vst.msk [vmem:[#allocation2 + $0xe0] sm:$0xff] %vm2777_vm8, %v2642_v28  ;;  %v2644_v49 = vpop.permute.xlu0 %2643  ;;  %v4644_v4 = vld [vmem:[%s9095_s0 + $0x2b8] sm:$0xff] }
 0x379   :  { %v3027_v9 = vpop.permute.xlu1 %3026  ;;  %2807 = vst.msk [vmem:[#allocation2 + $0xe8] sm:$0xff] %vm2777_vm8, %v2644_v49  ;;  %v4775_v8 = vld [vmem:[%s9095_s0 + $0x2da] sm:$0xff] }
 0x37a   :  { %v3251_v37 = vld [vmem:[#allocation2 + $0xc0] sm:$0xff]  ;;  %v3252_v1 = vld [vmem:[#allocation2 + $0xc8] sm:$0xff]  ;;  %3191 = vst.msk [vmem:[#allocation2 + $0xe0] sm:$0xff] %vm3162_vm9, %v3027_v9  ;;  %2677 = vrot.lane.b32.xlu0 %v4704_v13, %s5122_s9 }
 0x37b   :  { %5029 = vmatmul.mubr.msk.f32.gmra.mrb[22].mxu0 %vm3303_vm10, %v3250_v12  ;;  %2679 = vrot.lane.b32.xlu1 %v4705_v29, %s5122_s9  ;;  %4060 = vst.msk [vmem:[%s9099_s4] sm:$0xff] %vm3885_vm11, %v5124_v45 }
 0x37c   :  { %5031 = vmatprep.mubr.msk.f32.mxu0 %vm3303_vm10, %v3251_v37  ;;  %v3029_v46 = vpop.permute.xlu0 %3028  ;;  %v4710_v37 = vld [vmem:[%s9095_s0 + $0x2d1] sm:$0xff] }
 0x37d   :  { %v3253_v61 = vld [vmem:[#allocation2 + $0xd0] sm:$0xff]  ;;  %v3254_v17 = vld [vmem:[#allocation2 + $0xd8] sm:$0xff]  ;;  %v2261_v47 = vpop.permute.xlu1 %2260  ;;  %3192 = vst.msk [vmem:[#allocation2 + $0xe8] sm:$0xff] %vm3162_vm9, %v3029_v46  ;;  %v4648_v46 = vld [vmem:[%s9095_s0 + $0x2e8] sm:$0xff] }
 0x37e   :  { %2423 = vst.msk [vmem:[#allocation2 + $0xf0] sm:$0xff] %vm2392_vm7, %v2261_v47  ;;  %3062 = vrot.lane.b32.xlu0 %v4768_v20, %s5123_s13  ;;  %v4649_v47 = vld [vmem:[%s9095_s0 + $0x2f0] sm:$0xff] }
 0x37f   :  { %5032 = vmatmul.mubr.msk.f32.gmra.mrb[24].mxu0 %vm3303_vm10, %v3252_v1  ;;  %1910 = vrot.lane.b32.xlu1 %v4768_v20, %s5120_s15 }
 0x380   :  { %5034 = vmatprep.mubr.msk.f32.mxu0 %vm3303_vm10, %v3253_v61  ;;  %v2263_v10 = vpop.permute.xlu0 %2262 }
 0x381   :  { %v2646_v21 = vpop.permute.xlu1 %2645  ;;  %v3255_v23 = vld [vmem:[#allocation2 + $0xe0] sm:$0xff]  ;;  %2424 = vst.msk [vmem:[#allocation2 + $0xf8] sm:$0xff] %vm2392_vm7, %v2263_v10 }
 0x382   :  { %2808 = vst.msk [vmem:[#allocation2 + $0xf0] sm:$0xff] %vm2777_vm8, %v2646_v21  ;;  %3064 = vrot.lane.b32.xlu0 %v4769_v11, %s5123_s13 }
 0x383   :  { %5035 = vmatmul.mubr.msk.f32.gmra.mrb[26].mxu0 %vm3303_vm10, %v3254_v17  ;;  %1912 = vrot.lane.b32.xlu1 %v4769_v11, %s5120_s15 }
 0x384   :  { %5037 = vmatprep.mubr.msk.f32.mxu0 %vm3303_vm10, %v3255_v23  ;;  %v2648_v55 = vpop.permute.xlu0 %2647  ;;  %v3256_v32 = vld [vmem:[#allocation2 + $0xe8] sm:$0xff] }
 0x385   :  { %v3031_v24 = vpop.permute.xlu1 %3030  ;;  %2809 = vst.msk [vmem:[#allocation2 + $0xf8] sm:$0xff] %vm2777_vm8, %v2648_v55 }
 0x386   :  { %3193 = vst.msk [vmem:[#allocation2 + $0xf0] sm:$0xff] %vm3162_vm9, %v3031_v24  ;;  %2296 = vrot.lane.b32.xlu0 %v4642_v22, %s5121_s6 }
 0x387   :  { %5038 = vmatmul.mubr.msk.f32.gmra.mrb[28].mxu0 %vm3303_vm10, %v3256_v32  ;;  %2298 = vrot.lane.b32.xlu1 %v4643_v54, %s5121_s6 }
 0x388   :  { %v3033_v52 = vpop.permute.xlu0 %3032 }
 0x389   :  { %v2265_v42 = vpop.permute.xlu1 %2264  ;;  %3194 = vst.msk [vmem:[#allocation2 + $0xf8] sm:$0xff] %vm3162_vm9, %v3033_v52 }
 0x38a   :  { %2425 = vst.msk [vmem:[#allocation2 + $0x100] sm:$0xff] %vm2392_vm7, %v2265_v42  ;;  %2681 = vrot.lane.b32.xlu0 %v4706_v33, %s5122_s9  ;;  %v4712_v33 = vld [vmem:[%s9095_s0 + $0x2e9] sm:$0xff] }
 0x38b   :  { %2683 = vrot.lane.b32.xlu1 %v4707_v25, %s5122_s9  ;;  %v4713_v25 = vld [vmem:[%s9095_s0 + $0x2f1] sm:$0xff] }
 0x38c   :  { %v2267_v50 = vpop.permute.xlu0 %2266 }
 0x38d   :  { %v2650_v43 = vpop.permute.xlu1 %2649  ;;  %v3257_v56 = vld [vmem:[#allocation2 + $0xf0] sm:$0xff]  ;;  %2426 = vst.msk [vmem:[#allocation2 + $0x108] sm:$0xff] %vm2392_vm7, %v2267_v50 }
 0x38e   :  { %2810 = vst.msk [vmem:[#allocation2 + $0x100] sm:$0xff] %vm2777_vm8, %v2650_v43  ;;  %5040 = vmatprep.mubr.msk.f32.mxu0 %vm3303_vm10, %v3257_v56  ;;  %3066 = vrot.lane.b32.xlu0 %v4770_v18, %s5123_s13 }
 0x38f   :  { %1914 = vrot.lane.b32.xlu1 %v4770_v18, %s5120_s15  ;;  %v4776_v18 = vld [vmem:[%s9095_s0 + $0x2ea] sm:$0xff] }
 0x390   :  { %v2652_v19 = vpop.permute.xlu0 %2651  ;;  %v3258_v57 = vld [vmem:[#allocation2 + $0xf8] sm:$0xff] }
 0x391   :  { %v3035_v53 = vpop.permute.xlu1 %3034  ;;  %2811 = vst.msk [vmem:[#allocation2 + $0x108] sm:$0xff] %vm2777_vm8, %v2652_v19  ;;  %5041 = vmatmul.mubr.msk.f32.gmra.mrb[30].mxu0 %vm3303_vm10, %v3258_v57 }
 0x392   :  { %3195 = vst.msk [vmem:[#allocation2 + $0x100] sm:$0xff] %vm3162_vm9, %v3035_v53  ;;  %3068 = vrot.lane.b32.xlu0 %v4771_v51, %s5123_s13 }
 0x393   :  { %1916 = vrot.lane.b32.xlu1 %v4771_v51, %s5120_s15 }
 0x394   :  { %v3037_v31 = vpop.permute.xlu0 %3036 }
 0x395   :  { %v2269_v2 = vpop.permute.xlu1 %2268  ;;  %3196 = vst.msk [vmem:[#allocation2 + $0x108] sm:$0xff] %vm3162_vm9, %v3037_v31 }
 0x396   :  { %2427 = vst.msk [vmem:[#allocation2 + $0x110] sm:$0xff] %vm2392_vm7, %v2269_v2  ;;  %2300 = vrot.lane.b32.xlu0 %v4644_v4, %s5121_s6  ;;  %v4777_v4 = vld [vmem:[%s9095_s0 + $0x2f2] sm:$0xff] }
 0x397   :  { %2302 = vrot.lane.b32.xlu1 %v4645_v30, %s5121_s6 }
 0x398   :  { %v2271_v58 = vpop.permute.xlu0 %2270 }
 0x399   :  { %v2654_v5 = vpop.permute.xlu1 %2653  ;;  %v3259_v3 = vld [vmem:[#allocation2 + $0x100] sm:$0xff]  ;;  %2428 = vst.msk [vmem:[#allocation2 + $0x118] sm:$0xff] %vm2392_vm7, %v2271_v58 }
 0x39a   :  { %2812 = vst.msk [vmem:[#allocation2 + $0x110] sm:$0xff] %vm2777_vm8, %v2654_v5  ;;  %5043 = vmatprep.mubr.msk.f32.mxu1 %vm3303_vm10, %v3259_v3  ;;  %2685 = vrot.lane.b32.xlu0 %v4708_v26, %s5122_s9 }
 0x39b   :  { %2687 = vrot.lane.b32.xlu1 %v4709_v62, %s5122_s9 }
 0x39c   :  { %v2656_v27 = vpop.permute.xlu0 %2655  ;;  %v3260_v12 = vld [vmem:[#allocation2 + $0x108] sm:$0xff] }
 0x39d   :  { %v3039_v59 = vpop.permute.xlu1 %3038  ;;  %2813 = vst.msk [vmem:[#allocation2 + $0x118] sm:$0xff] %vm2777_vm8, %v2656_v27  ;;  %5044 = vmatmul.mubr.msk.f32.vlgmr.msra.gmra.mrb[0].mxu1 %vm3303_vm10, %v3260_v12 }
 0x39e   :  { %3197 = vst.msk [vmem:[#allocation2 + $0x110] sm:$0xff] %vm3162_vm9, %v3039_v59  ;;  %3070 = vrot.lane.b32.xlu0 %v4772_v63, %s5123_s13  ;;  %v4650_v59 = vld [vmem:[%s9095_s0 + $0x300] sm:$0xff] }
 0x39f   :  { %1918 = vrot.lane.b32.xlu1 %v4772_v63, %s5120_s15 }
 0x3a0   :  { %v3041_v35 = vpop.permute.xlu0 %3040 }
 0x3a1   :  { %v2273_v34 = vpop.permute.xlu1 %2272  ;;  %3198 = vst.msk [vmem:[#allocation2 + $0x118] sm:$0xff] %vm3162_vm9, %v3041_v35 }
 0x3a2   :  { %2429 = vst.msk [vmem:[#allocation2 + $0x120] sm:$0xff] %vm2392_vm7, %v2273_v34  ;;  %3072 = vrot.lane.b32.xlu0 %v4773_v14, %s5123_s13  ;;  %v4651_v34 = vld [vmem:[%s9095_s0 + $0x308] sm:$0xff] }
 0x3a3   :  { %1920 = vrot.lane.b32.xlu1 %v4773_v14, %s5120_s15 }
 0x3a4   :  { %v2275_v44 = vpop.permute.xlu0 %2274 }
 0x3a5   :  { %v2658_v38 = vpop.permute.xlu1 %2657  ;;  %v3261_v15 = vld [vmem:[#allocation2 + $0x110] sm:$0xff]  ;;  %2430 = vst.msk [vmem:[#allocation2 + $0x128] sm:$0xff] %vm2392_vm7, %v2275_v44  ;;  %v4714_v44 = vld [vmem:[%s9095_s0 + $0x301] sm:$0xff] }
 0x3a6   :  { %2814 = vst.msk [vmem:[#allocation2 + $0x120] sm:$0xff] %vm2777_vm8, %v2658_v38  ;;  %5046 = vmatprep.mubr.msk.f32.mxu1 %vm3303_vm10, %v3261_v15  ;;  %2304 = vrot.lane.b32.xlu0 %v4646_v36, %s5121_s6 }
 0x3a7   :  { %2306 = vrot.lane.b32.xlu1 %v4647_v0, %s5121_s6 }
 0x3a8   :  { %v2660_v16 = vpop.permute.xlu0 %2659  ;;  %v3262_v1 = vld [vmem:[#allocation2 + $0x118] sm:$0xff] }
 0x3a9   :  { %v3043_v39 = vpop.permute.xlu1 %3042  ;;  %2815 = vst.msk [vmem:[#allocation2 + $0x128] sm:$0xff] %vm2777_vm8, %v2660_v16  ;;  %5047 = vmatmul.mubr.msk.f32.gmra.mrb[2].mxu1 %vm3303_vm10, %v3262_v1 }
 0x3aa   :  { %3199 = vst.msk [vmem:[#allocation2 + $0x120] sm:$0xff] %vm3162_vm9, %v3043_v39  ;;  %2689 = vrot.lane.b32.xlu0 %v4710_v37, %s5122_s9  ;;  %v4715_v37 = vld [vmem:[%s9095_s0 + $0x309] sm:$0xff] }
 0x3ab   :  { %2691 = vrot.lane.b32.xlu1 %v4711_v6, %s5122_s9 }
 0x3ac   :  { %v3045_v60 = vpop.permute.xlu0 %3044 }
 0x3ad   :  { %v2277_v40 = vpop.permute.xlu1 %2276  ;;  %3200 = vst.msk [vmem:[#allocation2 + $0x128] sm:$0xff] %vm3162_vm9, %v3045_v60  ;;  %v4778_v60 = vld [vmem:[%s9095_s0 + $0x302] sm:$0xff] }
 0x3ae   :  { %2431 = vst.msk [vmem:[#allocation2 + $0x130] sm:$0xff] %vm2392_vm7, %v2277_v40  ;;  %3074 = vrot.lane.b32.xlu0 %v4774_v7, %s5123_s13 }
 0x3af   :  { %1922 = vrot.lane.b32.xlu1 %v4774_v7, %s5120_s15 }
 0x3b0   :  { %v2279_v48 = vpop.permute.xlu0 %2278  ;;  %v4997_v28 = vpop.f32.mrb[0].mxu0 }
 0x3b1   :  { %v3263_v61 = vld [vmem:[#allocation2 + $0x120] sm:$0xff]  ;;  %2432 = vst.msk [vmem:[#allocation2 + $0x138] sm:$0xff] %vm2392_vm7, %v2279_v48  ;;  %v3572_v13 = vadd.f32 %v4997_v28, %v8370_v41  ;;  %v2662_v29 = vpop.permute.xlu1 %2661  ;;  %v3566_v49 = vpop.f32.mrb[1].mxu0 }
 0x3b2   :  { %5049 = vmatprep.mubr.msk.f32.mxu1 %vm3303_vm10, %v3263_v61  ;;  %2816 = vst.msk [vmem:[#allocation2 + $0x130] sm:$0xff] %vm2777_vm8, %v2662_v29  ;;  %v3567_v9 = vadd.f32 %v8370_v41, %v3566_v49  ;;  %3076 = vrot.lane.b32.xlu0 %v4775_v8, %s5123_s13 }
 0x3b3   :  { %1924 = vrot.lane.b32.xlu1 %v4775_v8, %s5120_s15  ;;  %4853 = vst.msk [vmem:[%s9097_s3 + $0x21] sm:$0xff] %vm3885_vm11, %v3572_v13  ;;  %v4062_v17 = vsel %vm3885_vm11, %v3572_v13, 0.0  ;;  %v4197_v20 = vmul.f32 %v3572_v13, %v3572_v13 }
 0x3b4   :  { %4852 = vst.msk [vmem:[%s9097_s3 + $0x19] sm:$0xff] %vm3885_vm11, %v3567_v9  ;;  %v4061_v11 = vsel %vm3885_vm11, %v3567_v9, 0.0  ;;  %v4196_v10 = vmul.f32 %v3567_v9, %v3567_v9  ;;  %v2664_v21 = vpop.permute.xlu0 %2663  ;;  %v3264_v23 = vld [vmem:[#allocation2 + $0x128] sm:$0xff] }
 0x3b5   :  { %v4261_v22 = vsel %vm3885_vm11, %v4197_v20, 0.0  ;;  %v4063_v54 = vadd.f32 %v4062_v17, %v4061_v11  ;;  %2817 = vst.msk [vmem:[#allocation2 + $0x138] sm:$0xff] %vm2777_vm8, %v2664_v21  ;;  %v3047_v55 = vpop.permute.xlu1 %3046  ;;  %5050 = vmatmul.mubr.msk.f32.gmra.mrb[4].mxu1 %vm3303_vm10, %v3264_v23  ;;  %v4779_v20 = vld [vmem:[%s9095_s0 + $0x30a] sm:$0xff]  ;;  %v4652_v23 = vld [vmem:[%s9095_s0 + $0x318] sm:$0xff] }
 0x3b6   :  { %v4260_v24 = vsel %vm3885_vm11, %v4196_v10, 0.0  ;;  %3201 = vst.msk [vmem:[#allocation2 + $0x130] sm:$0xff] %vm3162_vm9, %v3047_v55  ;;  %2308 = vrot.lane.b32.xlu0 %v4648_v46, %s5121_s6  ;;  %v4653_v55 = vld [vmem:[%s9095_s0 + $0x320] sm:$0xff] }
 0x3b7   :  { %2310 = vrot.lane.b32.xlu1 %v4649_v47, %s5121_s6  ;;  %v4262_v32 = vadd.f32 %v4261_v22, %v4260_v24 }
 0x3b8   :  { %v3049_v52 = vpop.permute.xlu0 %3048 }
 0x3b9   :  { %3202 = vst.msk [vmem:[#allocation2 + $0x138] sm:$0xff] %vm3162_vm9, %v3049_v52  ;;  %v2281_v42 = vpop.permute.xlu1 %2280  ;;  %v4716_v52 = vld [vmem:[%s9095_s0 + $0x319] sm:$0xff] }
 0x3ba   :  { %2433 = vst.msk [vmem:[#allocation2 + $0x140] sm:$0xff] %vm2392_vm7, %v2281_v42  ;;  %2693 = vrot.lane.b32.xlu0 %v4712_v33, %s5122_s9 }
 0x3bb   :  { %2695 = vrot.lane.b32.xlu1 %v4713_v25, %s5122_s9 }
 0x3bc   :  { %v2283_v50 = vpop.permute.xlu0 %2282  ;;  %v5000_v43 = vpop.f32.mrb[2].mxu0 }
 0x3bd   :  { %2434 = vst.msk [vmem:[#allocation2 + $0x148] sm:$0xff] %vm2392_vm7, %v2283_v50  ;;  %v3582_v56 = vadd.f32 %v5000_v43, %v8370_v41  ;;  %v2666_v51 = vpop.permute.xlu1 %2665  ;;  %v3576_v19 = vpop.f32.mrb[3].mxu0  ;;  %v3265_v53 = vld [vmem:[#allocation2 + $0x130] sm:$0xff] }
 0x3be   :  { %2818 = vst.msk [vmem:[#allocation2 + $0x140] sm:$0xff] %vm2777_vm8, %v2666_v51  ;;  %v3577_v57 = vadd.f32 %v8370_v41, %v3576_v19  ;;  %3078 = vrot.lane.b32.xlu0 %v4776_v18, %s5123_s13  ;;  %5052 = vmatprep.mubr.msk.f32.mxu1 %vm3303_vm10, %v3265_v53  ;;  %v4717_v51 = vld [vmem:[%s9095_s0 + $0x321] sm:$0xff] }
 0x3bf   :  { %4855 = vst.msk [vmem:[%s9097_s3 + $0x39] sm:$0xff] %vm3885_vm11, %v3582_v56  ;;  %1926 = vrot.lane.b32.xlu1 %v4776_v18, %s5120_s15  ;;  %v4199_v30 = vmul.f32 %v3582_v56, %v3582_v56  ;;  %v4066_v3 = vsel %vm3885_vm11, %v3582_v56, 0.0 }
 0x3c0   :  { %4854 = vst.msk [vmem:[%s9097_s3 + $0x31] sm:$0xff] %vm3885_vm11, %v3577_v57  ;;  %v4064_v31 = vsel %vm3885_vm11, %v3577_v57, 0.0  ;;  %v4198_v2 = vmul.f32 %v3577_v57, %v3577_v57  ;;  %v2668_v26 = vpop.permute.xlu0 %2667  ;;  %v3266_v62 = vld [vmem:[#allocation2 + $0x138] sm:$0xff] }
 0x3c1   :  { %v4065_v58 = vadd.f32 %v4064_v31, %v4063_v54  ;;  %2819 = vst.msk [vmem:[#allocation2 + $0x148] sm:$0xff] %vm2777_vm8, %v2668_v26  ;;  %v3051_v5 = vpop.permute.xlu1 %3050  ;;  %5053 = vmatmul.mubr.msk.f32.gmra.mrb[6].mxu1 %vm3303_vm10, %v3266_v62  ;;  %v4265_v14 = vsel %vm3885_vm11, %v4199_v30, 0.0  ;;  %v4780_v31 = vld [vmem:[%s9095_s0 + $0x31a] sm:$0xff] }
 0x3c2   :  { %v4263_v63 = vsel %vm3885_vm11, %v4198_v2, 0.0  ;;  %3203 = vst.msk [vmem:[#allocation2 + $0x140] sm:$0xff] %vm3162_vm9, %v3051_v5  ;;  %3080 = vrot.lane.b32.xlu0 %v4777_v4, %s5123_s13 }
 0x3c3   :  { %v4264_v27 = vadd.f32 %v4263_v63, %v4262_v32  ;;  %1928 = vrot.lane.b32.xlu1 %v4777_v4, %s5120_s15  ;;  %v4067_v12 = vadd.f32 %v4066_v3, %v4065_v58  ;;  %v4781_v63 = vld [vmem:[%s9095_s0 + $0x322] sm:$0xff] }
 0x3c4   :  { %v3053_v35 = vpop.permute.xlu0 %3052 }
 0x3c5   :  { %3204 = vst.msk [vmem:[#allocation2 + $0x148] sm:$0xff] %vm3162_vm9, %v3053_v35  ;;  %v1901_v36 = vpop.permute.xlu1 %1900  ;;  %v4266_v0 = vadd.f32 %v4265_v14, %v4264_v27 }
 0x3c6   :  { %2050 = vst.msk [vmem:[#allocation2 + $0x158] sm:$0xff] %vm2006_vm6, %v1901_v36  ;;  %2312 = vrot.lane.b32.xlu0 %v4650_v59, %s5121_s6  ;;  %v4654_v36 = vld [vmem:[%s9095_s0 + $0x330] sm:$0xff] }
 0x3c7   :  { %2314 = vrot.lane.b32.xlu1 %v4651_v34, %s5121_s6 }
 0x3c8   :  { %v2285_v38 = vpop.permute.xlu0 %2284  ;;  %v5003_v15 = vpop.f32.mrb[4].mxu0 }
 0x3c9   :  { %2435 = vst.msk [vmem:[#allocation2 + $0x150] sm:$0xff] %vm2392_vm7, %v2285_v38  ;;  %v3592_v6 = vadd.f32 %v5003_v15, %v8370_v41  ;;  %v2287_v16 = vpop.permute.xlu1 %2286  ;;  %v3586_v39 = vpop.f32.mrb[5].mxu0  ;;  %v3267_v1 = vld [vmem:[#allocation2 + $0x140] sm:$0xff] }
 0x3ca   :  { %2436 = vst.msk [vmem:[#allocation2 + $0x158] sm:$0xff] %vm2392_vm7, %v2287_v16  ;;  %v3587_v7 = vadd.f32 %v8370_v41, %v3586_v39  ;;  %2697 = vrot.lane.b32.xlu0 %v4714_v44, %s5122_s9  ;;  %5055 = vmatprep.mubr.msk.f32.mxu1 %vm3303_vm10, %v3267_v1 }
 0x3cb   :  { %4857 = vst.msk [vmem:[%s9097_s3 + $0x51] sm:$0xff] %vm3885_vm11, %v3592_v6  ;;  %2699 = vrot.lane.b32.xlu1 %v4715_v37, %s5122_s9  ;;  %v4201_v40 = vmul.f32 %v3592_v6, %v3592_v6  ;;  %v4070_v49 = vsel %vm3885_vm11, %v3592_v6, 0.0  ;;  %v4655_v37 = vld [vmem:[%s9095_s0 + $0x338] sm:$0xff] }
 0x3cc   :  { %4856 = vst.msk [vmem:[%s9097_s3 + $0x49] sm:$0xff] %vm3885_vm11, %v3587_v7  ;;  %v4068_v8 = vsel %vm3885_vm11, %v3587_v7, 0.0  ;;  %v4200_v48 = vmul.f32 %v3587_v7, %v3587_v7  ;;  %v2670_v28 = vpop.permute.xlu0 %2669  ;;  %v3268_v61 = vld [vmem:[#allocation2 + $0x148] sm:$0xff] }
 0x3cd   :  { %v4069_v13 = vadd.f32 %v4068_v8, %v4067_v12  ;;  %2820 = vst.msk [vmem:[#allocation2 + $0x150] sm:$0xff] %vm2777_vm8, %v2670_v28  ;;  %v2672_v29 = vpop.permute.xlu1 %2671  ;;  %5056 = vmatmul.mubr.msk.f32.gmra.mrb[8].mxu1 %vm3303_vm10, %v3268_v61  ;;  %v4269_v47 = vsel %vm3885_vm11, %v4201_v40, 0.0  ;;  %v4719_v61 = vld [vmem:[%s9095_s0 + $0x339] sm:$0xff] }
 0x3ce   :  { %v4267_v9 = vsel %vm3885_vm11, %v4200_v48, 0.0  ;;  %2821 = vst.msk [vmem:[#allocation2 + $0x158] sm:$0xff] %vm2777_vm8, %v2672_v29  ;;  %3082 = vrot.lane.b32.xlu0 %v4778_v60, %s5123_s13 }
 0x3cf   :  { %v4268_v17 = vadd.f32 %v4267_v9, %v4266_v0  ;;  %1930 = vrot.lane.b32.xlu1 %v4778_v60, %s5120_s15  ;;  %v4071_v46 = vadd.f32 %v4070_v49, %v4069_v13  ;;  %v4718_v60 = vld [vmem:[%s9095_s0 + $0x331] sm:$0xff] }
 0x3d0   :  { %v3055_v11 = vpop.permute.xlu0 %3054  ;;  %v4782_v49 = vld [vmem:[%s9095_s0 + $0x332] sm:$0xff] }
 0x3d1   :  { %3205 = vst.msk [vmem:[#allocation2 + $0x150] sm:$0xff] %vm3162_vm9, %v3055_v11  ;;  %v1903_v10 = vpop.permute.xlu1 %1902  ;;  %v4270_v21 = vadd.f32 %v4269_v47, %v4268_v17 }
 0x3d2   :  { %2051 = vst.msk [vmem:[#allocation2 + $0x160] sm:$0xff] %vm2006_vm6, %v1903_v10  ;;  %3084 = vrot.lane.b32.xlu0 %v4779_v20, %s5123_s13 }
 0x3d3   :  { %1932 = vrot.lane.b32.xlu1 %v4779_v20, %s5120_s15 }
 0x3d4   :  { %v3057_v22 = vpop.permute.xlu0 %3056  ;;  %v5006_v54 = vpop.f32.mrb[6].mxu0 }
 0x3d5   :  { %3206 = vst.msk [vmem:[#allocation2 + $0x158] sm:$0xff] %vm3162_vm9, %v3057_v22  ;;  %v3602_v24 = vadd.f32 %v5006_v54, %v8370_v41  ;;  %v1905_v32 = vpop.permute.xlu1 %1904  ;;  %v3596_v33 = vpop.f32.mrb[7].mxu0 }
 0x3d6   :  { %2052 = vst.msk [vmem:[#allocation2 + $0x168] sm:$0xff] %vm2006_vm6, %v1905_v32  ;;  %v3597_v25 = vadd.f32 %v8370_v41, %v3596_v33  ;;  %2316 = vrot.lane.b32.xlu0 %v4652_v23, %s5121_s6 }
 0x3d7   :  { %4859 = vst.msk [vmem:[%s9097_s3 + $0x69] sm:$0xff] %vm3885_vm11, %v3602_v24  ;;  %2318 = vrot.lane.b32.xlu1 %v4653_v55, %s5121_s6  ;;  %v4203_v42 = vmul.f32 %v3602_v24, %v3602_v24  ;;  %v4074_v57 = vsel %vm3885_vm11, %v3602_v24, 0.0 }
 0x3d8   :  { %4858 = vst.msk [vmem:[%s9097_s3 + $0x61] sm:$0xff] %vm3885_vm11, %v3597_v25  ;;  %v4072_v18 = vsel %vm3885_vm11, %v3597_v25, 0.0  ;;  %v4202_v50 = vmul.f32 %v3597_v25, %v3597_v25  ;;  %v2289_v43 = vpop.permute.xlu0 %2288  ;;  %v3269_v56 = vld [vmem:[#allocation2 + $0x150] sm:$0xff] }
 0x3d9   :  { %v4073_v19 = vadd.f32 %v4072_v18, %v4071_v46  ;;  %2437 = vst.msk [vmem:[#allocation2 + $0x160] sm:$0xff] %vm2392_vm7, %v2289_v43  ;;  %v2291_v53 = vpop.permute.xlu1 %2290  ;;  %5058 = vmatprep.mubr.msk.f32.mxu1 %vm3303_vm10, %v3269_v56  ;;  %v4273_v26 = vsel %vm3885_vm11, %v4203_v42, 0.0  ;;  %v4656_v42 = vld [vmem:[%s9095_s0 + $0x348] sm:$0xff]  ;;  %v4657_v56 = vld [vmem:[%s9095_s0 + $0x350] sm:$0xff] }
 0x3da   :  { %v4271_v4 = vsel %vm3885_vm11, %v4202_v50, 0.0  ;;  %2438 = vst.msk [vmem:[#allocation2 + $0x168] sm:$0xff] %vm2392_vm7, %v2291_v53  ;;  %2701 = vrot.lane.b32.xlu0 %v4716_v52, %s5122_s9  ;;  %v4720_v53 = vld [vmem:[%s9095_s0 + $0x349] sm:$0xff] }
 0x3db   :  { %v4272_v30 = vadd.f32 %v4271_v4, %v4270_v21  ;;  %2703 = vrot.lane.b32.xlu1 %v4717_v51, %s5122_s9  ;;  %v4075_v2 = vadd.f32 %v4074_v57, %v4073_v19  ;;  %v4783_v21 = vld [vmem:[%s9095_s0 + $0x33a] sm:$0xff] }
 0x3dc   :  { %v2674_v62 = vpop.permute.xlu0 %2673  ;;  %v3270_v58 = vld [vmem:[#allocation2 + $0x158] sm:$0xff] }
 0x3dd   :  { %2822 = vst.msk [vmem:[#allocation2 + $0x160] sm:$0xff] %vm2777_vm8, %v2674_v62  ;;  %v2676_v5 = vpop.permute.xlu1 %2675  ;;  %5059 = vmatmul.mubr.msk.f32.gmra.mrb[10].mxu1 %vm3303_vm10, %v3270_v58  ;;  %v4274_v3 = vadd.f32 %v4273_v26, %v4272_v30 }
 0x3de   :  { %2823 = vst.msk [vmem:[#allocation2 + $0x168] sm:$0xff] %vm2777_vm8, %v2676_v5  ;;  %3086 = vrot.lane.b32.xlu0 %v4780_v31, %s5123_s13  ;;  %v4784_v5 = vld [vmem:[%s9095_s0 + $0x34a] sm:$0xff] }
 0x3df   :  { %1934 = vrot.lane.b32.xlu1 %v4780_v31, %s5120_s15  ;;  %v4721_v31 = vld [vmem:[%s9095_s0 + $0x351] sm:$0xff] }
 0x3e0   :  { %v3059_v27 = vpop.permute.xlu0 %3058  ;;  %v5009_v59 = vpop.f32.mrb[8].mxu0 }
 0x3e1   :  { %3207 = vst.msk [vmem:[#allocation2 + $0x160] sm:$0xff] %vm3162_vm9, %v3059_v27  ;;  %v3612_v12 = vadd.f32 %v5009_v59, %v8370_v41  ;;  %v1907_v14 = vpop.permute.xlu1 %1906  ;;  %v3606_v35 = vpop.f32.mrb[9].mxu0 }
 0x3e2   :  { %2053 = vst.msk [vmem:[#allocation2 + $0x170] sm:$0xff] %vm2006_vm6, %v1907_v14  ;;  %v3607_v34 = vadd.f32 %v8370_v41, %v3606_v35  ;;  %3088 = vrot.lane.b32.xlu0 %v4781_v63, %s5123_s13  ;;  %v4785_v14 = vld [vmem:[%s9095_s0 + $0x352] sm:$0xff] }
 0x3e3   :  { %4861 = vst.msk [vmem:[%s9097_s3 + $0x81] sm:$0xff] %vm3885_vm11, %v3612_v12  ;;  %1936 = vrot.lane.b32.xlu1 %v4781_v63, %s5120_s15  ;;  %v4205_v0 = vmul.f32 %v3612_v12, %v3612_v12  ;;  %v4078_v39 = vsel %vm3885_vm11, %v3612_v12, 0.0 }
 0x3e4   :  { %4860 = vst.msk [vmem:[%s9097_s3 + $0x79] sm:$0xff] %vm3885_vm11, %v3607_v34  ;;  %v4076_v44 = vsel %vm3885_vm11, %v3607_v34, 0.0  ;;  %v4204_v38 = vmul.f32 %v3607_v34, %v3607_v34  ;;  %v3061_v15 = vpop.permute.xlu0 %3060 }
 0x3e5   :  { %v4077_v6 = vadd.f32 %v4076_v44, %v4075_v2  ;;  %3208 = vst.msk [vmem:[#allocation2 + $0x168] sm:$0xff] %vm3162_vm9, %v3061_v15  ;;  %v1909_v16 = vpop.permute.xlu1 %1908  ;;  %v4277_v8 = vsel %vm3885_vm11, %v4205_v0, 0.0 }
 0x3e6   :  { %v4275_v1 = vsel %vm3885_vm11, %v4204_v38, 0.0  ;;  %2054 = vst.msk [vmem:[#allocation2 + $0x178] sm:$0xff] %vm2006_vm6, %v1909_v16  ;;  %2320 = vrot.lane.b32.xlu0 %v4654_v36, %s5121_s6 }
 0x3e7   :  { %v4276_v7 = vadd.f32 %v4275_v1, %v4274_v3  ;;  %2322 = vrot.lane.b32.xlu1 %v4655_v37, %s5121_s6  ;;  %v4079_v40 = vadd.f32 %v4078_v39, %v4077_v6 }
 0x3e8   :  { %v2293_v48 = vpop.permute.xlu0 %2292  ;;  %v3271_v28 = vld [vmem:[#allocation2 + $0x160] sm:$0xff] }
 0x3e9   :  { %2439 = vst.msk [vmem:[#allocation2 + $0x170] sm:$0xff] %vm2392_vm7, %v2293_v48  ;;  %v2295_v13 = vpop.permute.xlu1 %2294  ;;  %5061 = vmatprep.mubr.msk.f32.mxu1 %vm3303_vm10, %v3271_v28  ;;  %v4278_v29 = vadd.f32 %v4277_v8, %v4276_v7 }
 0x3ea   :  { %2440 = vst.msk [vmem:[#allocation2 + $0x178] sm:$0xff] %vm2392_vm7, %v2295_v13  ;;  %2705 = vrot.lane.b32.xlu0 %v4718_v60, %s5122_s9 }
 0x3eb   :  { %2707 = vrot.lane.b32.xlu1 %v4719_v61, %s5122_s9 }
 0x3ec   :  { %v2678_v9 = vpop.permute.xlu0 %2677  ;;  %v5012_v17 = vpop.f32.mrb[10].mxu0  ;;  %v3272_v20 = vld [vmem:[#allocation2 + $0x168] sm:$0xff] }
 0x3ed   :  { %2824 = vst.msk [vmem:[#allocation2 + $0x170] sm:$0xff] %vm2777_vm8, %v2678_v9  ;;  %v3622_v46 = vadd.f32 %v5012_v17, %v8370_v41  ;;  %v2680_v47 = vpop.permute.xlu1 %2679  ;;  %v3616_v11 = vpop.f32.mrb[11].mxu0  ;;  %5062 = vmatmul.mubr.msk.f32.gmra.mrb[12].mxu1 %vm3303_vm10, %v3272_v20 }
 0x3ee   :  { %2825 = vst.msk [vmem:[#allocation2 + $0x178] sm:$0xff] %vm2777_vm8, %v2680_v47  ;;  %v3617_v10 = vadd.f32 %v8370_v41, %v3616_v11  ;;  %3090 = vrot.lane.b32.xlu0 %v4782_v49, %s5123_s13 }
 0x3ef   :  { %4863 = vst.msk [vmem:[%s9097_s3 + $0x99] sm:$0xff] %vm3885_vm11, %v3622_v46  ;;  %1938 = vrot.lane.b32.xlu1 %v4782_v49, %s5120_s15  ;;  %v4207_v23 = vmul.f32 %v3622_v46, %v3622_v46  ;;  %v4082_v33 = vsel %vm3885_vm11, %v3622_v46, 0.0 }
 0x3f0   :  { %4862 = vst.msk [vmem:[%s9097_s3 + $0x91] sm:$0xff] %vm3885_vm11, %v3617_v10  ;;  %v4080_v22 = vsel %vm3885_vm11, %v3617_v10, 0.0  ;;  %v4206_v54 = vmul.f32 %v3617_v10, %v3617_v10  ;;  %v3063_v55 = vpop.permute.xlu0 %3062 }
 0x3f1   :  { %v4081_v24 = vadd.f32 %v4080_v22, %v4079_v40  ;;  %3209 = vst.msk [vmem:[#allocation2 + $0x170] sm:$0xff] %vm3162_vm9, %v3063_v55  ;;  %v1911_v32 = vpop.permute.xlu1 %1910  ;;  %v4281_v50 = vsel %vm3885_vm11, %v4207_v23, 0.0 }
 0x3f2   :  { %v4279_v25 = vsel %vm3885_vm11, %v4206_v54, 0.0  ;;  %2055 = vst.msk [vmem:[#allocation2 + $0x180] sm:$0xff] %vm2006_vm6, %v1911_v32  ;;  %3092 = vrot.lane.b32.xlu0 %v4783_v21, %s5123_s13 }
 0x3f3   :  { %v4280_v52 = vadd.f32 %v4279_v25, %v4278_v29  ;;  %1940 = vrot.lane.b32.xlu1 %v4783_v21, %s5120_s15  ;;  %v4083_v18 = vadd.f32 %v4082_v33, %v4081_v24 }
 0x3f4   :  { %v3065_v43 = vpop.permute.xlu0 %3064 }
 0x3f5   :  { %3210 = vst.msk [vmem:[#allocation2 + $0x178] sm:$0xff] %vm3162_vm9, %v3065_v43  ;;  %v1913_v51 = vpop.permute.xlu1 %1912  ;;  %v4282_v19 = vadd.f32 %v4281_v50, %v4280_v52 }
 0x3f6   :  { %2056 = vst.msk [vmem:[#allocation2 + $0x188] sm:$0xff] %vm2006_vm6, %v1913_v51  ;;  %2324 = vrot.lane.b32.xlu0 %v4656_v42, %s5121_s6 }
 0x3f7   :  { %2326 = vrot.lane.b32.xlu1 %v4657_v56, %s5121_s6 }
 0x3f8   :  { %v2297_v57 = vpop.permute.xlu0 %2296  ;;  %v5015_v4 = vpop.f32.mrb[12].mxu0  ;;  %v3273_v30 = vld [vmem:[#allocation2 + $0x170] sm:$0xff] }
 0x3f9   :  { %2441 = vst.msk [vmem:[#allocation2 + $0x180] sm:$0xff] %vm2392_vm7, %v2297_v57  ;;  %v3632_v2 = vadd.f32 %v5015_v4, %v8370_v41  ;;  %v2299_v26 = vpop.permute.xlu1 %2298  ;;  %v3626_v62 = vpop.f32.mrb[13].mxu0  ;;  %5064 = vmatprep.mubr.msk.f32.mxu1 %vm3303_vm10, %v3273_v30 }
 0x3fa   :  { %2442 = vst.msk [vmem:[#allocation2 + $0x188] sm:$0xff] %vm2392_vm7, %v2299_v26  ;;  %v3627_v58 = vadd.f32 %v8370_v41, %v3626_v62  ;;  %2709 = vrot.lane.b32.xlu0 %v4720_v53, %s5122_s9 }
 0x3fb   :  { %4865 = vst.msk [vmem:[%s9097_s3 + $0xb1] sm:$0xff] %vm3885_vm11, %v3632_v2  ;;  %2711 = vrot.lane.b32.xlu1 %v4721_v31, %s5122_s9  ;;  %v4209_v3 = vmul.f32 %v3632_v2, %v3632_v2  ;;  %v4086_v36 = vsel %vm3885_vm11, %v3632_v2, 0.0 }
 0x3fc   :  { %4864 = vst.msk [vmem:[%s9097_s3 + $0xa9] sm:$0xff] %vm3885_vm11, %v3627_v58  ;;  %v4084_v63 = vsel %vm3885_vm11, %v3627_v58, 0.0  ;;  %v4208_v27 = vmul.f32 %v3627_v58, %v3627_v58  ;;  %v2682_v59 = vpop.permute.xlu0 %2681  ;;  %v3274_v12 = vld [vmem:[#allocation2 + $0x178] sm:$0xff] }
 0x3fd   :  { %v4085_v35 = vadd.f32 %v4084_v63, %v4083_v18  ;;  %2826 = vst.msk [vmem:[#allocation2 + $0x180] sm:$0xff] %vm2777_vm8, %v2682_v59  ;;  %v2684_v34 = vpop.permute.xlu1 %2683  ;;  %5065 = vmatmul.mubr.msk.f32.gmra.mrb[14].mxu1 %vm3303_vm10, %v3274_v12  ;;  %v4285_v15 = vsel %vm3885_vm11, %v4209_v3, 0.0 }
 0x3fe   :  { %v4283_v0 = vsel %vm3885_vm11, %v4208_v27, 0.0  ;;  %2827 = vst.msk [vmem:[#allocation2 + $0x188] sm:$0xff] %vm2777_vm8, %v2684_v34  ;;  %3094 = vrot.lane.b32.xlu0 %v4784_v5, %s5123_s13 }
 0x3ff   :  { %v4284_v44 = vadd.f32 %v4283_v0, %v4282_v19  ;;  %3096 = vrot.lane.b32.xlu1 %v4785_v14, %s5123_s13  ;;  %v4087_v38 = vadd.f32 %v4086_v36, %v4085_v35 }
 0x400   :  { %v3067_v37 = vpop.permute.xlu0 %3066 }
 0x401   :  { %3211 = vst.msk [vmem:[#allocation2 + $0x180] sm:$0xff] %vm3162_vm9, %v3067_v37  ;;  %v1915_v6 = vpop.permute.xlu1 %1914  ;;  %v4286_v16 = vadd.f32 %v4285_v15, %v4284_v44 }
 0x402   :  { %2057 = vst.msk [vmem:[#allocation2 + $0x190] sm:$0xff] %vm2006_vm6, %v1915_v6 }
 0x404   :  { %v3069_v39 = vpop.permute.xlu0 %3068  ;;  %v5018_v1 = vpop.f32.mrb[14].mxu0 }
 0x405   :  { %3212 = vst.msk [vmem:[#allocation2 + $0x188] sm:$0xff] %vm3162_vm9, %v3069_v39  ;;  %v3642_v7 = vadd.f32 %v5018_v1, %v8370_v41  ;;  %v1917_v60 = vpop.permute.xlu1 %1916  ;;  %v3636_v40 = vpop.f32.mrb[15].mxu0 }
 0x406   :  { %2058 = vst.msk [vmem:[#allocation2 + $0x198] sm:$0xff] %vm2006_vm6, %v1917_v60  ;;  %v3637_v8 = vadd.f32 %v8370_v41, %v3636_v40 }
 0x407   :  { %4867 = vst.msk [vmem:[%s9097_s3 + $0xc9] sm:$0xff] %vm3885_vm11, %v3642_v7  ;;  %v4211_v48 = vmul.f32 %v3642_v7, %v3642_v7  ;;  %v4090_v17 = vsel %vm3885_vm11, %v3642_v7, 0.0 }
 0x408   :  { %4866 = vst.msk [vmem:[%s9097_s3 + $0xc1] sm:$0xff] %vm3885_vm11, %v3637_v8  ;;  %v4088_v28 = vsel %vm3885_vm11, %v3637_v8, 0.0  ;;  %v4210_v61 = vmul.f32 %v3637_v8, %v3637_v8  ;;  %v2301_v13 = vpop.permute.xlu0 %2300  ;;  %v3275_v29 = vld [vmem:[#allocation2 + $0x180] sm:$0xff] }
 0x409   :  { %v4089_v49 = vadd.f32 %v4088_v28, %v4087_v38  ;;  %2443 = vst.msk [vmem:[#allocation2 + $0x190] sm:$0xff] %vm2392_vm7, %v2301_v13  ;;  %v2303_v9 = vpop.permute.xlu1 %2302  ;;  %5067 = vmatprep.mubr.msk.f32.mxu1 %vm3303_vm10, %v3275_v29  ;;  %v4289_v11 = vsel %vm3885_vm11, %v4211_v48, 0.0 }
 0x40a   :  { %v4287_v20 = vsel %vm3885_vm11, %v4210_v61, 0.0  ;;  %2444 = vst.msk [vmem:[#allocation2 + $0x198] sm:$0xff] %vm2392_vm7, %v2303_v9 }
 0x40b   :  { %v4288_v46 = vadd.f32 %v4287_v20, %v4286_v16  ;;  %v4091_v47 = vadd.f32 %v4090_v17, %v4089_v49 }
 0x40c   :  { %v2686_v10 = vpop.permute.xlu0 %2685  ;;  %v3276_v21 = vld [vmem:[#allocation2 + $0x188] sm:$0xff] }
 0x40d   :  { %2828 = vst.msk [vmem:[#allocation2 + $0x190] sm:$0xff] %vm2777_vm8, %v2686_v10  ;;  %v2688_v23 = vpop.permute.xlu1 %2687  ;;  %5068 = vmatmul.mubr.msk.f32.gmra.mrb[16].mxu1 %vm3303_vm10, %v3276_v21  ;;  %v4290_v22 = vadd.f32 %v4289_v11, %v4288_v46 }
 0x40e   :  { %2829 = vst.msk [vmem:[#allocation2 + $0x198] sm:$0xff] %vm2777_vm8, %v2688_v23 }
 0x410   :  { %v3071_v54 = vpop.permute.xlu0 %3070 }
 0x411   :  { %3213 = vst.msk [vmem:[#allocation2 + $0x190] sm:$0xff] %vm3162_vm9, %v3071_v54  ;;  %v1919_v32 = vpop.permute.xlu1 %1918 }
 0x412   :  { %2059 = vst.msk [vmem:[#allocation2 + $0x1a0] sm:$0xff] %vm2006_vm6, %v1919_v32 }
 0x414   :  { %v3073_v50 = vpop.permute.xlu0 %3072 }
 0x415   :  { %3214 = vst.msk [vmem:[#allocation2 + $0x198] sm:$0xff] %vm3162_vm9, %v3073_v50  ;;  %v1921_v56 = vpop.permute.xlu1 %1920 }
 0x416   :  { %2060 = vst.msk [vmem:[#allocation2 + $0x1a8] sm:$0xff] %vm2006_vm6, %v1921_v56 }
 0x418   :  { %v2305_v30 = vpop.permute.xlu0 %2304  ;;  %v3277_v31 = vld [vmem:[#allocation2 + $0x190] sm:$0xff] }
 0x419   :  { %2445 = vst.msk [vmem:[#allocation2 + $0x1a0] sm:$0xff] %vm2392_vm7, %v2305_v30  ;;  %v2307_v2 = vpop.permute.xlu1 %2306  ;;  %5070 = vmatprep.mubr.msk.f32.mxu1 %vm3303_vm10, %v3277_v31 }
 0x41a   :  { %2446 = vst.msk [vmem:[#allocation2 + $0x1a8] sm:$0xff] %vm2392_vm7, %v2307_v2 }
 0x41c   :  { %v2690_v62 = vpop.permute.xlu0 %2689  ;;  %v3278_v5 = vld [vmem:[#allocation2 + $0x198] sm:$0xff] }
 0x41d   :  { %2830 = vst.msk [vmem:[#allocation2 + $0x1a0] sm:$0xff] %vm2777_vm8, %v2690_v62  ;;  %v2692_v63 = vpop.permute.xlu1 %2691  ;;  %5071 = vmatmul.mubr.msk.f32.gmra.mrb[18].mxu1 %vm3303_vm10, %v3278_v5 }
 0x41e   :  { %2831 = vst.msk [vmem:[#allocation2 + $0x1a8] sm:$0xff] %vm2777_vm8, %v2692_v63 }
 0x420   :  { %v3075_v34 = vpop.permute.xlu0 %3074 }
 0x421   :  { %3215 = vst.msk [vmem:[#allocation2 + $0x1a0] sm:$0xff] %vm3162_vm9, %v3075_v34  ;;  %v1923_v0 = vpop.permute.xlu1 %1922 }
 0x422   :  { %2061 = vst.msk [vmem:[#allocation2 + $0x1b0] sm:$0xff] %vm2006_vm6, %v1923_v0 }
 0x424   :  { %v3077_v16 = vpop.permute.xlu0 %3076 }
 0x425   :  { %3216 = vst.msk [vmem:[#allocation2 + $0x1a8] sm:$0xff] %vm3162_vm9, %v3077_v16  ;;  %v1925_v39 = vpop.permute.xlu1 %1924 }
 0x426   :  { %2062 = vst.msk [vmem:[#allocation2 + $0x1b8] sm:$0xff] %vm2006_vm6, %v1925_v39 }
 0x428   :  { %v2309_v7 = vpop.permute.xlu0 %2308  ;;  %v3279_v40 = vld [vmem:[#allocation2 + $0x1a0] sm:$0xff] }
 0x429   :  { %2447 = vst.msk [vmem:[#allocation2 + $0x1b0] sm:$0xff] %vm2392_vm7, %v2309_v7  ;;  %v2311_v48 = vpop.permute.xlu1 %2310  ;;  %5073 = vmatprep.mubr.msk.f32.mxu1 %vm3303_vm10, %v3279_v40 }
 0x42a   :  { %2448 = vst.msk [vmem:[#allocation2 + $0x1b8] sm:$0xff] %vm2392_vm7, %v2311_v48 }
 0x42c   :  { %v2694_v9 = vpop.permute.xlu0 %2693  ;;  %v3280_v17 = vld [vmem:[#allocation2 + $0x1a8] sm:$0xff] }
 0x42d   :  { %2832 = vst.msk [vmem:[#allocation2 + $0x1b0] sm:$0xff] %vm2777_vm8, %v2694_v9  ;;  %v2696_v46 = vpop.permute.xlu1 %2695  ;;  %5074 = vmatmul.mubr.msk.f32.gmra.mrb[20].mxu1 %vm3303_vm10, %v3280_v17 }
 0x42e   :  { %2833 = vst.msk [vmem:[#allocation2 + $0x1b8] sm:$0xff] %vm2777_vm8, %v2696_v46 }
 0x431   :  { %v1927_v54 = vpop.permute.xlu1 %1926 }
 0x432   :  { %2063 = vst.msk [vmem:[#allocation2 + $0x1c0] sm:$0xff] %vm2006_vm6, %v1927_v54 }
 0x442   :  { %v5021_v55 = vpop.f32.mrb[16].mxu0 }
 0x443   :  { %v3652_v24 = vadd.f32 %v5021_v55, %v8370_v41  ;;  %v3646_v33 = vpop.f32.mrb[17].mxu0 }
 0x444   :  { %v3647_v25 = vadd.f32 %v8370_v41, %v3646_v33 }
 0x445   :  { %4869 = vst.msk [vmem:[%s9097_s3 + $0xe1] sm:$0xff] %vm3885_vm11, %v3652_v24  ;;  %v4213_v52 = vmul.f32 %v3652_v24, %v3652_v24  ;;  %v4094_v51 = vsel %vm3885_vm11, %v3652_v24, 0.0 }
 0x446   :  { %4868 = vst.msk [vmem:[%s9097_s3 + $0xd9] sm:$0xff] %vm3885_vm11, %v3647_v25  ;;  %v4092_v42 = vsel %vm3885_vm11, %v3647_v25, 0.0  ;;  %v4212_v18 = vmul.f32 %v3647_v25, %v3647_v25  ;;  %v5024_v58 = vpop.f32.mrb[18].mxu0  ;;  %v1929_v25 = vpop.permute.xlu1 %1928 }
 0x447   :  { %v4093_v43 = vadd.f32 %v4092_v42, %v4091_v47  ;;  %v4293_v4 = vsel %vm3885_vm11, %v4213_v52, 0.0  ;;  %v3662_v3 = vadd.f32 %v5024_v58, %v8370_v41  ;;  %v3656_v27 = vpop.f32.mrb[19].mxu0  ;;  %2064 = vst.msk [vmem:[#allocation2 + $0x1c8] sm:$0xff] %vm2006_vm6, %v1929_v25 }
 0x448   :  { %v4291_v19 = vsel %vm3885_vm11, %v4212_v18, 0.0  ;;  %v3657_v59 = vadd.f32 %v8370_v41, %v3656_v27 }
 0x449   :  { %v4292_v53 = vadd.f32 %v4291_v19, %v4290_v22  ;;  %v4095_v57 = vadd.f32 %v4094_v51, %v4093_v43  ;;  %4871 = vst.msk [vmem:[%s9097_s3 + $0xf9] sm:$0xff] %vm3885_vm11, %v3662_v3  ;;  %v4215_v12 = vmul.f32 %v3662_v3, %v3662_v3  ;;  %v4098_v44 = vsel %vm3885_vm11, %v3662_v3, 0.0  ;;  %v3079_v22 = vpop.permute.xlu0 %3078 }
 0x44a   :  { %4870 = vst.msk [vmem:[%s9097_s3 + $0xf1] sm:$0xff] %vm3885_vm11, %v3657_v59  ;;  %v4096_v14 = vsel %vm3885_vm11, %v3657_v59, 0.0  ;;  %v4214_v35 = vmul.f32 %v3657_v59, %v3657_v59  ;;  %v5027_v60 = vpop.f32.mrb[20].mxu0 }
 0x44b   :  { %v4294_v26 = vadd.f32 %v4293_v4, %v4292_v53  ;;  %v4097_v36 = vadd.f32 %v4096_v14, %v4095_v57  ;;  %v4297_v6 = vsel %vm3885_vm11, %v4215_v12, 0.0  ;;  %v3672_v8 = vadd.f32 %v5027_v60, %v8370_v41  ;;  %v3666_v28 = vpop.f32.mrb[21].mxu0  ;;  %3217 = vst.msk [vmem:[#allocation2 + $0x1b0] sm:$0xff] %vm3162_vm9, %v3079_v22  ;;  %v2315_v53 = vpop.permute.xlu1 %2314 }
 0x44c   :  { %v4295_v38 = vsel %vm3885_vm11, %v4214_v35, 0.0  ;;  %v3667_v61 = vadd.f32 %v8370_v41, %v3666_v28  ;;  %2450 = vst.msk [vmem:[#allocation2 + $0x1c8] sm:$0xff] %vm2392_vm7, %v2315_v53 }
 0x44d   :  { %v4296_v15 = vadd.f32 %v4295_v38, %v4294_v26  ;;  %v4099_v37 = vadd.f32 %v4098_v44, %v4097_v36  ;;  %4873 = vst.msk [vmem:[%s9097_s3 + $0x111] sm:$0xff] %vm3885_vm11, %v3672_v8  ;;  %v4217_v13 = vmul.f32 %v3672_v8, %v3672_v8  ;;  %v4102_v47 = vsel %vm3885_vm11, %v3672_v8, 0.0  ;;  %v3081_v24 = vpop.permute.xlu0 %3080 }
 0x44e   :  { %4872 = vst.msk [vmem:[%s9097_s3 + $0x109] sm:$0xff] %vm3885_vm11, %v3667_v61  ;;  %v4100_v29 = vsel %vm3885_vm11, %v3667_v61, 0.0  ;;  %v4216_v49 = vmul.f32 %v3667_v61, %v3667_v61  ;;  %v5030_v32 = vpop.f32.mrb[22].mxu0 }
 0x44f   :  { %v4298_v1 = vadd.f32 %v4297_v6, %v4296_v15  ;;  %v4101_v20 = vadd.f32 %v4100_v29, %v4099_v37  ;;  %v4301_v23 = vsel %vm3885_vm11, %v4217_v13, 0.0  ;;  %3218 = vst.msk [vmem:[#allocation2 + $0x1b8] sm:$0xff] %vm3162_vm9, %v3081_v24  ;;  %v3682_v33 = vadd.f32 %v5030_v32, %v8370_v41  ;;  %v3676_v52 = vpop.f32.mrb[23].mxu0  ;;  %v2700_v58 = vpop.permute.xlu1 %2699 }
 0x450   :  { %v4299_v11 = vsel %vm3885_vm11, %v4216_v49, 0.0  ;;  %v3677_v42 = vadd.f32 %v8370_v41, %v3676_v52  ;;  %2835 = vst.msk [vmem:[#allocation2 + $0x1c8] sm:$0xff] %vm2777_vm8, %v2700_v58 }
 0x451   :  { %v4300_v10 = vadd.f32 %v4299_v11, %v4298_v1  ;;  %v4103_v21 = vadd.f32 %v4102_v47, %v4101_v20  ;;  %4875 = vst.msk [vmem:[%s9097_s3 + $0x129] sm:$0xff] %vm3885_vm11, %v3682_v33  ;;  %v4219_v18 = vmul.f32 %v3682_v33, %v3682_v33  ;;  %v2313_v56 = vpop.permute.xlu0 %2312  ;;  %v4106_v57 = vsel %vm3885_vm11, %v3682_v33, 0.0 }
 0x452   :  { %4874 = vst.msk [vmem:[%s9097_s3 + $0x121] sm:$0xff] %vm3885_vm11, %v3677_v42  ;;  %v4104_v50 = vsel %vm3885_vm11, %v3677_v42, 0.0  ;;  %v4218_v43 = vmul.f32 %v3677_v42, %v3677_v42  ;;  %v3281_v51 = vld [vmem:[#allocation2 + $0x1b0] sm:$0xff]  ;;  %v5033_v63 = vpop.f32.mrb[24].mxu0 }
 0x453   :  { %v4302_v55 = vadd.f32 %v4301_v23, %v4300_v10  ;;  %v4105_v19 = vadd.f32 %v4104_v50, %v4103_v21  ;;  %2449 = vst.msk [vmem:[#allocation2 + $0x1c0] sm:$0xff] %vm2392_vm7, %v2313_v56  ;;  %5076 = vmatprep.mubr.msk.f32.mxu1 %vm3303_vm10, %v3281_v51  ;;  %v4305_v2 = vsel %vm3885_vm11, %v4219_v18, 0.0  ;;  %v3692_v27 = vadd.f32 %v5033_v63, %v8370_v41  ;;  %v1931_v59 = vpop.permute.xlu1 %1930  ;;  %v3686_v12 = vpop.f32.mrb[25].mxu0 }
 0x454   :  { %v4303_v4 = vsel %vm3885_vm11, %v4218_v43, 0.0  ;;  %2065 = vst.msk [vmem:[#allocation2 + $0x1d0] sm:$0xff] %vm2006_vm6, %v1931_v59  ;;  %v3687_v14 = vadd.f32 %v8370_v41, %v3686_v12  ;;  %v8814_v43 = vld [vmem:[%s9098_s2] ss:$0 sm:$0xff] }
 0x455   :  { %v4304_v30 = vadd.f32 %v4303_v4, %v4302_v55  ;;  %v4107_v31 = vadd.f32 %v4106_v57, %v4105_v19  ;;  %v2698_v26 = vpop.permute.xlu0 %2697  ;;  %4877 = vst.msk [vmem:[%s9097_s3 + $0x141] sm:$0xff] %vm3885_vm11, %v3692_v27  ;;  %v4221_v35 = vmul.f32 %v3692_v27, %v3692_v27  ;;  %v4110_v15 = vsel %vm3885_vm11, %v3692_v27, 0.0 }
 0x456   :  { %v3282_v62 = vld [vmem:[#allocation2 + $0x1b8] sm:$0xff]  ;;  %2834 = vst.msk [vmem:[#allocation2 + $0x1c0] sm:$0xff] %vm2777_vm8, %v2698_v26  ;;  %v4108_v34 = vsel %vm3885_vm11, %v3687_v14, 0.0  ;;  %v4220_v36 = vmul.f32 %v3687_v14, %v3687_v14  ;;  %v5036_v48 = vpop.f32.mrb[26].mxu0 }
 0x457   :  { %5077 = vmatmul.mubr.msk.f32.gmra.mrb[22].mxu1 %vm3303_vm10, %v3282_v62  ;;  %v4306_v5 = vadd.f32 %v4305_v2, %v4304_v30  ;;  %4876 = vst.msk [vmem:[%s9097_s3 + $0x139] sm:$0xff] %vm3885_vm11, %v3687_v14  ;;  %v4109_v44 = vadd.f32 %v4108_v34, %v4107_v31  ;;  %v1933_v38 = vpop.permute.xlu1 %1932  ;;  %v4309_v39 = vsel %vm3885_vm11, %v4221_v35, 0.0  ;;  %v3702_v61 = vadd.f32 %v5036_v48, %v8370_v41  ;;  %v3696_v29 = vpop.f32.mrb[27].mxu0 }
 0x458   :  { %v4307_v37 = vsel %vm3885_vm11, %v4220_v36, 0.0  ;;  %2066 = vst.msk [vmem:[#allocation2 + $0x1d8] sm:$0xff] %vm2006_vm6, %v1933_v38  ;;  %v3697_v49 = vadd.f32 %v8370_v41, %v3696_v29 }
 0x459   :  { %v3083_v3 = vpop.permute.xlu0 %3082  ;;  %v4308_v6 = vadd.f32 %v4307_v37, %v4306_v5  ;;  %v4111_v16 = vadd.f32 %v4110_v15, %v4109_v44  ;;  %4879 = vst.msk [vmem:[%s9097_s3 + $0x159] sm:$0xff] %vm3885_vm11, %v3702_v61  ;;  %v4223_v9 = vmul.f32 %v3702_v61, %v3702_v61  ;;  %v4114_v10 = vsel %vm3885_vm11, %v3702_v61, 0.0 }
 0x45a   :  { %3219 = vst.msk [vmem:[#allocation2 + $0x1c0] sm:$0xff] %vm3162_vm9, %v3083_v3  ;;  %v4112_v17 = vsel %vm3885_vm11, %v3697_v49, 0.0  ;;  %v4222_v20 = vmul.f32 %v3697_v49, %v3697_v49  ;;  %v5039_v25 = vpop.f32.mrb[28].mxu0 }
 0x45b   :  { %v2319_v60 = vpop.permute.xlu1 %2318  ;;  %v4310_v40 = vadd.f32 %v4309_v39, %v4308_v6  ;;  %4878 = vst.msk [vmem:[%s9097_s3 + $0x151] sm:$0xff] %vm3885_vm11, %v3697_v49  ;;  %v4113_v47 = vadd.f32 %v4112_v17, %v4111_v16  ;;  %v4313_v54 = vsel %vm3885_vm11, %v4223_v9, 0.0  ;;  %v3712_v42 = vadd.f32 %v5039_v25, %v8370_v41  ;;  %v3706_v50 = vpop.f32.mrb[29].mxu0 }
 0x45c   :  { %2452 = vst.msk [vmem:[#allocation2 + $0x1d8] sm:$0xff] %vm2392_vm7, %v2319_v60  ;;  %v4311_v21 = vsel %vm3885_vm11, %v4222_v20, 0.0  ;;  %v3707_v56 = vadd.f32 %v8814_v43, %v3706_v50 }
 0x45d   :  { %v3085_v0 = vpop.permute.xlu0 %3084  ;;  %v4312_v23 = vadd.f32 %v4311_v21, %v4310_v40  ;;  %v4115_v22 = vadd.f32 %v4114_v10, %v4113_v47  ;;  %4881 = vst.msk [vmem:[%s9097_s3 + $0x171] sm:$0xff] %vm3885_vm11, %v3712_v42  ;;  %v4225_v51 = vmul.f32 %v3712_v42, %v3712_v42  ;;  %v4118_v31 = vsel %vm3885_vm11, %v3712_v42, 0.0 }
 0x45e   :  { %3220 = vst.msk [vmem:[#allocation2 + $0x1c8] sm:$0xff] %vm3162_vm9, %v3085_v0  ;;  %v4116_v41 = vsel %vm3885_vm11, %v3707_v56, 0.0  ;;  %v4224_v19 = vmul.f32 %v3707_v56, %v3707_v56 }
 0x45f   :  { %v2704_v13 = vpop.permute.xlu1 %2703  ;;  %v4314_v32 = vadd.f32 %v4313_v54, %v4312_v23  ;;  %4880 = vst.msk [vmem:[%s9097_s3 + $0x169] sm:$0xff] %vm3885_vm11, %v3707_v56  ;;  %v4117_v4 = vadd.f32 %v4116_v41, %v4115_v22  ;;  %v4317_v58 = vsel %vm3885_vm11, %v4225_v51, 0.0 }
 0x460   :  { %2837 = vst.msk [vmem:[#allocation2 + $0x1d8] sm:$0xff] %vm2777_vm8, %v2704_v13  ;;  %v4315_v2 = vsel %vm3885_vm11, %v4224_v19, 0.0 }
 0x461   :  { %v2317_v1 = vpop.permute.xlu0 %2316  ;;  %v3283_v7 = vld [vmem:[#allocation2 + $0x1c0] sm:$0xff]  ;;  %v4316_v26 = vadd.f32 %v4315_v2, %v4314_v32  ;;  %v4119_v62 = vadd.f32 %v4118_v31, %v4117_v4 }
 0x462   :  { %2451 = vst.msk [vmem:[#allocation2 + $0x1d0] sm:$0xff] %vm2392_vm7, %v2317_v1  ;;  %5079 = vmatprep.mubr.msk.f32.mxu1 %vm3303_vm10, %v3283_v7 }
 0x463   :  { %v1935_v11 = vpop.permute.xlu1 %1934  ;;  %v4318_v63 = vadd.f32 %v4317_v58, %v4316_v26 }
 0x464   :  { %2067 = vst.msk [vmem:[#allocation2 + $0x1e0] sm:$0xff] %vm2006_vm6, %v1935_v11  ;;  %v5042_v59 = vpop.f32.mrb[30].mxu0 }
 0x465   :  { %v2702_v8 = vpop.permute.xlu0 %2701  ;;  %v3284_v28 = vld [vmem:[#allocation2 + $0x1c8] sm:$0xff]  ;;  %v3722_v12 = vadd.f32 %v8814_v43, %v5042_v59  ;;  %v3716_v35 = vpop.f32.mrb[31].mxu0 }
 0x466   :  { %2836 = vst.msk [vmem:[#allocation2 + $0x1d0] sm:$0xff] %vm2777_vm8, %v2702_v8  ;;  %5080 = vmatmul.mubr.msk.f32.gmra.mrb[24].mxu1 %vm3303_vm10, %v3284_v28  ;;  %v3717_v34 = vadd.f32 %v8814_v43, %v3716_v35 }
 0x467   :  { %v1937_v24 = vpop.permute.xlu1 %1936  ;;  %4883 = vst.msk [vmem:[%s9097_s3 + $0x189] sm:$0xff] %vm3885_vm11, %v3722_v12  ;;  %v4227_v36 = vmul.f32 %v3722_v12, %v3722_v12  ;;  %v4122_v16 = vsel %vm3885_vm11, %v3722_v12, 0.0 }
 0x468   :  { %2068 = vst.msk [vmem:[#allocation2 + $0x1e8] sm:$0xff] %vm2006_vm6, %v1937_v24  ;;  %v4120_v0 = vsel %vm3885_vm11, %v3717_v34, 0.0  ;;  %v4226_v44 = vmul.f32 %v3717_v34, %v3717_v34 }
 0x469   :  { %v3087_v46 = vpop.permute.xlu0 %3086  ;;  %4882 = vst.msk [vmem:[%s9097_s3 + $0x181] sm:$0xff] %vm3885_vm11, %v3717_v34  ;;  %v4121_v37 = vadd.f32 %v4120_v0, %v4119_v62  ;;  %v4321_v60 = vsel %vm3885_vm11, %v4227_v36, 0.0 }
 0x46a   :  { %3221 = vst.msk [vmem:[#allocation2 + $0x1d0] sm:$0xff] %vm3162_vm9, %v3087_v46  ;;  %v4319_v39 = vsel %vm3885_vm11, %v4226_v44, 0.0 }
 0x46b   :  { %v2323_v18 = vpop.permute.xlu1 %2322  ;;  %v4320_v1 = vadd.f32 %v4319_v39, %v4318_v63  ;;  %v4123_v7 = vadd.f32 %v4122_v16, %v4121_v37 }
 0x46c   :  { %2454 = vst.msk [vmem:[#allocation2 + $0x1e8] sm:$0xff] %vm2392_vm7, %v2323_v18 }
 0x46d   :  { %v3089_v55 = vpop.permute.xlu0 %3088  ;;  %v4322_v28 = vadd.f32 %v4321_v60, %v4320_v1 }
 0x46e   :  { %3222 = vst.msk [vmem:[#allocation2 + $0x1d8] sm:$0xff] %vm3162_vm9, %v3089_v55 }
 0x46f   :  { %v2708_v30 = vpop.permute.xlu1 %2707 }
 0x470   :  { %2839 = vst.msk [vmem:[#allocation2 + $0x1e8] sm:$0xff] %vm2777_vm8, %v2708_v30  ;;  %v5045_v13 = vpop.f32.mrb[0].mxu1 }
 0x471   :  { %v2321_v33 = vpop.permute.xlu0 %2320  ;;  %v3285_v52 = vld [vmem:[#allocation2 + $0x1d0] sm:$0xff]  ;;  %v3732_v29 = vadd.f32 %v8814_v43, %v5045_v13  ;;  %v3726_v9 = vpop.f32.mrb[1].mxu1 }
 0x472   :  { %2453 = vst.msk [vmem:[#allocation2 + $0x1e0] sm:$0xff] %vm2392_vm7, %v2321_v33  ;;  %5082 = vmatprep.mubr.msk.f32.mxu1 %vm3303_vm10, %v3285_v52  ;;  %v3727_v17 = vadd.f32 %v8814_v43, %v3726_v9 }
 0x473   :  { %v1939_v3 = vpop.permute.xlu1 %1938  ;;  %4885 = vst.msk [vmem:[%s9097_s3 + $0x1d1] sm:$0xff] %vm3885_vm11, %v3732_v29  ;;  %v4229_v20 = vmul.f32 %v3732_v29, %v3732_v29  ;;  %v4126_v10 = vsel %vm3885_vm11, %v3732_v29, 0.0 }
 0x474   :  { %2069 = vst.msk [vmem:[#allocation2 + $0x1f0] sm:$0xff] %vm2006_vm6, %v1939_v3  ;;  %v4124_v46 = vsel %vm3885_vm11, %v3727_v17, 0.0  ;;  %v4228_v47 = vmul.f32 %v3727_v17, %v3727_v17 }
 0x475   :  { %v2706_v53 = vpop.permute.xlu0 %2705  ;;  %v3286_v57 = vld [vmem:[#allocation2 + $0x1d8] sm:$0xff]  ;;  %4884 = vst.msk [vmem:[%s9097_s3 + $0x1c9] sm:$0xff] %vm3885_vm11, %v3727_v17  ;;  %v4125_v11 = vadd.f32 %v4124_v46, %v4123_v7  ;;  %v4325_v54 = vsel %vm3885_vm11, %v4229_v20, 0.0 }
 0x476   :  { %2838 = vst.msk [vmem:[#allocation2 + $0x1e0] sm:$0xff] %vm2777_vm8, %v2706_v53  ;;  %5083 = vmatmul.mubr.msk.f32.gmra.mrb[26].mxu1 %vm3303_vm10, %v3286_v57  ;;  %v4323_v21 = vsel %vm3885_vm11, %v4228_v47, 0.0 }
 0x477   :  { %v1941_v14 = vpop.permute.xlu1 %1940  ;;  %v4324_v23 = vadd.f32 %v4323_v21, %v4322_v28  ;;  %v4127_v22 = vadd.f32 %v4126_v10, %v4125_v11 }
 0x478   :  { %2070 = vst.msk [vmem:[#allocation2 + $0x1f8] sm:$0xff] %vm2006_vm6, %v1941_v14 }
 0x479   :  { %v3091_v5 = vpop.permute.xlu0 %3090  ;;  %v4326_v32 = vadd.f32 %v4325_v54, %v4324_v23 }
 0x47a   :  { %3223 = vst.msk [vmem:[#allocation2 + $0x1e0] sm:$0xff] %vm3162_vm9, %v3091_v5 }
 0x47b   :  { %v2327_v6 = vpop.permute.xlu1 %2326 }
 0x47c   :  { %2456 = vst.msk [vmem:[#allocation2 + $0x1f8] sm:$0xff] %vm2392_vm7, %v2327_v6  ;;  %v5048_v33 = vpop.f32.mrb[2].mxu1 }
 0x47d   :  { %v3093_v27 = vpop.permute.xlu0 %3092  ;;  %v3742_v25 = vadd.f32 %v8814_v43, %v5048_v33  ;;  %v3736_v52 = vpop.f32.mrb[3].mxu1 }
 0x47e   :  { %3224 = vst.msk [vmem:[#allocation2 + $0x1e8] sm:$0xff] %vm3162_vm9, %v3093_v27  ;;  %v3737_v42 = vadd.f32 %v8814_v43, %v3736_v52 }
 0x47f   :  { %v2712_v48 = vpop.permute.xlu1 %2711  ;;  %4887 = vst.msk [vmem:[%s9097_s3 + $0x1e9] sm:$0xff] %vm3885_vm11, %v3742_v25  ;;  %v4231_v18 = vmul.f32 %v3742_v25, %v3742_v25  ;;  %v4130_v41 = vsel %vm3885_vm11, %v3742_v25, 0.0 }
 0x480   :  { %2841 = vst.msk [vmem:[#allocation2 + $0x1f8] sm:$0xff] %vm2777_vm8, %v2712_v48  ;;  %v4128_v50 = vsel %vm3885_vm11, %v3737_v42, 0.0  ;;  %v4230_v56 = vmul.f32 %v3737_v42, %v3737_v42 }
 0x481   :  { %v2325_v38 = vpop.permute.xlu0 %2324  ;;  %v3287_v15 = vld [vmem:[#allocation2 + $0x1e0] sm:$0xff]  ;;  %4886 = vst.msk [vmem:[%s9097_s3 + $0x1e1] sm:$0xff] %vm3885_vm11, %v3737_v42  ;;  %v4129_v51 = vadd.f32 %v4128_v50, %v4127_v22  ;;  %v4329_v4 = vsel %vm3885_vm11, %v4231_v18, 0.0 }
 0x482   :  { %2455 = vst.msk [vmem:[#allocation2 + $0x1f0] sm:$0xff] %vm2392_vm7, %v2325_v38  ;;  %5085 = vmatprep.mubr.msk.f32.mxu1 %vm3303_vm10, %v3287_v15  ;;  %v4327_v19 = vsel %vm3885_vm11, %v4230_v56, 0.0 }
 0x483   :  { %v3097_v49 = vpop.permute.xlu1 %3096  ;;  %v4328_v53 = vadd.f32 %v4327_v19, %v4326_v32  ;;  %v4131_v57 = vadd.f32 %v4130_v41, %v4129_v51 }
 0x484   :  { %3226 = vst.msk [vmem:[#allocation2 + $0x1f8] sm:$0xff] %vm3162_vm9, %v3097_v49 }
 0x485   :  { %v2710_v40 = vpop.permute.xlu0 %2709  ;;  %v3288_v8 = vld [vmem:[#allocation2 + $0x1e8] sm:$0xff]  ;;  %v4330_v30 = vadd.f32 %v4329_v4, %v4328_v53 }
 0x486   :  { %2840 = vst.msk [vmem:[#allocation2 + $0x1f0] sm:$0xff] %vm2777_vm8, %v2710_v40  ;;  %5086 = vmatmul.mubr.msk.f32.gmra.mrb[28].mxu1 %vm3303_vm10, %v3288_v8 }
 0x488   :  { %v5051_v31 = vpop.f32.mrb[4].mxu1 }
 0x489   :  { %v3095_v61 = vpop.permute.xlu0 %3094  ;;  %v3752_v2 = vadd.f32 %v8814_v43, %v5051_v31  ;;  %v3746_v26 = vpop.f32.mrb[5].mxu1 }
 0x48a   :  { %3225 = vst.msk [vmem:[#allocation2 + $0x1f0] sm:$0xff] %vm3162_vm9, %v3095_v61  ;;  %v3747_v62 = vadd.f32 %v8814_v43, %v3746_v26 }
 0x48b   :  { %v3290_v24 = vld [vmem:[#allocation2 + $0x1f8] sm:$0xff]  ;;  %4889 = vst.msk [vmem:[%s9097_s3 + $0x201] sm:$0xff] %vm3885_vm11, %v3752_v2  ;;  %v4233_v58 = vmul.f32 %v3752_v2, %v3752_v2  ;;  %v4134_v27 = vsel %vm3885_vm11, %v3752_v2, 0.0 }
 0x48c   :  { %4888 = vst.msk [vmem:[%s9097_s3 + $0x1f9] sm:$0xff] %vm3885_vm11, %v3747_v62  ;;  %v4132_v5 = vsel %vm3885_vm11, %v3747_v62, 0.0  ;;  %v4232_v3 = vmul.f32 %v3747_v62, %v3747_v62 }
 0x48d   :  { %v4133_v63 = vadd.f32 %v4132_v5, %v4131_v57  ;;  %v4333_v35 = vsel %vm3885_vm11, %v4233_v58, 0.0 }
 0x48e   :  { %v4331_v59 = vsel %vm3885_vm11, %v4232_v3, 0.0 }
 0x48f   :  { %v4332_v12 = vadd.f32 %v4331_v59, %v4330_v30  ;;  %v4135_v14 = vadd.f32 %v4134_v27, %v4133_v63 }
 0x491   :  { %v3289_v55 = vld [vmem:[#allocation2 + $0x1f0] sm:$0xff]  ;;  %v4334_v34 = vadd.f32 %v4333_v35, %v4332_v12 }
 0x492   :  { %5088 = vmatprep.mubr.msk.f32.mxu1 %vm3303_vm10, %v3289_v55 }
 0x493   :  { %5089 = vmatmul.mubr.msk.f32.gmra.mrb[30].mxu1 %vm3303_vm10, %v3290_v24 }
 0x494   :  { %v5054_v36 = vpop.f32.mrb[6].mxu1 }
 0x495   :  { %v3762_v0 = vadd.f32 %v8814_v43, %v5054_v36  ;;  %v3756_v44 = vpop.f32.mrb[7].mxu1 }
 0x496   :  { %v3757_v38 = vadd.f32 %v8814_v43, %v3756_v44 }
 0x497   :  { %4891 = vst.msk [vmem:[%s9097_s3 + $0x219] sm:$0xff] %vm3885_vm11, %v3762_v0  ;;  %v4235_v15 = vmul.f32 %v3762_v0, %v3762_v0  ;;  %v4138_v39 = vsel %vm3885_vm11, %v3762_v0, 0.0 }
 0x498   :  { %4890 = vst.msk [vmem:[%s9097_s3 + $0x211] sm:$0xff] %vm3885_vm11, %v3757_v38  ;;  %v4136_v37 = vsel %vm3885_vm11, %v3757_v38, 0.0  ;;  %v4234_v6 = vmul.f32 %v3757_v38, %v3757_v38 }
 0x499   :  { %v4137_v16 = vadd.f32 %v4136_v37, %v4135_v14  ;;  %v4337_v40 = vsel %vm3885_vm11, %v4235_v15, 0.0 }
 0x49a   :  { %v4335_v1 = vsel %vm3885_vm11, %v4234_v6, 0.0 }
 0x49b   :  { %v4336_v7 = vadd.f32 %v4335_v1, %v4334_v34  ;;  %v4139_v60 = vadd.f32 %v4138_v39, %v4137_v16 }
 0x49d   :  { %v4338_v8 = vadd.f32 %v4337_v40, %v4336_v7 }
 0x4a0   :  { %v5057_v48 = vpop.f32.mrb[8].mxu1 }
 0x4a1   :  { %v3772_v28 = vadd.f32 %v8814_v43, %v5057_v48  ;;  %v3766_v61 = vpop.f32.mrb[9].mxu1 }
 0x4a2   :  { %v3767_v13 = vadd.f32 %v8814_v43, %v3766_v61 }
 0x4a3   :  { %4893 = vst.msk [vmem:[%s9097_s3 + $0x231] sm:$0xff] %vm3885_vm11, %v3772_v28  ;;  %v4237_v29 = vmul.f32 %v3772_v28, %v3772_v28  ;;  %v4142_v20 = vsel %vm3885_vm11, %v3772_v28, 0.0 }
 0x4a4   :  { %4892 = vst.msk [vmem:[%s9097_s3 + $0x229] sm:$0xff] %vm3885_vm11, %v3767_v13  ;;  %v4140_v49 = vsel %vm3885_vm11, %v3767_v13, 0.0  ;;  %v4236_v9 = vmul.f32 %v3767_v13, %v3767_v13 }
 0x4a5   :  { %v4141_v17 = vadd.f32 %v4140_v49, %v4139_v60  ;;  %v4341_v10 = vsel %vm3885_vm11, %v4237_v29, 0.0 }
 0x4a6   :  { %v4339_v46 = vsel %vm3885_vm11, %v4236_v9, 0.0 }
 0x4a7   :  { %v4340_v47 = vadd.f32 %v4339_v46, %v4338_v8  ;;  %v4143_v11 = vadd.f32 %v4142_v20, %v4141_v17 }
 0x4a9   :  { %v4342_v21 = vadd.f32 %v4341_v10, %v4340_v47 }
 0x4b0   :  { %v5060_v23 = vpop.f32.mrb[10].mxu1 }
 0x4b1   :  { %v3782_v22 = vadd.f32 %v8814_v43, %v5060_v23  ;;  %v3776_v54 = vpop.f32.mrb[11].mxu1 }
 0x4b2   :  { %v3777_v55 = vadd.f32 %v8814_v43, %v3776_v54 }
 0x4b3   :  { %4895 = vst.msk [vmem:[%s9097_s3 + $0x249] sm:$0xff] %vm3885_vm11, %v3782_v22  ;;  %v4239_v24 = vmul.f32 %v3782_v22, %v3782_v22  ;;  %v4146_v52 = vsel %vm3885_vm11, %v3782_v22, 0.0 }
 0x4b4   :  { %4894 = vst.msk [vmem:[%s9097_s3 + $0x241] sm:$0xff] %vm3885_vm11, %v3777_v55  ;;  %v4144_v32 = vsel %vm3885_vm11, %v3777_v55, 0.0  ;;  %v4238_v33 = vmul.f32 %v3777_v55, %v3777_v55 }
 0x4b5   :  { %v4145_v25 = vadd.f32 %v4144_v32, %v4143_v11  ;;  %v4345_v56 = vsel %vm3885_vm11, %v4239_v24, 0.0 }
 0x4b6   :  { %v4343_v42 = vsel %vm3885_vm11, %v4238_v33, 0.0 }
 0x4b7   :  { %v4344_v18 = vadd.f32 %v4343_v42, %v4342_v21  ;;  %v4147_v50 = vadd.f32 %v4146_v52, %v4145_v25 }
 0x4b9   :  { %v4346_v51 = vadd.f32 %v4345_v56, %v4344_v18 }
 0x4c0   :  { %v5063_v41 = vpop.f32.mrb[12].mxu1 }
 0x4c1   :  { %v3792_v19 = vadd.f32 %v8814_v43, %v5063_v41  ;;  %v3786_v53 = vpop.f32.mrb[13].mxu1 }
 0x4c2   :  { %v3787_v57 = vadd.f32 %v8814_v43, %v3786_v53 }
 0x4c3   :  { %4897 = vst.msk [vmem:[%s9097_s3 + $0x261] sm:$0xff] %vm3885_vm11, %v3792_v19  ;;  %v4241_v4 = vmul.f32 %v3792_v19, %v3792_v19  ;;  %v4150_v26 = vsel %vm3885_vm11, %v3792_v19, 0.0 }
 0x4c4   :  { %4896 = vst.msk [vmem:[%s9097_s3 + $0x259] sm:$0xff] %vm3885_vm11, %v3787_v57  ;;  %v4148_v30 = vsel %vm3885_vm11, %v3787_v57, 0.0  ;;  %v4240_v31 = vmul.f32 %v3787_v57, %v3787_v57 }
 0x4c5   :  { %v4149_v2 = vadd.f32 %v4148_v30, %v4147_v50  ;;  %v4349_v3 = vsel %vm3885_vm11, %v4241_v4, 0.0 }
 0x4c6   :  { %v4347_v62 = vsel %vm3885_vm11, %v4240_v31, 0.0 }
 0x4c7   :  { %v4348_v58 = vadd.f32 %v4347_v62, %v4346_v51  ;;  %v4151_v5 = vadd.f32 %v4150_v26, %v4149_v2 }
 0x4c9   :  { %v4350_v63 = vadd.f32 %v4349_v3, %v4348_v58 }
 0x4d0   :  { %v5066_v27 = vpop.f32.mrb[14].mxu1 }
 0x4d1   :  { %v3802_v59 = vadd.f32 %v8814_v43, %v5066_v27  ;;  %v3796_v12 = vpop.f32.mrb[15].mxu1 }
 0x4d2   :  { %v3797_v14 = vadd.f32 %v8814_v43, %v3796_v12 }
 0x4d3   :  { %4899 = vst.msk [vmem:[%s9097_s3 + $0x279] sm:$0xff] %vm3885_vm11, %v3802_v59  ;;  %v4243_v35 = vmul.f32 %v3802_v59, %v3802_v59  ;;  %v4154_v44 = vsel %vm3885_vm11, %v3802_v59, 0.0 }
 0x4d4   :  { %4898 = vst.msk [vmem:[%s9097_s3 + $0x271] sm:$0xff] %vm3885_vm11, %v3797_v14  ;;  %v4152_v34 = vsel %vm3885_vm11, %v3797_v14, 0.0  ;;  %v4242_v36 = vmul.f32 %v3797_v14, %v3797_v14 }
 0x4d5   :  { %v4153_v0 = vadd.f32 %v4152_v34, %v4151_v5  ;;  %v4353_v6 = vsel %vm3885_vm11, %v4243_v35, 0.0 }
 0x4d6   :  { %v4351_v38 = vsel %vm3885_vm11, %v4242_v36, 0.0 }
 0x4d7   :  { %v4352_v15 = vadd.f32 %v4351_v38, %v4350_v63  ;;  %v4155_v37 = vadd.f32 %v4154_v44, %v4153_v0 }
 0x4d9   :  { %v4354_v16 = vadd.f32 %v4353_v6, %v4352_v15 }
 0x4e0   :  { %v5069_v45 = vpop.f32.mrb[16].mxu1 }
 0x4e1   :  { %v3812_v39 = vadd.f32 %v8814_v43, %v5069_v45  ;;  %v3806_v1 = vpop.f32.mrb[17].mxu1 }
 0x4e2   :  { %v3807_v7 = vadd.f32 %v8814_v43, %v3806_v1 }
 0x4e3   :  { %4901 = vst.msk [vmem:[%s9097_s3 + $0x291] sm:$0xff] %vm3885_vm11, %v3812_v39  ;;  %v4245_v60 = vmul.f32 %v3812_v39, %v3812_v39  ;;  %v4158_v28 = vsel %vm3885_vm11, %v3812_v39, 0.0 }
 0x4e4   :  { %4900 = vst.msk [vmem:[%s9097_s3 + $0x289] sm:$0xff] %vm3885_vm11, %v3807_v7  ;;  %v4156_v40 = vsel %vm3885_vm11, %v3807_v7, 0.0  ;;  %v4244_v8 = vmul.f32 %v3807_v7, %v3807_v7 }
 0x4e5   :  { %v4157_v48 = vadd.f32 %v4156_v40, %v4155_v37  ;;  %v4357_v49 = vsel %vm3885_vm11, %v4245_v60, 0.0 }
 0x4e6   :  { %v4355_v61 = vsel %vm3885_vm11, %v4244_v8, 0.0 }
 0x4e7   :  { %v4356_v13 = vadd.f32 %v4355_v61, %v4354_v16  ;;  %v4159_v29 = vadd.f32 %v4158_v28, %v4157_v48 }
 0x4e9   :  { %v4358_v9 = vadd.f32 %v4357_v49, %v4356_v13 }
 0x4f0   :  { %v5072_v17 = vpop.f32.mrb[18].mxu1 }
 0x4f1   :  { %v3822_v20 = vadd.f32 %v8814_v43, %v5072_v17  ;;  %v3816_v46 = vpop.f32.mrb[19].mxu1 }
 0x4f2   :  { %v3817_v47 = vadd.f32 %v8814_v43, %v3816_v46 }
 0x4f3   :  { %4903 = vst.msk [vmem:[%s9097_s3 + $0x2a9] sm:$0xff] %vm3885_vm11, %v3822_v20  ;;  %v4247_v11 = vmul.f32 %v3822_v20, %v3822_v20  ;;  %v4162_v22 = vsel %vm3885_vm11, %v3822_v20, 0.0 }
 0x4f4   :  { %4902 = vst.msk [vmem:[%s9097_s3 + $0x2a1] sm:$0xff] %vm3885_vm11, %v3817_v47  ;;  %v4160_v10 = vsel %vm3885_vm11, %v3817_v47, 0.0  ;;  %v4246_v21 = vmul.f32 %v3817_v47, %v3817_v47 }
 0x4f5   :  { %v4161_v23 = vadd.f32 %v4160_v10, %v4159_v29  ;;  %v4361_v32 = vsel %vm3885_vm11, %v4247_v11, 0.0 }
 0x4f6   :  { %v4359_v54 = vsel %vm3885_vm11, %v4246_v21, 0.0 }
 0x4f7   :  { %v4360_v55 = vadd.f32 %v4359_v54, %v4358_v9  ;;  %v4163_v24 = vadd.f32 %v4162_v22, %v4161_v23 }
 0x4f9   :  { %v4362_v33 = vadd.f32 %v4361_v32, %v4360_v55 }
 0x500   :  { %v5075_v25 = vpop.f32.mrb[20].mxu1 }
 0x501   :  { %v3832_v52 = vadd.f32 %v8814_v43, %v5075_v25  ;;  %v3826_v42 = vpop.f32.mrb[21].mxu1 }
 0x502   :  { %v3827_v18 = vadd.f32 %v8814_v43, %v3826_v42 }
 0x503   :  { %4905 = vst.msk [vmem:[%s9097_s3 + $0x2c1] sm:$0xff] %vm3885_vm11, %v3832_v52  ;;  %v4249_v50 = vmul.f32 %v3832_v52, %v3832_v52  ;;  %v4166_v19 = vsel %vm3885_vm11, %v3832_v52, 0.0 }
 0x504   :  { %4904 = vst.msk [vmem:[%s9097_s3 + $0x2b9] sm:$0xff] %vm3885_vm11, %v3827_v18  ;;  %v4164_v56 = vsel %vm3885_vm11, %v3827_v18, 0.0  ;;  %v4248_v51 = vmul.f32 %v3827_v18, %v3827_v18 }
 0x505   :  { %v4165_v41 = vadd.f32 %v4164_v56, %v4163_v24  ;;  %v4365_v30 = vsel %vm3885_vm11, %v4249_v50, 0.0 }
 0x506   :  { %v4363_v53 = vsel %vm3885_vm11, %v4248_v51, 0.0 }
 0x507   :  { %v4364_v57 = vadd.f32 %v4363_v53, %v4362_v33  ;;  %v4167_v4 = vadd.f32 %v4166_v19, %v4165_v41 }
 0x509   :  { %v4366_v31 = vadd.f32 %v4365_v30, %v4364_v57 }
 0x52a   :  { %v5078_v2 = vpop.f32.mrb[22].mxu1 }
 0x52b   :  { %v3842_v26 = vadd.f32 %v8814_v43, %v5078_v2  ;;  %v3836_v62 = vpop.f32.mrb[23].mxu1 }
 0x52c   :  { %v3837_v58 = vadd.f32 %v8814_v43, %v3836_v62 }
 0x52d   :  { %4907 = vst.msk [vmem:[%s9097_s3 + $0x2d9] sm:$0xff] %vm3885_vm11, %v3842_v26  ;;  %v4251_v5 = vmul.f32 %v3842_v26, %v3842_v26  ;;  %v4170_v59 = vsel %vm3885_vm11, %v3842_v26, 0.0 }
 0x52e   :  { %4906 = vst.msk [vmem:[%s9097_s3 + $0x2d1] sm:$0xff] %vm3885_vm11, %v3837_v58  ;;  %v4168_v3 = vsel %vm3885_vm11, %v3837_v58, 0.0  ;;  %v4250_v63 = vmul.f32 %v3837_v58, %v3837_v58 }
 0x52f   :  { %v4169_v27 = vadd.f32 %v4168_v3, %v4167_v4  ;;  %v4369_v34 = vsel %vm3885_vm11, %v4251_v5, 0.0 }
 0x530   :  { %v4367_v12 = vsel %vm3885_vm11, %v4250_v63, 0.0 }
 0x531   :  { %v4368_v14 = vadd.f32 %v4367_v12, %v4366_v31  ;;  %v4171_v35 = vadd.f32 %v4170_v59, %v4169_v27 }
 0x533   :  { %v4370_v36 = vadd.f32 %v4369_v34, %v4368_v14 }
 0x539   :  { %v5081_v0 = vpop.f32.mrb[24].mxu1 }
 0x53a   :  { %v3852_v44 = vadd.f32 %v8814_v43, %v5081_v0  ;;  %v3846_v38 = vpop.f32.mrb[25].mxu1 }
 0x53b   :  { %v3847_v15 = vadd.f32 %v8814_v43, %v3846_v38 }
 0x53c   :  { %4909 = vst.msk [vmem:[%s9097_s3 + $0x2f1] sm:$0xff] %vm3885_vm11, %v3852_v44  ;;  %v4253_v37 = vmul.f32 %v3852_v44, %v3852_v44  ;;  %v4174_v39 = vsel %vm3885_vm11, %v3852_v44, 0.0 }
 0x53d   :  { %4908 = vst.msk [vmem:[%s9097_s3 + $0x2e9] sm:$0xff] %vm3885_vm11, %v3847_v15  ;;  %v4172_v6 = vsel %vm3885_vm11, %v3847_v15, 0.0  ;;  %v4252_v16 = vmul.f32 %v3847_v15, %v3847_v15 }
 0x53e   :  { %v4173_v45 = vadd.f32 %v4172_v6, %v4171_v35  ;;  %v4373_v40 = vsel %vm3885_vm11, %v4253_v37, 0.0 }
 0x53f   :  { %v4371_v1 = vsel %vm3885_vm11, %v4252_v16, 0.0 }
 0x540   :  { %v4372_v7 = vadd.f32 %v4371_v1, %v4370_v36  ;;  %v4175_v60 = vadd.f32 %v4174_v39, %v4173_v45 }
 0x542   :  { %v4374_v8 = vadd.f32 %v4373_v40, %v4372_v7 }
 0x549   :  { %v5084_v48 = vpop.f32.mrb[26].mxu1 }
 0x54a   :  { %v3862_v28 = vadd.f32 %v8814_v43, %v5084_v48  ;;  %v3856_v61 = vpop.f32.mrb[27].mxu1 }
 0x54b   :  { %v3857_v13 = vadd.f32 %v8814_v43, %v3856_v61 }
 0x54c   :  { %4911 = vst.msk [vmem:[%s9097_s3 + $0x309] sm:$0xff] %vm3885_vm11, %v3862_v28  ;;  %v4255_v29 = vmul.f32 %v3862_v28, %v3862_v28  ;;  %v4178_v20 = vsel %vm3885_vm11, %v3862_v28, 0.0 }
 0x54d   :  { %4910 = vst.msk [vmem:[%s9097_s3 + $0x301] sm:$0xff] %vm3885_vm11, %v3857_v13  ;;  %v4176_v49 = vsel %vm3885_vm11, %v3857_v13, 0.0  ;;  %v4254_v9 = vmul.f32 %v3857_v13, %v3857_v13 }
 0x54e   :  { %v4177_v17 = vadd.f32 %v4176_v49, %v4175_v60  ;;  %v4377_v10 = vsel %vm3885_vm11, %v4255_v29, 0.0 }
 0x54f   :  { %v4375_v46 = vsel %vm3885_vm11, %v4254_v9, 0.0 }
 0x550   :  { %v4376_v47 = vadd.f32 %v4375_v46, %v4374_v8  ;;  %v4179_v11 = vadd.f32 %v4178_v20, %v4177_v17 }
 0x552   :  { %v4378_v21 = vadd.f32 %v4377_v10, %v4376_v47 }
 0x559   :  { %v5087_v23 = vpop.f32.mrb[28].mxu1 }
 0x55a   :  { %v3872_v22 = vadd.f32 %v8814_v43, %v5087_v23  ;;  %v3866_v54 = vpop.f32.mrb[29].mxu1 }
 0x55b   :  { %v3867_v55 = vadd.f32 %v8814_v43, %v3866_v54 }
 0x55c   :  { %4913 = vst.msk [vmem:[%s9097_s3 + $0x321] sm:$0xff] %vm3885_vm11, %v3872_v22  ;;  %v4257_v24 = vmul.f32 %v3872_v22, %v3872_v22  ;;  %v4182_v52 = vsel %vm3885_vm11, %v3872_v22, 0.0 }
 0x55d   :  { %4912 = vst.msk [vmem:[%s9097_s3 + $0x319] sm:$0xff] %vm3885_vm11, %v3867_v55  ;;  %v4180_v32 = vsel %vm3885_vm11, %v3867_v55, 0.0  ;;  %v4256_v33 = vmul.f32 %v3867_v55, %v3867_v55 }
 0x55e   :  { %v4181_v25 = vadd.f32 %v4180_v32, %v4179_v11  ;;  %v4381_v56 = vsel %vm3885_vm11, %v4257_v24, 0.0 }
 0x55f   :  { %v4379_v42 = vsel %vm3885_vm11, %v4256_v33, 0.0 }
 0x560   :  { %v4380_v18 = vadd.f32 %v4379_v42, %v4378_v21  ;;  %v4183_v50 = vadd.f32 %v4182_v52, %v4181_v25 }
 0x562   :  { %v4382_v51 = vadd.f32 %v4381_v56, %v4380_v18 }
 0x566   :  { %v5090_v41 = vpop.f32.mrb[30].mxu1 }
 0x567   :  { %v3882_v19 = vadd.f32 %v8814_v43, %v5090_v41  ;;  %v3876_v53 = vpop.f32.mrb[31].mxu1 }
 0x568   :  { %v3877_v57 = vadd.f32 %v8814_v43, %v3876_v53 }
 0x569   :  { %4915 = vst.msk [vmem:[%s9097_s3 + $0x339] sm:$0xff] %vm3885_vm11, %v3882_v19  ;;  %v4259_v4 = vmul.f32 %v3882_v19, %v3882_v19  ;;  %v4186_v26 = vsel %vm3885_vm11, %v3882_v19, 0.0 }
 0x56a   :  { %4914 = vst.msk [vmem:[%s9097_s3 + $0x331] sm:$0xff] %vm3885_vm11, %v3877_v57  ;;  %v4184_v30 = vsel %vm3885_vm11, %v3877_v57, 0.0  ;;  %v4258_v31 = vmul.f32 %v3877_v57, %v3877_v57 }
 0x56b   :  { %v4185_v2 = vadd.f32 %v4184_v30, %v4183_v50  ;;  %v4385_v5 = vsel %vm3885_vm11, %v4259_v4, 0.0 }
 0x56c   :  { %v4383_v62 = vsel %vm3885_vm11, %v4258_v31, 0.0 }
 0x56d   :  { %v4187_v43 = vadd.f32 %v4186_v26, %v4185_v2  ;;  %v4384_v58 = vadd.f32 %v4383_v62, %v4382_v51 }
 0x56f   :  { %v4188_v3 = vrot.slane %v4187_v43, 4  ;;  %v4386_v63 = vadd.f32 %v4385_v5, %v4384_v58 }
 0x571   :  { %v4189_v27 = vadd.f32 %v4188_v3, %v4187_v43  ;;  %v4387_v59 = vrot.slane %v4386_v63, 4 }
 0x573   :  { %v4190_v12 = vrot.slane %v4189_v27, 2  ;;  %v4388_v14 = vadd.f32 %v4387_v59, %v4386_v63 }
 0x575   :  { %v4191_v35 = vadd.f32 %v4190_v12, %v4189_v27  ;;  %v4389_v34 = vrot.slane %v4388_v14, 2 }
 0x577   :  { %v4192_v36 = vrot.slane %v4191_v35, 1  ;;  %v4390_v0 = vadd.f32 %v4389_v34, %v4388_v14 }
 0x579   :  { %v4193_v44 = vadd.f32 %v4192_v36, %v4191_v35  ;;  %v4391_v38 = vrot.slane %v4390_v0, 1 }
 0x57b   :  { %4195 = vst.msk [vmem:[%s9099_s4] sm:$0x1] %vm4194_vm13, %v4193_v44  ;;  %v4392_v15 = vadd.f32 %v4391_v38, %v4390_v0 }
 0x57d   :  { %4393 = vst.msk [vmem:[%s9099_s4 + $0x1] sm:$0x1] %vm4194_vm13, %v4392_v15 }

// kernel: block_forward.4
= control target key start
LH: loop header
LB: loop body
LE: loop exit
PB: predicated region body
PF: predicated region fallthrough
CT: control target
= control target key end

     0   :  { %vm24_vm0 = vcmask 64512   ;;  %vm27_vm1 = vcmask 58368   ;;  %v7712_v0 = vmov 0.0   ;;  %s5305_s23 = smov 8   ;;  %s5308_s16 = smov 32   ;;  %s7705_s0 = inlined_call_operand.vmem [shape: f32[2,18,18,8], index: 0, kind: input, shape index: {}]   ;;  %s7706_s1 = inlined_call_operand.vmem [shape: f32[1,8], index: 1, kind: input, shape index: {}]   ;;  %s7707_s2 = inlined_call_operand.vmem [shape: f32[1,8], index: 2, kind: input, shape index: {}]   ;;  %s7708_s3 = inlined_call_operand.vmem [shape: f32[72,8], index: 3, kind: input, shape index: {}]   ;;  %s7709_s4 = inlined_call_operand.vmem [shape: f32[1,8], index: 4, kind: input, shape index: {}]   ;;  %s7710_s6 = inlined_call_operand.vmem [shape: f32[1,8,8], index: 6, kind: output, shape index: {1}]   ;;  %s7711_s5 = inlined_call_operand.vmem [shape: f32[2,8,256], index: 5, kind: output, shape index: {0}]  }
   0x1   :  { %25 = vst.msk [vmem:[#allocation2] sm:$0xff] %vm24_vm0, %v7712_v0  ;;  %26 = vst.msk [vmem:[#allocation2 + $0x8] sm:$0xff] %vm24_vm0, %v7712_v0  ;;  %v5567_v1 = vld [vmem:[%s7706_s1] ss:$0 sm:$0xff]  ;;  %v4940_v5 = vld [vmem:[%s7705_s0 + $0x31] sm:$0xff]  ;;  %s5309_s17 = smov 40  }
   0x2   :  { %29 = vst.msk [vmem:[#allocation2 + $0x18] sm:$0xff] %vm24_vm0, %v7712_v0  ;;  %30 = vst.msk [vmem:[#allocation2 + $0x20] sm:$0xff] %vm24_vm0, %v7712_v0  ;;  %v5572_v2 = vld [vmem:[%s7707_s2] ss:$0 sm:$0xff]  ;;  %v4939_v6 = vld [vmem:[%s7705_s0 + $0x21] sm:$0xff]  ;;  %v207_v8 = vmul.f32 %v5567_v1, %v4940_v5  ;;  %s5310_s18 = smov 48  }
   0x3   :  { %32 = vst.msk [vmem:[#allocation2 + $0x30] sm:$0xff] %vm24_vm0, %v7712_v0  ;;  %33 = vst.msk [vmem:[#allocation2 + $0x38] sm:$0xff] %vm24_vm0, %v7712_v0  ;;  %v4938_v3 = vld [vmem:[%s7705_s0 + $0x19] sm:$0xff]  ;;  %v4942_v7 = vld [vmem:[%s7705_s0 + $0x49] sm:$0xff]  ;;  %v206_v9 = vmul.f32 %v5567_v1, %v4939_v6  ;;  %s5312_s12 = smov 64  }
   0x4   :  { %35 = vst.msk [vmem:[#allocation2 + $0x48] sm:$0xff] %vm24_vm0, %v7712_v0  ;;  %36 = vst.msk [vmem:[#allocation2 + $0x50] sm:$0xff] %vm24_vm0, %v7712_v0  ;;  %v205_v4 = vmul.f32 %v5567_v1, %v4938_v3  ;;  %v209_v10 = vmul.f32 %v5567_v1, %v4942_v7  ;;  %v4941_v11 = vld [vmem:[%s7705_s0 + $0x39] sm:$0xff]  ;;  %v4944_v12 = vld [vmem:[%s7705_s0 + $0x61] sm:$0xff]  ;;  %v277_v19 = vadd.f32 %v5572_v2, %v207_v8 }
   0x5   :  { %38 = vst.msk [vmem:[#allocation2 + $0x60] sm:$0xff] %vm24_vm0, %v7712_v0  ;;  %39 = vst.msk [vmem:[#allocation2 + $0x68] sm:$0xff] %vm24_vm0, %v7712_v0  ;;  %v4943_v13 = vld [vmem:[%s7705_s0 + $0x51] sm:$0xff]  ;;  %v208_v15 = vmul.f32 %v5567_v1, %v4941_v11  ;;  %v211_v16 = vmul.f32 %v5567_v1, %v4944_v12  ;;  %v4946_v18 = vld [vmem:[%s7705_s0 + $0x79] sm:$0xff]  ;;  %v276_v20 = vadd.f32 %v5572_v2, %v206_v9 }
   0x6   :  { %41 = vst.msk [vmem:[#allocation2 + $0x78] sm:$0xff] %vm24_vm0, %v7712_v0  ;;  %42 = vst.msk [vmem:[#allocation2 + $0x80] sm:$0xff] %vm24_vm0, %v7712_v0  ;;  %v275_v14 = vadd.f32 %v5572_v2, %v205_v4  ;;  %v210_v17 = vmul.f32 %v5567_v1, %v4943_v13  ;;  %v279_v21 = vadd.f32 %v5572_v2, %v209_v10  ;;  %v4945_v26 = vld [vmem:[%s7705_s0 + $0x69] sm:$0xff]  ;;  %v4948_v27 = vld [vmem:[%s7705_s0 + $0x91] sm:$0xff]  ;;  %vm341_vm3 = vcmp.ge.f32.partialorder %v277_v19, 0.0 }
   0x7   :  { %44 = vst.msk [vmem:[#allocation2 + $0x90] sm:$0xff] %vm24_vm0, %v7712_v0  ;;  %45 = vst.msk [vmem:[#allocation2 + $0x98] sm:$0xff] %vm24_vm0, %v7712_v0  ;;  %v213_v22 = vmul.f32 %v5567_v1, %v4946_v18  ;;  %v278_v24 = vadd.f32 %v5572_v2, %v208_v15  ;;  %v281_v25 = vadd.f32 %v5572_v2, %v211_v16  ;;  %v405_v28 = vmul.f32 0.01, %v277_v19  ;;  %v4947_v33 = vld [vmem:[%s7705_s0 + $0x81] sm:$0xff]  ;;  %v4950_v46 = vld [vmem:[%s7705_s0 + $0xa9] sm:$0xff] }
   0x8   :  { %47 = vst.msk [vmem:[#allocation2 + $0xa8] sm:$0xff] %vm24_vm0, %v7712_v0  ;;  %48 = vst.msk [vmem:[#allocation2 + $0xb0] sm:$0xff] %vm24_vm0, %v7712_v0  ;;  %vm339_vm2 = vcmp.ge.f32.partialorder %v275_v14, 0.0  ;;  %v403_v23 = vmul.f32 0.01, %v275_v14  ;;  %vm340_vm4 = vcmp.ge.f32.partialorder %v276_v20, 0.0  ;;  %v280_v40 = vadd.f32 %v5572_v2, %v210_v17 }
   0x9   :  { %50 = vst.msk [vmem:[#allocation2 + $0xc0] sm:$0xff] %vm24_vm0, %v7712_v0  ;;  %51 = vst.msk [vmem:[#allocation2 + $0xc8] sm:$0xff] %vm24_vm0, %v7712_v0  ;;  %v404_v29 = vmul.f32 0.01, %v276_v20  ;;  %v724_v30 = vld [vmem:[#allocation2 + $0x1] sm:$0xff]  ;;  %vm343_vm5 = vcmp.ge.f32.partialorder %v279_v21, 0.0  ;;  %v469_v34 = vsel %vm341_vm3, %v277_v19, %v405_v28  ;;  %v283_v41 = vadd.f32 %v5572_v2, %v213_v22 }
   0xa   :  { %53 = vst.msk [vmem:[#allocation2 + $0xd8] sm:$0xff] %vm24_vm0, %v7712_v0  ;;  %54 = vst.msk [vmem:[#allocation2 + $0xe0] sm:$0xff] %vm24_vm0, %v7712_v0  ;;  %v467_v31 = vsel %vm339_vm2, %v275_v14, %v403_v23  ;;  %v407_v32 = vmul.f32 0.01, %v279_v21  ;;  %vm342_vm6 = vcmp.ge.f32.partialorder %v278_v24, 0.0  ;;  %852 = vrot.lane.b32.xlu0 %v724_v30, %s5305_s23  ;;  %vm345_vm7 = vcmp.ge.f32.partialorder %v281_v25, 0.0 }
   0xb   :  { %56 = vst.msk [vmem:[#allocation2 + $0xf0] sm:$0xff] %vm24_vm0, %v7712_v0  ;;  %57 = vst.msk [vmem:[#allocation2 + $0xf8] sm:$0xff] %vm24_vm0, %v7712_v0  ;;  %v468_v35 = vsel %vm340_vm4, %v276_v20, %v404_v29  ;;  %v406_v36 = vmul.f32 0.01, %v278_v24  ;;  %v409_v39 = vmul.f32 0.01, %v281_v25  ;;  %v212_v43 = vmul.f32 %v5567_v1, %v4945_v26 }
   0xc   :  { %59 = vst.msk [vmem:[#allocation2 + $0x108] sm:$0xff] %vm24_vm0, %v7712_v0  ;;  %60 = vst.msk [vmem:[#allocation2 + $0x110] sm:$0xff] %vm24_vm0, %v7712_v0  ;;  %v471_v38 = vsel %vm343_vm5, %v279_v21, %v407_v32  ;;  %v215_v44 = vmul.f32 %v5567_v1, %v4948_v27  ;;  %v214_v45 = vmul.f32 %v5567_v1, %v4947_v33  ;;  %v4949_v47 = vld [vmem:[%s7705_s0 + $0x99] sm:$0xff]  ;;  %v4952_v48 = vld [vmem:[%s7705_s0 + $0xc1] sm:$0xff]  ;;  %vm344_vm8 = vcmp.ge.f32.partialorder %v280_v40, 0.0 }
   0xd   :  { %62 = vst.msk [vmem:[#allocation2 + $0x120] sm:$0xff] %vm24_vm0, %v7712_v0  ;;  %63 = vst.msk [vmem:[#allocation2 + $0x128] sm:$0xff] %vm24_vm0, %v7712_v0  ;;  %v470_v42 = vsel %vm342_vm6, %v278_v24, %v406_v36  ;;  %v473_v49 = vsel %vm345_vm7, %v281_v25, %v409_v39  ;;  %v408_v50 = vmul.f32 0.01, %v280_v40  ;;  %vm347_vm9 = vcmp.ge.f32.partialorder %v283_v41, 0.0  ;;  %v4951_v59 = vld [vmem:[%s7705_s0 + $0xb1] sm:$0xff] }
   0xe   :  { %65 = vst.msk [vmem:[#allocation2 + $0x138] sm:$0xff] %vm24_vm0, %v7712_v0  ;;  %66 = vst.msk [vmem:[#allocation2 + $0x140] sm:$0xff] %vm24_vm0, %v7712_v0  ;;  %v411_v51 = vmul.f32 0.01, %v283_v41  ;;  %v282_v52 = vadd.f32 %v5572_v2, %v212_v43  ;;  %v285_v53 = vadd.f32 %v5572_v2, %v215_v44  ;;  %v284_v54 = vadd.f32 %v5572_v2, %v214_v45  ;;  %v4954_v10 = vld [vmem:[%s7705_s0 + $0xd9] sm:$0xff]  ;;  %v4953_v11 = vld [vmem:[%s7705_s0 + $0xc9] sm:$0xff] }
   0xf   :  { %68 = vst.msk [vmem:[#allocation2 + $0x150] sm:$0xff] %vm24_vm0, %v7712_v0  ;;  %69 = vst.msk [vmem:[#allocation2 + $0x158] sm:$0xff] %vm24_vm0, %v7712_v0  ;;  %v472_v55 = vsel %vm344_vm8, %v280_v40, %v408_v50  ;;  %v217_v56 = vmul.f32 %v5567_v1, %v4950_v46  ;;  %v216_v57 = vmul.f32 %v5567_v1, %v4949_v47  ;;  %v4956_v16 = vld [vmem:[%s7705_s0 + $0xf1] sm:$0xff]  ;;  %v4955_v20 = vld [vmem:[%s7705_s0 + $0xe1] sm:$0xff] }
  0x10   :  { %71 = vst.msk [vmem:[#allocation2 + $0x168] sm:$0xff] %vm24_vm0, %v7712_v0  ;;  %72 = vst.msk [vmem:[#allocation2 + $0x170] sm:$0xff] %vm24_vm0, %v7712_v0  ;;  %v219_v58 = vmul.f32 %v5567_v1, %v4952_v48  ;;  %v475_v60 = vsel %vm347_vm9, %v283_v41, %v411_v51  ;;  %vm346_vm10 = vcmp.ge.f32.partialorder %v282_v52, 0.0  ;;  %v410_v61 = vmul.f32 0.01, %v282_v52  ;;  %v4958_v25 = vld [vmem:[%s7705_s0 + $0x109] sm:$0xff] }
  0x11   :  { %74 = vst.msk [vmem:[#allocation2 + $0x180] sm:$0xff] %vm24_vm0, %v7712_v0  ;;  %75 = vst.msk [vmem:[#allocation2 + $0x188] sm:$0xff] %vm24_vm0, %v7712_v0  ;;  %vm349_vm11 = vcmp.ge.f32.partialorder %v285_v53, 0.0  ;;  %v413_v63 = vmul.f32 0.01, %v285_v53  ;;  %vm348_vm12 = vcmp.ge.f32.partialorder %v284_v54, 0.0  ;;  %v287_v4 = vadd.f32 %v5572_v2, %v217_v56 }
  0x12   :  { %77 = vst.msk [vmem:[#allocation2 + $0x198] sm:$0xff] %vm24_vm0, %v7712_v0  ;;  %78 = vst.msk [vmem:[#allocation2 + $0x1a0] sm:$0xff] %vm24_vm0, %v7712_v0  ;;  %v412_v3 = vmul.f32 0.01, %v284_v54  ;;  %v474_v6 = vsel %vm346_vm10, %v282_v52, %v410_v61  ;;  %v286_v7 = vadd.f32 %v5572_v2, %v216_v57  ;;  %v289_v8 = vadd.f32 %v5572_v2, %v219_v58  ;;  %v4957_v26 = vld [vmem:[%s7705_s0 + $0xf9] sm:$0xff]  ;;  %v4960_v40 = vld [vmem:[%s7705_s0 + $0x121] sm:$0xff] }
  0x13   :  { %80 = vst.msk [vmem:[#allocation2 + $0x1b0] sm:$0xff] %vm24_vm0, %v7712_v0  ;;  %81 = vst.msk [vmem:[#allocation2 + $0x1b8] sm:$0xff] %vm24_vm0, %v7712_v0  ;;  %v218_v9 = vmul.f32 %v5567_v1, %v4951_v59  ;;  %v477_v13 = vsel %vm349_vm11, %v285_v53, %v413_v63  ;;  %vm351_vm13 = vcmp.ge.f32.partialorder %v287_v4, 0.0  ;;  %v415_v15 = vmul.f32 0.01, %v287_v4  ;;  %v4959_v46 = vld [vmem:[%s7705_s0 + $0x111] sm:$0xff] }
  0x14   :  { %83 = vst.msk [vmem:[#allocation2 + $0x1c8] sm:$0xff] %vm24_vm0, %v7712_v0  ;;  %84 = vst.msk [vmem:[#allocation2 + $0x1d0] sm:$0xff] %vm24_vm0, %v7712_v0  ;;  %v476_v14 = vsel %vm348_vm12, %v284_v54, %v412_v3  ;;  %vm350_vm14 = vcmp.ge.f32.partialorder %v286_v7, 0.0  ;;  %v414_v18 = vmul.f32 0.01, %v286_v7  ;;  %vm353_vm15 = vcmp.ge.f32.partialorder %v289_v8, 0.0 }
  0x15   :  { %86 = vst.msk [vmem:[#allocation2 + $0x1e0] sm:$0xff] %vm24_vm0, %v7712_v0  ;;  %87 = vst.msk [vmem:[#allocation2 + $0x1e8] sm:$0xff] %vm24_vm0, %v7712_v0  ;;  %v288_v19 = vadd.f32 %v5572_v2, %v218_v9  ;;  %v479_v21 = vsel %vm351_vm13, %v287_v4, %v415_v15  ;;  %v417_v22 = vmul.f32 0.01, %v289_v8  ;;  %v221_v23 = vmul.f32 %v5567_v1, %v4954_v10  ;;  %v4962_v52 = vld [vmem:[%s7705_s0 + $0x139] sm:$0xff]  ;;  %v4961_v53 = vld [vmem:[%s7705_s0 + $0x129] sm:$0xff] }
  0x16   :  { %89 = vst.msk [vmem:[#allocation2 + $0x1f8] sm:$0xff] %vm24_vm0, %v7712_v0  ;;  %90 = vst.msk [vmem:[#allocation2 + $0x200] sm:$0xff] %vm24_vm0, %v7712_v0  ;;  %v220_v24 = vmul.f32 %v5567_v1, %v4953_v11  ;;  %v478_v27 = vsel %vm350_vm14, %v286_v7, %v414_v18  ;;  %v223_v29 = vmul.f32 %v5567_v1, %v4956_v16  ;;  %v4964_v57 = vld [vmem:[%s7705_s0 + $0x151] sm:$0xff]  ;;  %v4963_v61 = vld [vmem:[%s7705_s0 + $0x141] sm:$0xff] }
  0x17   :  { %92 = vst.msk [vmem:[#allocation2 + $0x210] sm:$0xff] %vm24_vm0, %v7712_v0  ;;  %93 = vst.msk [vmem:[#allocation2 + $0x218] sm:$0xff] %vm24_vm0, %v7712_v0  ;;  %v416_v28 = vmul.f32 0.01, %v288_v19  ;;  %v291_v32 = vadd.f32 %v5572_v2, %v221_v23  ;;  %v224_v39 = vmul.f32 %v5567_v1, %v4957_v26  ;;  %v227_v51 = vmul.f32 %v5567_v1, %v4960_v40  ;;  %v596_v7 = vld [vmem:[#allocation2] sm:$0xff] }
  0x18   :  { %95 = vst.msk [vmem:[#allocation2 + $0x228] sm:$0xff] %vm24_vm0, %v7712_v0  ;;  %96 = vst.msk [vmem:[#allocation2 + $0x230] sm:$0xff] %vm24_vm0, %v7712_v0  ;;  %v290_v33 = vadd.f32 %v5572_v2, %v220_v24  ;;  %v226_v63 = vmul.f32 %v5567_v1, %v4959_v46  ;;  %v229_v3 = vmul.f32 %v5567_v1, %v4962_v52  ;;  %v4974_v46 = vld [vmem:[%s7705_s0 + $0x1f9] sm:$0xff] }
  0x19   :  { %98 = vst.msk [vmem:[#allocation2 + $0x240] sm:$0xff] %vm24_vm0, %v7712_v0  ;;  %99 = vst.msk [vmem:[#allocation2 + $0x248] sm:$0xff] %vm24_vm0, %v7712_v0  ;;  %vm355_vm2 = vcmp.ge.f32.partialorder %v291_v32, 0.0  ;;  %v419_v41 = vmul.f32 0.01, %v291_v32  ;;  %v294_v50 = vadd.f32 %v5572_v2, %v224_v39  ;;  %v228_v4 = vmul.f32 %v5567_v1, %v4961_v53 }
  0x1a   :  { %101 = vst.msk [vmem:[#allocation2 + $0x258] sm:$0xff] %vm24_vm0, %v7712_v0  ;;  %102 = vst.msk [vmem:[#allocation2 + $0x260] sm:$0xff] %vm24_vm0, %v7712_v0  ;;  %vm354_vm3 = vcmp.ge.f32.partialorder %v290_v33, 0.0  ;;  %v231_v16 = vmul.f32 %v5567_v1, %v4964_v57 }
  0x1b   :  { %104 = vst.msk [vmem:[#allocation2 + $0x270] sm:$0xff] %vm24_vm0, %v7712_v0  ;;  %105 = vst.msk [vmem:[#allocation2 + $0x278] sm:$0xff] %vm24_vm0, %v7712_v0  ;;  %v483_v48 = vsel %vm355_vm2, %v291_v32, %v419_v41  ;;  %vm358_vm7 = vcmp.ge.f32.partialorder %v294_v50, 0.0  ;;  %v422_v59 = vmul.f32 0.01, %v294_v50  ;;  %v298_v15 = vadd.f32 %v5572_v2, %v228_v4  ;;  %v4971_v41 = vld [vmem:[%s7705_s0 + $0x1d1] sm:$0xff] }
  0x1c   :  { %107 = vst.msk [vmem:[#allocation2 + $0x288] sm:$0xff] %vm24_vm0, %v7712_v0  ;;  %108 = vst.msk [vmem:[#allocation2 + $0x290] sm:$0xff] %vm24_vm0, %v7712_v0 }
  0x1d   :  { %110 = vst.msk [vmem:[#allocation2 + $0x2a0] sm:$0xff] %vm24_vm0, %v7712_v0  ;;  %111 = vst.msk [vmem:[#allocation2 + $0x2a8] sm:$0xff] %vm24_vm0, %v7712_v0  ;;  %v486_v10 = vsel %vm358_vm7, %v294_v50, %v422_v59  ;;  %vm362_vm11 = vcmp.ge.f32.partialorder %v298_v15, 0.0 }
  0x1e   :  { %113 = vst.msk [vmem:[#allocation2 + $0x2b8] sm:$0xff] %vm24_vm0, %v7712_v0  ;;  %114 = vst.msk [vmem:[#allocation2 + $0x2c0] sm:$0xff] %vm24_vm0, %v7712_v0 }
  0x1f   :  { %116 = vst.msk [vmem:[#allocation2 + $0x2d0] sm:$0xff] %vm24_vm0, %v7712_v0  ;;  %117 = vst.msk [vmem:[#allocation2 + $0x2d8] sm:$0xff] %vm24_vm0, %v7712_v0 }
  0x20   :  { %119 = vst.msk [vmem:[#allocation2 + $0x2e8] sm:$0xff] %vm24_vm0, %v7712_v0  ;;  %120 = vst.msk [vmem:[#allocation2 + $0x2f0] sm:$0xff] %vm24_vm0, %v7712_v0 }
  0x21   :  { %122 = vst.msk [vmem:[#allocation2 + $0x300] sm:$0xff] %vm24_vm0, %v7712_v0  ;;  %123 = vst.msk [vmem:[#allocation2 + $0x308] sm:$0xff] %vm24_vm0, %v7712_v0 }
  0x22   :  { %125 = vst.msk [vmem:[#allocation2 + $0x318] sm:$0xff] %vm24_vm0, %v7712_v0  ;;  %126 = vst.msk [vmem:[#allocation2 + $0x320] sm:$0xff] %vm24_vm0, %v7712_v0 }
  0x23   :  { %128 = vst.msk [vmem:[#allocation2 + $0x330] sm:$0xff] %vm24_vm0, %v7712_v0  ;;  %129 = vst.msk [vmem:[#allocation2 + $0x338] sm:$0xff] %vm24_vm0, %v7712_v0 }
  0x24   :  { %131 = vst.msk [vmem:[#allocation2 + $0x348] sm:$0xff] %vm24_vm0, %v7712_v0  ;;  %132 = vst.msk [vmem:[#allocation2 + $0x350] sm:$0xff] %vm24_vm0, %v7712_v0 }
  0x25   :  { %28 = vst.msk [vmem:[#allocation2 + $0x10] sm:$0x3] %vm27_vm1, %v7712_v0  ;;  %31 = vst.msk [vmem:[#allocation2 + $0x28] sm:$0x3] %vm27_vm1, %v7712_v0 }
  0x26   :  { %34 = vst.msk [vmem:[#allocation2 + $0x40] sm:$0x3] %vm27_vm1, %v7712_v0  ;;  %37 = vst.msk [vmem:[#allocation2 + $0x58] sm:$0x3] %vm27_vm1, %v7712_v0 }
  0x27   :  { %40 = vst.msk [vmem:[#allocation2 + $0x70] sm:$0x3] %vm27_vm1, %v7712_v0  ;;  %43 = vst.msk [vmem:[#allocation2 + $0x88] sm:$0x3] %vm27_vm1, %v7712_v0 }
  0x28   :  { %46 = vst.msk [vmem:[#allocation2 + $0xa0] sm:$0x3] %vm27_vm1, %v7712_v0  ;;  %49 = vst.msk [vmem:[#allocation2 + $0xb8] sm:$0x3] %vm27_vm1, %v7712_v0 }
  0x29   :  { %52 = vst.msk [vmem:[#allocation2 + $0xd0] sm:$0x3] %vm27_vm1, %v7712_v0  ;;  %55 = vst.msk [vmem:[#allocation2 + $0xe8] sm:$0x3] %vm27_vm1, %v7712_v0 }
  0x2a   :  { %58 = vst.msk [vmem:[#allocation2 + $0x100] sm:$0x3] %vm27_vm1, %v7712_v0  ;;  %61 = vst.msk [vmem:[#allocation2 + $0x118] sm:$0x3] %vm27_vm1, %v7712_v0 }
  0x2b   :  { %64 = vst.msk [vmem:[#allocation2 + $0x130] sm:$0x3] %vm27_vm1, %v7712_v0  ;;  %67 = vst.msk [vmem:[#allocation2 + $0x148] sm:$0x3] %vm27_vm1, %v7712_v0 }
  0x2c   :  { %70 = vst.msk [vmem:[#allocation2 + $0x160] sm:$0x3] %vm27_vm1, %v7712_v0  ;;  %73 = vst.msk [vmem:[#allocation2 + $0x178] sm:$0x3] %vm27_vm1, %v7712_v0  ;;  %v725_v37 = vld [vmem:[#allocation2 + $0x9] sm:$0xff] }
  0x2d   :  { %76 = vst.msk [vmem:[#allocation2 + $0x190] sm:$0x3] %vm27_vm1, %v7712_v0  ;;  %79 = vst.msk [vmem:[#allocation2 + $0x1a8] sm:$0x3] %vm27_vm1, %v7712_v0  ;;  %854 = vrot.lane.b32.xlu0 %v725_v37, %s5305_s23  ;;  %v293_v37 = vadd.f32 %v5572_v2, %v223_v29 }
  0x2e   :  { %82 = vst.msk [vmem:[#allocation2 + $0x1c0] sm:$0x3] %vm27_vm1, %v7712_v0  ;;  %85 = vst.msk [vmem:[#allocation2 + $0x1d8] sm:$0x3] %vm27_vm1, %v7712_v0 }
  0x2f   :  { %88 = vst.msk [vmem:[#allocation2 + $0x1f0] sm:$0x3] %vm27_vm1, %v7712_v0  ;;  %91 = vst.msk [vmem:[#allocation2 + $0x208] sm:$0x3] %vm27_vm1, %v7712_v0  ;;  %vm357_vm4 = vcmp.ge.f32.partialorder %v293_v37, 0.0 }
  0x30   :  { %94 = vst.msk [vmem:[#allocation2 + $0x220] sm:$0x3] %vm27_vm1, %v7712_v0  ;;  %97 = vst.msk [vmem:[#allocation2 + $0x238] sm:$0x3] %vm27_vm1, %v7712_v0  ;;  %v421_v43 = vmul.f32 0.01, %v293_v37 }
  0x31   :  { %100 = vst.msk [vmem:[#allocation2 + $0x250] sm:$0x3] %vm27_vm1, %v7712_v0  ;;  %103 = vst.msk [vmem:[#allocation2 + $0x268] sm:$0x3] %vm27_vm1, %v7712_v0 }
  0x32   :  { %106 = vst.msk [vmem:[#allocation2 + $0x280] sm:$0x3] %vm27_vm1, %v7712_v0  ;;  %109 = vst.msk [vmem:[#allocation2 + $0x298] sm:$0x3] %vm27_vm1, %v7712_v0 }
  0x33   :  { %112 = vst.msk [vmem:[#allocation2 + $0x2b0] sm:$0x3] %vm27_vm1, %v7712_v0  ;;  %115 = vst.msk [vmem:[#allocation2 + $0x2c8] sm:$0x3] %vm27_vm1, %v7712_v0 }
  0x34   :  { %118 = vst.msk [vmem:[#allocation2 + $0x2e0] sm:$0x3] %vm27_vm1, %v7712_v0  ;;  %121 = vst.msk [vmem:[#allocation2 + $0x2f8] sm:$0x3] %vm27_vm1, %v7712_v0 }
  0x35   :  { %124 = vst.msk [vmem:[#allocation2 + $0x310] sm:$0x3] %vm27_vm1, %v7712_v0  ;;  %127 = vst.msk [vmem:[#allocation2 + $0x328] sm:$0x3] %vm27_vm1, %v7712_v0 }
  0x36   :  { %130 = vst.msk [vmem:[#allocation2 + $0x340] sm:$0x3] %vm27_vm1, %v7712_v0  ;;  %133 = vst.msk [vmem:[#allocation2 + $0x358] sm:$0x3] %vm27_vm1, %v7712_v0  ;;  %vm352_vm1 = vcmp.ge.f32.partialorder %v288_v19, 0.0 }
  0x37   :  { %532 = vst.msk [vmem:[#allocation2 + $0x19] sm:$0xff] %vm24_vm0, %v467_v31  ;;  %534 = vst.msk [vmem:[#allocation2 + $0x31] sm:$0xff] %vm24_vm0, %v469_v34  ;;  %v481_v31 = vsel %vm353_vm15, %v289_v8, %v417_v22  ;;  %v222_v34 = vmul.f32 %v5567_v1, %v4955_v20  ;;  %v480_v36 = vsel %vm352_vm1, %v288_v19, %v416_v28 }
  0x38   :  { %533 = vst.msk [vmem:[#allocation2 + $0x21] sm:$0xff] %vm24_vm0, %v468_v35  ;;  %536 = vst.msk [vmem:[#allocation2 + $0x49] sm:$0xff] %vm24_vm0, %v471_v38  ;;  %v225_v38 = vmul.f32 %v5567_v1, %v4958_v25  ;;  %v230_v19 = vmul.f32 %v5567_v1, %v4963_v61  ;;  %v301_v28 = vadd.f32 %v5572_v2, %v231_v16 }
  0x39   :  { %535 = vst.msk [vmem:[#allocation2 + $0x39] sm:$0xff] %vm24_vm0, %v470_v42  ;;  %538 = vst.msk [vmem:[#allocation2 + $0x61] sm:$0xff] %vm24_vm0, %v473_v49  ;;  %v418_v42 = vmul.f32 0.01, %v290_v33  ;;  %v292_v44 = vadd.f32 %v5572_v2, %v222_v34  ;;  %v238_v61 = vmul.f32 %v5567_v1, %v4971_v41 }
  0x3a   :  { %537 = vst.msk [vmem:[#allocation2 + $0x51] sm:$0xff] %vm24_vm0, %v472_v55  ;;  %540 = vst.msk [vmem:[#allocation2 + $0x79] sm:$0xff] %vm24_vm0, %v475_v60  ;;  %v295_v45 = vadd.f32 %v5572_v2, %v225_v38  ;;  %v485_v55 = vsel %vm357_vm4, %v293_v37, %v421_v43  ;;  %v297_v60 = vadd.f32 %v5572_v2, %v227_v51  ;;  %v4972_v37 = vld [vmem:[%s7705_s0 + $0x1e1] sm:$0xff]  ;;  %vm365_vm12 = vcmp.ge.f32.partialorder %v301_v28, 0.0  ;;  %v4973_v51 = vld [vmem:[%s7705_s0 + $0x1e9] sm:$0xff] }
  0x3b   :  { %539 = vst.msk [vmem:[#allocation2 + $0x69] sm:$0xff] %vm24_vm0, %v474_v6  ;;  %542 = vst.msk [vmem:[#allocation2 + $0x91] sm:$0xff] %vm24_vm0, %v477_v13  ;;  %v482_v49 = vsel %vm354_vm3, %v290_v33, %v418_v42  ;;  %vm356_vm5 = vcmp.ge.f32.partialorder %v292_v44, 0.0  ;;  %v420_v56 = vmul.f32 0.01, %v292_v44  ;;  %v4965_v6 = vld [vmem:[%s7705_s0 + $0x159] sm:$0xff]  ;;  %v296_v13 = vadd.f32 %v5572_v2, %v226_v63 }
  0x3c   :  { %541 = vst.msk [vmem:[#allocation2 + $0x81] sm:$0xff] %vm24_vm0, %v476_v14  ;;  %544 = vst.msk [vmem:[#allocation2 + $0xa9] sm:$0xff] %vm24_vm0, %v479_v21  ;;  %vm359_vm6 = vcmp.ge.f32.partialorder %v295_v45, 0.0  ;;  %v423_v58 = vmul.f32 0.01, %v295_v45  ;;  %vm361_vm8 = vcmp.ge.f32.partialorder %v297_v60, 0.0  ;;  %v299_v14 = vadd.f32 %v5572_v2, %v229_v3 }
  0x3d   :  { %543 = vst.msk [vmem:[#allocation2 + $0x99] sm:$0xff] %vm24_vm0, %v478_v27  ;;  %546 = vst.msk [vmem:[#allocation2 + $0xc1] sm:$0xff] %vm24_vm0, %v481_v31  ;;  %v425_v11 = vmul.f32 0.01, %v297_v60  ;;  %v232_v21 = vmul.f32 %v5567_v1, %v4965_v6  ;;  %vm360_vm9 = vcmp.ge.f32.partialorder %v296_v13, 0.0  ;;  %v300_v29 = vadd.f32 %v5572_v2, %v230_v19  ;;  %v4970_v31 = vld [vmem:[%s7705_s0 + $0x1c9] sm:$0xff] }
  0x3e   :  { %v726_v62 = vld [vmem:[#allocation2 + $0x19] sm:$0xff]  ;;  %v728_v5 = vld [vmem:[#allocation2 + $0x31] sm:$0xff]  ;;  %545 = vst.msk [vmem:[#allocation2 + $0xb1] sm:$0xff] %vm24_vm0, %v480_v36  ;;  %548 = vst.msk [vmem:[#allocation2 + $0xd9] sm:$0xff] %vm24_vm0, %v483_v48  ;;  %v487_v9 = vsel %vm359_vm6, %v295_v45, %v423_v58  ;;  %v424_v24 = vmul.f32 0.01, %v296_v13  ;;  %v237_v50 = vmul.f32 %v5567_v1, %v4970_v31 }
  0x3f   :  { %856 = vrot.lane.b32.xlu1 %v726_v62, %s5305_s23  ;;  %860 = vrot.lane.b32.xlu0 %v728_v5, %s5305_s23  ;;  %v727_v12 = vld [vmem:[#allocation2 + $0x21] sm:$0xff]  ;;  %v730_v17 = vld [vmem:[#allocation2 + $0x49] sm:$0xff]  ;;  %547 = vst.msk [vmem:[#allocation2 + $0xc9] sm:$0xff] %vm24_vm0, %v482_v49  ;;  %550 = vst.msk [vmem:[#allocation2 + $0xf1] sm:$0xff] %vm24_vm0, %v485_v55  ;;  %v484_v62 = vsel %vm356_vm5, %v292_v44, %v420_v56  ;;  %v489_v18 = vsel %vm361_vm8, %v297_v60, %v425_v11  ;;  %vm363_vm10 = vcmp.ge.f32.partialorder %v299_v14, 0.0 }
  0x40   :  { %v729_v30 = vld [vmem:[#allocation2 + $0x39] sm:$0xff]  ;;  %v732_v35 = vld [vmem:[#allocation2 + $0x61] sm:$0xff]  ;;  %v4966_v5 = vld [vmem:[%s7705_s0 + $0x169] sm:$0xff]  ;;  %549 = vst.msk [vmem:[#allocation2 + $0xe1] sm:$0xff] %vm24_vm0, %v484_v62  ;;  %v427_v25 = vmul.f32 0.01, %v299_v14  ;;  %v488_v33 = vsel %vm360_vm9, %v296_v13, %v424_v24  ;;  %v302_v36 = vadd.f32 %v5572_v2, %v232_v21  ;;  %v239_v56 = vmul.f32 %v5567_v1, %v4972_v37 }
  0x41   :  { %v731_v47 = vld [vmem:[#allocation2 + $0x51] sm:$0xff]  ;;  %v734_v54 = vld [vmem:[#allocation2 + $0x79] sm:$0xff]  ;;  %660 = vst.msk [vmem:[#allocation3] sm:$0xff] %vm24_vm0, %v596_v7  ;;  %552 = vst.msk [vmem:[#allocation2 + $0x109] sm:$0xff] %vm24_vm0, %v487_v9  ;;  %v233_v20 = vmul.f32 %v5567_v1, %v4966_v5  ;;  %v426_v27 = vmul.f32 0.01, %v298_v15  ;;  %v307_v60 = vadd.f32 %v5572_v2, %v237_v50  ;;  %v241_v62 = vmul.f32 %v5567_v1, %v4974_v46 }
  0x42   :  { %v733_v8 = vld [vmem:[#allocation2 + $0x69] sm:$0xff]  ;;  %551 = vst.msk [vmem:[#allocation2 + $0xf9] sm:$0xff] %vm24_vm0, %v486_v10  ;;  %v5755_v22 = vld [vmem:[#allocation2 + $0x18] sm:$0xff]  ;;  %554 = vst.msk [vmem:[#allocation2 + $0x121] sm:$0xff] %vm24_vm0, %v489_v18  ;;  %v491_v34 = vsel %vm363_vm10, %v299_v14, %v427_v25  ;;  %v429_v40 = vmul.f32 0.01, %v301_v28  ;;  %v309_v4 = vadd.f32 %v5572_v2, %v239_v56  ;;  %v240_v5 = vmul.f32 %v5567_v1, %v4973_v51 }
  0x43   :  { %858 = vrot.lane.b32.xlu1 %v727_v12, %s5305_s23  ;;  %864 = vrot.lane.b32.xlu0 %v730_v17, %s5305_s23  ;;  %v736_v12 = vld [vmem:[#allocation2 + $0x91] sm:$0xff]  ;;  %v597_v17 = vld [vmem:[#allocation2 + $0x8] sm:$0xff]  ;;  %662 = vst.msk [vmem:[#allocation3 + $0x10] sm:$0xff] %vm24_vm0, %v5755_v22  ;;  %v5779_v38 = vld [vmem:[#allocation2 + $0x20] sm:$0xff]  ;;  %v490_v39 = vsel %vm362_vm11, %v298_v15, %v426_v27  ;;  %vm364_vm13 = vcmp.ge.f32.partialorder %v300_v29, 0.0  ;;  %vm366_vm15 = vcmp.ge.f32.partialorder %v302_v36, 0.0  ;;  %v311_v13 = vadd.f32 %v5572_v2, %v241_v62 }
  0x44   :  { %661 = vst.msk [vmem:[#allocation3 + $0x8] sm:$0xff] %vm24_vm0, %v597_v17  ;;  %v5757_v23 = vld [vmem:[#allocation2 + $0x30] sm:$0xff]  ;;  %v735_v26 = vld [vmem:[#allocation2 + $0x81] sm:$0xff]  ;;  %553 = vst.msk [vmem:[#allocation2 + $0x111] sm:$0xff] %vm24_vm0, %v488_v33  ;;  %v428_v43 = vmul.f32 0.01, %v300_v29  ;;  %v493_v48 = vsel %vm365_vm12, %v301_v28, %v429_v40  ;;  %v310_v19 = vadd.f32 %v5572_v2, %v240_v5 }
  0x45   :  { %664 = vst.msk [vmem:[#allocation3 + $0x20] sm:$0xff] %vm24_vm0, %v5757_v23  ;;  %v738_v32 = vld [vmem:[#allocation2 + $0xa9] sm:$0xff]  ;;  %556 = vst.msk [vmem:[#allocation2 + $0x139] sm:$0xff] %vm24_vm0, %v491_v34  ;;  %v430_v49 = vmul.f32 0.01, %v302_v36  ;;  %v740_v52 = vld [vmem:[#allocation2 + $0xc1] sm:$0xff] }
  0x46   :  { %663 = vst.msk [vmem:[#allocation3 + $0x18] sm:$0xff] %vm24_vm0, %v5779_v38  ;;  %v5788_v42 = vld [vmem:[#allocation2 + $0x48] sm:$0xff]  ;;  %555 = vst.msk [vmem:[#allocation2 + $0x129] sm:$0xff] %vm24_vm0, %v490_v39  ;;  %v492_v53 = vsel %vm364_vm13, %v300_v29, %v428_v43  ;;  %v5808_v57 = vld [vmem:[#allocation2 + $0x38] sm:$0xff]  ;;  %vm371_vm2 = vcmp.ge.f32.partialorder %v307_v60, 0.0  ;;  %vm373_vm3 = vcmp.ge.f32.partialorder %v309_v4, 0.0 }
  0x47   :  { %862 = vrot.lane.b32.xlu1 %v729_v30, %s5305_s23  ;;  %868 = vrot.lane.b32.xlu0 %v732_v35, %s5305_s23  ;;  %v4967_v30 = vld [vmem:[%s7705_s0 + $0x171] sm:$0xff]  ;;  %v303_v35 = vadd.f32 %v5572_v2, %v233_v20  ;;  %666 = vst.msk [vmem:[#allocation3 + $0x30] sm:$0xff] %vm24_vm0, %v5788_v42  ;;  %558 = vst.msk [vmem:[#allocation2 + $0x151] sm:$0xff] %vm24_vm0, %v493_v48  ;;  %v5810_v58 = vld [vmem:[#allocation2 + $0x60] sm:$0xff]  ;;  %v494_v59 = vsel %vm366_vm15, %v302_v36, %v430_v49  ;;  %v435_v11 = vmul.f32 0.01, %v307_v60 }
  0x48   :  { %v234_v45 = vmul.f32 %v5567_v1, %v4967_v30  ;;  %557 = vst.msk [vmem:[#allocation2 + $0x141] sm:$0xff] %vm24_vm0, %v492_v53  ;;  %665 = vst.msk [vmem:[#allocation3 + $0x28] sm:$0xff] %vm24_vm0, %v5808_v57  ;;  %v5821_v63 = vld [vmem:[#allocation2 + $0x50] sm:$0xff]  ;;  %v4975_v7 = vld [vmem:[%s7705_s0 + $0x201] sm:$0xff]  ;;  %v437_v18 = vmul.f32 0.01, %v309_v4 }
  0x49   :  { %vm367_vm14 = vcmp.ge.f32.partialorder %v303_v35, 0.0  ;;  %v431_v44 = vmul.f32 0.01, %v303_v35  ;;  %668 = vst.msk [vmem:[#allocation3 + $0x40] sm:$0xff] %vm24_vm0, %v5810_v58  ;;  %559 = vst.msk [vmem:[#allocation2 + $0x159] sm:$0xff] %vm24_vm0, %v494_v59  ;;  %v4976_v6 = vld [vmem:[%s7705_s0 + $0x211] sm:$0xff]  ;;  %v499_v24 = vsel %vm371_vm2, %v307_v60, %v435_v11 }
  0x4a   :  { %v304_v55 = vadd.f32 %v5572_v2, %v234_v45  ;;  %667 = vst.msk [vmem:[#allocation3 + $0x38] sm:$0xff] %vm24_vm0, %v5821_v63  ;;  %v5838_v9 = vld [vmem:[#allocation2 + $0x78] sm:$0xff]  ;;  %v5845_v14 = vld [vmem:[#allocation2 + $0x68] sm:$0xff]  ;;  %v5847_v15 = vld [vmem:[#allocation2 + $0x90] sm:$0xff]  ;;  %vm375_vm5 = vcmp.ge.f32.partialorder %v311_v13, 0.0  ;;  %v501_v28 = vsel %vm373_vm3, %v309_v4, %v437_v18  ;;  %vm374_vm6 = vcmp.ge.f32.partialorder %v310_v19, 0.0 }
  0x4b   :  { %866 = vrot.lane.b32.xlu1 %v731_v47, %s5305_s23  ;;  %872 = vrot.lane.b32.xlu0 %v734_v54, %s5305_s23  ;;  %v737_v47 = vld [vmem:[#allocation2 + $0x99] sm:$0xff]  ;;  %v495_v54 = vsel %vm367_vm14, %v303_v35, %v431_v44  ;;  %v739_v10 = vld [vmem:[#allocation2 + $0xb1] sm:$0xff]  ;;  %670 = vst.msk [vmem:[#allocation3 + $0x50] sm:$0xff] %vm24_vm0, %v5838_v9  ;;  %v4980_v21 = vld [vmem:[%s7705_s0 + $0x241] sm:$0xff]  ;;  %v439_v29 = vmul.f32 0.01, %v311_v13  ;;  %v243_v34 = vmul.f32 %v5567_v1, %v4976_v6 }
  0x4c   :  { %560 = vst.msk [vmem:[#allocation2 + $0x169] sm:$0xff] %vm24_vm0, %v495_v54  ;;  %vm368_vm1 = vcmp.ge.f32.partialorder %v304_v55, 0.0  ;;  %v432_v3 = vmul.f32 0.01, %v304_v55  ;;  %v742_v16 = vld [vmem:[#allocation2 + $0xd9] sm:$0xff]  ;;  %669 = vst.msk [vmem:[#allocation3 + $0x48] sm:$0xff] %vm24_vm0, %v5845_v14  ;;  %v242_v35 = vmul.f32 %v5567_v1, %v4975_v7  ;;  %v247_v45 = vmul.f32 %v5567_v1, %v4980_v21 }
  0x4d   :  { %v4977_v20 = vld [vmem:[%s7705_s0 + $0x219] sm:$0xff]  ;;  %672 = vst.msk [vmem:[#allocation3 + $0x60] sm:$0xff] %vm24_vm0, %v5847_v15  ;;  %564 = vst.msk [vmem:[#allocation2 + $0x1c9] sm:$0xff] %vm24_vm0, %v499_v24  ;;  %v438_v30 = vmul.f32 0.01, %v310_v19  ;;  %v5873_v31 = vld [vmem:[#allocation2 + $0xa8] sm:$0xff]  ;;  %v503_v41 = vsel %vm375_vm5, %v311_v13, %v439_v29 }
  0x4e   :  { %v496_v17 = vsel %vm368_vm1, %v304_v55, %v432_v3  ;;  %v5866_v27 = vld [vmem:[#allocation2 + $0x80] sm:$0xff]  ;;  %566 = vst.msk [vmem:[#allocation2 + $0x1e1] sm:$0xff] %vm24_vm0, %v501_v28  ;;  %v4981_v39 = vld [vmem:[%s7705_s0 + $0x249] sm:$0xff]  ;;  %674 = vst.msk [vmem:[#allocation3 + $0x70] sm:$0xff] %vm24_vm0, %v5873_v31  ;;  %v244_v44 = vmul.f32 %v5567_v1, %v4977_v20  ;;  %v312_v48 = vadd.f32 %v5572_v2, %v242_v35 }
  0x4f   :  { %870 = vrot.lane.b32.xlu1 %v733_v8, %s5305_s23  ;;  %876 = vrot.lane.b32.xlu0 %v736_v12, %s5305_s23  ;;  %v4978_v8 = vld [vmem:[%s7705_s0 + $0x229] sm:$0xff]  ;;  %v308_v12 = vadd.f32 %v5572_v2, %v238_v61  ;;  %561 = vst.msk [vmem:[#allocation2 + $0x171] sm:$0xff] %vm24_vm0, %v496_v17  ;;  %671 = vst.msk [vmem:[#allocation3 + $0x58] sm:$0xff] %vm24_vm0, %v5866_v27  ;;  %v4982_v37 = vld [vmem:[%s7705_s0 + $0x259] sm:$0xff]  ;;  %v502_v43 = vsel %vm374_vm6, %v310_v19, %v438_v30 }
  0x50   :  { %v245_v36 = vmul.f32 %v5567_v1, %v4978_v8  ;;  %v744_v40 = vld [vmem:[#allocation2 + $0xf1] sm:$0xff]  ;;  %568 = vst.msk [vmem:[#allocation2 + $0x1f9] sm:$0xff] %vm24_vm0, %v503_v41  ;;  %567 = vst.msk [vmem:[#allocation2 + $0x1e9] sm:$0xff] %vm24_vm0, %v502_v43  ;;  %v5904_v51 = vld [vmem:[#allocation2 + $0xc0] sm:$0xff]  ;;  %v314_v53 = vadd.f32 %v5572_v2, %v244_v44  ;;  %v317_v54 = vadd.f32 %v5572_v2, %v247_v45  ;;  %vm376_vm8 = vcmp.ge.f32.partialorder %v312_v48, 0.0 }
  0x51   :  { %vm372_vm4 = vcmp.ge.f32.partialorder %v308_v12, 0.0  ;;  %v436_v25 = vmul.f32 0.01, %v308_v12  ;;  %v5894_v46 = vld [vmem:[#allocation2 + $0x98] sm:$0xff]  ;;  %v249_v55 = vmul.f32 %v5567_v1, %v4982_v37  ;;  %v248_v56 = vmul.f32 %v5567_v1, %v4981_v39  ;;  %v4983_v60 = vld [vmem:[%s7705_s0 + $0x261] sm:$0xff]  ;;  %676 = vst.msk [vmem:[#allocation3 + $0x80] sm:$0xff] %vm24_vm0, %v5904_v51 }
  0x52   :  { %v315_v49 = vadd.f32 %v5572_v2, %v245_v36  ;;  %673 = vst.msk [vmem:[#allocation3 + $0x68] sm:$0xff] %vm24_vm0, %v5894_v46  ;;  %v4984_v59 = vld [vmem:[%s7705_s0 + $0x271] sm:$0xff]  ;;  %v440_v4 = vmul.f32 0.01, %v312_v48  ;;  %v746_v5 = vld [vmem:[#allocation2 + $0x109] sm:$0xff]  ;;  %vm378_vm10 = vcmp.ge.f32.partialorder %v314_v53, 0.0 }
  0x53   :  { %874 = vrot.lane.b32.xlu1 %v735_v26, %s5305_s23  ;;  %880 = vrot.lane.b32.xlu0 %v738_v32, %s5305_s23  ;;  %v4979_v26 = vld [vmem:[%s7705_s0 + $0x231] sm:$0xff]  ;;  %v741_v32 = vld [vmem:[#allocation2 + $0xc9] sm:$0xff]  ;;  %v500_v33 = vsel %vm372_vm4, %v308_v12, %v436_v25  ;;  %vm381_vm11 = vcmp.ge.f32.partialorder %v317_v54, 0.0  ;;  %v445_v11 = vmul.f32 0.01, %v317_v54  ;;  %v319_v17 = vadd.f32 %v5572_v2, %v249_v55  ;;  %v745_v20 = vld [vmem:[#allocation2 + $0xf9] sm:$0xff] }
  0x54   :  { %565 = vst.msk [vmem:[#allocation2 + $0x1d1] sm:$0xff] %vm24_vm0, %v500_v33  ;;  %v246_v50 = vmul.f32 %v5567_v1, %v4979_v26  ;;  %v5919_v61 = vld [vmem:[#allocation2 + $0xb0] sm:$0xff]  ;;  %v5921_v62 = vld [vmem:[#allocation2 + $0xd8] sm:$0xff]  ;;  %vm379_vm9 = vcmp.ge.f32.partialorder %v315_v49, 0.0  ;;  %v443_v6 = vmul.f32 0.01, %v315_v49  ;;  %v504_v8 = vsel %vm376_vm8, %v312_v48, %v440_v4 }
  0x55   :  { %675 = vst.msk [vmem:[#allocation3 + $0x78] sm:$0xff] %vm24_vm0, %v5919_v61  ;;  %678 = vst.msk [vmem:[#allocation3 + $0x90] sm:$0xff] %vm24_vm0, %v5921_v62  ;;  %v4986_v12 = vld [vmem:[%s7705_s0 + $0x289] sm:$0xff]  ;;  %v318_v18 = vadd.f32 %v5572_v2, %v248_v56  ;;  %v509_v24 = vsel %vm381_vm11, %v317_v54, %v445_v11  ;;  %v251_v25 = vmul.f32 %v5567_v1, %v4984_v59  ;;  %v4985_v28 = vld [vmem:[%s7705_s0 + $0x279] sm:$0xff]  ;;  %vm383_vm13 = vcmp.ge.f32.partialorder %v319_v17, 0.0 }
  0x56   :  { %569 = vst.msk [vmem:[#allocation2 + $0x201] sm:$0xff] %vm24_vm0, %v504_v8  ;;  %v507_v13 = vsel %vm379_vm9, %v315_v49, %v443_v6  ;;  %v5937_v19 = vld [vmem:[#allocation2 + $0xc8] sm:$0xff]  ;;  %v250_v26 = vmul.f32 %v5567_v1, %v4983_v60  ;;  %v5950_v29 = vld [vmem:[#allocation2 + $0xf0] sm:$0xff]  ;;  %574 = vst.msk [vmem:[#allocation2 + $0x241] sm:$0xff] %vm24_vm0, %v509_v24  ;;  %v253_v33 = vmul.f32 %v5567_v1, %v4986_v12  ;;  %v447_v36 = vmul.f32 0.01, %v319_v17 }
  0x57   :  { %878 = vrot.lane.b32.xlu1 %v737_v47, %s5305_s23  ;;  %884 = vrot.lane.b32.xlu0 %v740_v52, %s5305_s23  ;;  %v313_v47 = vadd.f32 %v5572_v2, %v243_v34  ;;  %v743_v52 = vld [vmem:[#allocation2 + $0xe1] sm:$0xff]  ;;  %572 = vst.msk [vmem:[#allocation2 + $0x229] sm:$0xff] %vm24_vm0, %v507_v13  ;;  %677 = vst.msk [vmem:[#allocation3 + $0x88] sm:$0xff] %vm24_vm0, %v5937_v19  ;;  %v4987_v35 = vld [vmem:[%s7705_s0 + $0x291] sm:$0xff]  ;;  %vm382_vm14 = vcmp.ge.f32.partialorder %v318_v18, 0.0  ;;  %v321_v39 = vadd.f32 %v5572_v2, %v251_v25 }
  0x58   :  { %v748_v30 = vld [vmem:[#allocation2 + $0x121] sm:$0xff]  ;;  %680 = vst.msk [vmem:[#allocation3 + $0xa0] sm:$0xff] %vm24_vm0, %v5950_v29  ;;  %v446_v37 = vmul.f32 0.01, %v318_v18  ;;  %v4989_v41 = vld [vmem:[%s7705_s0 + $0x2a9] sm:$0xff]  ;;  %v747_v43 = vld [vmem:[#allocation2 + $0x111] sm:$0xff]  ;;  %v320_v45 = vadd.f32 %v5572_v2, %v250_v26  ;;  %v252_v48 = vmul.f32 %v5567_v1, %v4985_v28 }
  0x59   :  { %vm377_vm7 = vcmp.ge.f32.partialorder %v313_v47, 0.0  ;;  %v441_v3 = vmul.f32 0.01, %v313_v47  ;;  %v4988_v34 = vld [vmem:[%s7705_s0 + $0x2a1] sm:$0xff]  ;;  %vm385_vm15 = vcmp.ge.f32.partialorder %v321_v39, 0.0  ;;  %v5986_v56 = vld [vmem:[#allocation2 + $0xf8] sm:$0xff] }
  0x5a   :  { %v5974_v49 = vld [vmem:[#allocation2 + $0xe0] sm:$0xff]  ;;  %v510_v54 = vsel %vm382_vm14, %v318_v18, %v446_v37  ;;  %v449_v55 = vmul.f32 0.01, %v321_v39  ;;  %vm384_vm1 = vcmp.ge.f32.partialorder %v320_v45, 0.0  ;;  %v448_v60 = vmul.f32 0.01, %v320_v45 }
  0x5b   :  { %882 = vrot.lane.b32.xlu1 %v739_v10, %s5305_s23  ;;  %888 = vrot.lane.b32.xlu0 %v742_v16, %s5305_s23  ;;  %v505_v7 = vsel %vm377_vm7, %v313_v47, %v441_v3  ;;  %v442_v10 = vmul.f32 0.01, %v314_v53  ;;  %v316_v16 = vadd.f32 %v5572_v2, %v246_v50  ;;  %v323_v47 = vadd.f32 %v5572_v2, %v253_v33  ;;  %v5976_v50 = vld [vmem:[#allocation2 + $0x108] sm:$0xff]  ;;  %v5988_v59 = vld [vmem:[#allocation2 + $0x120] sm:$0xff]  ;;  %v4992_v8 = vld [vmem:[%s7705_s0 + $0x2d1] sm:$0xff] }
  0x5c   :  { %570 = vst.msk [vmem:[#allocation2 + $0x211] sm:$0xff] %vm24_vm0, %v505_v7  ;;  %679 = vst.msk [vmem:[#allocation3 + $0x98] sm:$0xff] %vm24_vm0, %v5974_v49  ;;  %v513_v4 = vsel %vm385_vm15, %v321_v39, %v449_v55  ;;  %v255_v6 = vmul.f32 %v5567_v1, %v4988_v34  ;;  %v254_v7 = vmul.f32 %v5567_v1, %v4987_v35  ;;  %v749_v18 = vld [vmem:[#allocation2 + $0x129] sm:$0xff]  ;;  %v6018_v25 = vld [vmem:[#allocation2 + $0x138] sm:$0xff] }
  0x5d   :  { %v506_v21 = vsel %vm378_vm10, %v314_v53, %v442_v10  ;;  %vm380_vm12 = vcmp.ge.f32.partialorder %v316_v16, 0.0  ;;  %v511_v53 = vsel %vm383_vm13, %v319_v17, %v447_v36  ;;  %682 = vst.msk [vmem:[#allocation3 + $0xb0] sm:$0xff] %vm24_vm0, %v5976_v50  ;;  %575 = vst.msk [vmem:[#allocation2 + $0x249] sm:$0xff] %vm24_vm0, %v510_v54  ;;  %vm387_vm2 = vcmp.ge.f32.partialorder %v323_v47, 0.0  ;;  %v4991_v10 = vld [vmem:[%s7705_s0 + $0x2c1] sm:$0xff]  ;;  %v6009_v17 = vld [vmem:[#allocation2 + $0x110] sm:$0xff] }
  0x5e   :  { %571 = vst.msk [vmem:[#allocation2 + $0x219] sm:$0xff] %vm24_vm0, %v506_v21  ;;  %576 = vst.msk [vmem:[#allocation2 + $0x259] sm:$0xff] %vm24_vm0, %v511_v53  ;;  %v451_v3 = vmul.f32 0.01, %v323_v47  ;;  %v512_v11 = vsel %vm384_vm1, %v320_v45, %v448_v60  ;;  %v325_v21 = vadd.f32 %v5572_v2, %v255_v6  ;;  %v324_v24 = vadd.f32 %v5572_v2, %v254_v7  ;;  %v752_v26 = vld [vmem:[#allocation2 + $0x151] sm:$0xff]  ;;  %v4994_v34 = vld [vmem:[%s7705_s0 + $0x2e9] sm:$0xff] }
  0x5f   :  { %886 = vrot.lane.b32.xlu1 %v741_v32, %s5305_s23  ;;  %892 = vrot.lane.b32.xlu0 %v744_v40, %s5305_s23  ;;  %v444_v32 = vmul.f32 0.01, %v316_v16  ;;  %v4990_v40 = vld [vmem:[%s7705_s0 + $0x2b9] sm:$0xff]  ;;  %681 = vst.msk [vmem:[#allocation3 + $0xa8] sm:$0xff] %vm24_vm0, %v5986_v56  ;;  %684 = vst.msk [vmem:[#allocation3 + $0xc0] sm:$0xff] %vm24_vm0, %v5988_v59  ;;  %v258_v33 = vmul.f32 %v5567_v1, %v4991_v10  ;;  %v6029_v35 = vld [vmem:[#allocation2 + $0x128] sm:$0xff] }
  0x60   :  { %578 = vst.msk [vmem:[#allocation2 + $0x271] sm:$0xff] %vm24_vm0, %v513_v4  ;;  %v515_v12 = vsel %vm387_vm2, %v323_v47, %v451_v3  ;;  %v257_v13 = vmul.f32 %v5567_v1, %v4990_v40  ;;  %577 = vst.msk [vmem:[#allocation2 + $0x261] sm:$0xff] %vm24_vm0, %v512_v11  ;;  %vm389_vm4 = vcmp.ge.f32.partialorder %v325_v21, 0.0  ;;  %v453_v37 = vmul.f32 0.01, %v325_v21  ;;  %v4993_v39 = vld [vmem:[%s7705_s0 + $0x2d9] sm:$0xff] }
  0x61   :  { %v508_v44 = vsel %vm380_vm12, %v316_v16, %v444_v32  ;;  %v256_v16 = vmul.f32 %v5567_v1, %v4989_v41  ;;  %580 = vst.msk [vmem:[#allocation2 + $0x289] sm:$0xff] %vm24_vm0, %v515_v12  ;;  %683 = vst.msk [vmem:[#allocation3 + $0xb8] sm:$0xff] %vm24_vm0, %v6009_v17  ;;  %v259_v32 = vmul.f32 %v5567_v1, %v4992_v8  ;;  %vm388_vm5 = vcmp.ge.f32.partialorder %v324_v24, 0.0  ;;  %v4996_v40 = vld [vmem:[%s7705_s0 + $0x301] sm:$0xff]  ;;  %v6039_v41 = vld [vmem:[#allocation2 + $0x150] sm:$0xff] }
  0x62   :  { %573 = vst.msk [vmem:[#allocation2 + $0x231] sm:$0xff] %vm24_vm0, %v508_v44  ;;  %v327_v28 = vadd.f32 %v5572_v2, %v257_v13  ;;  %686 = vst.msk [vmem:[#allocation3 + $0xd0] sm:$0xff] %vm24_vm0, %v6018_v25  ;;  %v4995_v47 = vld [vmem:[%s7705_s0 + $0x2f1] sm:$0xff]  ;;  %v328_v54 = vadd.f32 %v5572_v2, %v258_v33  ;;  %v4998_v55 = vld [vmem:[%s7705_s0 + $0x319] sm:$0xff]  ;;  %v261_v12 = vmul.f32 %v5567_v1, %v4994_v34  ;;  %vm1044_vm2 = vcmask 130112  }
  0x63   :  { %890 = vrot.lane.b32.xlu1 %v743_v52, %s5305_s23  ;;  %896 = vrot.lane.b32.xlu0 %v746_v5, %s5305_s23  ;;  %v750_v52 = vld [vmem:[#allocation2 + $0x139] sm:$0xff]  ;;  %v322_v5 = vadd.f32 %v5572_v2, %v252_v48  ;;  %685 = vst.msk [vmem:[#allocation3 + $0xc8] sm:$0xff] %vm24_vm0, %v6029_v35  ;;  %v329_v45 = vadd.f32 %v5572_v2, %v259_v32  ;;  %688 = vst.msk [vmem:[#allocation3 + $0xe0] sm:$0xff] %vm24_vm0, %v6039_v41  ;;  %v751_v48 = vld [vmem:[#allocation2 + $0x141] sm:$0xff] }
  0x64   :  { %vm391_vm6 = vcmp.ge.f32.partialorder %v327_v28, 0.0  ;;  %v455_v44 = vmul.f32 0.01, %v327_v28  ;;  %v4997_v60 = vld [vmem:[%s7705_s0 + $0x309] sm:$0xff]  ;;  %v6061_v7 = vld [vmem:[#allocation2 + $0x140] sm:$0xff]  ;;  %vm392_vm9 = vcmp.ge.f32.partialorder %v328_v54, 0.0  ;;  %v331_v32 = vadd.f32 %v5572_v2, %v261_v12 }
  0x65   :  { %vm386_vm3 = vcmp.ge.f32.partialorder %v322_v5, 0.0  ;;  %v754_v3 = vld [vmem:[#allocation2 + $0x169] sm:$0xff]  ;;  %vm393_vm8 = vcmp.ge.f32.partialorder %v329_v45, 0.0  ;;  %v457_v6 = vmul.f32 0.01, %v329_v45  ;;  %v4999_v13 = vld [vmem:[%s7705_s0 + $0x321] sm:$0xff]  ;;  %v265_v33 = vmul.f32 %v5567_v1, %v4998_v55 }
  0x66   :  { %v6063_v8 = vld [vmem:[#allocation2 + $0x168] sm:$0xff]  ;;  %v456_v11 = vmul.f32 0.01, %v328_v54  ;;  %687 = vst.msk [vmem:[#allocation3 + $0xd8] sm:$0xff] %vm24_vm0, %v6061_v7  ;;  %v264_v34 = vmul.f32 %v5567_v1, %v4997_v60  ;;  %vm395_vm10 = vcmp.ge.f32.partialorder %v331_v32, 0.0 }
  0x67   :  { %894 = vrot.lane.b32.xlu1 %v745_v20, %s5305_s23  ;;  %900 = vrot.lane.b32.xlu0 %v748_v30, %s5305_s23  ;;  %v450_v20 = vmul.f32 0.01, %v322_v5  ;;  %v326_v30 = vadd.f32 %v5572_v2, %v256_v16  ;;  %690 = vst.msk [vmem:[#allocation3 + $0xf0] sm:$0xff] %vm24_vm0, %v6063_v8  ;;  %v6075_v16 = vld [vmem:[#allocation2 + $0x158] sm:$0xff] }
  0x68   :  { %689 = vst.msk [vmem:[#allocation3 + $0xe8] sm:$0xff] %vm24_vm0, %v6075_v16 }
  0x69   :  { %v514_v36 = vsel %vm386_vm3, %v322_v5, %v450_v20  ;;  %vm390_vm7 = vcmp.ge.f32.partialorder %v326_v30, 0.0  ;;  %v454_v53 = vmul.f32 0.01, %v326_v30  ;;  %v519_v5 = vsel %vm391_vm6, %v327_v28, %v455_v44  ;;  %v753_v28 = vld [vmem:[#allocation2 + $0x159] sm:$0xff] }
  0x6a   :  { %579 = vst.msk [vmem:[#allocation2 + $0x279] sm:$0xff] %vm24_vm0, %v514_v36  ;;  %584 = vst.msk [vmem:[#allocation2 + $0x2b9] sm:$0xff] %vm24_vm0, %v519_v5  ;;  %v260_v20 = vmul.f32 %v5567_v1, %v4993_v39  ;;  %v6092_v36 = vld [vmem:[#allocation2 + $0x170] sm:$0xff]  ;;  %v6098_v39 = vld [vmem:[%s7707_s2] ss:$0 sm:$0xff] }
  0x6b   :  { %898 = vrot.lane.b32.xlu1 %v747_v43, %s5305_s23  ;;  %904 = vrot.lane.b32.xlu0 %v750_v52, %s5305_s23  ;;  %v452_v43 = vmul.f32 0.01, %v324_v24  ;;  %v517_v52 = vsel %vm389_vm4, %v325_v21, %v453_v37  ;;  %v518_v10 = vsel %vm390_vm7, %v326_v30, %v454_v53  ;;  %v263_v21 = vmul.f32 %v5567_v1, %v4996_v40  ;;  %v756_v37 = vld [vmem:[#allocation2 + $0x1b1] sm:$0xff] }
  0x6c   :  { %582 = vst.msk [vmem:[#allocation2 + $0x2a1] sm:$0xff] %vm24_vm0, %v517_v52  ;;  %583 = vst.msk [vmem:[#allocation2 + $0x2a9] sm:$0xff] %vm24_vm0, %v518_v10  ;;  %v520_v30 = vsel %vm392_vm9, %v328_v54, %v456_v11  ;;  %v330_v40 = vadd.f32 %v6098_v39, %v260_v20  ;;  %v334_v52 = vadd.f32 %v6098_v39, %v264_v34  ;;  %v629_v53 = vld [vmem:[#allocation2 + $0x1b8] sm:$0xff]  ;;  %v6117_v54 = vld [vmem:[#allocation2 + $0x1e0] sm:$0xff]  ;;  %vm2199_vm9 = vcmask 326912  }
  0x6d   :  { %v516_v4 = vsel %vm388_vm5, %v324_v24, %v452_v43  ;;  %v262_v24 = vmul.f32 %v5567_v1, %v4995_v47  ;;  %585 = vst.msk [vmem:[#allocation2 + $0x2c1] sm:$0xff] %vm24_vm0, %v520_v30  ;;  %v333_v2 = vadd.f32 %v6098_v39, %v263_v21  ;;  %v6106_v1 = vld [vmem:[%s7706_s1] ss:$0 sm:$0xff]  ;;  %691 = vst.msk [vmem:[#allocation3 + $0xf8] sm:$0xff] %vm24_vm0, %v6092_v36  ;;  %v459_v47 = vmul.f32 0.01, %v331_v32 }
  0x6e   :  { %581 = vst.msk [vmem:[#allocation2 + $0x291] sm:$0xff] %vm24_vm0, %v516_v4  ;;  %v266_v44 = vmul.f32 %v6106_v1, %v4999_v13  ;;  %vm394_vm11 = vcmp.ge.f32.partialorder %v330_v40, 0.0  ;;  %v458_v55 = vmul.f32 0.01, %v330_v40  ;;  %693 = vst.msk [vmem:[#allocation3 + $0x108] sm:$0xff] %vm24_vm0, %v629_v53  ;;  %vm398_vm15 = vcmp.ge.f32.partialorder %v334_v52, 0.0 }
  0x6f   :  { %902 = vrot.lane.b32.xlu1 %v749_v18, %s5305_s23  ;;  %908 = vrot.lane.b32.xlu0 %v752_v26, %s5305_s23  ;;  %v521_v18 = vsel %vm393_vm8, %v329_v45, %v457_v6  ;;  %v628_v26 = vld [vmem:[#allocation2 + $0x1b0] sm:$0xff]  ;;  %v332_v43 = vadd.f32 %v6098_v39, %v262_v24  ;;  %v6111_v45 = vld [vmem:[#allocation2 + $0x1c8] sm:$0xff]  ;;  %vm397_vm12 = vcmp.ge.f32.partialorder %v333_v2, 0.0  ;;  %v461_v60 = vmul.f32 0.01, %v333_v2  ;;  %696 = vst.msk [vmem:[#allocation3 + $0x120] sm:$0xff] %vm24_vm0, %v6117_v54 }
  0x70   :  { %586 = vst.msk [vmem:[#allocation2 + $0x2d1] sm:$0xff] %vm24_vm0, %v521_v18  ;;  %692 = vst.msk [vmem:[#allocation3 + $0x100] sm:$0xff] %vm24_vm0, %v628_v26  ;;  %v523_v4 = vsel %vm395_vm10, %v331_v32, %v459_v47  ;;  %v758_v6 = vld [vmem:[#allocation2 + $0x1c9] sm:$0xff]  ;;  %v522_v10 = vsel %vm394_vm11, %v330_v40, %v458_v55  ;;  %v462_v18 = vmul.f32 0.01, %v334_v52  ;;  %v336_v20 = vadd.f32 %v6098_v39, %v266_v44  ;;  %v6131_v24 = vld [vmem:[#allocation2 + $0x1f8] sm:$0xff] }
  0x71   :  { %694 = vst.msk [vmem:[#allocation3 + $0x110] sm:$0xff] %vm24_vm0, %v6111_v45  ;;  %vm396_vm13 = vcmp.ge.f32.partialorder %v332_v43, 0.0  ;;  %v460_v5 = vmul.f32 0.01, %v332_v43  ;;  %588 = vst.msk [vmem:[#allocation2 + $0x2e9] sm:$0xff] %vm24_vm0, %v523_v4  ;;  %v525_v11 = vsel %vm397_vm12, %v333_v2, %v461_v60  ;;  %v6129_v21 = vld [vmem:[#allocation2 + $0x1d0] sm:$0xff] }
  0x72   :  { %587 = vst.msk [vmem:[#allocation2 + $0x2d9] sm:$0xff] %vm24_vm0, %v522_v10  ;;  %590 = vst.msk [vmem:[#allocation2 + $0x301] sm:$0xff] %vm24_vm0, %v525_v11  ;;  %v526_v30 = vsel %vm398_vm15, %v334_v52, %v462_v18  ;;  %vm400_vm1 = vcmp.ge.f32.partialorder %v336_v20, 0.0  ;;  %v464_v32 = vmul.f32 0.01, %v336_v20  ;;  %v6145_v34 = vld [vmem:[#allocation2 + $0x210] sm:$0xff] }
  0x73   :  { %906 = vrot.lane.b32.xlu1 %v751_v48, %s5305_s23  ;;  %912 = vrot.lane.b32.xlu0 %v754_v3, %s5305_s23  ;;  %v335_v48 = vadd.f32 %v6098_v39, %v265_v33  ;;  %v755_v3 = vld [vmem:[#allocation2 + $0x171] sm:$0xff]  ;;  %v524_v13 = vsel %vm396_vm13, %v332_v43, %v460_v5  ;;  %695 = vst.msk [vmem:[#allocation3 + $0x118] sm:$0xff] %vm24_vm0, %v6129_v21  ;;  %698 = vst.msk [vmem:[#allocation3 + $0x130] sm:$0xff] %vm24_vm0, %v6131_v24  ;;  %v6143_v33 = vld [vmem:[#allocation2 + $0x1e8] sm:$0xff]  ;;  %s5306_s1 = smov 16   ;;  %vm1429_vm5 = vcmask 195712  }
  0x74   :  { %589 = vst.msk [vmem:[#allocation2 + $0x2f1] sm:$0xff] %vm24_vm0, %v524_v13  ;;  %591 = vst.msk [vmem:[#allocation2 + $0x309] sm:$0xff] %vm24_vm0, %v526_v30  ;;  %v6152_v40 = vld [vmem:[#allocation2 + $0x200] sm:$0xff]  ;;  %v528_v2 = vsel %vm400_vm1, %v336_v20, %v464_v32  ;;  %v6156_v43 = vld [vmem:[#allocation2 + $0x228] sm:$0xff]  ;;  %vm1814_vm8 = vcmask 261312   ;;  %vm2584_vm10 = vcmask 392512  }
  0x75   :  { %vm399_vm14 = vcmp.ge.f32.partialorder %v335_v48, 0.0  ;;  %v463_v12 = vmul.f32 0.01, %v335_v48  ;;  %697 = vst.msk [vmem:[#allocation3 + $0x128] sm:$0xff] %vm24_vm0, %v6143_v33  ;;  %700 = vst.msk [vmem:[#allocation3 + $0x140] sm:$0xff] %vm24_vm0, %v6145_v34  ;;  %v759_v44 = vld [vmem:[#allocation2 + $0x1d1] sm:$0xff] }
  0x76   :  { %699 = vst.msk [vmem:[#allocation3 + $0x138] sm:$0xff] %vm24_vm0, %v6152_v40  ;;  %593 = vst.msk [vmem:[#allocation2 + $0x321] sm:$0xff] %vm24_vm0, %v528_v2  ;;  %v6163_v47 = vld [vmem:[#allocation2 + $0x218] sm:$0xff]  ;;  %v6167_v52 = vld [vmem:[#allocation2 + $0x240] sm:$0xff]  ;;  %vm2970_vm11 = vcmask 458112   ;;  %vm3355_vm12 = vcmask 523712  }
  0x77   :  { %910 = vrot.lane.b32.xlu1 %v753_v28, %s5305_s23  ;;  %916 = vrot.lane.b32.xlu0 %v756_v37, %s5305_s23  ;;  %v527_v26 = vsel %vm399_vm14, %v335_v48, %v463_v12  ;;  %v757_v28 = vld [vmem:[#allocation2 + $0x1b9] sm:$0xff]  ;;  %v760_v37 = vld [vmem:[#allocation2 + $0x1e1] sm:$0xff]  ;;  %702 = vst.msk [vmem:[#allocation3 + $0x150] sm:$0xff] %vm24_vm0, %v6156_v43  ;;  %701 = vst.msk [vmem:[#allocation3 + $0x148] sm:$0xff] %vm24_vm0, %v6163_v47  ;;  %vm3740_vm13 = vcmask 589312   ;;  %vm3885_vm14 = vcmask 588800  }
  0x78   :  { %592 = vst.msk [vmem:[#allocation2 + $0x319] sm:$0xff] %vm24_vm0, %v527_v26  ;;  %v762_v48 = vld [vmem:[#allocation2 + $0x1f9] sm:$0xff]  ;;  %704 = vst.msk [vmem:[#allocation3 + $0x160] sm:$0xff] %vm24_vm0, %v6167_v52  ;;  %v761_v53 = vld [vmem:[#allocation2 + $0x1e9] sm:$0xff]  ;;  %vm4597_vm15 = vcmask 57344  }
  0x79   :  { %v6173_v55 = vld [vmem:[#allocation2 + $0x230] sm:$0xff]  ;;  %v763_v4 = vld [vmem:[#allocation2 + $0x201] sm:$0xff]  ;;  %v765_v11 = vld [vmem:[#allocation2 + $0x219] sm:$0xff] }
  0x7a   :  { %v764_v60 = vld [vmem:[#allocation2 + $0x211] sm:$0xff]  ;;  %703 = vst.msk [vmem:[#allocation3 + $0x158] sm:$0xff] %vm24_vm0, %v6173_v55  ;;  %v6183_v5 = vld [vmem:[#allocation2 + $0x248] sm:$0xff]  ;;  %v6193_v12 = vld [vmem:[#allocation2 + $0x260] sm:$0xff] }
  0x7b   :  { %914 = vrot.lane.b32.xlu1 %v755_v3, %s5305_s23  ;;  %920 = vrot.lane.b32.xlu0 %v758_v6, %s5305_s23  ;;  %v6177_v3 = vld [vmem:[#allocation2 + $0x258] sm:$0xff]  ;;  %v766_v6 = vld [vmem:[#allocation2 + $0x229] sm:$0xff]  ;;  %705 = vst.msk [vmem:[#allocation3 + $0x168] sm:$0xff] %vm24_vm0, %v6183_v5  ;;  %v768_v13 = vld [vmem:[#allocation2 + $0x241] sm:$0xff] }
  0x7c   :  { %706 = vst.msk [vmem:[#allocation3 + $0x170] sm:$0xff] %vm24_vm0, %v6177_v3  ;;  %v6187_v10 = vld [vmem:[#allocation2 + $0x270] sm:$0xff]  ;;  %707 = vst.msk [vmem:[#allocation3 + $0x178] sm:$0xff] %vm24_vm0, %v6193_v12  ;;  %v6197_v18 = vld [vmem:[#allocation2 + $0x288] sm:$0xff] }
  0x7d   :  { %708 = vst.msk [vmem:[#allocation3 + $0x180] sm:$0xff] %vm24_vm0, %v6187_v10  ;;  %710 = vst.msk [vmem:[#allocation3 + $0x190] sm:$0xff] %vm24_vm0, %v6197_v18  ;;  %v767_v20 = vld [vmem:[#allocation2 + $0x231] sm:$0xff]  ;;  %v6207_v30 = vld [vmem:[#allocation2 + $0x2a0] sm:$0xff] }
  0x7e   :  { %v6203_v26 = vld [vmem:[#allocation2 + $0x278] sm:$0xff]  ;;  %712 = vst.msk [vmem:[#allocation3 + $0x1a0] sm:$0xff] %vm24_vm0, %v6207_v30  ;;  %v769_v32 = vld [vmem:[#allocation2 + $0x249] sm:$0xff] }
  0x7f   :  { %918 = vrot.lane.b32.xlu1 %v757_v28, %s5305_s23  ;;  %924 = vrot.lane.b32.xlu0 %v760_v37, %s5305_s23  ;;  %v770_v28 = vld [vmem:[#allocation2 + $0x259] sm:$0xff]  ;;  %709 = vst.msk [vmem:[#allocation3 + $0x188] sm:$0xff] %vm24_vm0, %v6203_v26  ;;  %v6213_v37 = vld [vmem:[#allocation2 + $0x290] sm:$0xff] }
  0x80   :  { %v772_v2 = vld [vmem:[#allocation2 + $0x271] sm:$0xff]  ;;  %711 = vst.msk [vmem:[#allocation3 + $0x198] sm:$0xff] %vm24_vm0, %v6213_v37 }
  0x81   :  { %v6257_v0 = vld [vmem:[#allocation2 + $0x318] sm:$0xff] }
  0x82   :  { %7730 = vst [vmem:[#allocation11_spill] sm:$0xff] %v6257_v0  ;;  %722 = vst.msk [vmem:[#allocation3 + $0x1f0] sm:$0xff] %vm24_vm0, %v6257_v0 }
  0x83   :  { %922 = vrot.lane.b32.xlu1 %v759_v44, %s5305_s23  ;;  %928 = vrot.lane.b32.xlu0 %v762_v48, %s5305_s23  ;;  %v6217_v44 = vld [vmem:[#allocation2 + $0x2b8] sm:$0xff]  ;;  %v771_v48 = vld [vmem:[#allocation2 + $0x261] sm:$0xff] }
  0x84   :  { %714 = vst.msk [vmem:[#allocation3 + $0x1b0] sm:$0xff] %vm24_vm0, %v6217_v44 }
  0x87   :  { %926 = vrot.lane.b32.xlu1 %v761_v53, %s5305_s23  ;;  %932 = vrot.lane.b32.xlu0 %v764_v60, %s5305_s23  ;;  %v6223_v53 = vld [vmem:[#allocation2 + $0x2a8] sm:$0xff] }
  0x88   :  { %7723 = vst [vmem:[#allocation4_spill] sm:$0xff] %v6223_v53  ;;  %v774_v60 = vld [vmem:[#allocation2 + $0x289] sm:$0xff]  ;;  %713 = vst.msk [vmem:[#allocation3 + $0x1a8] sm:$0xff] %vm24_vm0, %v6223_v53 }
  0x8b   :  { %930 = vrot.lane.b32.xlu1 %v763_v4, %s5305_s23  ;;  %936 = vrot.lane.b32.xlu0 %v766_v6, %s5305_s23  ;;  %v6227_v4 = vld [vmem:[#allocation2 + $0x2d0] sm:$0xff]  ;;  %v773_v6 = vld [vmem:[#allocation2 + $0x279] sm:$0xff] }
  0x8c   :  { %7724 = vst [vmem:[#allocation5_spill] sm:$0xff] %v6227_v4  ;;  %716 = vst.msk [vmem:[#allocation3 + $0x1c0] sm:$0xff] %vm24_vm0, %v6227_v4 }
  0x8f   :  { %934 = vrot.lane.b32.xlu1 %v765_v11, %s5305_s23  ;;  %940 = vrot.lane.b32.xlu0 %v768_v13, %s5305_s23  ;;  %v6233_v11 = vld [vmem:[#allocation2 + $0x2c0] sm:$0xff] }
  0x90   :  { %7725 = vst [vmem:[#allocation6_spill] sm:$0xff] %v6233_v11  ;;  %v776_v13 = vld [vmem:[#allocation2 + $0x2a1] sm:$0xff]  ;;  %715 = vst.msk [vmem:[#allocation3 + $0x1b8] sm:$0xff] %vm24_vm0, %v6233_v11 }
  0x91   :  { %v1109_v11 = vld [vmem:[#allocation2 + $0x2] sm:$0xff] }
  0x93   :  { %938 = vrot.lane.b32.xlu1 %v767_v20, %s5305_s23  ;;  %944 = vrot.lane.b32.xlu0 %v770_v28, %s5305_s23  ;;  %v6237_v20 = vld [vmem:[#allocation2 + $0x2e8] sm:$0xff]  ;;  %v775_v28 = vld [vmem:[#allocation2 + $0x291] sm:$0xff] }
  0x94   :  { %7726 = vst [vmem:[#allocation7_spill] sm:$0xff] %v6237_v20  ;;  %718 = vst.msk [vmem:[#allocation3 + $0x1d0] sm:$0xff] %vm24_vm0, %v6237_v20  ;;  %v784_v20 = vld [vmem:[#allocation2 + $0x301] sm:$0xff] }
  0x97   :  { %942 = vrot.lane.b32.xlu1 %v769_v32, %s5305_s23  ;;  %948 = vrot.lane.b32.xlu0 %v772_v2, %s5305_s23  ;;  %v6243_v32 = vld [vmem:[#allocation2 + $0x2d8] sm:$0xff] }
  0x98   :  { %7727 = vst [vmem:[#allocation8_spill] sm:$0xff] %v6243_v32  ;;  %v778_v2 = vld [vmem:[#allocation2 + $0x2b9] sm:$0xff]  ;;  %717 = vst.msk [vmem:[#allocation3 + $0x1c8] sm:$0xff] %vm24_vm0, %v6243_v32  ;;  %v782_v32 = vld [vmem:[#allocation2 + $0x2e9] sm:$0xff] }
  0x9b   :  { %946 = vrot.lane.b32.xlu1 %v771_v48, %s5305_s23  ;;  %952 = vrot.lane.b32.xlu0 %v774_v60, %s5305_s23  ;;  %v6247_v48 = vld [vmem:[#allocation2 + $0x300] sm:$0xff]  ;;  %v777_v60 = vld [vmem:[#allocation2 + $0x2a9] sm:$0xff] }
  0x9c   :  { %7728 = vst [vmem:[#allocation9_spill] sm:$0xff] %v6247_v48  ;;  %720 = vst.msk [vmem:[#allocation3 + $0x1e0] sm:$0xff] %vm24_vm0, %v6247_v48  ;;  %v6263_v48 = vld [vmem:[#allocation2 + $0x308] sm:$0xff] }
  0x9d   :  { %7731 = vst [vmem:[#allocation12_spill] sm:$0xff] %v6263_v48  ;;  %721 = vst.msk [vmem:[#allocation3 + $0x1e8] sm:$0xff] %vm24_vm0, %v6263_v48  ;;  %v786_v48 = vld [vmem:[#allocation2 + $0x319] sm:$0xff] }
  0x9f   :  { %950 = vrot.lane.b32.xlu1 %v773_v6, %s5305_s23  ;;  %956 = vrot.lane.b32.xlu0 %v776_v13, %s5305_s23  ;;  %v6253_v6 = vld [vmem:[#allocation2 + $0x2f0] sm:$0xff] }
  0xa0   :  { %7729 = vst [vmem:[#allocation10_spill] sm:$0xff] %v6253_v6  ;;  %v780_v13 = vld [vmem:[#allocation2 + $0x2d1] sm:$0xff]  ;;  %719 = vst.msk [vmem:[#allocation3 + $0x1d8] sm:$0xff] %vm24_vm0, %v6253_v6  ;;  %v6270_v6 = vld [vmem:[#allocation2 + $0x320] sm:$0xff] }
  0xa1   :  { %7732 = vst [vmem:[#allocation13_spill] sm:$0xff] %v6270_v6  ;;  %723 = vst.msk [vmem:[#allocation3 + $0x1f8] sm:$0xff] %vm24_vm0, %v6270_v6 }
  0xa3   :  { %954 = vrot.lane.b32.xlu1 %v775_v28, %s5305_s23  ;;  %960 = vrot.lane.b32.xlu0 %v778_v2, %s5305_s23  ;;  %v779_v28 = vld [vmem:[#allocation2 + $0x2c1] sm:$0xff]  ;;  %v853_v2 = vpop.permute.xlu0 %852 }
  0xa4   :  { %1045 = vst.msk [vmem:[#allocation3] sm:$0xff] %vm1044_vm2, %v853_v2 }
  0xa7   :  { %958 = vrot.lane.b32.xlu1 %v777_v60, %s5305_s23  ;;  %964 = vrot.lane.b32.xlu0 %v780_v13, %s5305_s23  ;;  %v781_v60 = vld [vmem:[#allocation2 + $0x2d9] sm:$0xff]  ;;  %v855_v0 = vpop.permute.xlu0 %854  ;;  %v783_v13 = vld [vmem:[#allocation2 + $0x2f1] sm:$0xff] }
  0xa8   :  { %1046 = vst.msk [vmem:[#allocation3 + $0x8] sm:$0xff] %vm1044_vm2, %v855_v0 }
  0xab   :  { %962 = vrot.lane.b32.xlu1 %v779_v28, %s5305_s23  ;;  %968 = vrot.lane.b32.xlu0 %v782_v32, %s5305_s23  ;;  %v785_v28 = vld [vmem:[#allocation2 + $0x309] sm:$0xff] }
  0xaf   :  { %966 = vrot.lane.b32.xlu1 %v781_v60, %s5305_s23  ;;  %972 = vrot.lane.b32.xlu0 %v784_v20, %s5305_s23  ;;  %v787_v20 = vld [vmem:[#allocation2 + $0x321] sm:$0xff] }
  0xb1   :  { %v857_v2 = vpop.permute.xlu1 %856  ;;  %v861_v32 = vpop.permute.xlu0 %860 }
  0xb2   :  { %1047 = vst.msk [vmem:[#allocation3 + $0x10] sm:$0xff] %vm1044_vm2, %v857_v2  ;;  %1049 = vst.msk [vmem:[#allocation3 + $0x20] sm:$0xff] %vm1044_vm2, %v861_v32  ;;  %v1111_v2 = vld [vmem:[#allocation2 + $0x1a] sm:$0xff]  ;;  %v1113_v32 = vld [vmem:[#allocation2 + $0x32] sm:$0xff] }
  0xb3   :  { %970 = vrot.lane.b32.xlu1 %v783_v13, %s5305_s23  ;;  %976 = vrot.lane.b32.xlu0 %v786_v48, %s5305_s23  ;;  %v1110_v48 = vld [vmem:[#allocation2 + $0xa] sm:$0xff] }
  0xb5   :  { %v859_v6 = vpop.permute.xlu1 %858  ;;  %v865_v0 = vpop.permute.xlu0 %864 }
  0xb6   :  { %1048 = vst.msk [vmem:[#allocation3 + $0x18] sm:$0xff] %vm1044_vm2, %v859_v6  ;;  %1051 = vst.msk [vmem:[#allocation3 + $0x30] sm:$0xff] %vm1044_vm2, %v865_v0 }
  0xb7   :  { %974 = vrot.lane.b32.xlu1 %v785_v28, %s5305_s23  ;;  %1237 = vrot.lane.b32.xlu0 %v1109_v11, %s5306_s1  ;;  %v1112_v11 = vld [vmem:[#allocation2 + $0x22] sm:$0xff] }
  0xb9   :  { %v863_v60 = vpop.permute.xlu1 %862  ;;  %v869_v13 = vpop.permute.xlu0 %868 }
  0xba   :  { %1050 = vst.msk [vmem:[#allocation3 + $0x28] sm:$0xff] %vm1044_vm2, %v863_v60  ;;  %1053 = vst.msk [vmem:[#allocation3 + $0x40] sm:$0xff] %vm1044_vm2, %v869_v13  ;;  %v1115_v60 = vld [vmem:[#allocation2 + $0x4a] sm:$0xff] }
  0xbb   :  { %978 = vrot.lane.b32.xlu1 %v787_v20, %s5305_s23  ;;  %1241 = vrot.lane.b32.xlu0 %v1111_v2, %s5306_s1  ;;  %v1114_v2 = vld [vmem:[#allocation2 + $0x3a] sm:$0xff]  ;;  %s5311_s23 = smov 56  }
  0xbd   :  { %v867_v6 = vpop.permute.xlu1 %866  ;;  %v873_v28 = vpop.permute.xlu0 %872 }
  0xbe   :  { %1052 = vst.msk [vmem:[#allocation3 + $0x38] sm:$0xff] %vm1044_vm2, %v867_v6  ;;  %1055 = vst.msk [vmem:[#allocation3 + $0x50] sm:$0xff] %vm1044_vm2, %v873_v28  ;;  %v1117_v6 = vld [vmem:[#allocation2 + $0x62] sm:$0xff] }
  0xbf   :  { %1239 = vrot.lane.b32.xlu1 %v1110_v48, %s5306_s1  ;;  %1245 = vrot.lane.b32.xlu0 %v1113_v32, %s5306_s1  ;;  %v1116_v32 = vld [vmem:[#allocation2 + $0x52] sm:$0xff] }
  0xc1   :  { %v871_v0 = vpop.permute.xlu1 %870  ;;  %v877_v20 = vpop.permute.xlu0 %876 }
  0xc2   :  { %1054 = vst.msk [vmem:[#allocation3 + $0x48] sm:$0xff] %vm1044_vm2, %v871_v0  ;;  %1057 = vst.msk [vmem:[#allocation3 + $0x60] sm:$0xff] %vm1044_vm2, %v877_v20  ;;  %v1119_v0 = vld [vmem:[#allocation2 + $0x7a] sm:$0xff] }
  0xc3   :  { %1243 = vrot.lane.b32.xlu1 %v1112_v11, %s5306_s1  ;;  %1249 = vrot.lane.b32.xlu0 %v1115_v60, %s5306_s1  ;;  %v1118_v60 = vld [vmem:[#allocation2 + $0x6a] sm:$0xff] }
  0xc5   :  { %v875_v13 = vpop.permute.xlu1 %874  ;;  %v881_v48 = vpop.permute.xlu0 %880 }
  0xc6   :  { %1056 = vst.msk [vmem:[#allocation3 + $0x58] sm:$0xff] %vm1044_vm2, %v875_v13  ;;  %1059 = vst.msk [vmem:[#allocation3 + $0x70] sm:$0xff] %vm1044_vm2, %v881_v48  ;;  %v1121_v13 = vld [vmem:[#allocation2 + $0x92] sm:$0xff] }
  0xc7   :  { %1247 = vrot.lane.b32.xlu1 %v1114_v2, %s5306_s1  ;;  %1253 = vrot.lane.b32.xlu0 %v1117_v6, %s5306_s1  ;;  %v1120_v6 = vld [vmem:[#allocation2 + $0x82] sm:$0xff] }
  0xc9   :  { %v879_v28 = vpop.permute.xlu1 %878  ;;  %v885_v11 = vpop.permute.xlu0 %884 }
  0xca   :  { %1058 = vst.msk [vmem:[#allocation3 + $0x68] sm:$0xff] %vm1044_vm2, %v879_v28  ;;  %1061 = vst.msk [vmem:[#allocation3 + $0x80] sm:$0xff] %vm1044_vm2, %v885_v11  ;;  %v1123_v28 = vld [vmem:[#allocation2 + $0xaa] sm:$0xff] }
  0xcb   :  { %1251 = vrot.lane.b32.xlu1 %v1116_v32, %s5306_s1  ;;  %1257 = vrot.lane.b32.xlu0 %v1119_v0, %s5306_s1  ;;  %v1122_v0 = vld [vmem:[#allocation2 + $0x9a] sm:$0xff] }
  0xcd   :  { %v883_v20 = vpop.permute.xlu1 %882  ;;  %v889_v2 = vpop.permute.xlu0 %888 }
  0xce   :  { %1060 = vst.msk [vmem:[#allocation3 + $0x78] sm:$0xff] %vm1044_vm2, %v883_v20  ;;  %1063 = vst.msk [vmem:[#allocation3 + $0x90] sm:$0xff] %vm1044_vm2, %v889_v2  ;;  %v1125_v20 = vld [vmem:[#allocation2 + $0xc2] sm:$0xff] }
  0xcf   :  { %1255 = vrot.lane.b32.xlu1 %v1118_v60, %s5306_s1  ;;  %1261 = vrot.lane.b32.xlu0 %v1121_v13, %s5306_s1  ;;  %v1124_v13 = vld [vmem:[#allocation2 + $0xb2] sm:$0xff] }
  0xd1   :  { %v887_v48 = vpop.permute.xlu1 %886  ;;  %v893_v32 = vpop.permute.xlu0 %892 }
  0xd2   :  { %1062 = vst.msk [vmem:[#allocation3 + $0x88] sm:$0xff] %vm1044_vm2, %v887_v48  ;;  %1065 = vst.msk [vmem:[#allocation3 + $0xa0] sm:$0xff] %vm1044_vm2, %v893_v32  ;;  %v1127_v48 = vld [vmem:[#allocation2 + $0xda] sm:$0xff] }
  0xd3   :  { %1259 = vrot.lane.b32.xlu1 %v1120_v6, %s5306_s1  ;;  %1265 = vrot.lane.b32.xlu0 %v1123_v28, %s5306_s1  ;;  %v1126_v28 = vld [vmem:[#allocation2 + $0xca] sm:$0xff] }
  0xd5   :  { %v891_v11 = vpop.permute.xlu1 %890  ;;  %v897_v60 = vpop.permute.xlu0 %896 }
  0xd6   :  { %1064 = vst.msk [vmem:[#allocation3 + $0x98] sm:$0xff] %vm1044_vm2, %v891_v11  ;;  %1067 = vst.msk [vmem:[#allocation3 + $0xb0] sm:$0xff] %vm1044_vm2, %v897_v60  ;;  %v1129_v11 = vld [vmem:[#allocation2 + $0xf2] sm:$0xff] }
  0xd7   :  { %1263 = vrot.lane.b32.xlu1 %v1122_v0, %s5306_s1  ;;  %1269 = vrot.lane.b32.xlu0 %v1125_v20, %s5306_s1  ;;  %v1128_v20 = vld [vmem:[#allocation2 + $0xe2] sm:$0xff] }
  0xd9   :  { %v895_v2 = vpop.permute.xlu1 %894  ;;  %v901_v6 = vpop.permute.xlu0 %900 }
  0xda   :  { %1066 = vst.msk [vmem:[#allocation3 + $0xa8] sm:$0xff] %vm1044_vm2, %v895_v2  ;;  %1069 = vst.msk [vmem:[#allocation3 + $0xc0] sm:$0xff] %vm1044_vm2, %v901_v6  ;;  %v1131_v2 = vld [vmem:[#allocation2 + $0x10a] sm:$0xff]  ;;  %v4968_v6 = vld [vmem:[%s7705_s0 + $0x181] sm:$0xff] }
  0xdb   :  { %1267 = vrot.lane.b32.xlu1 %v1124_v13, %s5306_s1  ;;  %1273 = vrot.lane.b32.xlu0 %v1127_v48, %s5306_s1  ;;  %v1130_v48 = vld [vmem:[#allocation2 + $0xfa] sm:$0xff] }
  0xdd   :  { %v899_v32 = vpop.permute.xlu1 %898  ;;  %v905_v0 = vpop.permute.xlu0 %904 }
  0xde   :  { %1068 = vst.msk [vmem:[#allocation3 + $0xb8] sm:$0xff] %vm1044_vm2, %v899_v32  ;;  %1071 = vst.msk [vmem:[#allocation3 + $0xd0] sm:$0xff] %vm1044_vm2, %v905_v0  ;;  %v1133_v32 = vld [vmem:[#allocation2 + $0x122] sm:$0xff] }
  0xdf   :  { %1271 = vrot.lane.b32.xlu1 %v1126_v28, %s5306_s1  ;;  %1277 = vrot.lane.b32.xlu0 %v1129_v11, %s5306_s1  ;;  %v235_v11 = vmul.f32 %v6106_v1, %v4968_v6 }
  0xe1   :  { %v903_v60 = vpop.permute.xlu1 %902  ;;  %v909_v13 = vpop.permute.xlu0 %908 }
  0xe2   :  { %1070 = vst.msk [vmem:[#allocation3 + $0xc8] sm:$0xff] %vm1044_vm2, %v903_v60  ;;  %1073 = vst.msk [vmem:[#allocation3 + $0xe0] sm:$0xff] %vm1044_vm2, %v909_v13  ;;  %v1132_v60 = vld [vmem:[#allocation2 + $0x112] sm:$0xff]  ;;  %v1135_v13 = vld [vmem:[#allocation2 + $0x13a] sm:$0xff] }
  0xe3   :  { %1275 = vrot.lane.b32.xlu1 %v1128_v20, %s5306_s1  ;;  %1281 = vrot.lane.b32.xlu0 %v1131_v2, %s5306_s1  ;;  %v305_v20 = vadd.f32 %v6098_v39, %v235_v11 }
  0xe5   :  { %v907_v28 = vpop.permute.xlu1 %906  ;;  %v913_v0 = vpop.permute.xlu0 %912  ;;  %v433_v4 = vmul.f32 0.01, %v305_v20  ;;  %vm369_vm3 = vcmp.ge.f32.partialorder %v305_v20, 0.0 }
  0xe6   :  { %1072 = vst.msk [vmem:[#allocation3 + $0xd8] sm:$0xff] %vm1044_vm2, %v907_v28  ;;  %1075 = vst.msk [vmem:[#allocation3 + $0xf0] sm:$0xff] %vm1044_vm2, %v913_v0  ;;  %v1134_v28 = vld [vmem:[#allocation2 + $0x12a] sm:$0xff]  ;;  %v1137_v0 = vld [vmem:[#allocation2 + $0x152] sm:$0xff] }
  0xe7   :  { %1279 = vrot.lane.b32.xlu1 %v1130_v48, %s5306_s1  ;;  %1285 = vrot.lane.b32.xlu0 %v1133_v32, %s5306_s1  ;;  %v497_v6 = vsel %vm369_vm3, %v305_v20, %v433_v4  ;;  %v4969_v48 = vld [vmem:[%s7705_s0 + $0x189] sm:$0xff] }
  0xe8   :  { %562 = vst.msk [vmem:[#allocation2 + $0x181] sm:$0xff] %vm24_vm0, %v497_v6  ;;  %v236_v32 = vmul.f32 %v6106_v1, %v4969_v48  ;;  %v1136_v4 = vld [vmem:[#allocation2 + $0x142] sm:$0xff] }
  0xe9   :  { %v911_v2 = vpop.permute.xlu1 %910  ;;  %v917_v53 = vpop.permute.xlu0 %916 }
  0xea   :  { %1074 = vst.msk [vmem:[#allocation3 + $0xe8] sm:$0xff] %vm1044_vm2, %v911_v2  ;;  %1077 = vst.msk [vmem:[#allocation3 + $0x100] sm:$0xff] %vm1044_vm2, %v917_v53  ;;  %v306_v53 = vadd.f32 %v6098_v39, %v236_v32 }
  0xeb   :  { %1283 = vrot.lane.b32.xlu1 %v1132_v60, %s5306_s1  ;;  %1289 = vrot.lane.b32.xlu0 %v1135_v13, %s5306_s1  ;;  %v1139_v13 = vld [vmem:[#allocation2 + $0x16a] sm:$0xff] }
  0xec   :  { %v434_v20 = vmul.f32 0.01, %v306_v53  ;;  %vm370_vm4 = vcmp.ge.f32.partialorder %v306_v53, 0.0 }
  0xed   :  { %v915_v11 = vpop.permute.xlu1 %914  ;;  %v921_v2 = vpop.permute.xlu0 %920 }
  0xee   :  { %1076 = vst.msk [vmem:[#allocation3 + $0xf8] sm:$0xff] %vm1044_vm2, %v915_v11  ;;  %1079 = vst.msk [vmem:[#allocation3 + $0x110] sm:$0xff] %vm1044_vm2, %v921_v2  ;;  %v498_v48 = vsel %vm370_vm4, %v306_v53, %v434_v20  ;;  %v1141_v11 = vld [vmem:[#allocation2 + $0x1b2] sm:$0xff]  ;;  %v1143_v20 = vld [vmem:[#allocation2 + $0x1ca] sm:$0xff] }
  0xef   :  { %1287 = vrot.lane.b32.xlu1 %v1134_v28, %s5306_s1  ;;  %1293 = vrot.lane.b32.xlu0 %v1137_v0, %s5306_s1  ;;  %563 = vst.msk [vmem:[#allocation2 + $0x189] sm:$0xff] %vm24_vm0, %v498_v48  ;;  %v1138_v28 = vld [vmem:[#allocation2 + $0x15a] sm:$0xff]  ;;  %v1140_v2 = vld [vmem:[#allocation2 + $0x172] sm:$0xff] }
  0xf1   :  { %v919_v60 = vpop.permute.xlu1 %918  ;;  %v925_v6 = vpop.permute.xlu0 %924 }
  0xf2   :  { %1078 = vst.msk [vmem:[#allocation3 + $0x108] sm:$0xff] %vm1044_vm2, %v919_v60  ;;  %1081 = vst.msk [vmem:[#allocation3 + $0x120] sm:$0xff] %vm1044_vm2, %v925_v6  ;;  %v1142_v60 = vld [vmem:[#allocation2 + $0x1ba] sm:$0xff]  ;;  %v1145_v6 = vld [vmem:[#allocation2 + $0x1e2] sm:$0xff] }
  0xf3   :  { %1291 = vrot.lane.b32.xlu1 %v1136_v4, %s5306_s1  ;;  %1297 = vrot.lane.b32.xlu0 %v1139_v13, %s5306_s1 }
  0xf5   :  { %v923_v32 = vpop.permute.xlu1 %922  ;;  %v929_v0 = vpop.permute.xlu0 %928 }
  0xf6   :  { %1080 = vst.msk [vmem:[#allocation3 + $0x118] sm:$0xff] %vm1044_vm2, %v923_v32  ;;  %1083 = vst.msk [vmem:[#allocation3 + $0x130] sm:$0xff] %vm1044_vm2, %v929_v0 }
  0xf7   :  { %1295 = vrot.lane.b32.xlu1 %v1138_v28, %s5306_s1  ;;  %1301 = vrot.lane.b32.xlu0 %v1141_v11, %s5306_s1  ;;  %v1144_v28 = vld [vmem:[#allocation2 + $0x1d2] sm:$0xff]  ;;  %v1147_v11 = vld [vmem:[#allocation2 + $0x1fa] sm:$0xff] }
  0xf9   :  { %v927_v53 = vpop.permute.xlu1 %926  ;;  %v933_v4 = vpop.permute.xlu0 %932 }
  0xfa   :  { %1082 = vst.msk [vmem:[#allocation3 + $0x128] sm:$0xff] %vm1044_vm2, %v927_v53  ;;  %1085 = vst.msk [vmem:[#allocation3 + $0x140] sm:$0xff] %vm1044_vm2, %v933_v4 }
  0xfb   :  { %1299 = vrot.lane.b32.xlu1 %v1140_v2, %s5306_s1  ;;  %1305 = vrot.lane.b32.xlu0 %v1143_v20, %s5306_s1  ;;  %v1146_v2 = vld [vmem:[#allocation2 + $0x1ea] sm:$0xff]  ;;  %v1149_v20 = vld [vmem:[#allocation2 + $0x212] sm:$0xff] }
  0xfd   :  { %v931_v13 = vpop.permute.xlu1 %930  ;;  %v937_v48 = vpop.permute.xlu0 %936 }
  0xfe   :  { %1084 = vst.msk [vmem:[#allocation3 + $0x138] sm:$0xff] %vm1044_vm2, %v931_v13  ;;  %1087 = vst.msk [vmem:[#allocation3 + $0x150] sm:$0xff] %vm1044_vm2, %v937_v48 }
  0xff   :  { %1303 = vrot.lane.b32.xlu1 %v1142_v60, %s5306_s1  ;;  %1309 = vrot.lane.b32.xlu0 %v1145_v6, %s5306_s1  ;;  %v1148_v60 = vld [vmem:[#allocation2 + $0x202] sm:$0xff]  ;;  %v1151_v6 = vld [vmem:[#allocation2 + $0x22a] sm:$0xff] }
 0x101   :  { %v935_v32 = vpop.permute.xlu1 %934  ;;  %v941_v0 = vpop.permute.xlu0 %940 }
 0x102   :  { %1086 = vst.msk [vmem:[#allocation3 + $0x148] sm:$0xff] %vm1044_vm2, %v935_v32  ;;  %1089 = vst.msk [vmem:[#allocation3 + $0x160] sm:$0xff] %vm1044_vm2, %v941_v0 }
 0x103   :  { %1307 = vrot.lane.b32.xlu1 %v1144_v28, %s5306_s1  ;;  %1313 = vrot.lane.b32.xlu0 %v1147_v11, %s5306_s1  ;;  %v1150_v28 = vld [vmem:[#allocation2 + $0x21a] sm:$0xff]  ;;  %v1153_v11 = vld [vmem:[#allocation2 + $0x242] sm:$0xff] }
 0x105   :  { %v939_v53 = vpop.permute.xlu1 %938  ;;  %v945_v4 = vpop.permute.xlu0 %944 }
 0x106   :  { %1088 = vst.msk [vmem:[#allocation3 + $0x158] sm:$0xff] %vm1044_vm2, %v939_v53  ;;  %1091 = vst.msk [vmem:[#allocation3 + $0x170] sm:$0xff] %vm1044_vm2, %v945_v4 }
 0x107   :  { %1311 = vrot.lane.b32.xlu1 %v1146_v2, %s5306_s1  ;;  %1317 = vrot.lane.b32.xlu0 %v1149_v20, %s5306_s1  ;;  %v1152_v2 = vld [vmem:[#allocation2 + $0x232] sm:$0xff]  ;;  %v1155_v20 = vld [vmem:[#allocation2 + $0x25a] sm:$0xff] }
 0x109   :  { %v943_v13 = vpop.permute.xlu1 %942  ;;  %v949_v48 = vpop.permute.xlu0 %948 }
 0x10a   :  { %1090 = vst.msk [vmem:[#allocation3 + $0x168] sm:$0xff] %vm1044_vm2, %v943_v13  ;;  %1093 = vst.msk [vmem:[#allocation3 + $0x180] sm:$0xff] %vm1044_vm2, %v949_v48 }
 0x10b   :  { %1315 = vrot.lane.b32.xlu1 %v1148_v60, %s5306_s1  ;;  %1321 = vrot.lane.b32.xlu0 %v1151_v6, %s5306_s1  ;;  %v1154_v60 = vld [vmem:[#allocation2 + $0x24a] sm:$0xff]  ;;  %v1157_v6 = vld [vmem:[#allocation2 + $0x272] sm:$0xff] }
 0x10d   :  { %v947_v32 = vpop.permute.xlu1 %946  ;;  %v953_v0 = vpop.permute.xlu0 %952 }
 0x10e   :  { %1092 = vst.msk [vmem:[#allocation3 + $0x178] sm:$0xff] %vm1044_vm2, %v947_v32  ;;  %1095 = vst.msk [vmem:[#allocation3 + $0x190] sm:$0xff] %vm1044_vm2, %v953_v0 }
 0x10f   :  { %1319 = vrot.lane.b32.xlu1 %v1150_v28, %s5306_s1  ;;  %1325 = vrot.lane.b32.xlu0 %v1153_v11, %s5306_s1  ;;  %v1156_v28 = vld [vmem:[#allocation2 + $0x262] sm:$0xff]  ;;  %v1159_v11 = vld [vmem:[#allocation2 + $0x28a] sm:$0xff] }
 0x111   :  { %v951_v53 = vpop.permute.xlu1 %950  ;;  %v957_v4 = vpop.permute.xlu0 %956 }
 0x112   :  { %1094 = vst.msk [vmem:[#allocation3 + $0x188] sm:$0xff] %vm1044_vm2, %v951_v53  ;;  %1097 = vst.msk [vmem:[#allocation3 + $0x1a0] sm:$0xff] %vm1044_vm2, %v957_v4 }
 0x113   :  { %1323 = vrot.lane.b32.xlu1 %v1152_v2, %s5306_s1  ;;  %1329 = vrot.lane.b32.xlu0 %v1155_v20, %s5306_s1  ;;  %v1158_v2 = vld [vmem:[#allocation2 + $0x27a] sm:$0xff]  ;;  %v1161_v20 = vld [vmem:[#allocation2 + $0x2a2] sm:$0xff] }
 0x115   :  { %v955_v13 = vpop.permute.xlu1 %954  ;;  %v961_v48 = vpop.permute.xlu0 %960 }
 0x116   :  { %1096 = vst.msk [vmem:[#allocation3 + $0x198] sm:$0xff] %vm1044_vm2, %v955_v13  ;;  %1099 = vst.msk [vmem:[#allocation3 + $0x1b0] sm:$0xff] %vm1044_vm2, %v961_v48 }
 0x117   :  { %1327 = vrot.lane.b32.xlu1 %v1154_v60, %s5306_s1  ;;  %1333 = vrot.lane.b32.xlu0 %v1157_v6, %s5306_s1  ;;  %v1160_v60 = vld [vmem:[#allocation2 + $0x292] sm:$0xff]  ;;  %v1163_v6 = vld [vmem:[#allocation2 + $0x2ba] sm:$0xff] }
 0x119   :  { %v959_v32 = vpop.permute.xlu1 %958  ;;  %v965_v0 = vpop.permute.xlu0 %964 }
 0x11a   :  { %1098 = vst.msk [vmem:[#allocation3 + $0x1a8] sm:$0xff] %vm1044_vm2, %v959_v32  ;;  %1101 = vst.msk [vmem:[#allocation3 + $0x1c0] sm:$0xff] %vm1044_vm2, %v965_v0  ;;  %v5000_v32 = vld [vmem:[%s7705_s0 + $0x331] sm:$0xff] }
 0x11b   :  { %1331 = vrot.lane.b32.xlu1 %v1156_v28, %s5306_s1  ;;  %1337 = vrot.lane.b32.xlu0 %v1159_v11, %s5306_s1  ;;  %v1162_v28 = vld [vmem:[#allocation2 + $0x2aa] sm:$0xff]  ;;  %v1165_v0 = vld [vmem:[#allocation2 + $0x2d2] sm:$0xff] }
 0x11d   :  { %v963_v53 = vpop.permute.xlu1 %962  ;;  %v969_v4 = vpop.permute.xlu0 %968 }
 0x11e   :  { %1100 = vst.msk [vmem:[#allocation3 + $0x1b8] sm:$0xff] %vm1044_vm2, %v963_v53  ;;  %1103 = vst.msk [vmem:[#allocation3 + $0x1d0] sm:$0xff] %vm1044_vm2, %v969_v4  ;;  %v1164_v4 = vld [vmem:[#allocation2 + $0x2c2] sm:$0xff] }
 0x11f   :  { %1335 = vrot.lane.b32.xlu1 %v1158_v2, %s5306_s1  ;;  %1341 = vrot.lane.b32.xlu0 %v1161_v20, %s5306_s1  ;;  %v267_v2 = vmul.f32 %v6106_v1, %v5000_v32 }
 0x121   :  { %v967_v13 = vpop.permute.xlu1 %966  ;;  %v973_v48 = vpop.permute.xlu0 %972  ;;  %v337_v20 = vadd.f32 %v6098_v39, %v267_v2 }
 0x122   :  { %1102 = vst.msk [vmem:[#allocation3 + $0x1c8] sm:$0xff] %vm1044_vm2, %v967_v13  ;;  %1105 = vst.msk [vmem:[#allocation3 + $0x1e0] sm:$0xff] %vm1044_vm2, %v973_v48  ;;  %v1167_v13 = vld [vmem:[#allocation2 + $0x2ea] sm:$0xff] }
 0x123   :  { %1339 = vrot.lane.b32.xlu1 %v1160_v60, %s5306_s1  ;;  %1345 = vrot.lane.b32.xlu0 %v1163_v6, %s5306_s1  ;;  %v465_v6 = vmul.f32 0.01, %v337_v20  ;;  %vm401_vm6 = vcmp.ge.f32.partialorder %v337_v20, 0.0 }
 0x125   :  { %v971_v11 = vpop.permute.xlu1 %970  ;;  %v977_v53 = vpop.permute.xlu0 %976  ;;  %v529_v32 = vsel %vm401_vm6, %v337_v20, %v465_v6  ;;  %v1168_v20 = vld [vmem:[#allocation2 + $0x2f2] sm:$0xff]  ;;  %v1171_v6 = vld [vmem:[#allocation2 + $0x31a] sm:$0xff] }
 0x126   :  { %1104 = vst.msk [vmem:[#allocation3 + $0x1d8] sm:$0xff] %vm1044_vm2, %v971_v11  ;;  %1107 = vst.msk [vmem:[#allocation3 + $0x1f0] sm:$0xff] %vm1044_vm2, %v977_v53  ;;  %v1166_v11 = vld [vmem:[#allocation2 + $0x2da] sm:$0xff]  ;;  %v1169_v53 = vld [vmem:[#allocation2 + $0x302] sm:$0xff] }
 0x127   :  { %1343 = vrot.lane.b32.xlu1 %v1162_v28, %s5306_s1  ;;  %1349 = vrot.lane.b32.xlu0 %v1165_v0, %s5306_s1  ;;  %v5001_v28 = vld [vmem:[%s7705_s0 + $0x339] sm:$0xff]  ;;  %594 = vst.msk [vmem:[#allocation2 + $0x331] sm:$0xff] %vm24_vm0, %v529_v32  ;;  %s5307_s0 = smov 24  }
 0x128   :  { %v268_v0 = vmul.f32 %v6106_v1, %v5001_v28 }
 0x129   :  { %v975_v60 = vpop.permute.xlu1 %974  ;;  %v1238_v48 = vpop.permute.xlu0 %1237 }
 0x12a   :  { %1106 = vst.msk [vmem:[#allocation3 + $0x1e8] sm:$0xff] %vm1044_vm2, %v975_v60 }
 0x12b   :  { %1430 = vst.msk [vmem:[#allocation3] sm:$0xff] %vm1429_vm5, %v1238_v48  ;;  %1347 = vrot.lane.b32.xlu1 %v1164_v4, %s5306_s1  ;;  %1353 = vrot.lane.b32.xlu0 %v1167_v13, %s5306_s1  ;;  %v338_v48 = vadd.f32 %v6098_v39, %v268_v0  ;;  %v1170_v39 = vld [vmem:[#allocation2 + $0x30a] sm:$0xff]  ;;  %v1172_v0 = vld [vmem:[#allocation2 + $0x322] sm:$0xff] }
 0x12d   :  { %v979_v2 = vpop.permute.xlu1 %978  ;;  %v1242_v60 = vpop.permute.xlu0 %1241  ;;  %v466_v4 = vmul.f32 0.01, %v338_v48  ;;  %vm402_vm7 = vcmp.ge.f32.partialorder %v338_v48, 0.0 }
 0x12e   :  { %1108 = vst.msk [vmem:[#allocation3 + $0x1f8] sm:$0xff] %vm1044_vm2, %v979_v2 }
 0x12f   :  { %1432 = vst.msk [vmem:[#allocation3 + $0x10] sm:$0xff] %vm1429_vm5, %v1242_v60  ;;  %1351 = vrot.lane.b32.xlu1 %v1166_v11, %s5306_s1  ;;  %1357 = vrot.lane.b32.xlu0 %v1169_v53, %s5306_s1  ;;  %v530_v32 = vsel %vm402_vm7, %v338_v48, %v466_v4 }
 0x130   :  { %595 = vst.msk [vmem:[#allocation2 + $0x339] sm:$0xff] %vm24_vm0, %v530_v32 }
 0x131   :  { %v1240_v13 = vpop.permute.xlu1 %1239  ;;  %v1246_v1 = vpop.permute.xlu0 %1245 }
 0x132   :  { %1431 = vst.msk [vmem:[#allocation3 + $0x8] sm:$0xff] %vm1429_vm5, %v1240_v13  ;;  %1434 = vst.msk [vmem:[#allocation3 + $0x20] sm:$0xff] %vm1429_vm5, %v1246_v1 }
 0x133   :  { %1355 = vrot.lane.b32.xlu1 %v1168_v20, %s5306_s1  ;;  %1361 = vrot.lane.b32.xlu0 %v1171_v6, %s5306_s1 }
 0x135   :  { %v1244_v28 = vpop.permute.xlu1 %1243  ;;  %v1250_v11 = vpop.permute.xlu0 %1249 }
 0x136   :  { %1433 = vst.msk [vmem:[#allocation3 + $0x18] sm:$0xff] %vm1429_vm5, %v1244_v28  ;;  %1436 = vst.msk [vmem:[#allocation3 + $0x30] sm:$0xff] %vm1429_vm5, %v1250_v11 }
 0x137   :  { %1359 = vrot.lane.b32.xlu1 %v1170_v39, %s5306_s1  ;;  %1622 = vrot.lane.b32.xlu0 %v5755_v22, %s5307_s0 }
 0x139   :  { %v1248_v2 = vpop.permute.xlu1 %1247  ;;  %v1254_v53 = vpop.permute.xlu0 %1253 }
 0x13a   :  { %1435 = vst.msk [vmem:[#allocation3 + $0x28] sm:$0xff] %vm1429_vm5, %v1248_v2  ;;  %1438 = vst.msk [vmem:[#allocation3 + $0x40] sm:$0xff] %vm1429_vm5, %v1254_v53  ;;  %v7737_v2 = vld [vmem:[#allocation8_spill] sm:$0xff]  ;;  %v7738_v53 = vld [vmem:[#allocation9_spill] sm:$0xff] }
 0x13b   :  { %1363 = vrot.lane.b32.xlu1 %v1172_v0, %s5306_s1  ;;  %1626 = vrot.lane.b32.xlu0 %v5757_v23, %s5307_s0 }
 0x13d   :  { %v1252_v60 = vpop.permute.xlu1 %1251  ;;  %v1258_v48 = vpop.permute.xlu0 %1257 }
 0x13e   :  { %1437 = vst.msk [vmem:[#allocation3 + $0x38] sm:$0xff] %vm1429_vm5, %v1252_v60  ;;  %1440 = vst.msk [vmem:[#allocation3 + $0x50] sm:$0xff] %vm1429_vm5, %v1258_v48 }
 0x13f   :  { %1624 = vrot.lane.b32.xlu1 %v5779_v38, %s5307_s0  ;;  %1630 = vrot.lane.b32.xlu0 %v5788_v42, %s5307_s0 }
 0x141   :  { %v1256_v22 = vpop.permute.xlu1 %1255  ;;  %v1262_v20 = vpop.permute.xlu0 %1261 }
 0x142   :  { %1439 = vst.msk [vmem:[#allocation3 + $0x48] sm:$0xff] %vm1429_vm5, %v1256_v22  ;;  %1442 = vst.msk [vmem:[#allocation3 + $0x60] sm:$0xff] %vm1429_vm5, %v1262_v20  ;;  %v7739_v22 = vld [vmem:[#allocation10_spill] sm:$0xff]  ;;  %v7740_v20 = vld [vmem:[#allocation11_spill] sm:$0xff] }
 0x143   :  { %1628 = vrot.lane.b32.xlu1 %v5808_v57, %s5307_s0  ;;  %1634 = vrot.lane.b32.xlu0 %v5810_v58, %s5307_s0 }
 0x145   :  { %v1260_v23 = vpop.permute.xlu1 %1259  ;;  %v1266_v4 = vpop.permute.xlu0 %1265 }
 0x146   :  { %1441 = vst.msk [vmem:[#allocation3 + $0x58] sm:$0xff] %vm1429_vm5, %v1260_v23  ;;  %1444 = vst.msk [vmem:[#allocation3 + $0x70] sm:$0xff] %vm1429_vm5, %v1266_v4  ;;  %v1556_v4 = vld [vmem:[#allocation2 + $0x330] sm:$0xff] }
 0x147   :  { %1632 = vrot.lane.b32.xlu1 %v5821_v63, %s5307_s0  ;;  %1638 = vrot.lane.b32.xlu0 %v5838_v9, %s5307_s0 }
 0x149   :  { %v1264_v38 = vpop.permute.xlu1 %1263  ;;  %v1270_v42 = vpop.permute.xlu0 %1269 }
 0x14a   :  { %1443 = vst.msk [vmem:[#allocation3 + $0x68] sm:$0xff] %vm1429_vm5, %v1264_v38  ;;  %1446 = vst.msk [vmem:[#allocation3 + $0x80] sm:$0xff] %vm1429_vm5, %v1270_v42  ;;  %v7741_v42 = vld [vmem:[#allocation12_spill] sm:$0xff] }
 0x14b   :  { %1636 = vrot.lane.b32.xlu1 %v5845_v14, %s5307_s0  ;;  %1642 = vrot.lane.b32.xlu0 %v5847_v15, %s5307_s0 }
 0x14d   :  { %v1268_v57 = vpop.permute.xlu1 %1267  ;;  %v1274_v58 = vpop.permute.xlu0 %1273 }
 0x14e   :  { %1445 = vst.msk [vmem:[#allocation3 + $0x78] sm:$0xff] %vm1429_vm5, %v1268_v57  ;;  %1448 = vst.msk [vmem:[#allocation3 + $0x90] sm:$0xff] %vm1429_vm5, %v1274_v58  ;;  %v1879_v58 = vld [vmem:[#allocation2 + $0x19] sm:$0xff] }
 0x14f   :  { %1640 = vrot.lane.b32.xlu1 %v5866_v27, %s5307_s0  ;;  %1646 = vrot.lane.b32.xlu0 %v5873_v31, %s5307_s0 }
 0x151   :  { %v1272_v63 = vpop.permute.xlu1 %1271  ;;  %v1278_v9 = vpop.permute.xlu0 %1277 }
 0x152   :  { %1447 = vst.msk [vmem:[#allocation3 + $0x88] sm:$0xff] %vm1429_vm5, %v1272_v63  ;;  %1450 = vst.msk [vmem:[#allocation3 + $0xa0] sm:$0xff] %vm1429_vm5, %v1278_v9  ;;  %v7742_v9 = vld [vmem:[#allocation13_spill] sm:$0xff] }
 0x153   :  { %1644 = vrot.lane.b32.xlu1 %v5894_v46, %s5307_s0  ;;  %1650 = vrot.lane.b32.xlu0 %v5904_v51, %s5307_s0 }
 0x155   :  { %v1276_v14 = vpop.permute.xlu1 %1275  ;;  %v1282_v15 = vpop.permute.xlu0 %1281 }
 0x156   :  { %1449 = vst.msk [vmem:[#allocation3 + $0x98] sm:$0xff] %vm1429_vm5, %v1276_v14  ;;  %1452 = vst.msk [vmem:[#allocation3 + $0xb0] sm:$0xff] %vm1429_vm5, %v1282_v15  ;;  %v1557_v14 = vld [vmem:[#allocation2 + $0x338] sm:$0xff] }
 0x157   :  { %1648 = vrot.lane.b32.xlu1 %v5919_v61, %s5307_s0  ;;  %1654 = vrot.lane.b32.xlu0 %v5921_v62, %s5307_s0 }
 0x159   :  { %v1280_v27 = vpop.permute.xlu1 %1279  ;;  %v1286_v31 = vpop.permute.xlu0 %1285 }
 0x15a   :  { %1451 = vst.msk [vmem:[#allocation3 + $0xa8] sm:$0xff] %vm1429_vm5, %v1280_v27  ;;  %1454 = vst.msk [vmem:[#allocation3 + $0xc0] sm:$0xff] %vm1429_vm5, %v1286_v31  ;;  %v1881_v27 = vld [vmem:[#allocation2 + $0x31] sm:$0xff] }
 0x15b   :  { %1652 = vrot.lane.b32.xlu1 %v5937_v19, %s5307_s0  ;;  %1658 = vrot.lane.b32.xlu0 %v5950_v29, %s5307_s0 }
 0x15d   :  { %v1284_v46 = vpop.permute.xlu1 %1283  ;;  %v1290_v51 = vpop.permute.xlu0 %1289 }
 0x15e   :  { %1453 = vst.msk [vmem:[#allocation3 + $0xb8] sm:$0xff] %vm1429_vm5, %v1284_v46  ;;  %1456 = vst.msk [vmem:[#allocation3 + $0xd0] sm:$0xff] %vm1429_vm5, %v1290_v51  ;;  %v1880_v46 = vld [vmem:[#allocation2 + $0x21] sm:$0xff] }
 0x15f   :  { %1656 = vrot.lane.b32.xlu1 %v5974_v49, %s5307_s0  ;;  %1662 = vrot.lane.b32.xlu0 %v5976_v50, %s5307_s0 }
 0x161   :  { %v1288_v61 = vpop.permute.xlu1 %1287  ;;  %v1294_v62 = vpop.permute.xlu0 %1293 }
 0x162   :  { %1455 = vst.msk [vmem:[#allocation3 + $0xc8] sm:$0xff] %vm1429_vm5, %v1288_v61  ;;  %1458 = vst.msk [vmem:[#allocation3 + $0xe0] sm:$0xff] %vm1429_vm5, %v1294_v62  ;;  %v1883_v61 = vld [vmem:[#allocation2 + $0x49] sm:$0xff] }
 0x163   :  { %1660 = vrot.lane.b32.xlu1 %v5986_v56, %s5307_s0  ;;  %1666 = vrot.lane.b32.xlu0 %v5988_v59, %s5307_s0 }
 0x165   :  { %v1292_v19 = vpop.permute.xlu1 %1291  ;;  %v1298_v29 = vpop.permute.xlu0 %1297 }
 0x166   :  { %1457 = vst.msk [vmem:[#allocation3 + $0xd8] sm:$0xff] %vm1429_vm5, %v1292_v19  ;;  %1460 = vst.msk [vmem:[#allocation3 + $0xf0] sm:$0xff] %vm1429_vm5, %v1298_v29  ;;  %v1882_v19 = vld [vmem:[#allocation2 + $0x39] sm:$0xff] }
 0x167   :  { %1664 = vrot.lane.b32.xlu1 %v6009_v17, %s5307_s0  ;;  %1670 = vrot.lane.b32.xlu0 %v6018_v25, %s5307_s0  ;;  %v1524_v25 = vld [vmem:[#allocation2 + $0x180] sm:$0xff] }
 0x169   :  { %v1296_v49 = vpop.permute.xlu1 %1295  ;;  %v1302_v50 = vpop.permute.xlu0 %1301 }
 0x16a   :  { %1459 = vst.msk [vmem:[#allocation3 + $0xe8] sm:$0xff] %vm1429_vm5, %v1296_v49  ;;  %1462 = vst.msk [vmem:[#allocation3 + $0x100] sm:$0xff] %vm1429_vm5, %v1302_v50  ;;  %v1885_v49 = vld [vmem:[#allocation2 + $0x61] sm:$0xff] }
 0x16b   :  { %1668 = vrot.lane.b32.xlu1 %v6029_v35, %s5307_s0  ;;  %1674 = vrot.lane.b32.xlu0 %v6039_v41, %s5307_s0 }
 0x16d   :  { %v1300_v56 = vpop.permute.xlu1 %1299  ;;  %v1306_v59 = vpop.permute.xlu0 %1305 }
 0x16e   :  { %1461 = vst.msk [vmem:[#allocation3 + $0xf8] sm:$0xff] %vm1429_vm5, %v1300_v56  ;;  %1464 = vst.msk [vmem:[#allocation3 + $0x110] sm:$0xff] %vm1429_vm5, %v1306_v59  ;;  %v1884_v56 = vld [vmem:[#allocation2 + $0x51] sm:$0xff] }
 0x16f   :  { %1672 = vrot.lane.b32.xlu1 %v6061_v7, %s5307_s0  ;;  %1678 = vrot.lane.b32.xlu0 %v6063_v8, %s5307_s0  ;;  %v1525_v7 = vld [vmem:[#allocation2 + $0x188] sm:$0xff] }
 0x171   :  { %v1304_v17 = vpop.permute.xlu1 %1303  ;;  %v1310_v35 = vpop.permute.xlu0 %1309 }
 0x172   :  { %1463 = vst.msk [vmem:[#allocation3 + $0x108] sm:$0xff] %vm1429_vm5, %v1304_v17  ;;  %1466 = vst.msk [vmem:[#allocation3 + $0x120] sm:$0xff] %vm1429_vm5, %v1310_v35  ;;  %v1887_v17 = vld [vmem:[#allocation2 + $0x79] sm:$0xff]  ;;  %v1886_v35 = vld [vmem:[#allocation2 + $0x69] sm:$0xff] }
 0x173   :  { %1676 = vrot.lane.b32.xlu1 %v6075_v16, %s5307_s0  ;;  %1682 = vrot.lane.b32.xlu0 %v1524_v25, %s5307_s0 }
 0x175   :  { %v1308_v41 = vpop.permute.xlu1 %1307  ;;  %v1314_v13 = vpop.permute.xlu0 %1313 }
 0x176   :  { %1465 = vst.msk [vmem:[#allocation3 + $0x118] sm:$0xff] %vm1429_vm5, %v1308_v41  ;;  %1468 = vst.msk [vmem:[#allocation3 + $0x130] sm:$0xff] %vm1429_vm5, %v1314_v13  ;;  %v1889_v13 = vld [vmem:[#allocation2 + $0x91] sm:$0xff] }
 0x177   :  { %1680 = vrot.lane.b32.xlu1 %v6092_v36, %s5307_s0  ;;  %1686 = vrot.lane.b32.xlu0 %v6111_v45, %s5307_s0 }
 0x179   :  { %v1312_v8 = vpop.permute.xlu1 %1311  ;;  %v1318_v6 = vpop.permute.xlu0 %1317 }
 0x17a   :  { %1467 = vst.msk [vmem:[#allocation3 + $0x128] sm:$0xff] %vm1429_vm5, %v1312_v8  ;;  %1470 = vst.msk [vmem:[#allocation3 + $0x140] sm:$0xff] %vm1429_vm5, %v1318_v6  ;;  %v1888_v8 = vld [vmem:[#allocation2 + $0x81] sm:$0xff] }
 0x17b   :  { %1684 = vrot.lane.b32.xlu1 %v1525_v7, %s5307_s0  ;;  %1690 = vrot.lane.b32.xlu0 %v6117_v54, %s5307_s0 }
 0x17d   :  { %v1316_v16 = vpop.permute.xlu1 %1315  ;;  %v1322_v1 = vpop.permute.xlu0 %1321 }
 0x17e   :  { %1469 = vst.msk [vmem:[#allocation3 + $0x138] sm:$0xff] %vm1429_vm5, %v1316_v16  ;;  %1472 = vst.msk [vmem:[#allocation3 + $0x150] sm:$0xff] %vm1429_vm5, %v1322_v1  ;;  %v1891_v16 = vld [vmem:[#allocation2 + $0xa9] sm:$0xff] }
 0x17f   :  { %1688 = vrot.lane.b32.xlu1 %v6129_v21, %s5307_s0  ;;  %1694 = vrot.lane.b32.xlu0 %v6131_v24, %s5307_s0 }
 0x181   :  { %v1320_v36 = vpop.permute.xlu1 %1319  ;;  %v1326_v45 = vpop.permute.xlu0 %1325 }
 0x182   :  { %1471 = vst.msk [vmem:[#allocation3 + $0x148] sm:$0xff] %vm1429_vm5, %v1320_v36  ;;  %1474 = vst.msk [vmem:[#allocation3 + $0x160] sm:$0xff] %vm1429_vm5, %v1326_v45  ;;  %v1890_v36 = vld [vmem:[#allocation2 + $0x99] sm:$0xff] }
 0x183   :  { %1692 = vrot.lane.b32.xlu1 %v6143_v33, %s5307_s0  ;;  %1698 = vrot.lane.b32.xlu0 %v6145_v34, %s5307_s0 }
 0x185   :  { %v1324_v54 = vpop.permute.xlu1 %1323  ;;  %v1330_v32 = vpop.permute.xlu0 %1329 }
 0x186   :  { %1473 = vst.msk [vmem:[#allocation3 + $0x158] sm:$0xff] %vm1429_vm5, %v1324_v54  ;;  %1476 = vst.msk [vmem:[#allocation3 + $0x170] sm:$0xff] %vm1429_vm5, %v1330_v32  ;;  %v1893_v54 = vld [vmem:[#allocation2 + $0xc1] sm:$0xff] }
 0x187   :  { %1696 = vrot.lane.b32.xlu1 %v6152_v40, %s5307_s0  ;;  %1702 = vrot.lane.b32.xlu0 %v6156_v43, %s5307_s0 }
 0x189   :  { %v1328_v21 = vpop.permute.xlu1 %1327  ;;  %v1334_v24 = vpop.permute.xlu0 %1333 }
 0x18a   :  { %1475 = vst.msk [vmem:[#allocation3 + $0x168] sm:$0xff] %vm1429_vm5, %v1328_v21  ;;  %1478 = vst.msk [vmem:[#allocation3 + $0x180] sm:$0xff] %vm1429_vm5, %v1334_v24  ;;  %v1892_v21 = vld [vmem:[#allocation2 + $0xb1] sm:$0xff] }
 0x18b   :  { %1700 = vrot.lane.b32.xlu1 %v6163_v47, %s5307_s0  ;;  %1706 = vrot.lane.b32.xlu0 %v6167_v52, %s5307_s0 }
 0x18d   :  { %v1332_v33 = vpop.permute.xlu1 %1331  ;;  %v1338_v34 = vpop.permute.xlu0 %1337 }
 0x18e   :  { %1477 = vst.msk [vmem:[#allocation3 + $0x178] sm:$0xff] %vm1429_vm5, %v1332_v33  ;;  %1480 = vst.msk [vmem:[#allocation3 + $0x190] sm:$0xff] %vm1429_vm5, %v1338_v34  ;;  %v1895_v33 = vld [vmem:[#allocation2 + $0xd9] sm:$0xff] }
 0x18f   :  { %1704 = vrot.lane.b32.xlu1 %v6173_v55, %s5307_s0  ;;  %1710 = vrot.lane.b32.xlu0 %v6177_v3, %s5307_s0 }
 0x191   :  { %v1336_v40 = vpop.permute.xlu1 %1335  ;;  %v1342_v43 = vpop.permute.xlu0 %1341 }
 0x192   :  { %1479 = vst.msk [vmem:[#allocation3 + $0x188] sm:$0xff] %vm1429_vm5, %v1336_v40  ;;  %1482 = vst.msk [vmem:[#allocation3 + $0x1a0] sm:$0xff] %vm1429_vm5, %v1342_v43  ;;  %v1894_v40 = vld [vmem:[#allocation2 + $0xc9] sm:$0xff] }
 0x193   :  { %1708 = vrot.lane.b32.xlu1 %v6183_v5, %s5307_s0  ;;  %1714 = vrot.lane.b32.xlu0 %v6187_v10, %s5307_s0 }
 0x195   :  { %v1340_v47 = vpop.permute.xlu1 %1339  ;;  %v1346_v52 = vpop.permute.xlu0 %1345 }
 0x196   :  { %1481 = vst.msk [vmem:[#allocation3 + $0x198] sm:$0xff] %vm1429_vm5, %v1340_v47  ;;  %1484 = vst.msk [vmem:[#allocation3 + $0x1b0] sm:$0xff] %vm1429_vm5, %v1346_v52  ;;  %v1897_v47 = vld [vmem:[#allocation2 + $0xf1] sm:$0xff] }
 0x197   :  { %1712 = vrot.lane.b32.xlu1 %v6193_v12, %s5307_s0  ;;  %1718 = vrot.lane.b32.xlu0 %v6197_v18, %s5307_s0 }
 0x199   :  { %v1344_v55 = vpop.permute.xlu1 %1343  ;;  %v1350_v3 = vpop.permute.xlu0 %1349 }
 0x19a   :  { %1483 = vst.msk [vmem:[#allocation3 + $0x1a8] sm:$0xff] %vm1429_vm5, %v1344_v55  ;;  %1486 = vst.msk [vmem:[#allocation3 + $0x1c0] sm:$0xff] %vm1429_vm5, %v1350_v3  ;;  %v1896_v55 = vld [vmem:[#allocation2 + $0xe1] sm:$0xff] }
 0x19b   :  { %1716 = vrot.lane.b32.xlu1 %v6203_v26, %s5307_s0  ;;  %1722 = vrot.lane.b32.xlu0 %v6207_v30, %s5307_s0  ;;  %v7733_v26 = vld [vmem:[#allocation4_spill] sm:$0xff]  ;;  %v7734_v30 = vld [vmem:[#allocation5_spill] sm:$0xff] }
 0x19d   :  { %v1348_v5 = vpop.permute.xlu1 %1347  ;;  %v1354_v10 = vpop.permute.xlu0 %1353 }
 0x19e   :  { %1485 = vst.msk [vmem:[#allocation3 + $0x1b8] sm:$0xff] %vm1429_vm5, %v1348_v5  ;;  %1488 = vst.msk [vmem:[#allocation3 + $0x1d0] sm:$0xff] %vm1429_vm5, %v1354_v10  ;;  %v1899_v5 = vld [vmem:[#allocation2 + $0x109] sm:$0xff] }
 0x19f   :  { %1720 = vrot.lane.b32.xlu1 %v6213_v37, %s5307_s0  ;;  %1726 = vrot.lane.b32.xlu0 %v6217_v44, %s5307_s0  ;;  %v7735_v37 = vld [vmem:[#allocation6_spill] sm:$0xff]  ;;  %v7736_v44 = vld [vmem:[#allocation7_spill] sm:$0xff] }
 0x1a1   :  { %v1352_v12 = vpop.permute.xlu1 %1351  ;;  %v1358_v18 = vpop.permute.xlu0 %1357 }
 0x1a2   :  { %1487 = vst.msk [vmem:[#allocation3 + $0x1c8] sm:$0xff] %vm1429_vm5, %v1352_v12  ;;  %1490 = vst.msk [vmem:[#allocation3 + $0x1e0] sm:$0xff] %vm1429_vm5, %v1358_v18  ;;  %v1898_v12 = vld [vmem:[#allocation2 + $0xf9] sm:$0xff] }
 0x1a3   :  { %1724 = vrot.lane.b32.xlu1 %v7733_v26, %s5307_s0  ;;  %1730 = vrot.lane.b32.xlu0 %v7734_v30, %s5307_s0  ;;  %v1901_v26 = vld [vmem:[#allocation2 + $0x121] sm:$0xff] }
 0x1a5   :  { %v1356_v39 = vpop.permute.xlu1 %1355  ;;  %v1362_v28 = vpop.permute.xlu0 %1361 }
 0x1a6   :  { %1489 = vst.msk [vmem:[#allocation3 + $0x1d8] sm:$0xff] %vm1429_vm5, %v1356_v39  ;;  %1492 = vst.msk [vmem:[#allocation3 + $0x1f0] sm:$0xff] %vm1429_vm5, %v1362_v28  ;;  %v1900_v39 = vld [vmem:[#allocation2 + $0x111] sm:$0xff] }
 0x1a7   :  { %1728 = vrot.lane.b32.xlu1 %v7735_v37, %s5307_s0  ;;  %1734 = vrot.lane.b32.xlu0 %v7736_v44, %s5307_s0  ;;  %v1903_v37 = vld [vmem:[#allocation2 + $0x139] sm:$0xff] }
 0x1a9   :  { %v1360_v11 = vpop.permute.xlu1 %1359  ;;  %v1623_v0 = vpop.permute.xlu0 %1622 }
 0x1aa   :  { %1491 = vst.msk [vmem:[#allocation3 + $0x1e8] sm:$0xff] %vm1429_vm5, %v1360_v11  ;;  %v1902_v11 = vld [vmem:[#allocation2 + $0x129] sm:$0xff] }
 0x1ab   :  { %1815 = vst.msk [vmem:[#allocation3] sm:$0xff] %vm1814_vm8, %v1623_v0  ;;  %1732 = vrot.lane.b32.xlu1 %v7737_v2, %s5307_s0  ;;  %1738 = vrot.lane.b32.xlu0 %v7738_v53, %s5307_s0  ;;  %v1905_v2 = vld [vmem:[#allocation2 + $0x151] sm:$0xff] }
 0x1ad   :  { %v1364_v60 = vpop.permute.xlu1 %1363  ;;  %v1627_v48 = vpop.permute.xlu0 %1626 }
 0x1ae   :  { %1493 = vst.msk [vmem:[#allocation3 + $0x1f8] sm:$0xff] %vm1429_vm5, %v1364_v60  ;;  %v1904_v60 = vld [vmem:[#allocation2 + $0x141] sm:$0xff] }
 0x1af   :  { %1817 = vst.msk [vmem:[#allocation3 + $0x10] sm:$0xff] %vm1814_vm8, %v1627_v48  ;;  %1736 = vrot.lane.b32.xlu1 %v7739_v22, %s5307_s0  ;;  %1742 = vrot.lane.b32.xlu0 %v7740_v20, %s5307_s0  ;;  %v1907_v22 = vld [vmem:[#allocation2 + $0x169] sm:$0xff] }
 0x1b1   :  { %v1625_v23 = vpop.permute.xlu1 %1624  ;;  %v1631_v38 = vpop.permute.xlu0 %1630 }
 0x1b2   :  { %1816 = vst.msk [vmem:[#allocation3 + $0x8] sm:$0xff] %vm1814_vm8, %v1625_v23  ;;  %1819 = vst.msk [vmem:[#allocation3 + $0x20] sm:$0xff] %vm1814_vm8, %v1631_v38  ;;  %v1906_v23 = vld [vmem:[#allocation2 + $0x159] sm:$0xff]  ;;  %v1909_v38 = vld [vmem:[#allocation2 + $0x181] sm:$0xff] }
 0x1b3   :  { %1740 = vrot.lane.b32.xlu1 %v7741_v42, %s5307_s0  ;;  %1746 = vrot.lane.b32.xlu0 %v1556_v4, %s5307_s0 }
 0x1b5   :  { %v1629_v57 = vpop.permute.xlu1 %1628  ;;  %v1635_v63 = vpop.permute.xlu0 %1634 }
 0x1b6   :  { %1818 = vst.msk [vmem:[#allocation3 + $0x18] sm:$0xff] %vm1814_vm8, %v1629_v57  ;;  %1821 = vst.msk [vmem:[#allocation3 + $0x30] sm:$0xff] %vm1814_vm8, %v1635_v63  ;;  %v1908_v57 = vld [vmem:[#allocation2 + $0x171] sm:$0xff]  ;;  %v1911_v63 = vld [vmem:[#allocation2 + $0x1c9] sm:$0xff] }
 0x1b7   :  { %1744 = vrot.lane.b32.xlu1 %v7742_v9, %s5307_s0  ;;  %2007 = vrot.lane.b32.xlu0 %v1879_v58, %s5308_s16 }
 0x1b9   :  { %v1633_v15 = vpop.permute.xlu1 %1632  ;;  %v1639_v31 = vpop.permute.xlu0 %1638 }
 0x1ba   :  { %1820 = vst.msk [vmem:[#allocation3 + $0x28] sm:$0xff] %vm1814_vm8, %v1633_v15  ;;  %1823 = vst.msk [vmem:[#allocation3 + $0x40] sm:$0xff] %vm1814_vm8, %v1639_v31 }
 0x1bb   :  { %1748 = vrot.lane.b32.xlu1 %v1557_v14, %s5307_s0  ;;  %2011 = vrot.lane.b32.xlu0 %v1881_v27, %s5308_s16  ;;  %v1910_v14 = vld [vmem:[#allocation2 + $0x189] sm:$0xff]  ;;  %v1913_v27 = vld [vmem:[#allocation2 + $0x1e1] sm:$0xff] }
 0x1bd   :  { %v1637_v51 = vpop.permute.xlu1 %1636  ;;  %v1643_v62 = vpop.permute.xlu0 %1642 }
 0x1be   :  { %1822 = vst.msk [vmem:[#allocation3 + $0x38] sm:$0xff] %vm1814_vm8, %v1637_v51  ;;  %1825 = vst.msk [vmem:[#allocation3 + $0x50] sm:$0xff] %vm1814_vm8, %v1643_v62 }
 0x1bf   :  { %2009 = vrot.lane.b32.xlu1 %v1880_v46, %s5308_s16  ;;  %2015 = vrot.lane.b32.xlu0 %v1883_v61, %s5308_s16  ;;  %v1912_v46 = vld [vmem:[#allocation2 + $0x1d1] sm:$0xff]  ;;  %v1915_v61 = vld [vmem:[#allocation2 + $0x1f9] sm:$0xff] }
 0x1c1   :  { %v1641_v29 = vpop.permute.xlu1 %1640  ;;  %v1647_v50 = vpop.permute.xlu0 %1646 }
 0x1c2   :  { %1824 = vst.msk [vmem:[#allocation3 + $0x48] sm:$0xff] %vm1814_vm8, %v1641_v29  ;;  %1827 = vst.msk [vmem:[#allocation3 + $0x60] sm:$0xff] %vm1814_vm8, %v1647_v50 }
 0x1c3   :  { %2013 = vrot.lane.b32.xlu1 %v1882_v19, %s5308_s16  ;;  %2019 = vrot.lane.b32.xlu0 %v1885_v49, %s5308_s16  ;;  %v1914_v19 = vld [vmem:[#allocation2 + $0x1e9] sm:$0xff]  ;;  %v1917_v49 = vld [vmem:[#allocation2 + $0x211] sm:$0xff] }
 0x1c5   :  { %v1645_v59 = vpop.permute.xlu1 %1644  ;;  %v1651_v25 = vpop.permute.xlu0 %1650 }
 0x1c6   :  { %1826 = vst.msk [vmem:[#allocation3 + $0x58] sm:$0xff] %vm1814_vm8, %v1645_v59  ;;  %1829 = vst.msk [vmem:[#allocation3 + $0x70] sm:$0xff] %vm1814_vm8, %v1651_v25 }
 0x1c7   :  { %2017 = vrot.lane.b32.xlu1 %v1884_v56, %s5308_s16  ;;  %2023 = vrot.lane.b32.xlu0 %v1887_v17, %s5308_s16  ;;  %v1916_v56 = vld [vmem:[#allocation2 + $0x201] sm:$0xff]  ;;  %v1919_v17 = vld [vmem:[#allocation2 + $0x229] sm:$0xff] }
 0x1c9   :  { %v1649_v41 = vpop.permute.xlu1 %1648  ;;  %v1655_v7 = vpop.permute.xlu0 %1654 }
 0x1ca   :  { %1828 = vst.msk [vmem:[#allocation3 + $0x68] sm:$0xff] %vm1814_vm8, %v1649_v41  ;;  %1831 = vst.msk [vmem:[#allocation3 + $0x80] sm:$0xff] %vm1814_vm8, %v1655_v7 }
 0x1cb   :  { %2021 = vrot.lane.b32.xlu1 %v1886_v35, %s5308_s16  ;;  %2027 = vrot.lane.b32.xlu0 %v1889_v13, %s5308_s16  ;;  %v1918_v35 = vld [vmem:[#allocation2 + $0x219] sm:$0xff]  ;;  %v1921_v13 = vld [vmem:[#allocation2 + $0x241] sm:$0xff] }
 0x1cd   :  { %v1653_v6 = vpop.permute.xlu1 %1652  ;;  %v1659_v1 = vpop.permute.xlu0 %1658 }
 0x1ce   :  { %1830 = vst.msk [vmem:[#allocation3 + $0x78] sm:$0xff] %vm1814_vm8, %v1653_v6  ;;  %1833 = vst.msk [vmem:[#allocation3 + $0x90] sm:$0xff] %vm1814_vm8, %v1659_v1 }
 0x1cf   :  { %2025 = vrot.lane.b32.xlu1 %v1888_v8, %s5308_s16  ;;  %2031 = vrot.lane.b32.xlu0 %v1891_v16, %s5308_s16  ;;  %v1920_v8 = vld [vmem:[#allocation2 + $0x231] sm:$0xff]  ;;  %v1923_v16 = vld [vmem:[#allocation2 + $0x259] sm:$0xff] }
 0x1d1   :  { %v1657_v45 = vpop.permute.xlu1 %1656  ;;  %v1663_v32 = vpop.permute.xlu0 %1662 }
 0x1d2   :  { %1832 = vst.msk [vmem:[#allocation3 + $0x88] sm:$0xff] %vm1814_vm8, %v1657_v45  ;;  %1835 = vst.msk [vmem:[#allocation3 + $0xa0] sm:$0xff] %vm1814_vm8, %v1663_v32 }
 0x1d3   :  { %2029 = vrot.lane.b32.xlu1 %v1890_v36, %s5308_s16  ;;  %2035 = vrot.lane.b32.xlu0 %v1893_v54, %s5308_s16  ;;  %v1922_v36 = vld [vmem:[#allocation2 + $0x249] sm:$0xff]  ;;  %v1925_v54 = vld [vmem:[#allocation2 + $0x271] sm:$0xff] }
 0x1d5   :  { %v1661_v24 = vpop.permute.xlu1 %1660  ;;  %v1667_v34 = vpop.permute.xlu0 %1666 }
 0x1d6   :  { %1834 = vst.msk [vmem:[#allocation3 + $0x98] sm:$0xff] %vm1814_vm8, %v1661_v24  ;;  %1837 = vst.msk [vmem:[#allocation3 + $0xb0] sm:$0xff] %vm1814_vm8, %v1667_v34 }
 0x1d7   :  { %2033 = vrot.lane.b32.xlu1 %v1892_v21, %s5308_s16  ;;  %2039 = vrot.lane.b32.xlu0 %v1895_v33, %s5308_s16  ;;  %v1924_v21 = vld [vmem:[#allocation2 + $0x261] sm:$0xff]  ;;  %v1927_v33 = vld [vmem:[#allocation2 + $0x289] sm:$0xff] }
 0x1d9   :  { %v1665_v43 = vpop.permute.xlu1 %1664  ;;  %v1671_v52 = vpop.permute.xlu0 %1670 }
 0x1da   :  { %1836 = vst.msk [vmem:[#allocation3 + $0xa8] sm:$0xff] %vm1814_vm8, %v1665_v43  ;;  %1839 = vst.msk [vmem:[#allocation3 + $0xc0] sm:$0xff] %vm1814_vm8, %v1671_v52 }
 0x1db   :  { %2037 = vrot.lane.b32.xlu1 %v1894_v40, %s5308_s16  ;;  %2043 = vrot.lane.b32.xlu0 %v1897_v47, %s5308_s16  ;;  %v1926_v40 = vld [vmem:[#allocation2 + $0x279] sm:$0xff]  ;;  %v1929_v47 = vld [vmem:[#allocation2 + $0x2a1] sm:$0xff] }
 0x1dd   :  { %v1669_v3 = vpop.permute.xlu1 %1668  ;;  %v1675_v10 = vpop.permute.xlu0 %1674 }
 0x1de   :  { %1838 = vst.msk [vmem:[#allocation3 + $0xb8] sm:$0xff] %vm1814_vm8, %v1669_v3  ;;  %1841 = vst.msk [vmem:[#allocation3 + $0xd0] sm:$0xff] %vm1814_vm8, %v1675_v10 }
 0x1df   :  { %2041 = vrot.lane.b32.xlu1 %v1896_v55, %s5308_s16  ;;  %2047 = vrot.lane.b32.xlu0 %v1899_v5, %s5308_s16  ;;  %v1928_v55 = vld [vmem:[#allocation2 + $0x291] sm:$0xff]  ;;  %v1931_v5 = vld [vmem:[#allocation2 + $0x2b9] sm:$0xff] }
 0x1e1   :  { %v1673_v18 = vpop.permute.xlu1 %1672  ;;  %v1679_v30 = vpop.permute.xlu0 %1678 }
 0x1e2   :  { %1840 = vst.msk [vmem:[#allocation3 + $0xc8] sm:$0xff] %vm1814_vm8, %v1673_v18  ;;  %1843 = vst.msk [vmem:[#allocation3 + $0xe0] sm:$0xff] %vm1814_vm8, %v1679_v30 }
 0x1e3   :  { %2045 = vrot.lane.b32.xlu1 %v1898_v12, %s5308_s16  ;;  %2051 = vrot.lane.b32.xlu0 %v1901_v26, %s5308_s16  ;;  %v1930_v12 = vld [vmem:[#allocation2 + $0x2a9] sm:$0xff]  ;;  %v1933_v26 = vld [vmem:[#allocation2 + $0x2d1] sm:$0xff] }
 0x1e5   :  { %v1677_v28 = vpop.permute.xlu1 %1676  ;;  %v1683_v44 = vpop.permute.xlu0 %1682 }
 0x1e6   :  { %1842 = vst.msk [vmem:[#allocation3 + $0xd8] sm:$0xff] %vm1814_vm8, %v1677_v28  ;;  %1845 = vst.msk [vmem:[#allocation3 + $0xf0] sm:$0xff] %vm1814_vm8, %v1683_v44 }
 0x1e7   :  { %2049 = vrot.lane.b32.xlu1 %v1900_v39, %s5308_s16  ;;  %2055 = vrot.lane.b32.xlu0 %v1903_v37, %s5308_s16  ;;  %v1932_v39 = vld [vmem:[#allocation2 + $0x2c1] sm:$0xff]  ;;  %v1935_v37 = vld [vmem:[#allocation2 + $0x2e9] sm:$0xff] }
 0x1e9   :  { %v1681_v0 = vpop.permute.xlu1 %1680  ;;  %v1687_v53 = vpop.permute.xlu0 %1686 }
 0x1ea   :  { %1844 = vst.msk [vmem:[#allocation3 + $0xe8] sm:$0xff] %vm1814_vm8, %v1681_v0  ;;  %1847 = vst.msk [vmem:[#allocation3 + $0x100] sm:$0xff] %vm1814_vm8, %v1687_v53 }
 0x1eb   :  { %2053 = vrot.lane.b32.xlu1 %v1902_v11, %s5308_s16  ;;  %2059 = vrot.lane.b32.xlu0 %v1905_v2, %s5308_s16  ;;  %v1934_v11 = vld [vmem:[#allocation2 + $0x2d9] sm:$0xff]  ;;  %v1937_v2 = vld [vmem:[#allocation2 + $0x301] sm:$0xff] }
 0x1ed   :  { %v1685_v48 = vpop.permute.xlu1 %1684  ;;  %v1691_v20 = vpop.permute.xlu0 %1690 }
 0x1ee   :  { %1846 = vst.msk [vmem:[#allocation3 + $0xf8] sm:$0xff] %vm1814_vm8, %v1685_v48  ;;  %1849 = vst.msk [vmem:[#allocation3 + $0x110] sm:$0xff] %vm1814_vm8, %v1691_v20 }
 0x1ef   :  { %2057 = vrot.lane.b32.xlu1 %v1904_v60, %s5308_s16  ;;  %2063 = vrot.lane.b32.xlu0 %v1907_v22, %s5308_s16  ;;  %v1936_v60 = vld [vmem:[#allocation2 + $0x2f1] sm:$0xff]  ;;  %v1939_v22 = vld [vmem:[#allocation2 + $0x319] sm:$0xff] }
 0x1f1   :  { %v1689_v4 = vpop.permute.xlu1 %1688  ;;  %v1695_v42 = vpop.permute.xlu0 %1694 }
 0x1f2   :  { %1848 = vst.msk [vmem:[#allocation3 + $0x108] sm:$0xff] %vm1814_vm8, %v1689_v4  ;;  %1851 = vst.msk [vmem:[#allocation3 + $0x120] sm:$0xff] %vm1814_vm8, %v1695_v42 }
 0x1f3   :  { %2061 = vrot.lane.b32.xlu1 %v1906_v23, %s5308_s16  ;;  %2067 = vrot.lane.b32.xlu0 %v1909_v38, %s5308_s16  ;;  %v1938_v23 = vld [vmem:[#allocation2 + $0x309] sm:$0xff]  ;;  %v1941_v38 = vld [vmem:[#allocation2 + $0x331] sm:$0xff] }
 0x1f5   :  { %v1693_v58 = vpop.permute.xlu1 %1692  ;;  %v1699_v9 = vpop.permute.xlu0 %1698 }
 0x1f6   :  { %1850 = vst.msk [vmem:[#allocation3 + $0x118] sm:$0xff] %vm1814_vm8, %v1693_v58  ;;  %1853 = vst.msk [vmem:[#allocation3 + $0x130] sm:$0xff] %vm1814_vm8, %v1699_v9 }
 0x1f7   :  { %2065 = vrot.lane.b32.xlu1 %v1908_v57, %s5308_s16  ;;  %2071 = vrot.lane.b32.xlu0 %v1911_v63, %s5308_s16  ;;  %v1940_v57 = vld [vmem:[#allocation2 + $0x321] sm:$0xff] }
 0x1f8   :  { %v2264_v63 = vld [vmem:[#allocation2 + $0x1a] sm:$0xff] }
 0x1f9   :  { %v1697_v15 = vpop.permute.xlu1 %1696  ;;  %v1703_v31 = vpop.permute.xlu0 %1702 }
 0x1fa   :  { %1852 = vst.msk [vmem:[#allocation3 + $0x128] sm:$0xff] %vm1814_vm8, %v1697_v15  ;;  %1855 = vst.msk [vmem:[#allocation3 + $0x140] sm:$0xff] %vm1814_vm8, %v1703_v31 }
 0x1fb   :  { %2069 = vrot.lane.b32.xlu1 %v1910_v14, %s5308_s16  ;;  %2075 = vrot.lane.b32.xlu0 %v1913_v27, %s5308_s16  ;;  %v1942_v14 = vld [vmem:[#allocation2 + $0x339] sm:$0xff] }
 0x1fc   :  { %v6753_v27 = vld [vmem:[#allocation2 + $0x32] sm:$0xff] }
 0x1fd   :  { %v1701_v51 = vpop.permute.xlu1 %1700  ;;  %v1707_v62 = vpop.permute.xlu0 %1706 }
 0x1fe   :  { %1854 = vst.msk [vmem:[#allocation3 + $0x138] sm:$0xff] %vm1814_vm8, %v1701_v51  ;;  %1857 = vst.msk [vmem:[#allocation3 + $0x150] sm:$0xff] %vm1814_vm8, %v1707_v62 }
 0x1ff   :  { %2073 = vrot.lane.b32.xlu1 %v1912_v46, %s5308_s16  ;;  %2079 = vrot.lane.b32.xlu0 %v1915_v61, %s5308_s16  ;;  %v2265_v46 = vld [vmem:[#allocation2 + $0x22] sm:$0xff]  ;;  %v6760_v61 = vld [vmem:[#allocation2 + $0x4a] sm:$0xff] }
 0x201   :  { %v1705_v29 = vpop.permute.xlu1 %1704  ;;  %v1711_v50 = vpop.permute.xlu0 %1710 }
 0x202   :  { %1856 = vst.msk [vmem:[#allocation3 + $0x148] sm:$0xff] %vm1814_vm8, %v1705_v29  ;;  %1859 = vst.msk [vmem:[#allocation3 + $0x160] sm:$0xff] %vm1814_vm8, %v1711_v50 }
 0x203   :  { %2077 = vrot.lane.b32.xlu1 %v1914_v19, %s5308_s16  ;;  %2083 = vrot.lane.b32.xlu0 %v1917_v49, %s5308_s16  ;;  %v6767_v19 = vld [vmem:[#allocation2 + $0x3a] sm:$0xff]  ;;  %v6769_v49 = vld [vmem:[#allocation2 + $0x62] sm:$0xff] }
 0x205   :  { %v1709_v59 = vpop.permute.xlu1 %1708  ;;  %v1715_v25 = vpop.permute.xlu0 %1714 }
 0x206   :  { %1858 = vst.msk [vmem:[#allocation3 + $0x158] sm:$0xff] %vm1814_vm8, %v1709_v59  ;;  %1861 = vst.msk [vmem:[#allocation3 + $0x170] sm:$0xff] %vm1814_vm8, %v1715_v25 }
 0x207   :  { %2081 = vrot.lane.b32.xlu1 %v1916_v56, %s5308_s16  ;;  %2087 = vrot.lane.b32.xlu0 %v1919_v17, %s5308_s16  ;;  %v6777_v56 = vld [vmem:[#allocation2 + $0x52] sm:$0xff]  ;;  %v2272_v17 = vld [vmem:[#allocation2 + $0x7a] sm:$0xff] }
 0x209   :  { %v1713_v41 = vpop.permute.xlu1 %1712  ;;  %v1719_v7 = vpop.permute.xlu0 %1718 }
 0x20a   :  { %1860 = vst.msk [vmem:[#allocation3 + $0x168] sm:$0xff] %vm1814_vm8, %v1713_v41  ;;  %1863 = vst.msk [vmem:[#allocation3 + $0x180] sm:$0xff] %vm1814_vm8, %v1719_v7 }
 0x20b   :  { %2085 = vrot.lane.b32.xlu1 %v1918_v35, %s5308_s16  ;;  %2091 = vrot.lane.b32.xlu0 %v1921_v13, %s5308_s16  ;;  %v6784_v35 = vld [vmem:[#allocation2 + $0x6a] sm:$0xff]  ;;  %v2274_v13 = vld [vmem:[#allocation2 + $0x92] sm:$0xff] }
 0x20d   :  { %v1717_v6 = vpop.permute.xlu1 %1716  ;;  %v1723_v1 = vpop.permute.xlu0 %1722 }
 0x20e   :  { %1862 = vst.msk [vmem:[#allocation3 + $0x178] sm:$0xff] %vm1814_vm8, %v1717_v6  ;;  %1865 = vst.msk [vmem:[#allocation3 + $0x190] sm:$0xff] %vm1814_vm8, %v1723_v1 }
 0x20f   :  { %2089 = vrot.lane.b32.xlu1 %v1920_v8, %s5308_s16  ;;  %2095 = vrot.lane.b32.xlu0 %v1923_v16, %s5308_s16  ;;  %v2273_v8 = vld [vmem:[#allocation2 + $0x82] sm:$0xff]  ;;  %v2276_v16 = vld [vmem:[#allocation2 + $0xaa] sm:$0xff] }
 0x211   :  { %v1721_v45 = vpop.permute.xlu1 %1720  ;;  %v1727_v32 = vpop.permute.xlu0 %1726 }
 0x212   :  { %1864 = vst.msk [vmem:[#allocation3 + $0x188] sm:$0xff] %vm1814_vm8, %v1721_v45  ;;  %1867 = vst.msk [vmem:[#allocation3 + $0x1a0] sm:$0xff] %vm1814_vm8, %v1727_v32 }
 0x213   :  { %2093 = vrot.lane.b32.xlu1 %v1922_v36, %s5308_s16  ;;  %2099 = vrot.lane.b32.xlu0 %v1925_v54, %s5308_s16  ;;  %v2275_v36 = vld [vmem:[#allocation2 + $0x9a] sm:$0xff]  ;;  %v2278_v54 = vld [vmem:[#allocation2 + $0xc2] sm:$0xff] }
 0x215   :  { %v1725_v24 = vpop.permute.xlu1 %1724  ;;  %v1731_v34 = vpop.permute.xlu0 %1730 }
 0x216   :  { %1866 = vst.msk [vmem:[#allocation3 + $0x198] sm:$0xff] %vm1814_vm8, %v1725_v24  ;;  %1869 = vst.msk [vmem:[#allocation3 + $0x1b0] sm:$0xff] %vm1814_vm8, %v1731_v34 }
 0x217   :  { %2097 = vrot.lane.b32.xlu1 %v1924_v21, %s5308_s16  ;;  %2103 = vrot.lane.b32.xlu0 %v1927_v33, %s5308_s16  ;;  %v2277_v21 = vld [vmem:[#allocation2 + $0xb2] sm:$0xff]  ;;  %v2280_v33 = vld [vmem:[#allocation2 + $0xda] sm:$0xff] }
 0x219   :  { %v1729_v43 = vpop.permute.xlu1 %1728  ;;  %v1735_v52 = vpop.permute.xlu0 %1734 }
 0x21a   :  { %1868 = vst.msk [vmem:[#allocation3 + $0x1a8] sm:$0xff] %vm1814_vm8, %v1729_v43  ;;  %1871 = vst.msk [vmem:[#allocation3 + $0x1c0] sm:$0xff] %vm1814_vm8, %v1735_v52 }
 0x21b   :  { %2101 = vrot.lane.b32.xlu1 %v1926_v40, %s5308_s16  ;;  %2107 = vrot.lane.b32.xlu0 %v1929_v47, %s5308_s16  ;;  %v2279_v40 = vld [vmem:[#allocation2 + $0xca] sm:$0xff]  ;;  %v2282_v47 = vld [vmem:[#allocation2 + $0xf2] sm:$0xff] }
 0x21d   :  { %v1733_v3 = vpop.permute.xlu1 %1732  ;;  %v1739_v10 = vpop.permute.xlu0 %1738 }
 0x21e   :  { %1870 = vst.msk [vmem:[#allocation3 + $0x1b8] sm:$0xff] %vm1814_vm8, %v1733_v3  ;;  %1873 = vst.msk [vmem:[#allocation3 + $0x1d0] sm:$0xff] %vm1814_vm8, %v1739_v10 }
 0x21f   :  { %2105 = vrot.lane.b32.xlu1 %v1928_v55, %s5308_s16  ;;  %2111 = vrot.lane.b32.xlu0 %v1931_v5, %s5308_s16  ;;  %v2281_v55 = vld [vmem:[#allocation2 + $0xe2] sm:$0xff]  ;;  %v2284_v5 = vld [vmem:[#allocation2 + $0x10a] sm:$0xff] }
 0x221   :  { %v1737_v18 = vpop.permute.xlu1 %1736  ;;  %v1743_v30 = vpop.permute.xlu0 %1742 }
 0x222   :  { %1872 = vst.msk [vmem:[#allocation3 + $0x1c8] sm:$0xff] %vm1814_vm8, %v1737_v18  ;;  %1875 = vst.msk [vmem:[#allocation3 + $0x1e0] sm:$0xff] %vm1814_vm8, %v1743_v30 }
 0x223   :  { %2109 = vrot.lane.b32.xlu1 %v1930_v12, %s5308_s16  ;;  %2115 = vrot.lane.b32.xlu0 %v1933_v26, %s5308_s16  ;;  %v2283_v12 = vld [vmem:[#allocation2 + $0xfa] sm:$0xff]  ;;  %v2286_v26 = vld [vmem:[#allocation2 + $0x122] sm:$0xff] }
 0x225   :  { %v1741_v28 = vpop.permute.xlu1 %1740  ;;  %v1747_v44 = vpop.permute.xlu0 %1746 }
 0x226   :  { %1874 = vst.msk [vmem:[#allocation3 + $0x1d8] sm:$0xff] %vm1814_vm8, %v1741_v28  ;;  %1877 = vst.msk [vmem:[#allocation3 + $0x1f0] sm:$0xff] %vm1814_vm8, %v1747_v44 }
 0x227   :  { %2113 = vrot.lane.b32.xlu1 %v1932_v39, %s5308_s16  ;;  %2119 = vrot.lane.b32.xlu0 %v1935_v37, %s5308_s16  ;;  %v2285_v39 = vld [vmem:[#allocation2 + $0x112] sm:$0xff]  ;;  %v2288_v37 = vld [vmem:[#allocation2 + $0x13a] sm:$0xff] }
 0x229   :  { %v1745_v0 = vpop.permute.xlu1 %1744  ;;  %v2008_v53 = vpop.permute.xlu0 %2007 }
 0x22a   :  { %1876 = vst.msk [vmem:[#allocation3 + $0x1e8] sm:$0xff] %vm1814_vm8, %v1745_v0 }
 0x22b   :  { %2200 = vst.msk [vmem:[#allocation3] sm:$0xff] %vm2199_vm9, %v2008_v53  ;;  %2117 = vrot.lane.b32.xlu1 %v1934_v11, %s5308_s16  ;;  %2123 = vrot.lane.b32.xlu0 %v1937_v2, %s5308_s16  ;;  %v2287_v11 = vld [vmem:[#allocation2 + $0x12a] sm:$0xff]  ;;  %v2290_v2 = vld [vmem:[#allocation2 + $0x152] sm:$0xff] }
 0x22d   :  { %v1749_v48 = vpop.permute.xlu1 %1748  ;;  %v2012_v20 = vpop.permute.xlu0 %2011 }
 0x22e   :  { %1878 = vst.msk [vmem:[#allocation3 + $0x1f8] sm:$0xff] %vm1814_vm8, %v1749_v48 }
 0x22f   :  { %2202 = vst.msk [vmem:[#allocation3 + $0x10] sm:$0xff] %vm2199_vm9, %v2012_v20  ;;  %2121 = vrot.lane.b32.xlu1 %v1936_v60, %s5308_s16  ;;  %2127 = vrot.lane.b32.xlu0 %v1939_v22, %s5308_s16  ;;  %v2289_v60 = vld [vmem:[#allocation2 + $0x142] sm:$0xff]  ;;  %v2292_v22 = vld [vmem:[#allocation2 + $0x16a] sm:$0xff] }
 0x231   :  { %v2010_v4 = vpop.permute.xlu1 %2009  ;;  %v2016_v42 = vpop.permute.xlu0 %2015 }
 0x232   :  { %2201 = vst.msk [vmem:[#allocation3 + $0x8] sm:$0xff] %vm2199_vm9, %v2010_v4  ;;  %2204 = vst.msk [vmem:[#allocation3 + $0x20] sm:$0xff] %vm2199_vm9, %v2016_v42 }
 0x233   :  { %2125 = vrot.lane.b32.xlu1 %v1938_v23, %s5308_s16  ;;  %2131 = vrot.lane.b32.xlu0 %v1941_v38, %s5308_s16  ;;  %v2291_v23 = vld [vmem:[#allocation2 + $0x15a] sm:$0xff]  ;;  %v2294_v38 = vld [vmem:[#allocation2 + $0x182] sm:$0xff] }
 0x235   :  { %v2014_v58 = vpop.permute.xlu1 %2013  ;;  %v2020_v9 = vpop.permute.xlu0 %2019 }
 0x236   :  { %2203 = vst.msk [vmem:[#allocation3 + $0x18] sm:$0xff] %vm2199_vm9, %v2014_v58  ;;  %2206 = vst.msk [vmem:[#allocation3 + $0x30] sm:$0xff] %vm2199_vm9, %v2020_v9 }
 0x237   :  { %2129 = vrot.lane.b32.xlu1 %v1940_v57, %s5308_s16  ;;  %2392 = vrot.lane.b32.xlu0 %v2264_v63, %s5309_s17  ;;  %v2293_v57 = vld [vmem:[#allocation2 + $0x172] sm:$0xff]  ;;  %v2296_v63 = vld [vmem:[#allocation2 + $0x1ca] sm:$0xff] }
 0x239   :  { %v2018_v15 = vpop.permute.xlu1 %2017  ;;  %v2024_v31 = vpop.permute.xlu0 %2023 }
 0x23a   :  { %2205 = vst.msk [vmem:[#allocation3 + $0x28] sm:$0xff] %vm2199_vm9, %v2018_v15  ;;  %2208 = vst.msk [vmem:[#allocation3 + $0x40] sm:$0xff] %vm2199_vm9, %v2024_v31  ;;  %v2298_v31 = vld [vmem:[#allocation2 + $0x1e2] sm:$0xff] }
 0x23b   :  { %2133 = vrot.lane.b32.xlu1 %v1942_v14, %s5308_s16  ;;  %2396 = vrot.lane.b32.xlu0 %v6753_v27, %s5309_s17  ;;  %v2295_v14 = vld [vmem:[#allocation2 + $0x18a] sm:$0xff] }
 0x23d   :  { %v2022_v51 = vpop.permute.xlu1 %2021  ;;  %v2028_v62 = vpop.permute.xlu0 %2027 }
 0x23e   :  { %2207 = vst.msk [vmem:[#allocation3 + $0x38] sm:$0xff] %vm2199_vm9, %v2022_v51  ;;  %2210 = vst.msk [vmem:[#allocation3 + $0x50] sm:$0xff] %vm2199_vm9, %v2028_v62  ;;  %v2297_v51 = vld [vmem:[#allocation2 + $0x1d2] sm:$0xff] }
 0x23f   :  { %2394 = vrot.lane.b32.xlu1 %v2265_v46, %s5309_s17  ;;  %2400 = vrot.lane.b32.xlu0 %v6760_v61, %s5309_s17 }
 0x241   :  { %v2026_v29 = vpop.permute.xlu1 %2025  ;;  %v2032_v50 = vpop.permute.xlu0 %2031 }
 0x242   :  { %2209 = vst.msk [vmem:[#allocation3 + $0x48] sm:$0xff] %vm2199_vm9, %v2026_v29  ;;  %2212 = vst.msk [vmem:[#allocation3 + $0x60] sm:$0xff] %vm2199_vm9, %v2032_v50  ;;  %v2300_v29 = vld [vmem:[#allocation2 + $0x1fa] sm:$0xff] }
 0x243   :  { %2398 = vrot.lane.b32.xlu1 %v6767_v19, %s5309_s17  ;;  %2404 = vrot.lane.b32.xlu0 %v6769_v49, %s5309_s17 }
 0x245   :  { %v2030_v59 = vpop.permute.xlu1 %2029  ;;  %v2036_v25 = vpop.permute.xlu0 %2035 }
 0x246   :  { %2211 = vst.msk [vmem:[#allocation3 + $0x58] sm:$0xff] %vm2199_vm9, %v2030_v59  ;;  %2214 = vst.msk [vmem:[#allocation3 + $0x70] sm:$0xff] %vm2199_vm9, %v2036_v25  ;;  %v2299_v59 = vld [vmem:[#allocation2 + $0x1ea] sm:$0xff]  ;;  %v2302_v25 = vld [vmem:[#allocation2 + $0x212] sm:$0xff] }
 0x247   :  { %2402 = vrot.lane.b32.xlu1 %v6777_v56, %s5309_s17  ;;  %2408 = vrot.lane.b32.xlu0 %v2272_v17, %s5309_s17 }
 0x249   :  { %v2034_v41 = vpop.permute.xlu1 %2033  ;;  %v2040_v7 = vpop.permute.xlu0 %2039 }
 0x24a   :  { %2213 = vst.msk [vmem:[#allocation3 + $0x68] sm:$0xff] %vm2199_vm9, %v2034_v41  ;;  %2216 = vst.msk [vmem:[#allocation3 + $0x80] sm:$0xff] %vm2199_vm9, %v2040_v7 }
 0x24b   :  { %2406 = vrot.lane.b32.xlu1 %v6784_v35, %s5309_s17  ;;  %2412 = vrot.lane.b32.xlu0 %v2274_v13, %s5309_s17  ;;  %v2301_v13 = vld [vmem:[#allocation2 + $0x202] sm:$0xff] }
 0x24d   :  { %v2038_v6 = vpop.permute.xlu1 %2037  ;;  %v2044_v1 = vpop.permute.xlu0 %2043 }
 0x24e   :  { %2215 = vst.msk [vmem:[#allocation3 + $0x78] sm:$0xff] %vm2199_vm9, %v2038_v6  ;;  %2218 = vst.msk [vmem:[#allocation3 + $0x90] sm:$0xff] %vm2199_vm9, %v2044_v1 }
 0x24f   :  { %2410 = vrot.lane.b32.xlu1 %v2273_v8, %s5309_s17  ;;  %2416 = vrot.lane.b32.xlu0 %v2276_v16, %s5309_s17  ;;  %v2304_v8 = vld [vmem:[#allocation2 + $0x22a] sm:$0xff]  ;;  %v2303_v16 = vld [vmem:[#allocation2 + $0x21a] sm:$0xff] }
 0x251   :  { %v2042_v45 = vpop.permute.xlu1 %2041  ;;  %v2048_v32 = vpop.permute.xlu0 %2047 }
 0x252   :  { %2217 = vst.msk [vmem:[#allocation3 + $0x88] sm:$0xff] %vm2199_vm9, %v2042_v45  ;;  %2220 = vst.msk [vmem:[#allocation3 + $0xa0] sm:$0xff] %vm2199_vm9, %v2048_v32 }
 0x253   :  { %2414 = vrot.lane.b32.xlu1 %v2275_v36, %s5309_s17  ;;  %2420 = vrot.lane.b32.xlu0 %v2278_v54, %s5309_s17  ;;  %v2306_v36 = vld [vmem:[#allocation2 + $0x242] sm:$0xff]  ;;  %v2305_v54 = vld [vmem:[#allocation2 + $0x232] sm:$0xff] }
 0x255   :  { %v2046_v24 = vpop.permute.xlu1 %2045  ;;  %v2052_v34 = vpop.permute.xlu0 %2051 }
 0x256   :  { %2219 = vst.msk [vmem:[#allocation3 + $0x98] sm:$0xff] %vm2199_vm9, %v2046_v24  ;;  %2222 = vst.msk [vmem:[#allocation3 + $0xb0] sm:$0xff] %vm2199_vm9, %v2052_v34 }
 0x257   :  { %2418 = vrot.lane.b32.xlu1 %v2277_v21, %s5309_s17  ;;  %2424 = vrot.lane.b32.xlu0 %v2280_v33, %s5309_s17  ;;  %v2308_v21 = vld [vmem:[#allocation2 + $0x25a] sm:$0xff]  ;;  %v2307_v33 = vld [vmem:[#allocation2 + $0x24a] sm:$0xff] }
 0x259   :  { %v2050_v43 = vpop.permute.xlu1 %2049  ;;  %v2056_v52 = vpop.permute.xlu0 %2055 }
 0x25a   :  { %2221 = vst.msk [vmem:[#allocation3 + $0xa8] sm:$0xff] %vm2199_vm9, %v2050_v43  ;;  %2224 = vst.msk [vmem:[#allocation3 + $0xc0] sm:$0xff] %vm2199_vm9, %v2056_v52 }
 0x25b   :  { %2422 = vrot.lane.b32.xlu1 %v2279_v40, %s5309_s17  ;;  %2428 = vrot.lane.b32.xlu0 %v2282_v47, %s5309_s17  ;;  %v2310_v40 = vld [vmem:[#allocation2 + $0x272] sm:$0xff]  ;;  %v2309_v47 = vld [vmem:[#allocation2 + $0x262] sm:$0xff] }
 0x25d   :  { %v2054_v3 = vpop.permute.xlu1 %2053  ;;  %v2060_v10 = vpop.permute.xlu0 %2059 }
 0x25e   :  { %2223 = vst.msk [vmem:[#allocation3 + $0xb8] sm:$0xff] %vm2199_vm9, %v2054_v3  ;;  %2226 = vst.msk [vmem:[#allocation3 + $0xd0] sm:$0xff] %vm2199_vm9, %v2060_v10 }
 0x25f   :  { %2426 = vrot.lane.b32.xlu1 %v2281_v55, %s5309_s17  ;;  %2432 = vrot.lane.b32.xlu0 %v2284_v5, %s5309_s17  ;;  %v2312_v55 = vld [vmem:[#allocation2 + $0x28a] sm:$0xff]  ;;  %v2311_v5 = vld [vmem:[#allocation2 + $0x27a] sm:$0xff] }
 0x261   :  { %v2058_v18 = vpop.permute.xlu1 %2057  ;;  %v2064_v30 = vpop.permute.xlu0 %2063 }
 0x262   :  { %2225 = vst.msk [vmem:[#allocation3 + $0xc8] sm:$0xff] %vm2199_vm9, %v2058_v18  ;;  %2228 = vst.msk [vmem:[#allocation3 + $0xe0] sm:$0xff] %vm2199_vm9, %v2064_v30 }
 0x263   :  { %2430 = vrot.lane.b32.xlu1 %v2283_v12, %s5309_s17  ;;  %2436 = vrot.lane.b32.xlu0 %v2286_v26, %s5309_s17  ;;  %v2314_v12 = vld [vmem:[#allocation2 + $0x2a2] sm:$0xff]  ;;  %v2313_v26 = vld [vmem:[#allocation2 + $0x292] sm:$0xff] }
 0x265   :  { %v2062_v28 = vpop.permute.xlu1 %2061  ;;  %v2068_v44 = vpop.permute.xlu0 %2067 }
 0x266   :  { %2227 = vst.msk [vmem:[#allocation3 + $0xd8] sm:$0xff] %vm2199_vm9, %v2062_v28  ;;  %2230 = vst.msk [vmem:[#allocation3 + $0xf0] sm:$0xff] %vm2199_vm9, %v2068_v44 }
 0x267   :  { %2434 = vrot.lane.b32.xlu1 %v2285_v39, %s5309_s17  ;;  %2440 = vrot.lane.b32.xlu0 %v2288_v37, %s5309_s17  ;;  %v2316_v39 = vld [vmem:[#allocation2 + $0x2ba] sm:$0xff]  ;;  %v2315_v37 = vld [vmem:[#allocation2 + $0x2aa] sm:$0xff] }
 0x269   :  { %v2066_v0 = vpop.permute.xlu1 %2065  ;;  %v2072_v53 = vpop.permute.xlu0 %2071 }
 0x26a   :  { %2229 = vst.msk [vmem:[#allocation3 + $0xe8] sm:$0xff] %vm2199_vm9, %v2066_v0  ;;  %2232 = vst.msk [vmem:[#allocation3 + $0x100] sm:$0xff] %vm2199_vm9, %v2072_v53 }
 0x26b   :  { %2438 = vrot.lane.b32.xlu1 %v2287_v11, %s5309_s17  ;;  %2444 = vrot.lane.b32.xlu0 %v2290_v2, %s5309_s17  ;;  %v2318_v11 = vld [vmem:[#allocation2 + $0x2d2] sm:$0xff]  ;;  %v2317_v2 = vld [vmem:[#allocation2 + $0x2c2] sm:$0xff] }
 0x26d   :  { %v2070_v48 = vpop.permute.xlu1 %2069  ;;  %v2076_v20 = vpop.permute.xlu0 %2075 }
 0x26e   :  { %2231 = vst.msk [vmem:[#allocation3 + $0xf8] sm:$0xff] %vm2199_vm9, %v2070_v48  ;;  %2234 = vst.msk [vmem:[#allocation3 + $0x110] sm:$0xff] %vm2199_vm9, %v2076_v20 }
 0x26f   :  { %2442 = vrot.lane.b32.xlu1 %v2289_v60, %s5309_s17  ;;  %2448 = vrot.lane.b32.xlu0 %v2292_v22, %s5309_s17  ;;  %v2320_v60 = vld [vmem:[#allocation2 + $0x2ea] sm:$0xff]  ;;  %v2319_v22 = vld [vmem:[#allocation2 + $0x2da] sm:$0xff] }
 0x271   :  { %v2074_v4 = vpop.permute.xlu1 %2073  ;;  %v2080_v42 = vpop.permute.xlu0 %2079 }
 0x272   :  { %2233 = vst.msk [vmem:[#allocation3 + $0x108] sm:$0xff] %vm2199_vm9, %v2074_v4  ;;  %2236 = vst.msk [vmem:[#allocation3 + $0x120] sm:$0xff] %vm2199_vm9, %v2080_v42 }
 0x273   :  { %2446 = vrot.lane.b32.xlu1 %v2291_v23, %s5309_s17  ;;  %2452 = vrot.lane.b32.xlu0 %v2294_v38, %s5309_s17  ;;  %v2322_v23 = vld [vmem:[#allocation2 + $0x302] sm:$0xff]  ;;  %v2321_v38 = vld [vmem:[#allocation2 + $0x2f2] sm:$0xff] }
 0x275   :  { %v2078_v58 = vpop.permute.xlu1 %2077  ;;  %v2084_v9 = vpop.permute.xlu0 %2083 }
 0x276   :  { %2235 = vst.msk [vmem:[#allocation3 + $0x118] sm:$0xff] %vm2199_vm9, %v2078_v58  ;;  %2238 = vst.msk [vmem:[#allocation3 + $0x130] sm:$0xff] %vm2199_vm9, %v2084_v9 }
 0x277   :  { %2450 = vrot.lane.b32.xlu1 %v2293_v57, %s5309_s17  ;;  %2456 = vrot.lane.b32.xlu0 %v2296_v63, %s5309_s17  ;;  %v2324_v57 = vld [vmem:[#allocation2 + $0x31a] sm:$0xff]  ;;  %v2323_v63 = vld [vmem:[#allocation2 + $0x30a] sm:$0xff] }
 0x279   :  { %v2082_v15 = vpop.permute.xlu1 %2081  ;;  %v2088_v46 = vpop.permute.xlu0 %2087 }
 0x27a   :  { %2237 = vst.msk [vmem:[#allocation3 + $0x128] sm:$0xff] %vm2199_vm9, %v2082_v15  ;;  %2240 = vst.msk [vmem:[#allocation3 + $0x140] sm:$0xff] %vm2199_vm9, %v2088_v46 }
 0x27b   :  { %2454 = vrot.lane.b32.xlu1 %v2295_v14, %s5309_s17  ;;  %2460 = vrot.lane.b32.xlu0 %v2298_v31, %s5309_s17  ;;  %v2326_v14 = vld [vmem:[#allocation2 + $0x332] sm:$0xff]  ;;  %v2325_v31 = vld [vmem:[#allocation2 + $0x322] sm:$0xff] }
 0x27d   :  { %v2086_v62 = vpop.permute.xlu1 %2085  ;;  %v2092_v50 = vpop.permute.xlu0 %2091 }
 0x27e   :  { %2239 = vst.msk [vmem:[#allocation3 + $0x138] sm:$0xff] %vm2199_vm9, %v2086_v62  ;;  %2242 = vst.msk [vmem:[#allocation3 + $0x150] sm:$0xff] %vm2199_vm9, %v2092_v50 }
 0x27f   :  { %2458 = vrot.lane.b32.xlu1 %v2297_v51, %s5309_s17  ;;  %2464 = vrot.lane.b32.xlu0 %v2300_v29, %s5309_s17  ;;  %v2650_v51 = vld [vmem:[#allocation2 + $0x30] sm:$0xff]  ;;  %v2327_v29 = vld [vmem:[#allocation2 + $0x33a] sm:$0xff] }
 0x281   :  { %v2090_v17 = vpop.permute.xlu1 %2089  ;;  %v2096_v41 = vpop.permute.xlu0 %2095 }
 0x282   :  { %2241 = vst.msk [vmem:[#allocation3 + $0x148] sm:$0xff] %vm2199_vm9, %v2090_v17  ;;  %2244 = vst.msk [vmem:[#allocation3 + $0x160] sm:$0xff] %vm2199_vm9, %v2096_v41 }
 0x283   :  { %2462 = vrot.lane.b32.xlu1 %v2299_v59, %s5309_s17  ;;  %2468 = vrot.lane.b32.xlu0 %v2302_v25, %s5309_s17  ;;  %v2652_v59 = vld [vmem:[#allocation2 + $0x48] sm:$0xff]  ;;  %v2651_v25 = vld [vmem:[#allocation2 + $0x38] sm:$0xff] }
 0x285   :  { %v2094_v7 = vpop.permute.xlu1 %2093  ;;  %v2100_v6 = vpop.permute.xlu0 %2099 }
 0x286   :  { %2243 = vst.msk [vmem:[#allocation3 + $0x158] sm:$0xff] %vm2199_vm9, %v2094_v7  ;;  %2246 = vst.msk [vmem:[#allocation3 + $0x170] sm:$0xff] %vm2199_vm9, %v2100_v6 }
 0x287   :  { %2466 = vrot.lane.b32.xlu1 %v2301_v13, %s5309_s17  ;;  %2472 = vrot.lane.b32.xlu0 %v2304_v8, %s5309_s17  ;;  %v2654_v13 = vld [vmem:[#allocation2 + $0x60] sm:$0xff]  ;;  %v2653_v8 = vld [vmem:[#allocation2 + $0x50] sm:$0xff] }
 0x289   :  { %v2098_v1 = vpop.permute.xlu1 %2097  ;;  %v2104_v45 = vpop.permute.xlu0 %2103 }
 0x28a   :  { %2245 = vst.msk [vmem:[#allocation3 + $0x168] sm:$0xff] %vm2199_vm9, %v2098_v1  ;;  %2248 = vst.msk [vmem:[#allocation3 + $0x180] sm:$0xff] %vm2199_vm9, %v2104_v45 }
 0x28b   :  { %2470 = vrot.lane.b32.xlu1 %v2303_v16, %s5309_s17  ;;  %2476 = vrot.lane.b32.xlu0 %v2306_v36, %s5309_s17  ;;  %v2656_v16 = vld [vmem:[#allocation2 + $0x78] sm:$0xff]  ;;  %v2655_v36 = vld [vmem:[#allocation2 + $0x68] sm:$0xff] }
 0x28d   :  { %v2102_v32 = vpop.permute.xlu1 %2101  ;;  %v2108_v24 = vpop.permute.xlu0 %2107 }
 0x28e   :  { %2247 = vst.msk [vmem:[#allocation3 + $0x178] sm:$0xff] %vm2199_vm9, %v2102_v32  ;;  %2250 = vst.msk [vmem:[#allocation3 + $0x190] sm:$0xff] %vm2199_vm9, %v2108_v24 }
 0x28f   :  { %2474 = vrot.lane.b32.xlu1 %v2305_v54, %s5309_s17  ;;  %2480 = vrot.lane.b32.xlu0 %v2308_v21, %s5309_s17  ;;  %v2658_v54 = vld [vmem:[#allocation2 + $0x90] sm:$0xff]  ;;  %v2657_v21 = vld [vmem:[#allocation2 + $0x80] sm:$0xff] }
 0x291   :  { %v2106_v34 = vpop.permute.xlu1 %2105  ;;  %v2112_v43 = vpop.permute.xlu0 %2111 }
 0x292   :  { %2249 = vst.msk [vmem:[#allocation3 + $0x188] sm:$0xff] %vm2199_vm9, %v2106_v34  ;;  %2252 = vst.msk [vmem:[#allocation3 + $0x1a0] sm:$0xff] %vm2199_vm9, %v2112_v43 }
 0x293   :  { %2478 = vrot.lane.b32.xlu1 %v2307_v33, %s5309_s17  ;;  %2484 = vrot.lane.b32.xlu0 %v2310_v40, %s5309_s17  ;;  %v2660_v33 = vld [vmem:[#allocation2 + $0xa8] sm:$0xff]  ;;  %v2659_v40 = vld [vmem:[#allocation2 + $0x98] sm:$0xff] }
 0x295   :  { %v2110_v52 = vpop.permute.xlu1 %2109  ;;  %v2116_v3 = vpop.permute.xlu0 %2115 }
 0x296   :  { %2251 = vst.msk [vmem:[#allocation3 + $0x198] sm:$0xff] %vm2199_vm9, %v2110_v52  ;;  %2254 = vst.msk [vmem:[#allocation3 + $0x1b0] sm:$0xff] %vm2199_vm9, %v2116_v3 }
 0x297   :  { %2482 = vrot.lane.b32.xlu1 %v2309_v47, %s5309_s17  ;;  %2488 = vrot.lane.b32.xlu0 %v2312_v55, %s5309_s17  ;;  %v2662_v47 = vld [vmem:[#allocation2 + $0xc0] sm:$0xff]  ;;  %v2661_v55 = vld [vmem:[#allocation2 + $0xb0] sm:$0xff] }
 0x299   :  { %v2114_v10 = vpop.permute.xlu1 %2113  ;;  %v2120_v18 = vpop.permute.xlu0 %2119 }
 0x29a   :  { %2253 = vst.msk [vmem:[#allocation3 + $0x1a8] sm:$0xff] %vm2199_vm9, %v2114_v10  ;;  %2256 = vst.msk [vmem:[#allocation3 + $0x1c0] sm:$0xff] %vm2199_vm9, %v2120_v18 }
 0x29b   :  { %2486 = vrot.lane.b32.xlu1 %v2311_v5, %s5309_s17  ;;  %2492 = vrot.lane.b32.xlu0 %v2314_v12, %s5309_s17  ;;  %v2664_v5 = vld [vmem:[#allocation2 + $0xd8] sm:$0xff]  ;;  %v2663_v12 = vld [vmem:[#allocation2 + $0xc8] sm:$0xff] }
 0x29d   :  { %v2118_v30 = vpop.permute.xlu1 %2117  ;;  %v2124_v28 = vpop.permute.xlu0 %2123 }
 0x29e   :  { %2255 = vst.msk [vmem:[#allocation3 + $0x1b8] sm:$0xff] %vm2199_vm9, %v2118_v30  ;;  %2258 = vst.msk [vmem:[#allocation3 + $0x1d0] sm:$0xff] %vm2199_vm9, %v2124_v28 }
 0x29f   :  { %2490 = vrot.lane.b32.xlu1 %v2313_v26, %s5309_s17  ;;  %2496 = vrot.lane.b32.xlu0 %v2316_v39, %s5309_s17  ;;  %v2666_v26 = vld [vmem:[#allocation2 + $0xf0] sm:$0xff]  ;;  %v2665_v39 = vld [vmem:[#allocation2 + $0xe0] sm:$0xff] }
 0x2a1   :  { %v2122_v44 = vpop.permute.xlu1 %2121  ;;  %v2128_v0 = vpop.permute.xlu0 %2127 }
 0x2a2   :  { %2257 = vst.msk [vmem:[#allocation3 + $0x1c8] sm:$0xff] %vm2199_vm9, %v2122_v44  ;;  %2260 = vst.msk [vmem:[#allocation3 + $0x1e0] sm:$0xff] %vm2199_vm9, %v2128_v0 }
 0x2a3   :  { %2494 = vrot.lane.b32.xlu1 %v2315_v37, %s5309_s17  ;;  %2500 = vrot.lane.b32.xlu0 %v2318_v11, %s5309_s17  ;;  %v2668_v37 = vld [vmem:[#allocation2 + $0x108] sm:$0xff]  ;;  %v2667_v11 = vld [vmem:[#allocation2 + $0xf8] sm:$0xff] }
 0x2a5   :  { %v2126_v53 = vpop.permute.xlu1 %2125  ;;  %v2132_v48 = vpop.permute.xlu0 %2131 }
 0x2a6   :  { %2259 = vst.msk [vmem:[#allocation3 + $0x1d8] sm:$0xff] %vm2199_vm9, %v2126_v53  ;;  %2262 = vst.msk [vmem:[#allocation3 + $0x1f0] sm:$0xff] %vm2199_vm9, %v2132_v48 }
 0x2a7   :  { %2498 = vrot.lane.b32.xlu1 %v2317_v2, %s5309_s17  ;;  %2504 = vrot.lane.b32.xlu0 %v2320_v60, %s5309_s17  ;;  %v2670_v2 = vld [vmem:[#allocation2 + $0x120] sm:$0xff]  ;;  %v2669_v60 = vld [vmem:[#allocation2 + $0x110] sm:$0xff] }
 0x2a9   :  { %v2130_v20 = vpop.permute.xlu1 %2129  ;;  %v2393_v4 = vpop.permute.xlu0 %2392 }
 0x2aa   :  { %2261 = vst.msk [vmem:[#allocation3 + $0x1e8] sm:$0xff] %vm2199_vm9, %v2130_v20 }
 0x2ab   :  { %2585 = vst.msk [vmem:[#allocation3] sm:$0xff] %vm2584_vm10, %v2393_v4  ;;  %2502 = vrot.lane.b32.xlu1 %v2319_v22, %s5309_s17  ;;  %2508 = vrot.lane.b32.xlu0 %v2322_v23, %s5309_s17  ;;  %v2672_v22 = vld [vmem:[#allocation2 + $0x138] sm:$0xff]  ;;  %v2671_v23 = vld [vmem:[#allocation2 + $0x128] sm:$0xff] }
 0x2ad   :  { %v2134_v42 = vpop.permute.xlu1 %2133  ;;  %v2397_v58 = vpop.permute.xlu0 %2396 }
 0x2ae   :  { %2263 = vst.msk [vmem:[#allocation3 + $0x1f8] sm:$0xff] %vm2199_vm9, %v2134_v42 }
 0x2af   :  { %2587 = vst.msk [vmem:[#allocation3 + $0x10] sm:$0xff] %vm2584_vm10, %v2397_v58  ;;  %2506 = vrot.lane.b32.xlu1 %v2321_v38, %s5309_s17  ;;  %2512 = vrot.lane.b32.xlu0 %v2324_v57, %s5309_s17  ;;  %v2674_v38 = vld [vmem:[#allocation2 + $0x150] sm:$0xff]  ;;  %v2673_v57 = vld [vmem:[#allocation2 + $0x140] sm:$0xff] }
 0x2b1   :  { %v2395_v9 = vpop.permute.xlu1 %2394  ;;  %v2401_v15 = vpop.permute.xlu0 %2400 }
 0x2b2   :  { %2586 = vst.msk [vmem:[#allocation3 + $0x8] sm:$0xff] %vm2584_vm10, %v2395_v9  ;;  %2589 = vst.msk [vmem:[#allocation3 + $0x20] sm:$0xff] %vm2584_vm10, %v2401_v15 }
 0x2b3   :  { %2510 = vrot.lane.b32.xlu1 %v2323_v63, %s5309_s17  ;;  %2516 = vrot.lane.b32.xlu0 %v2326_v14, %s5309_s17  ;;  %v2676_v63 = vld [vmem:[#allocation2 + $0x168] sm:$0xff]  ;;  %v2675_v14 = vld [vmem:[#allocation2 + $0x158] sm:$0xff] }
 0x2b5   :  { %v2399_v46 = vpop.permute.xlu1 %2398  ;;  %v2405_v62 = vpop.permute.xlu0 %2404 }
 0x2b6   :  { %2588 = vst.msk [vmem:[#allocation3 + $0x18] sm:$0xff] %vm2584_vm10, %v2399_v46  ;;  %2591 = vst.msk [vmem:[#allocation3 + $0x30] sm:$0xff] %vm2584_vm10, %v2405_v62 }
 0x2b7   :  { %2514 = vrot.lane.b32.xlu1 %v2325_v31, %s5309_s17  ;;  %2778 = vrot.lane.b32.xlu0 %v2650_v51, %s5310_s18  ;;  %v2678_v31 = vld [vmem:[#allocation2 + $0x180] sm:$0xff]  ;;  %v2677_v51 = vld [vmem:[#allocation2 + $0x170] sm:$0xff] }
 0x2b9   :  { %v2403_v50 = vpop.permute.xlu1 %2402  ;;  %v2409_v17 = vpop.permute.xlu0 %2408 }
 0x2ba   :  { %2590 = vst.msk [vmem:[#allocation3 + $0x28] sm:$0xff] %vm2584_vm10, %v2403_v50  ;;  %2593 = vst.msk [vmem:[#allocation3 + $0x40] sm:$0xff] %vm2584_vm10, %v2409_v17 }
 0x2bb   :  { %2518 = vrot.lane.b32.xlu1 %v2327_v29, %s5309_s17  ;;  %2782 = vrot.lane.b32.xlu0 %v2652_v59, %s5310_s18  ;;  %v2680_v29 = vld [vmem:[#allocation2 + $0x198] sm:$0xff]  ;;  %v2679_v59 = vld [vmem:[#allocation2 + $0x188] sm:$0xff] }
 0x2bd   :  { %v2407_v41 = vpop.permute.xlu1 %2406  ;;  %v2413_v7 = vpop.permute.xlu0 %2412 }
 0x2be   :  { %2592 = vst.msk [vmem:[#allocation3 + $0x38] sm:$0xff] %vm2584_vm10, %v2407_v41  ;;  %2595 = vst.msk [vmem:[#allocation3 + $0x50] sm:$0xff] %vm2584_vm10, %v2413_v7 }
 0x2bf   :  { %2780 = vrot.lane.b32.xlu1 %v2651_v25, %s5310_s18  ;;  %2786 = vrot.lane.b32.xlu0 %v2654_v13, %s5310_s18  ;;  %v2682_v25 = vld [vmem:[#allocation2 + $0x1e0] sm:$0xff] }
 0x2c0   :  { %v2681_v13 = vld [vmem:[#allocation2 + $0x1a0] sm:$0xff] }
 0x2c1   :  { %v2411_v6 = vpop.permute.xlu1 %2410  ;;  %v2417_v1 = vpop.permute.xlu0 %2416 }
 0x2c2   :  { %2594 = vst.msk [vmem:[#allocation3 + $0x48] sm:$0xff] %vm2584_vm10, %v2411_v6  ;;  %2597 = vst.msk [vmem:[#allocation3 + $0x60] sm:$0xff] %vm2584_vm10, %v2417_v1 }
 0x2c3   :  { %2784 = vrot.lane.b32.xlu1 %v2653_v8, %s5310_s18  ;;  %2790 = vrot.lane.b32.xlu0 %v2656_v16, %s5310_s18  ;;  %v2684_v8 = vld [vmem:[#allocation2 + $0x1f8] sm:$0xff]  ;;  %v2683_v16 = vld [vmem:[#allocation2 + $0x1e8] sm:$0xff] }
 0x2c5   :  { %v2415_v45 = vpop.permute.xlu1 %2414  ;;  %v2421_v32 = vpop.permute.xlu0 %2420 }
 0x2c6   :  { %2596 = vst.msk [vmem:[#allocation3 + $0x58] sm:$0xff] %vm2584_vm10, %v2415_v45  ;;  %2599 = vst.msk [vmem:[#allocation3 + $0x70] sm:$0xff] %vm2584_vm10, %v2421_v32 }
 0x2c7   :  { %2788 = vrot.lane.b32.xlu1 %v2655_v36, %s5310_s18  ;;  %2794 = vrot.lane.b32.xlu0 %v2658_v54, %s5310_s18  ;;  %v2686_v36 = vld [vmem:[#allocation2 + $0x210] sm:$0xff]  ;;  %v2685_v54 = vld [vmem:[#allocation2 + $0x200] sm:$0xff] }
 0x2c9   :  { %v2419_v24 = vpop.permute.xlu1 %2418  ;;  %v2425_v34 = vpop.permute.xlu0 %2424 }
 0x2ca   :  { %2598 = vst.msk [vmem:[#allocation3 + $0x68] sm:$0xff] %vm2584_vm10, %v2419_v24  ;;  %2601 = vst.msk [vmem:[#allocation3 + $0x80] sm:$0xff] %vm2584_vm10, %v2425_v34 }
 0x2cb   :  { %2792 = vrot.lane.b32.xlu1 %v2657_v21, %s5310_s18  ;;  %2798 = vrot.lane.b32.xlu0 %v2660_v33, %s5310_s18  ;;  %v2688_v21 = vld [vmem:[#allocation2 + $0x228] sm:$0xff]  ;;  %v2687_v33 = vld [vmem:[#allocation2 + $0x218] sm:$0xff] }
 0x2cd   :  { %v2423_v43 = vpop.permute.xlu1 %2422  ;;  %v2429_v52 = vpop.permute.xlu0 %2428 }
 0x2ce   :  { %2600 = vst.msk [vmem:[#allocation3 + $0x78] sm:$0xff] %vm2584_vm10, %v2423_v43  ;;  %2603 = vst.msk [vmem:[#allocation3 + $0x90] sm:$0xff] %vm2584_vm10, %v2429_v52 }
 0x2cf   :  { %2796 = vrot.lane.b32.xlu1 %v2659_v40, %s5310_s18  ;;  %2802 = vrot.lane.b32.xlu0 %v2662_v47, %s5310_s18  ;;  %v2690_v40 = vld [vmem:[#allocation2 + $0x240] sm:$0xff]  ;;  %v2689_v47 = vld [vmem:[#allocation2 + $0x230] sm:$0xff] }
 0x2d1   :  { %v2427_v3 = vpop.permute.xlu1 %2426  ;;  %v2433_v10 = vpop.permute.xlu0 %2432 }
 0x2d2   :  { %2602 = vst.msk [vmem:[#allocation3 + $0x88] sm:$0xff] %vm2584_vm10, %v2427_v3  ;;  %2605 = vst.msk [vmem:[#allocation3 + $0xa0] sm:$0xff] %vm2584_vm10, %v2433_v10 }
 0x2d3   :  { %2800 = vrot.lane.b32.xlu1 %v2661_v55, %s5310_s18  ;;  %2806 = vrot.lane.b32.xlu0 %v2664_v5, %s5310_s18  ;;  %v2692_v55 = vld [vmem:[#allocation2 + $0x258] sm:$0xff]  ;;  %v2691_v5 = vld [vmem:[#allocation2 + $0x248] sm:$0xff] }
 0x2d5   :  { %v2431_v18 = vpop.permute.xlu1 %2430  ;;  %v2437_v30 = vpop.permute.xlu0 %2436 }
 0x2d6   :  { %2604 = vst.msk [vmem:[#allocation3 + $0x98] sm:$0xff] %vm2584_vm10, %v2431_v18  ;;  %2607 = vst.msk [vmem:[#allocation3 + $0xb0] sm:$0xff] %vm2584_vm10, %v2437_v30  ;;  %v3869_v18 = vld [vmem:[%s7708_s3] sm:$0xff] }
 0x2d7   :  { %2804 = vrot.lane.b32.xlu1 %v2663_v12, %s5310_s18  ;;  %2810 = vrot.lane.b32.xlu0 %v2666_v26, %s5310_s18  ;;  %v2694_v12 = vld [vmem:[#allocation2 + $0x270] sm:$0xff]  ;;  %v3870_v26 = vld [vmem:[%s7708_s3 + $0x8] sm:$0xff] }
 0x2d9   :  { %v2435_v28 = vpop.permute.xlu1 %2434  ;;  %v2441_v44 = vpop.permute.xlu0 %2440 }
 0x2da   :  { %2606 = vst.msk [vmem:[#allocation3 + $0xa8] sm:$0xff] %vm2584_vm10, %v2435_v28  ;;  %2609 = vst.msk [vmem:[#allocation3 + $0xc0] sm:$0xff] %vm2584_vm10, %v2441_v44  ;;  %v2693_v28 = vld [vmem:[#allocation2 + $0x260] sm:$0xff]  ;;  %v2696_v44 = vld [vmem:[#allocation2 + $0x288] sm:$0xff] }
 0x2db   :  { %2808 = vrot.lane.b32.xlu1 %v2665_v39, %s5310_s18  ;;  %2814 = vrot.lane.b32.xlu0 %v2668_v37, %s5310_s18  ;;  %v5258_v39 = vpack.c.bf16 %v3870_v26, %v3869_v18  ;;  %v3046_v18 = vld [vmem:[#allocation2 + $0xb1] sm:$0xff] }
 0x2dd   :  { %v2439_v0 = vpop.permute.xlu1 %2438  ;;  %v2445_v53 = vpop.permute.xlu0 %2444  ;;  %5259 = vmatprep.subr.bf16.mxu0 %v5258_v39  ;;  %5274 = vmatprep.subr.bf16.mxu1 %v5258_v39 }
 0x2de   :  { %2608 = vst.msk [vmem:[#allocation3 + $0xb8] sm:$0xff] %vm2584_vm10, %v2439_v0  ;;  %2611 = vst.msk [vmem:[#allocation3 + $0xd0] sm:$0xff] %vm2584_vm10, %v2445_v53  ;;  %5261 = vmatpush3.bf16.msra.mxu0 %v5258_v39  ;;  %v3872_v0 = vld [vmem:[%s7708_s3 + $0x18] sm:$0xff]  ;;  %5279 = vmatpush3.bf16.msra.mxu1 %v5258_v39 }
 0x2df   :  { %2812 = vrot.lane.b32.xlu1 %v2667_v11, %s5310_s18  ;;  %2818 = vrot.lane.b32.xlu0 %v2670_v2, %s5310_s18  ;;  %v3871_v11 = vld [vmem:[%s7708_s3 + $0x10] sm:$0xff] }
 0x2e0   :  { %v5262_v53 = vpack.c.bf16 %v3872_v0, %v3871_v11  ;;  %v5301_v11 = vld [vmem:[#allocation2 + $0xc2] sm:$0xff] }
 0x2e1   :  { %v2443_v48 = vpop.permute.xlu1 %2442  ;;  %v2449_v20 = vpop.permute.xlu0 %2448  ;;  %v3048_v0 = vld [vmem:[#allocation2 + $0xc9] sm:$0xff] }
 0x2e2   :  { %2610 = vst.msk [vmem:[#allocation3 + $0xc8] sm:$0xff] %vm2584_vm10, %v2443_v48  ;;  %2613 = vst.msk [vmem:[#allocation3 + $0xe0] sm:$0xff] %vm2584_vm10, %v2449_v20  ;;  %5263 = vmatprep.subr.bf16.mxu0 %v5262_v53  ;;  %v3873_v20 = vld [vmem:[%s7708_s3 + $0x20] sm:$0xff]  ;;  %5275 = vmatprep.subr.bf16.mxu1 %v5262_v53 }
 0x2e3   :  { %2816 = vrot.lane.b32.xlu1 %v2669_v60, %s5310_s18  ;;  %2822 = vrot.lane.b32.xlu0 %v2672_v22, %s5310_s18  ;;  %v2695_v60 = vld [vmem:[#allocation2 + $0x278] sm:$0xff]  ;;  %v2698_v22 = vld [vmem:[#allocation2 + $0x2a0] sm:$0xff] }
 0x2e4   :  { %5265 = vmatpush3.bf16.msra.mxu0 %v5262_v53  ;;  %5280 = vmatpush3.bf16.msra.mxu1 %v5262_v53  ;;  %v3049_v53 = vld [vmem:[#allocation2 + $0xd9] sm:$0xff] }
 0x2e5   :  { %v2447_v4 = vpop.permute.xlu1 %2446  ;;  %v2453_v42 = vpop.permute.xlu0 %2452 }
 0x2e6   :  { %2612 = vst.msk [vmem:[#allocation3 + $0xd8] sm:$0xff] %vm2584_vm10, %v2447_v4  ;;  %2615 = vst.msk [vmem:[#allocation3 + $0xf0] sm:$0xff] %vm2584_vm10, %v2453_v42  ;;  %v2697_v42 = vld [vmem:[#allocation2 + $0x290] sm:$0xff] }
 0x2e7   :  { %2820 = vrot.lane.b32.xlu1 %v2671_v23, %s5310_s18  ;;  %2826 = vrot.lane.b32.xlu0 %v2674_v38, %s5310_s18  ;;  %v3874_v23 = vld [vmem:[%s7708_s3 + $0x28] sm:$0xff] }
 0x2e8   :  { %v5266_v38 = vpack.c.bf16 %v3874_v23, %v3873_v20  ;;  %v5302_v23 = vld [vmem:[#allocation2 + $0xca] sm:$0xff] }
 0x2e9   :  { %v2451_v58 = vpop.permute.xlu1 %2450  ;;  %v2457_v9 = vpop.permute.xlu0 %2456 }
 0x2ea   :  { %2614 = vst.msk [vmem:[#allocation3 + $0xe8] sm:$0xff] %vm2584_vm10, %v2451_v58  ;;  %2617 = vst.msk [vmem:[#allocation3 + $0x100] sm:$0xff] %vm2584_vm10, %v2457_v9  ;;  %5267 = vmatprep.subr.bf16.mxu0 %v5266_v38  ;;  %v3035_v58 = vld [vmem:[#allocation2 + $0x31] sm:$0xff]  ;;  %5276 = vmatprep.subr.bf16.mxu1 %v5266_v38 }
 0x2eb   :  { %2824 = vrot.lane.b32.xlu1 %v2673_v57, %s5310_s18  ;;  %2830 = vrot.lane.b32.xlu0 %v2676_v63, %s5310_s18  ;;  %v3875_v63 = vld [vmem:[%s7708_s3 + $0x30] sm:$0xff]  ;;  %v3876_v9 = vld [vmem:[%s7708_s3 + $0x38] sm:$0xff] }
 0x2ec   :  { %5269 = vmatpush3.bf16.msra.mxu0 %v5266_v38  ;;  %5281 = vmatpush3.bf16.msra.mxu1 %v5266_v38 }
 0x2ed   :  { %v2455_v15 = vpop.permute.xlu1 %2454  ;;  %v2461_v46 = vpop.permute.xlu0 %2460 }
 0x2ee   :  { %2616 = vst.msk [vmem:[#allocation3 + $0xf8] sm:$0xff] %vm2584_vm10, %v2455_v15  ;;  %2619 = vst.msk [vmem:[#allocation3 + $0x110] sm:$0xff] %vm2584_vm10, %v2461_v46  ;;  %v5270_v15 = vpack.c.bf16 %v3876_v9, %v3875_v63  ;;  %v3436_v9 = vld [vmem:[#allocation2 + $0xf2] sm:$0xff] }
 0x2ef   :  { %2828 = vrot.lane.b32.xlu1 %v2675_v14, %s5310_s18  ;;  %2834 = vrot.lane.b32.xlu0 %v2678_v31, %s5310_s18  ;;  %v2699_v31 = vld [vmem:[#allocation2 + $0x2a8] sm:$0xff] }
 0x2f0   :  { %5271 = vmatprep.subr.bf16.mxu0 %v5270_v15  ;;  %5277 = vmatprep.subr.bf16.mxu1 %v5270_v15 }
 0x2f1   :  { %v2459_v62 = vpop.permute.xlu1 %2458  ;;  %v2465_v50 = vpop.permute.xlu0 %2464  ;;  %5273 = vmatpush3.bf16.msra.mxu0 %v5270_v15  ;;  %5282 = vmatpush3.bf16.msra.mxu1 %v5270_v15  ;;  %v3052_v15 = vld [vmem:[#allocation2 + $0xf9] sm:$0xff] }
 0x2f2   :  { %2618 = vst.msk [vmem:[#allocation3 + $0x108] sm:$0xff] %vm2584_vm10, %v2459_v62  ;;  %2621 = vst.msk [vmem:[#allocation3 + $0x120] sm:$0xff] %vm2584_vm10, %v2465_v50  ;;  %v3877_v62 = vld [vmem:[%s7708_s3 + $0x40] sm:$0xff] }
 0x2f3   :  { %2832 = vrot.lane.b32.xlu1 %v2677_v51, %s5310_s18  ;;  %2838 = vrot.lane.b32.xlu0 %v2680_v29, %s5310_s18  ;;  %v3036_v29 = vld [vmem:[#allocation2 + $0x39] sm:$0xff] }
 0x2f4   :  { %5160 = vmatprep.subr.mxu0 %v3877_v62  ;;  %5278 = vmatprep.subr.mxu1 %v3877_v62 }
 0x2f5   :  { %v2463_v17 = vpop.permute.xlu1 %2462  ;;  %v2469_v41 = vpop.permute.xlu0 %2468  ;;  %5161 = vmatpush3.msra.mxu0 %v3877_v62  ;;  %5283 = vmatpush3.msra.mxu1 %v3877_v62  ;;  %v3437_v62 = vld [vmem:[#allocation2 + $0xfa] sm:$0xff] }
 0x2f6   :  { %2620 = vst.msk [vmem:[#allocation3 + $0x118] sm:$0xff] %vm2584_vm10, %v2463_v17  ;;  %2623 = vst.msk [vmem:[#allocation3 + $0x130] sm:$0xff] %vm2584_vm10, %v2469_v41  ;;  %v3038_v41 = vld [vmem:[#allocation2 + $0x51] sm:$0xff] }
 0x2f7   :  { %2836 = vrot.lane.b32.xlu1 %v2679_v59, %s5310_s18  ;;  %2842 = vrot.lane.b32.xlu0 %v2682_v25, %s5310_s18  ;;  %v3037_v59 = vld [vmem:[#allocation2 + $0x49] sm:$0xff] }
 0x2f9   :  { %v2467_v7 = vpop.permute.xlu1 %2466  ;;  %v2473_v6 = vpop.permute.xlu0 %2472 }
 0x2fa   :  { %2622 = vst.msk [vmem:[#allocation3 + $0x128] sm:$0xff] %vm2584_vm10, %v2467_v7  ;;  %2625 = vst.msk [vmem:[#allocation3 + $0x140] sm:$0xff] %vm2584_vm10, %v2473_v6  ;;  %v3039_v7 = vld [vmem:[#allocation2 + $0x61] sm:$0xff] }
 0x2fb   :  { %2840 = vrot.lane.b32.xlu1 %v2681_v13, %s5310_s18  ;;  %2846 = vrot.lane.b32.xlu0 %v2684_v8, %s5310_s18 }
 0x2fd   :  { %v2471_v1 = vpop.permute.xlu1 %2470  ;;  %v2477_v45 = vpop.permute.xlu0 %2476 }
 0x2fe   :  { %2624 = vst.msk [vmem:[#allocation3 + $0x138] sm:$0xff] %vm2584_vm10, %v2471_v1  ;;  %2627 = vst.msk [vmem:[#allocation3 + $0x150] sm:$0xff] %vm2584_vm10, %v2477_v45  ;;  %v3041_v1 = vld [vmem:[#allocation2 + $0x79] sm:$0xff] }
 0x2ff   :  { %2844 = vrot.lane.b32.xlu1 %v2683_v16, %s5310_s18  ;;  %2850 = vrot.lane.b32.xlu0 %v2686_v36, %s5310_s18 }
 0x301   :  { %v2475_v32 = vpop.permute.xlu1 %2474  ;;  %v2481_v24 = vpop.permute.xlu0 %2480 }
 0x302   :  { %2626 = vst.msk [vmem:[#allocation3 + $0x148] sm:$0xff] %vm2584_vm10, %v2475_v32  ;;  %2629 = vst.msk [vmem:[#allocation3 + $0x160] sm:$0xff] %vm2584_vm10, %v2481_v24 }
 0x303   :  { %2848 = vrot.lane.b32.xlu1 %v2685_v54, %s5310_s18  ;;  %2854 = vrot.lane.b32.xlu0 %v2688_v21, %s5310_s18  ;;  %v3043_v21 = vld [vmem:[#allocation2 + $0x91] sm:$0xff] }
 0x305   :  { %v2479_v34 = vpop.permute.xlu1 %2478  ;;  %v2485_v43 = vpop.permute.xlu0 %2484 }
 0x306   :  { %2628 = vst.msk [vmem:[#allocation3 + $0x158] sm:$0xff] %vm2584_vm10, %v2479_v34  ;;  %2631 = vst.msk [vmem:[#allocation3 + $0x170] sm:$0xff] %vm2584_vm10, %v2485_v43  ;;  %v3044_v43 = vld [vmem:[#allocation2 + $0x99] sm:$0xff] }
 0x307   :  { %2852 = vrot.lane.b32.xlu1 %v2687_v33, %s5310_s18  ;;  %2858 = vrot.lane.b32.xlu0 %v2690_v40, %s5310_s18  ;;  %v5297_v40 = vld [vmem:[#allocation2 + $0x92] sm:$0xff] }
 0x309   :  { %v2483_v52 = vpop.permute.xlu1 %2482  ;;  %v2489_v3 = vpop.permute.xlu0 %2488 }
 0x30a   :  { %2630 = vst.msk [vmem:[#allocation3 + $0x168] sm:$0xff] %vm2584_vm10, %v2483_v52  ;;  %2633 = vst.msk [vmem:[#allocation3 + $0x180] sm:$0xff] %vm2584_vm10, %v2489_v3  ;;  %v3045_v52 = vld [vmem:[#allocation2 + $0xa9] sm:$0xff] }
 0x30b   :  { %2856 = vrot.lane.b32.xlu1 %v2689_v47, %s5310_s18  ;;  %2862 = vrot.lane.b32.xlu0 %v2692_v55, %s5310_s18 }
 0x30d   :  { %v2487_v10 = vpop.permute.xlu1 %2486  ;;  %v2493_v30 = vpop.permute.xlu0 %2492 }
 0x30e   :  { %2632 = vst.msk [vmem:[#allocation3 + $0x178] sm:$0xff] %vm2584_vm10, %v2487_v10  ;;  %2635 = vst.msk [vmem:[#allocation3 + $0x190] sm:$0xff] %vm2584_vm10, %v2493_v30  ;;  %v5298_v10 = vld [vmem:[#allocation2 + $0x9a] sm:$0xff] }
 0x30f   :  { %2860 = vrot.lane.b32.xlu1 %v2691_v5, %s5310_s18  ;;  %2866 = vrot.lane.b32.xlu0 %v2694_v12, %s5310_s18  ;;  %v5299_v12 = vld [vmem:[#allocation2 + $0xaa] sm:$0xff]  ;;  %v3047_v30 = vld [vmem:[#allocation2 + $0xc1] sm:$0xff] }
 0x311   :  { %v2491_v37 = vpop.permute.xlu1 %2490  ;;  %v2497_v2 = vpop.permute.xlu0 %2496 }
 0x312   :  { %2634 = vst.msk [vmem:[#allocation3 + $0x188] sm:$0xff] %vm2584_vm10, %v2491_v37  ;;  %2637 = vst.msk [vmem:[#allocation3 + $0x1a0] sm:$0xff] %vm2584_vm10, %v2497_v2 }
 0x313   :  { %2864 = vrot.lane.b32.xlu1 %v2693_v28, %s5310_s18  ;;  %2870 = vrot.lane.b32.xlu0 %v2696_v44, %s5310_s18  ;;  %v5300_v44 = vld [vmem:[#allocation2 + $0xb2] sm:$0xff] }
 0x315   :  { %v2495_v48 = vpop.permute.xlu1 %2494  ;;  %v2501_v4 = vpop.permute.xlu0 %2500 }
 0x316   :  { %2636 = vst.msk [vmem:[#allocation3 + $0x198] sm:$0xff] %vm2584_vm10, %v2495_v48  ;;  %2639 = vst.msk [vmem:[#allocation3 + $0x1b0] sm:$0xff] %vm2584_vm10, %v2501_v4  ;;  %v3050_v4 = vld [vmem:[#allocation2 + $0xe1] sm:$0xff] }
 0x317   :  { %2868 = vrot.lane.b32.xlu1 %v2695_v60, %s5310_s18  ;;  %2874 = vrot.lane.b32.xlu0 %v2698_v22, %s5310_s18  ;;  %v3434_v22 = vld [vmem:[#allocation2 + $0xda] sm:$0xff] }
 0x319   :  { %v2499_v57 = vpop.permute.xlu1 %2498  ;;  %v2505_v14 = vpop.permute.xlu0 %2504 }
 0x31a   :  { %2638 = vst.msk [vmem:[#allocation3 + $0x1a8] sm:$0xff] %vm2584_vm10, %v2499_v57  ;;  %2641 = vst.msk [vmem:[#allocation3 + $0x1c0] sm:$0xff] %vm2584_vm10, %v2505_v14 }
 0x31b   :  { %2872 = vrot.lane.b32.xlu1 %v2697_v42, %s5310_s18  ;;  %3163 = vrot.lane.b32.xlu0 %v3035_v58, %s5311_s23  ;;  %v3051_v42 = vld [vmem:[#allocation2 + $0xf1] sm:$0xff]  ;;  %v3435_v58 = vld [vmem:[#allocation2 + $0xe2] sm:$0xff] }
 0x31d   :  { %v2503_v46 = vpop.permute.xlu1 %2502  ;;  %v2509_v51 = vpop.permute.xlu0 %2508 }
 0x31e   :  { %2640 = vst.msk [vmem:[#allocation3 + $0x1b8] sm:$0xff] %vm2584_vm10, %v2503_v46  ;;  %2643 = vst.msk [vmem:[#allocation3 + $0x1d0] sm:$0xff] %vm2584_vm10, %v2509_v51  ;;  %v3053_v46 = vld [vmem:[#allocation2 + $0x109] sm:$0xff] }
 0x31f   :  { %2876 = vrot.lane.b32.xlu1 %v2699_v31, %s5310_s18  ;;  %3548 = vrot.lane.b32.xlu0 %v6753_v27, %s5312_s12 }
 0x321   :  { %v2507_v50 = vpop.permute.xlu1 %2506  ;;  %v2513_v17 = vpop.permute.xlu0 %2512 }
 0x322   :  { %2642 = vst.msk [vmem:[#allocation3 + $0x1c8] sm:$0xff] %vm2584_vm10, %v2507_v50  ;;  %2645 = vst.msk [vmem:[#allocation3 + $0x1e0] sm:$0xff] %vm2584_vm10, %v2513_v17  ;;  %v3438_v50 = vld [vmem:[#allocation2 + $0x10a] sm:$0xff] }
 0x323   :  { %3165 = vrot.lane.b32.xlu1 %v3036_v29, %s5311_s23  ;;  %3167 = vrot.lane.b32.xlu0 %v3037_v59, %s5311_s23  ;;  %v3054_v17 = vld [vmem:[#allocation2 + $0x111] sm:$0xff] }
 0x325   :  { %v2511_v25 = vpop.permute.xlu1 %2510  ;;  %v2517_v27 = vpop.permute.xlu0 %2516 }
 0x326   :  { %2644 = vst.msk [vmem:[#allocation3 + $0x1d8] sm:$0xff] %vm2584_vm10, %v2511_v25  ;;  %2647 = vst.msk [vmem:[#allocation3 + $0x1f0] sm:$0xff] %vm2584_vm10, %v2517_v27  ;;  %v3055_v27 = vld [vmem:[#allocation2 + $0x121] sm:$0xff] }
 0x327   :  { %3550 = vrot.lane.b32.xlu1 %v6767_v19, %s5312_s12  ;;  %3552 = vrot.lane.b32.xlu0 %v6760_v61, %s5312_s12  ;;  %v3040_v61 = vld [vmem:[#allocation2 + $0x69] sm:$0xff] }
 0x329   :  { %v2515_v13 = vpop.permute.xlu1 %2514  ;;  %v2779_v8 = vpop.permute.xlu0 %2778 }
 0x32a   :  { %2646 = vst.msk [vmem:[#allocation3 + $0x1e8] sm:$0xff] %vm2584_vm10, %v2515_v13  ;;  %v3439_v13 = vld [vmem:[#allocation2 + $0x112] sm:$0xff] }
 0x32b   :  { %2971 = vst.msk [vmem:[#allocation3] sm:$0xff] %vm2970_vm11, %v2779_v8  ;;  %3169 = vrot.lane.b32.xlu1 %v3038_v41, %s5311_s23  ;;  %3171 = vrot.lane.b32.xlu0 %v3039_v7, %s5311_s23  ;;  %v3440_v8 = vld [vmem:[#allocation2 + $0x122] sm:$0xff] }
 0x32d   :  { %v2519_v6 = vpop.permute.xlu1 %2518  ;;  %v2783_v19 = vpop.permute.xlu0 %2782 }
 0x32e   :  { %2648 = vst.msk [vmem:[#allocation3 + $0x1f8] sm:$0xff] %vm2584_vm10, %v2519_v6 }
 0x32f   :  { %2973 = vst.msk [vmem:[#allocation3 + $0x10] sm:$0xff] %vm2970_vm11, %v2783_v19  ;;  %3554 = vrot.lane.b32.xlu1 %v6777_v56, %s5312_s12  ;;  %3556 = vrot.lane.b32.xlu0 %v6769_v49, %s5312_s12  ;;  %v5295_v49 = vld [vmem:[#allocation2 + $0x7a] sm:$0xff]  ;;  %v3056_v19 = vld [vmem:[#allocation2 + $0x129] sm:$0xff] }
 0x330   :  { %v3042_v56 = vld [vmem:[#allocation2 + $0x81] sm:$0xff] }
 0x331   :  { %v2781_v16 = vpop.permute.xlu1 %2780  ;;  %v2787_v36 = vpop.permute.xlu0 %2786 }
 0x332   :  { %2972 = vst.msk [vmem:[#allocation3 + $0x8] sm:$0xff] %vm2970_vm11, %v2781_v16  ;;  %2975 = vst.msk [vmem:[#allocation3 + $0x20] sm:$0xff] %vm2970_vm11, %v2787_v36  ;;  %v3057_v16 = vld [vmem:[#allocation2 + $0x139] sm:$0xff]  ;;  %v3441_v36 = vld [vmem:[#allocation2 + $0x12a] sm:$0xff] }
 0x333   :  { %3173 = vrot.lane.b32.xlu1 %v3040_v61, %s5311_s23  ;;  %3175 = vrot.lane.b32.xlu0 %v3041_v1, %s5311_s23 }
 0x335   :  { %v2785_v45 = vpop.permute.xlu1 %2784  ;;  %v2791_v54 = vpop.permute.xlu0 %2790 }
 0x336   :  { %2974 = vst.msk [vmem:[#allocation3 + $0x18] sm:$0xff] %vm2970_vm11, %v2785_v45  ;;  %2977 = vst.msk [vmem:[#allocation3 + $0x30] sm:$0xff] %vm2970_vm11, %v2791_v54  ;;  %v3442_v54 = vld [vmem:[#allocation2 + $0x13a] sm:$0xff] }
 0x337   :  { %3558 = vrot.lane.b32.xlu1 %v6784_v35, %s5312_s12  ;;  %3560 = vrot.lane.b32.xlu0 %v5295_v49, %s5312_s12  ;;  %v5296_v35 = vld [vmem:[#allocation2 + $0x82] sm:$0xff] }
 0x339   :  { %v2789_v32 = vpop.permute.xlu1 %2788  ;;  %v2795_v24 = vpop.permute.xlu0 %2794 }
 0x33a   :  { %2976 = vst.msk [vmem:[#allocation3 + $0x28] sm:$0xff] %vm2970_vm11, %v2789_v32  ;;  %2979 = vst.msk [vmem:[#allocation3 + $0x40] sm:$0xff] %vm2970_vm11, %v2795_v24 }
 0x33b   :  { %3177 = vrot.lane.b32.xlu1 %v3042_v56, %s5311_s23  ;;  %3179 = vrot.lane.b32.xlu0 %v3043_v21, %s5311_s23  ;;  %v3058_v56 = vld [vmem:[#allocation2 + $0x141] sm:$0xff] }
 0x33c   :  { %v3443_v21 = vld [vmem:[#allocation2 + $0x142] sm:$0xff] }
 0x33d   :  { %v2793_v33 = vpop.permute.xlu1 %2792  ;;  %v2799_v34 = vpop.permute.xlu0 %2798 }
 0x33e   :  { %2978 = vst.msk [vmem:[#allocation3 + $0x38] sm:$0xff] %vm2970_vm11, %v2793_v33  ;;  %2981 = vst.msk [vmem:[#allocation3 + $0x50] sm:$0xff] %vm2970_vm11, %v2799_v34  ;;  %v3067_v33 = vld [vmem:[#allocation2 + $0x1e1] sm:$0xff] }
 0x33f   :  { %3562 = vrot.lane.b32.xlu1 %v5296_v35, %s5312_s12  ;;  %3564 = vrot.lane.b32.xlu0 %v5297_v40, %s5312_s12  ;;  %v3452_v35 = vld [vmem:[#allocation2 + $0x1e2] sm:$0xff] }
 0x341   :  { %v2797_v47 = vpop.permute.xlu1 %2796  ;;  %v2803_v55 = vpop.permute.xlu0 %2802 }
 0x342   :  { %2980 = vst.msk [vmem:[#allocation3 + $0x48] sm:$0xff] %vm2970_vm11, %v2797_v47  ;;  %2983 = vst.msk [vmem:[#allocation3 + $0x60] sm:$0xff] %vm2970_vm11, %v2803_v55 }
 0x343   :  { %3181 = vrot.lane.b32.xlu1 %v3044_v43, %s5311_s23  ;;  %3183 = vrot.lane.b32.xlu0 %v3045_v52, %s5311_s23  ;;  %v3068_v43 = vld [vmem:[#allocation2 + $0x1e9] sm:$0xff] }
 0x344   :  { %v3453_v52 = vld [vmem:[#allocation2 + $0x1ea] sm:$0xff] }
 0x345   :  { %v2801_v3 = vpop.permute.xlu1 %2800  ;;  %v2807_v5 = vpop.permute.xlu0 %2806 }
 0x346   :  { %2982 = vst.msk [vmem:[#allocation3 + $0x58] sm:$0xff] %vm2970_vm11, %v2801_v3  ;;  %2985 = vst.msk [vmem:[#allocation3 + $0x70] sm:$0xff] %vm2970_vm11, %v2807_v5  ;;  %v3059_v3 = vld [vmem:[#allocation2 + $0x151] sm:$0xff] }
 0x347   :  { %3566 = vrot.lane.b32.xlu1 %v5298_v10, %s5312_s12  ;;  %3568 = vrot.lane.b32.xlu0 %v5299_v12, %s5312_s12  ;;  %v3444_v10 = vld [vmem:[#allocation2 + $0x152] sm:$0xff] }
 0x349   :  { %v2805_v26 = vpop.permute.xlu1 %2804  ;;  %v2811_v39 = vpop.permute.xlu0 %2810 }
 0x34a   :  { %2984 = vst.msk [vmem:[#allocation3 + $0x68] sm:$0xff] %vm2970_vm11, %v2805_v26  ;;  %2987 = vst.msk [vmem:[#allocation3 + $0x80] sm:$0xff] %vm2970_vm11, %v2811_v39 }
 0x34b   :  { %3185 = vrot.lane.b32.xlu1 %v3046_v18, %s5311_s23  ;;  %3187 = vrot.lane.b32.xlu0 %v3047_v30, %s5311_s23  ;;  %v3060_v18 = vld [vmem:[#allocation2 + $0x159] sm:$0xff] }
 0x34c   :  { %v3445_v30 = vld [vmem:[#allocation2 + $0x15a] sm:$0xff] }
 0x34d   :  { %v2809_v28 = vpop.permute.xlu1 %2808  ;;  %v2815_v37 = vpop.permute.xlu0 %2814 }
 0x34e   :  { %2986 = vst.msk [vmem:[#allocation3 + $0x78] sm:$0xff] %vm2970_vm11, %v2809_v28  ;;  %2989 = vst.msk [vmem:[#allocation3 + $0x90] sm:$0xff] %vm2970_vm11, %v2815_v37  ;;  %v3069_v28 = vld [vmem:[#allocation2 + $0x1f9] sm:$0xff] }
 0x34f   :  { %3570 = vrot.lane.b32.xlu1 %v5300_v44, %s5312_s12  ;;  %3572 = vrot.lane.b32.xlu0 %v5301_v11, %s5312_s12  ;;  %v3454_v44 = vld [vmem:[#allocation2 + $0x1fa] sm:$0xff] }
 0x351   :  { %v2813_v2 = vpop.permute.xlu1 %2812  ;;  %v2819_v60 = vpop.permute.xlu0 %2818 }
 0x352   :  { %2988 = vst.msk [vmem:[#allocation3 + $0x88] sm:$0xff] %vm2970_vm11, %v2813_v2  ;;  %2991 = vst.msk [vmem:[#allocation3 + $0xa0] sm:$0xff] %vm2970_vm11, %v2819_v60 }
 0x353   :  { %3189 = vrot.lane.b32.xlu1 %v3048_v0, %s5311_s23  ;;  %3191 = vrot.lane.b32.xlu0 %v3049_v53, %s5311_s23  ;;  %v3070_v0 = vld [vmem:[#allocation2 + $0x201] sm:$0xff] }
 0x354   :  { %v3455_v53 = vld [vmem:[#allocation2 + $0x202] sm:$0xff] }
 0x355   :  { %v2817_v48 = vpop.permute.xlu1 %2816  ;;  %v2823_v20 = vpop.permute.xlu0 %2822 }
 0x356   :  { %2990 = vst.msk [vmem:[#allocation3 + $0x98] sm:$0xff] %vm2970_vm11, %v2817_v48  ;;  %2993 = vst.msk [vmem:[#allocation3 + $0xb0] sm:$0xff] %vm2970_vm11, %v2823_v20  ;;  %v3061_v48 = vld [vmem:[#allocation2 + $0x169] sm:$0xff] }
 0x357   :  { %3574 = vrot.lane.b32.xlu1 %v5302_v23, %s5312_s12  ;;  %3576 = vrot.lane.b32.xlu0 %v3434_v22, %s5312_s12  ;;  %v3446_v20 = vld [vmem:[#allocation2 + $0x16a] sm:$0xff] }
 0x359   :  { %v2821_v38 = vpop.permute.xlu1 %2820  ;;  %v2827_v57 = vpop.permute.xlu0 %2826 }
 0x35a   :  { %2992 = vst.msk [vmem:[#allocation3 + $0xa8] sm:$0xff] %vm2970_vm11, %v2821_v38  ;;  %2995 = vst.msk [vmem:[#allocation3 + $0xc0] sm:$0xff] %vm2970_vm11, %v2827_v57 }
 0x35b   :  { %3193 = vrot.lane.b32.xlu1 %v3050_v4, %s5311_s23  ;;  %3195 = vrot.lane.b32.xlu0 %v3051_v42, %s5311_s23  ;;  %v3062_v4 = vld [vmem:[#allocation2 + $0x171] sm:$0xff] }
 0x35c   :  { %v3447_v42 = vld [vmem:[#allocation2 + $0x172] sm:$0xff] }
 0x35d   :  { %v2825_v63 = vpop.permute.xlu1 %2824  ;;  %v2831_v14 = vpop.permute.xlu0 %2830 }
 0x35e   :  { %2994 = vst.msk [vmem:[#allocation3 + $0xb8] sm:$0xff] %vm2970_vm11, %v2825_v63  ;;  %2997 = vst.msk [vmem:[#allocation3 + $0xd0] sm:$0xff] %vm2970_vm11, %v2831_v14  ;;  %v3071_v63 = vld [vmem:[#allocation2 + $0x211] sm:$0xff] }
 0x35f   :  { %3578 = vrot.lane.b32.xlu1 %v3435_v58, %s5312_s12  ;;  %3580 = vrot.lane.b32.xlu0 %v3436_v9, %s5312_s12  ;;  %v3456_v14 = vld [vmem:[#allocation2 + $0x212] sm:$0xff] }
 0x361   :  { %v2829_v31 = vpop.permute.xlu1 %2828  ;;  %v2835_v51 = vpop.permute.xlu0 %2834 }
 0x362   :  { %2996 = vst.msk [vmem:[#allocation3 + $0xc8] sm:$0xff] %vm2970_vm11, %v2829_v31  ;;  %2999 = vst.msk [vmem:[#allocation3 + $0xe0] sm:$0xff] %vm2970_vm11, %v2835_v51  ;;  %v3072_v31 = vld [vmem:[#allocation2 + $0x219] sm:$0xff] }
 0x363   :  { %3197 = vrot.lane.b32.xlu1 %v3052_v15, %s5311_s23  ;;  %3199 = vrot.lane.b32.xlu0 %v3053_v46, %s5311_s23 }
 0x365   :  { %v2833_v29 = vpop.permute.xlu1 %2832  ;;  %v2839_v59 = vpop.permute.xlu0 %2838 }
 0x366   :  { %2998 = vst.msk [vmem:[#allocation3 + $0xd8] sm:$0xff] %vm2970_vm11, %v2833_v29  ;;  %3001 = vst.msk [vmem:[#allocation3 + $0xf0] sm:$0xff] %vm2970_vm11, %v2839_v59  ;;  %v3063_v59 = vld [vmem:[#allocation2 + $0x181] sm:$0xff] }
 0x367   :  { %3582 = vrot.lane.b32.xlu1 %v3437_v62, %s5312_s12  ;;  %3584 = vrot.lane.b32.xlu0 %v3438_v50, %s5312_s12  ;;  %v3457_v62 = vld [vmem:[#allocation2 + $0x21a] sm:$0xff] }
 0x369   :  { %v2837_v25 = vpop.permute.xlu1 %2836  ;;  %v2843_v41 = vpop.permute.xlu0 %2842 }
 0x36a   :  { %3000 = vst.msk [vmem:[#allocation3 + $0xe8] sm:$0xff] %vm2970_vm11, %v2837_v25  ;;  %3003 = vst.msk [vmem:[#allocation3 + $0x100] sm:$0xff] %vm2970_vm11, %v2843_v41  ;;  %v3448_v25 = vld [vmem:[#allocation2 + $0x182] sm:$0xff] }
 0x36b   :  { %3201 = vrot.lane.b32.xlu1 %v3054_v17, %s5311_s23  ;;  %3203 = vrot.lane.b32.xlu0 %v3055_v27, %s5311_s23  ;;  %v3064_v41 = vld [vmem:[#allocation2 + $0x189] sm:$0xff] }
 0x36d   :  { %v2841_v7 = vpop.permute.xlu1 %2840  ;;  %v2847_v6 = vpop.permute.xlu0 %2846 }
 0x36e   :  { %3002 = vst.msk [vmem:[#allocation3 + $0xf8] sm:$0xff] %vm2970_vm11, %v2841_v7  ;;  %3005 = vst.msk [vmem:[#allocation3 + $0x110] sm:$0xff] %vm2970_vm11, %v2847_v6 }
 0x36f   :  { %3586 = vrot.lane.b32.xlu1 %v3439_v13, %s5312_s12  ;;  %3588 = vrot.lane.b32.xlu0 %v3440_v8, %s5312_s12  ;;  %v3449_v8 = vld [vmem:[#allocation2 + $0x18a] sm:$0xff] }
 0x371   :  { %v2845_v61 = vpop.permute.xlu1 %2844  ;;  %v2851_v1 = vpop.permute.xlu0 %2850 }
 0x372   :  { %3004 = vst.msk [vmem:[#allocation3 + $0x108] sm:$0xff] %vm2970_vm11, %v2845_v61  ;;  %3007 = vst.msk [vmem:[#allocation3 + $0x120] sm:$0xff] %vm2970_vm11, %v2851_v1  ;;  %v3073_v61 = vld [vmem:[#allocation2 + $0x229] sm:$0xff] }
 0x373   :  { %3205 = vrot.lane.b32.xlu1 %v3056_v19, %s5311_s23  ;;  %3207 = vrot.lane.b32.xlu0 %v3057_v16, %s5311_s23  ;;  %v3458_v1 = vld [vmem:[#allocation2 + $0x22a] sm:$0xff] }
 0x375   :  { %v2849_v45 = vpop.permute.xlu1 %2848  ;;  %v2855_v49 = vpop.permute.xlu0 %2854 }
 0x376   :  { %3006 = vst.msk [vmem:[#allocation3 + $0x118] sm:$0xff] %vm2970_vm11, %v2849_v45  ;;  %3009 = vst.msk [vmem:[#allocation3 + $0x130] sm:$0xff] %vm2970_vm11, %v2855_v49  ;;  %v3074_v45 = vld [vmem:[#allocation2 + $0x231] sm:$0xff] }
 0x377   :  { %3590 = vrot.lane.b32.xlu1 %v3441_v36, %s5312_s12  ;;  %3592 = vrot.lane.b32.xlu0 %v3442_v54, %s5312_s12 }
 0x379   :  { %v2853_v32 = vpop.permute.xlu1 %2852  ;;  %v2859_v24 = vpop.permute.xlu0 %2858 }
 0x37a   :  { %3008 = vst.msk [vmem:[#allocation3 + $0x128] sm:$0xff] %vm2970_vm11, %v2853_v32  ;;  %3011 = vst.msk [vmem:[#allocation3 + $0x140] sm:$0xff] %vm2970_vm11, %v2859_v24  ;;  %v3065_v24 = vld [vmem:[#allocation2 + $0x199] sm:$0xff] }
 0x37b   :  { %3209 = vrot.lane.b32.xlu1 %v3058_v56, %s5311_s23  ;;  %3594 = vrot.lane.b32.xlu0 %v3443_v21, %s5312_s12  ;;  %v3459_v56 = vld [vmem:[#allocation2 + $0x232] sm:$0xff] }
 0x37d   :  { %v2857_v34 = vpop.permute.xlu1 %2856  ;;  %v2863_v40 = vpop.permute.xlu0 %2862 }
 0x37e   :  { %3010 = vst.msk [vmem:[#allocation3 + $0x138] sm:$0xff] %vm2970_vm11, %v2857_v34  ;;  %3013 = vst.msk [vmem:[#allocation3 + $0x150] sm:$0xff] %vm2970_vm11, %v2863_v40  ;;  %v3450_v34 = vld [vmem:[#allocation2 + $0x19a] sm:$0xff] }
 0x37f   :  { %3227 = vrot.lane.b32.xlu1 %v3067_v33, %s5311_s23  ;;  %3612 = vrot.lane.b32.xlu0 %v3452_v35, %s5312_s12  ;;  %v3066_v40 = vld [vmem:[#allocation2 + $0x1a1] sm:$0xff] }
 0x381   :  { %v2861_v47 = vpop.permute.xlu1 %2860  ;;  %v2867_v55 = vpop.permute.xlu0 %2866 }
 0x382   :  { %3012 = vst.msk [vmem:[#allocation3 + $0x148] sm:$0xff] %vm2970_vm11, %v2861_v47  ;;  %3015 = vst.msk [vmem:[#allocation3 + $0x160] sm:$0xff] %vm2970_vm11, %v2867_v55 }
 0x383   :  { %3229 = vrot.lane.b32.xlu1 %v3068_v43, %s5311_s23  ;;  %3614 = vrot.lane.b32.xlu0 %v3453_v52, %s5312_s12  ;;  %v3451_v52 = vld [vmem:[#allocation2 + $0x1a2] sm:$0xff] }
 0x385   :  { %v2865_v5 = vpop.permute.xlu1 %2864  ;;  %v2871_v12 = vpop.permute.xlu0 %2870 }
 0x386   :  { %3014 = vst.msk [vmem:[#allocation3 + $0x158] sm:$0xff] %vm2970_vm11, %v2865_v5  ;;  %3017 = vst.msk [vmem:[#allocation3 + $0x170] sm:$0xff] %vm2970_vm11, %v2871_v12  ;;  %v3075_v5 = vld [vmem:[#allocation2 + $0x241] sm:$0xff] }
 0x387   :  { %3211 = vrot.lane.b32.xlu1 %v3059_v3, %s5311_s23  ;;  %3596 = vrot.lane.b32.xlu0 %v3444_v10, %s5312_s12  ;;  %v3460_v12 = vld [vmem:[#allocation2 + $0x242] sm:$0xff] }
 0x389   :  { %v2869_v26 = vpop.permute.xlu1 %2868  ;;  %v2875_v39 = vpop.permute.xlu0 %2874 }
 0x38a   :  { %3016 = vst.msk [vmem:[#allocation3 + $0x168] sm:$0xff] %vm2970_vm11, %v2869_v26  ;;  %3019 = vst.msk [vmem:[#allocation3 + $0x180] sm:$0xff] %vm2970_vm11, %v2875_v39  ;;  %v3076_v26 = vld [vmem:[#allocation2 + $0x249] sm:$0xff] }
 0x38b   :  { %3213 = vrot.lane.b32.xlu1 %v3060_v18, %s5311_s23  ;;  %3598 = vrot.lane.b32.xlu0 %v3445_v30, %s5312_s12 }
 0x38d   :  { %v2873_v37 = vpop.permute.xlu1 %2872  ;;  %v3164_v11 = vpop.permute.xlu0 %3163 }
 0x38e   :  { %3018 = vst.msk [vmem:[#allocation3 + $0x178] sm:$0xff] %vm2970_vm11, %v2873_v37 }
 0x38f   :  { %3356 = vst.msk [vmem:[#allocation3] sm:$0xff] %vm3355_vm12, %v3164_v11  ;;  %3231 = vrot.lane.b32.xlu1 %v3069_v28, %s5311_s23  ;;  %3616 = vrot.lane.b32.xlu0 %v3454_v44, %s5312_s12  ;;  %v3077_v28 = vld [vmem:[#allocation2 + $0x259] sm:$0xff]  ;;  %v3461_v11 = vld [vmem:[#allocation2 + $0x24a] sm:$0xff] }
 0x391   :  { %v2877_v2 = vpop.permute.xlu1 %2876  ;;  %v3549_v60 = vpop.permute.xlu0 %3548 }
 0x392   :  { %3020 = vst.msk [vmem:[#allocation3 + $0x188] sm:$0xff] %vm2970_vm11, %v2877_v2  ;;  %v3462_v2 = vld [vmem:[#allocation2 + $0x25a] sm:$0xff] }
 0x393   :  { %3741 = vst.msk [vmem:[#allocation3] sm:$0xff] %vm3740_vm13, %v3549_v60  ;;  %3233 = vrot.lane.b32.xlu1 %v3070_v0, %s5311_s23  ;;  %3618 = vrot.lane.b32.xlu0 %v3455_v53, %s5312_s12  ;;  %v3078_v60 = vld [vmem:[#allocation2 + $0x261] sm:$0xff] }
 0x395   :  { %v3166_v22 = vpop.permute.xlu1 %3165  ;;  %v3168_v23 = vpop.permute.xlu0 %3167 }
 0x396   :  { %3357 = vst.msk [vmem:[#allocation3 + $0x8] sm:$0xff] %vm3355_vm12, %v3166_v22  ;;  %3358 = vst.msk [vmem:[#allocation3 + $0x10] sm:$0xff] %vm3355_vm12, %v3168_v23 }
 0x397   :  { %3215 = vrot.lane.b32.xlu1 %v3061_v48, %s5311_s23  ;;  %3600 = vrot.lane.b32.xlu0 %v3446_v20, %s5312_s12  ;;  %v3079_v20 = vld [vmem:[#allocation2 + $0x271] sm:$0xff] }
 0x399   :  { %v3551_v38 = vpop.permute.xlu1 %3550  ;;  %v3553_v57 = vpop.permute.xlu0 %3552 }
 0x39a   :  { %3742 = vst.msk [vmem:[#allocation3 + $0x8] sm:$0xff] %vm3740_vm13, %v3551_v38  ;;  %v3805_v58 = vld [vmem:[#allocation3] sm:$0xff]  ;;  %3743 = vst.msk [vmem:[#allocation3 + $0x10] sm:$0xff] %vm3740_vm13, %v3553_v57  ;;  %v3464_v57 = vld [vmem:[#allocation2 + $0x272] sm:$0xff] }
 0x39b   :  { %3217 = vrot.lane.b32.xlu1 %v3062_v4, %s5311_s23  ;;  %5162 = vmatprep.mubr.msk.f32.mxu0 %vm3885_vm14, %v3805_v58  ;;  %v3463_v38 = vld [vmem:[#allocation2 + $0x262] sm:$0xff] }
 0x39c   :  { %3602 = vrot.lane.b32.xlu0 %v3447_v42, %s5312_s12 }
 0x39d   :  { %v3170_v9 = vpop.permute.xlu1 %3169  ;;  %v3172_v15 = vpop.permute.xlu0 %3171 }
 0x39e   :  { %3359 = vst.msk [vmem:[#allocation3 + $0x18] sm:$0xff] %vm3355_vm12, %v3170_v9  ;;  %3360 = vst.msk [vmem:[#allocation3 + $0x20] sm:$0xff] %vm3355_vm12, %v3172_v15  ;;  %v3081_v15 = vld [vmem:[#allocation2 + $0x289] sm:$0xff] }
 0x39f   :  { %3235 = vrot.lane.b32.xlu1 %v3071_v63, %s5311_s23  ;;  %v3080_v63 = vld [vmem:[#allocation2 + $0x279] sm:$0xff] }
 0x3a0   :  { %3620 = vrot.lane.b32.xlu0 %v3456_v14, %s5312_s12 }
 0x3a1   :  { %v3555_v46 = vpop.permute.xlu1 %3554  ;;  %v3806_v51 = vld [vmem:[#allocation3 + $0x8] sm:$0xff]  ;;  %v3557_v29 = vpop.permute.xlu0 %3556  ;;  %v3807_v50 = vld [vmem:[#allocation3 + $0x10] sm:$0xff] }
 0x3a2   :  { %3744 = vst.msk [vmem:[#allocation3 + $0x18] sm:$0xff] %vm3740_vm13, %v3555_v46  ;;  %5163 = vmatmul.mubr.msk.f32.vlgmr.msra.gmra.mrb[0].mxu0 %vm3885_vm14, %v3806_v51  ;;  %3745 = vst.msk [vmem:[#allocation3 + $0x20] sm:$0xff] %vm3740_vm13, %v3557_v29  ;;  %v3465_v51 = vld [vmem:[#allocation2 + $0x27a] sm:$0xff]  ;;  %v3466_v29 = vld [vmem:[#allocation2 + $0x28a] sm:$0xff] }
 0x3a3   :  { %3237 = vrot.lane.b32.xlu1 %v3072_v31, %s5311_s23  ;;  %5165 = vmatprep.mubr.msk.f32.mxu0 %vm3885_vm14, %v3807_v50 }
 0x3a4   :  { %3622 = vrot.lane.b32.xlu0 %v3457_v62, %s5312_s12 }
 0x3a5   :  { %v3174_v17 = vpop.permute.xlu1 %3173  ;;  %v3176_v27 = vpop.permute.xlu0 %3175 }
 0x3a6   :  { %3361 = vst.msk [vmem:[#allocation3 + $0x28] sm:$0xff] %vm3355_vm12, %v3174_v17  ;;  %3362 = vst.msk [vmem:[#allocation3 + $0x30] sm:$0xff] %vm3355_vm12, %v3176_v27  ;;  %v3083_v27 = vld [vmem:[#allocation2 + $0x2a1] sm:$0xff] }
 0x3a7   :  { %3219 = vrot.lane.b32.xlu1 %v3063_v59, %s5311_s23  ;;  %v3082_v59 = vld [vmem:[#allocation2 + $0x291] sm:$0xff] }
 0x3a8   :  { %3604 = vrot.lane.b32.xlu0 %v3448_v25, %s5312_s12 }
 0x3a9   :  { %v3559_v13 = vpop.permute.xlu1 %3558  ;;  %v3808_v7 = vld [vmem:[#allocation3 + $0x18] sm:$0xff]  ;;  %v3561_v6 = vpop.permute.xlu0 %3560  ;;  %v3809_v19 = vld [vmem:[#allocation3 + $0x20] sm:$0xff] }
 0x3aa   :  { %3746 = vst.msk [vmem:[#allocation3 + $0x28] sm:$0xff] %vm3740_vm13, %v3559_v13  ;;  %5166 = vmatmul.mubr.msk.f32.gmra.mrb[2].mxu0 %vm3885_vm14, %v3808_v7  ;;  %3747 = vst.msk [vmem:[#allocation3 + $0x30] sm:$0xff] %vm3740_vm13, %v3561_v6  ;;  %v3467_v7 = vld [vmem:[#allocation2 + $0x292] sm:$0xff]  ;;  %v3468_v6 = vld [vmem:[#allocation2 + $0x2a2] sm:$0xff] }
 0x3ab   :  { %3221 = vrot.lane.b32.xlu1 %v3064_v41, %s5311_s23  ;;  %5168 = vmatprep.mubr.msk.f32.mxu0 %vm3885_vm14, %v3809_v19 }
 0x3ac   :  { %3606 = vrot.lane.b32.xlu0 %v3449_v8, %s5312_s12 }
 0x3ad   :  { %v3178_v16 = vpop.permute.xlu1 %3177  ;;  %v3180_v36 = vpop.permute.xlu0 %3179 }
 0x3ae   :  { %3363 = vst.msk [vmem:[#allocation3 + $0x38] sm:$0xff] %vm3355_vm12, %v3178_v16  ;;  %3364 = vst.msk [vmem:[#allocation3 + $0x40] sm:$0xff] %vm3355_vm12, %v3180_v36  ;;  %v2700_v36 = vld [vmem:[#allocation2 + $0x2b8] sm:$0xff] }
 0x3af   :  { %3239 = vrot.lane.b32.xlu1 %v3073_v61, %s5311_s23  ;;  %v3084_v61 = vld [vmem:[#allocation2 + $0x2a9] sm:$0xff] }
 0x3b0   :  { %3624 = vrot.lane.b32.xlu0 %v3458_v1, %s5312_s12 }
 0x3b1   :  { %v3563_v54 = vpop.permute.xlu1 %3562  ;;  %v3810_v49 = vld [vmem:[#allocation3 + $0x28] sm:$0xff]  ;;  %v3565_v32 = vpop.permute.xlu0 %3564  ;;  %v3811_v21 = vld [vmem:[#allocation3 + $0x30] sm:$0xff] }
 0x3b2   :  { %3748 = vst.msk [vmem:[#allocation3 + $0x38] sm:$0xff] %vm3740_vm13, %v3563_v54  ;;  %5169 = vmatmul.mubr.msk.f32.gmra.mrb[4].mxu0 %vm3885_vm14, %v3810_v49  ;;  %3749 = vst.msk [vmem:[#allocation3 + $0x40] sm:$0xff] %vm3740_vm13, %v3565_v32  ;;  %v3469_v49 = vld [vmem:[#allocation2 + $0x2aa] sm:$0xff]  ;;  %v3085_v32 = vld [vmem:[#allocation2 + $0x2b9] sm:$0xff] }
 0x3b3   :  { %3241 = vrot.lane.b32.xlu1 %v3074_v45, %s5311_s23  ;;  %5171 = vmatprep.mubr.msk.f32.mxu0 %vm3885_vm14, %v3811_v21 }
 0x3b4   :  { %3626 = vrot.lane.b32.xlu0 %v3459_v56, %s5312_s12 }
 0x3b5   :  { %v3182_v33 = vpop.permute.xlu1 %3181  ;;  %v3184_v35 = vpop.permute.xlu0 %3183 }
 0x3b6   :  { %3365 = vst.msk [vmem:[#allocation3 + $0x48] sm:$0xff] %vm3355_vm12, %v3182_v33  ;;  %3366 = vst.msk [vmem:[#allocation3 + $0x50] sm:$0xff] %vm3355_vm12, %v3184_v35  ;;  %v3470_v35 = vld [vmem:[#allocation2 + $0x2ba] sm:$0xff] }
 0x3b7   :  { %3223 = vrot.lane.b32.xlu1 %v3065_v24, %s5311_s23  ;;  %v2701_v24 = vld [vmem:[#allocation2 + $0x2c0] sm:$0xff] }
 0x3b8   :  { %3608 = vrot.lane.b32.xlu0 %v3450_v34, %s5312_s12 }
 0x3b9   :  { %v3567_v43 = vpop.permute.xlu1 %3566  ;;  %v3812_v47 = vld [vmem:[#allocation3 + $0x38] sm:$0xff]  ;;  %v3569_v55 = vpop.permute.xlu0 %3568  ;;  %v3813_v3 = vld [vmem:[#allocation3 + $0x40] sm:$0xff] }
 0x3ba   :  { %3750 = vst.msk [vmem:[#allocation3 + $0x48] sm:$0xff] %vm3740_vm13, %v3567_v43  ;;  %5172 = vmatmul.mubr.msk.f32.gmra.mrb[6].mxu0 %vm3885_vm14, %v3812_v47  ;;  %3751 = vst.msk [vmem:[#allocation3 + $0x50] sm:$0xff] %vm3740_vm13, %v3569_v55  ;;  %v3086_v47 = vld [vmem:[#allocation2 + $0x2c1] sm:$0xff]  ;;  %v2702_v55 = vld [vmem:[#allocation2 + $0x2d0] sm:$0xff] }
 0x3bb   :  { %3225 = vrot.lane.b32.xlu1 %v3066_v40, %s5311_s23  ;;  %5174 = vmatprep.mubr.msk.f32.mxu0 %vm3885_vm14, %v3813_v3 }
 0x3bc   :  { %3610 = vrot.lane.b32.xlu0 %v3451_v52, %s5312_s12 }
 0x3bd   :  { %v3186_v10 = vpop.permute.xlu1 %3185  ;;  %v3188_v18 = vpop.permute.xlu0 %3187 }
 0x3be   :  { %3367 = vst.msk [vmem:[#allocation3 + $0x58] sm:$0xff] %vm3355_vm12, %v3186_v10  ;;  %3368 = vst.msk [vmem:[#allocation3 + $0x60] sm:$0xff] %vm3355_vm12, %v3188_v18  ;;  %v3087_v18 = vld [vmem:[#allocation2 + $0x2d1] sm:$0xff] }
 0x3bf   :  { %3243 = vrot.lane.b32.xlu1 %v3075_v5, %s5311_s23  ;;  %v3471_v5 = vld [vmem:[#allocation2 + $0x2c2] sm:$0xff] }
 0x3c0   :  { %3628 = vrot.lane.b32.xlu0 %v3460_v12, %s5312_s12 }
 0x3c1   :  { %v3571_v30 = vpop.permute.xlu1 %3570  ;;  %v3814_v39 = vld [vmem:[#allocation3 + $0x48] sm:$0xff]  ;;  %v3573_v37 = vpop.permute.xlu0 %3572  ;;  %v3815_v44 = vld [vmem:[#allocation3 + $0x50] sm:$0xff] }
 0x3c2   :  { %3752 = vst.msk [vmem:[#allocation3 + $0x58] sm:$0xff] %vm3740_vm13, %v3571_v30  ;;  %5175 = vmatmul.mubr.msk.f32.gmra.mrb[8].mxu0 %vm3885_vm14, %v3814_v39  ;;  %3753 = vst.msk [vmem:[#allocation3 + $0x60] sm:$0xff] %vm3740_vm13, %v3573_v37  ;;  %v2703_v39 = vld [vmem:[#allocation2 + $0x2d8] sm:$0xff] }
 0x3c3   :  { %3245 = vrot.lane.b32.xlu1 %v3076_v26, %s5311_s23  ;;  %5177 = vmatprep.mubr.msk.f32.mxu0 %vm3885_vm14, %v3815_v44  ;;  %v3472_v37 = vld [vmem:[#allocation2 + $0x2d2] sm:$0xff] }
 0x3c4   :  { %3247 = vrot.lane.b32.xlu0 %v3077_v28, %s5311_s23 }
 0x3c5   :  { %v3190_v0 = vpop.permute.xlu1 %3189  ;;  %v3192_v53 = vpop.permute.xlu0 %3191 }
 0x3c6   :  { %3369 = vst.msk [vmem:[#allocation3 + $0x68] sm:$0xff] %vm3355_vm12, %v3190_v0  ;;  %3370 = vst.msk [vmem:[#allocation3 + $0x70] sm:$0xff] %vm3355_vm12, %v3192_v53  ;;  %v3088_v0 = vld [vmem:[#allocation2 + $0x2d9] sm:$0xff]  ;;  %v2704_v53 = vld [vmem:[#allocation2 + $0x2e8] sm:$0xff] }
 0x3c7   :  { %3630 = vrot.lane.b32.xlu1 %v3461_v11, %s5312_s12 }
 0x3c8   :  { %3632 = vrot.lane.b32.xlu0 %v3462_v2, %s5312_s12 }
 0x3c9   :  { %v3575_v48 = vpop.permute.xlu1 %3574  ;;  %v3816_v22 = vld [vmem:[#allocation3 + $0x58] sm:$0xff]  ;;  %v3577_v23 = vpop.permute.xlu0 %3576  ;;  %v3817_v4 = vld [vmem:[#allocation3 + $0x60] sm:$0xff] }
 0x3ca   :  { %3754 = vst.msk [vmem:[#allocation3 + $0x68] sm:$0xff] %vm3740_vm13, %v3575_v48  ;;  %5178 = vmatmul.mubr.msk.f32.gmra.mrb[10].mxu0 %vm3885_vm14, %v3816_v22  ;;  %3755 = vst.msk [vmem:[#allocation3 + $0x70] sm:$0xff] %vm3740_vm13, %v3577_v23  ;;  %v3473_v22 = vld [vmem:[#allocation2 + $0x2da] sm:$0xff]  ;;  %v3089_v23 = vld [vmem:[#allocation2 + $0x2e9] sm:$0xff] }
 0x3cb   :  { %3249 = vrot.lane.b32.xlu1 %v3078_v60, %s5311_s23  ;;  %5180 = vmatprep.mubr.msk.f32.mxu0 %vm3885_vm14, %v3817_v4 }
 0x3cc   :  { %3251 = vrot.lane.b32.xlu0 %v3079_v20, %s5311_s23 }
 0x3cd   :  { %v3194_v42 = vpop.permute.xlu1 %3193  ;;  %v3196_v58 = vpop.permute.xlu0 %3195 }
 0x3ce   :  { %3371 = vst.msk [vmem:[#allocation3 + $0x78] sm:$0xff] %vm3355_vm12, %v3194_v42  ;;  %3372 = vst.msk [vmem:[#allocation3 + $0x80] sm:$0xff] %vm3355_vm12, %v3196_v58  ;;  %v2705_v42 = vld [vmem:[#allocation2 + $0x2f0] sm:$0xff] }
 0x3cf   :  { %3634 = vrot.lane.b32.xlu1 %v3463_v38, %s5312_s12  ;;  %v3474_v58 = vld [vmem:[#allocation2 + $0x2ea] sm:$0xff] }
 0x3d0   :  { %3636 = vrot.lane.b32.xlu0 %v3464_v57, %s5312_s12 }
 0x3d1   :  { %v3579_v9 = vpop.permute.xlu1 %3578  ;;  %v3818_v14 = vld [vmem:[#allocation3 + $0x68] sm:$0xff]  ;;  %v3581_v31 = vpop.permute.xlu0 %3580  ;;  %v3819_v46 = vld [vmem:[#allocation3 + $0x70] sm:$0xff] }
 0x3d2   :  { %3756 = vst.msk [vmem:[#allocation3 + $0x78] sm:$0xff] %vm3740_vm13, %v3579_v9  ;;  %5181 = vmatmul.mubr.msk.f32.gmra.mrb[12].mxu0 %vm3885_vm14, %v3818_v14  ;;  %3757 = vst.msk [vmem:[#allocation3 + $0x80] sm:$0xff] %vm3740_vm13, %v3581_v31  ;;  %v3090_v14 = vld [vmem:[#allocation2 + $0x2f1] sm:$0xff]  ;;  %v2706_v31 = vld [vmem:[#allocation2 + $0x300] sm:$0xff] }
 0x3d3   :  { %3253 = vrot.lane.b32.xlu1 %v3080_v63, %s5311_s23  ;;  %5183 = vmatprep.mubr.msk.f32.mxu0 %vm3885_vm14, %v3819_v46 }
 0x3d4   :  { %3255 = vrot.lane.b32.xlu0 %v3081_v15, %s5311_s23 }
 0x3d5   :  { %v3198_v62 = vpop.permute.xlu1 %3197  ;;  %v3200_v50 = vpop.permute.xlu0 %3199 }
 0x3d6   :  { %3373 = vst.msk [vmem:[#allocation3 + $0x88] sm:$0xff] %vm3355_vm12, %v3198_v62  ;;  %3374 = vst.msk [vmem:[#allocation3 + $0x90] sm:$0xff] %vm3355_vm12, %v3200_v50  ;;  %v3475_v62 = vld [vmem:[#allocation2 + $0x2f2] sm:$0xff]  ;;  %v3091_v50 = vld [vmem:[#allocation2 + $0x301] sm:$0xff] }
 0x3d7   :  { %3638 = vrot.lane.b32.xlu1 %v3465_v51, %s5312_s12 }
 0x3d8   :  { %3640 = vrot.lane.b32.xlu0 %v3466_v29, %s5312_s12 }
 0x3d9   :  { %v3583_v17 = vpop.permute.xlu1 %3582  ;;  %v3820_v25 = vld [vmem:[#allocation3 + $0x78] sm:$0xff]  ;;  %v3585_v41 = vpop.permute.xlu0 %3584  ;;  %v3821_v13 = vld [vmem:[#allocation3 + $0x80] sm:$0xff] }
 0x3da   :  { %3758 = vst.msk [vmem:[#allocation3 + $0x88] sm:$0xff] %vm3740_vm13, %v3583_v17  ;;  %5184 = vmatmul.mubr.msk.f32.gmra.mrb[14].mxu0 %vm3885_vm14, %v3820_v25  ;;  %3759 = vst.msk [vmem:[#allocation3 + $0x90] sm:$0xff] %vm3740_vm13, %v3585_v41  ;;  %v2707_v25 = vld [vmem:[#allocation2 + $0x308] sm:$0xff] }
 0x3db   :  { %3257 = vrot.lane.b32.xlu1 %v3082_v59, %s5311_s23  ;;  %5186 = vmatprep.mubr.msk.f32.mxu0 %vm3885_vm14, %v3821_v13  ;;  %v3476_v41 = vld [vmem:[#allocation2 + $0x302] sm:$0xff] }
 0x3dc   :  { %3259 = vrot.lane.b32.xlu0 %v3083_v27, %s5311_s23 }
 0x3dd   :  { %v3202_v8 = vpop.permute.xlu1 %3201  ;;  %v3204_v19 = vpop.permute.xlu0 %3203 }
 0x3de   :  { %3375 = vst.msk [vmem:[#allocation3 + $0x98] sm:$0xff] %vm3355_vm12, %v3202_v8  ;;  %3376 = vst.msk [vmem:[#allocation3 + $0xa0] sm:$0xff] %vm3355_vm12, %v3204_v19  ;;  %v3092_v8 = vld [vmem:[#allocation2 + $0x309] sm:$0xff]  ;;  %v2708_v19 = vld [vmem:[#allocation2 + $0x318] sm:$0xff] }
 0x3df   :  { %3642 = vrot.lane.b32.xlu1 %v3467_v7, %s5312_s12 }
 0x3e0   :  { %3644 = vrot.lane.b32.xlu0 %v3468_v6, %s5312_s12 }
 0x3e1   :  { %v3587_v16 = vpop.permute.xlu1 %3586  ;;  %v3822_v1 = vld [vmem:[#allocation3 + $0x88] sm:$0xff]  ;;  %v3589_v45 = vpop.permute.xlu0 %3588  ;;  %v3823_v54 = vld [vmem:[#allocation3 + $0x90] sm:$0xff] }
 0x3e2   :  { %3760 = vst.msk [vmem:[#allocation3 + $0x98] sm:$0xff] %vm3740_vm13, %v3587_v16  ;;  %5187 = vmatmul.mubr.msk.f32.gmra.mrb[16].mxu0 %vm3885_vm14, %v3822_v1  ;;  %3761 = vst.msk [vmem:[#allocation3 + $0xa0] sm:$0xff] %vm3740_vm13, %v3589_v45  ;;  %v3477_v1 = vld [vmem:[#allocation2 + $0x30a] sm:$0xff]  ;;  %v3093_v45 = vld [vmem:[#allocation2 + $0x319] sm:$0xff] }
 0x3e3   :  { %3261 = vrot.lane.b32.xlu1 %v3084_v61, %s5311_s23  ;;  %5189 = vmatprep.mubr.msk.f32.mxu0 %vm3885_vm14, %v3823_v54 }
 0x3e4   :  { %2878 = vrot.lane.b32.xlu0 %v2700_v36, %s5310_s18 }
 0x3e5   :  { %v3206_v56 = vpop.permute.xlu1 %3205  ;;  %v3208_v21 = vpop.permute.xlu0 %3207 }
 0x3e6   :  { %3377 = vst.msk [vmem:[#allocation3 + $0xa8] sm:$0xff] %vm3355_vm12, %v3206_v56  ;;  %3378 = vst.msk [vmem:[#allocation3 + $0xb0] sm:$0xff] %vm3355_vm12, %v3208_v21  ;;  %v2709_v56 = vld [vmem:[#allocation2 + $0x320] sm:$0xff] }
 0x3e7   :  { %3646 = vrot.lane.b32.xlu1 %v3469_v49, %s5312_s12  ;;  %v3478_v21 = vld [vmem:[#allocation2 + $0x31a] sm:$0xff] }
 0x3e8   :  { %3263 = vrot.lane.b32.xlu0 %v3085_v32, %s5311_s23 }
 0x3e9   :  { %v3591_v33 = vpop.permute.xlu1 %3590  ;;  %v3824_v34 = vld [vmem:[#allocation3 + $0x98] sm:$0xff]  ;;  %v3593_v40 = vpop.permute.xlu0 %3592  ;;  %v3825_v43 = vld [vmem:[#allocation3 + $0xa0] sm:$0xff] }
 0x3ea   :  { %3762 = vst.msk [vmem:[#allocation3 + $0xa8] sm:$0xff] %vm3740_vm13, %v3591_v33  ;;  %5190 = vmatmul.mubr.msk.f32.gmra.mrb[18].mxu0 %vm3885_vm14, %v3824_v34  ;;  %3763 = vst.msk [vmem:[#allocation3 + $0xb0] sm:$0xff] %vm3740_vm13, %v3593_v40  ;;  %v3094_v34 = vld [vmem:[#allocation2 + $0x321] sm:$0xff]  ;;  %v2710_v40 = vld [vmem:[#allocation2 + $0x330] sm:$0xff] }
 0x3eb   :  { %2880 = vrot.lane.b32.xlu1 %v2701_v24, %s5310_s18  ;;  %5192 = vmatprep.mubr.msk.f32.mxu0 %vm3885_vm14, %v3825_v43 }
 0x3ec   :  { %3648 = vrot.lane.b32.xlu0 %v3470_v35, %s5312_s12 }
 0x3ed   :  { %v3210_v52 = vpop.permute.xlu1 %3209  ;;  %v3595_v3 = vpop.permute.xlu0 %3594 }
 0x3ee   :  { %3379 = vst.msk [vmem:[#allocation3 + $0xb8] sm:$0xff] %vm3355_vm12, %v3210_v52  ;;  %v3479_v52 = vld [vmem:[#allocation2 + $0x322] sm:$0xff] }
 0x3ef   :  { %3764 = vst.msk [vmem:[#allocation3 + $0xb8] sm:$0xff] %vm3740_vm13, %v3595_v3  ;;  %3265 = vrot.lane.b32.xlu1 %v3086_v47, %s5311_s23  ;;  %v3095_v3 = vld [vmem:[#allocation2 + $0x331] sm:$0xff] }
 0x3f0   :  { %2882 = vrot.lane.b32.xlu0 %v2702_v55, %s5310_s18 }
 0x3f1   :  { %v3228_v10 = vpop.permute.xlu1 %3227  ;;  %v3826_v12 = vld [vmem:[#allocation3 + $0xa8] sm:$0xff]  ;;  %v3613_v26 = vpop.permute.xlu0 %3612  ;;  %v3827_v30 = vld [vmem:[#allocation3 + $0xb0] sm:$0xff] }
 0x3f2   :  { %3388 = vst.msk [vmem:[#allocation3 + $0x100] sm:$0xff] %vm3355_vm12, %v3228_v10  ;;  %5193 = vmatmul.mubr.msk.f32.gmra.mrb[20].mxu0 %vm3885_vm14, %v3826_v12  ;;  %v2711_v12 = vld [vmem:[#allocation2 + $0x338] sm:$0xff] }
 0x3f3   :  { %3773 = vst.msk [vmem:[#allocation3 + $0x100] sm:$0xff] %vm3740_vm13, %v3613_v26  ;;  %3650 = vrot.lane.b32.xlu1 %v3471_v5, %s5312_s12  ;;  %5195 = vmatprep.mubr.msk.f32.mxu0 %vm3885_vm14, %v3827_v30  ;;  %v3480_v26 = vld [vmem:[#allocation2 + $0x332] sm:$0xff] }
 0x3f4   :  { %3267 = vrot.lane.b32.xlu0 %v3087_v18, %s5311_s23 }
 0x3f5   :  { %v3230_v28 = vpop.permute.xlu1 %3229  ;;  %v3615_v44 = vpop.permute.xlu0 %3614 }
 0x3f6   :  { %3389 = vst.msk [vmem:[#allocation3 + $0x108] sm:$0xff] %vm3355_vm12, %v3230_v28  ;;  %v3828_v11 = vld [vmem:[#allocation3 + $0xb8] sm:$0xff] }
 0x3f7   :  { %3774 = vst.msk [vmem:[#allocation3 + $0x108] sm:$0xff] %vm3740_vm13, %v3615_v44  ;;  %2884 = vrot.lane.b32.xlu1 %v2703_v39, %s5310_s18  ;;  %5196 = vmatmul.mubr.msk.f32.gmra.mrb[22].mxu0 %vm3885_vm14, %v3828_v11  ;;  %v3096_v28 = vld [vmem:[#allocation2 + $0x339] sm:$0xff]  ;;  %v2712_v44 = vld [vmem:[#allocation2 + $0x348] sm:$0xff] }
 0x3f8   :  { %3652 = vrot.lane.b32.xlu0 %v3472_v37, %s5312_s12 }
 0x3f9   :  { %v3212_v2 = vpop.permute.xlu1 %3211  ;;  %v3597_v60 = vpop.permute.xlu0 %3596 }
 0x3fa   :  { %3380 = vst.msk [vmem:[#allocation3 + $0xc0] sm:$0xff] %vm3355_vm12, %v3212_v2  ;;  %v3837_v48 = vld [vmem:[#allocation3 + $0x100] sm:$0xff] }
 0x3fb   :  { %3765 = vst.msk [vmem:[#allocation3 + $0xc0] sm:$0xff] %vm3740_vm13, %v3597_v60  ;;  %3269 = vrot.lane.b32.xlu1 %v3088_v0, %s5311_s23  ;;  %5210 = vmatprep.mubr.msk.f32.mxu1 %vm3885_vm14, %v3837_v48  ;;  %v3481_v2 = vld [vmem:[#allocation2 + $0x33a] sm:$0xff]  ;;  %v3097_v60 = vld [vmem:[#allocation2 + $0x349] sm:$0xff] }
 0x3fc   :  { %2886 = vrot.lane.b32.xlu0 %v2704_v53, %s5310_s18 }
 0x3fd   :  { %v3214_v20 = vpop.permute.xlu1 %3213  ;;  %v3599_v4 = vpop.permute.xlu0 %3598 }
 0x3fe   :  { %3381 = vst.msk [vmem:[#allocation3 + $0xc8] sm:$0xff] %vm3355_vm12, %v3214_v20  ;;  %v3838_v38 = vld [vmem:[#allocation3 + $0x108] sm:$0xff]  ;;  %v2713_v20 = vld [vmem:[#allocation2 + $0x350] sm:$0xff] }
 0x3ff   :  { %3766 = vst.msk [vmem:[#allocation3 + $0xc8] sm:$0xff] %vm3740_vm13, %v3599_v4  ;;  %3654 = vrot.lane.b32.xlu1 %v3473_v22, %s5312_s12  ;;  %5211 = vmatmul.mubr.msk.f32.vlgmr.msra.gmra.mrb[0].mxu1 %vm3885_vm14, %v3838_v38  ;;  %v3482_v4 = vld [vmem:[#allocation2 + $0x34a] sm:$0xff] }
 0x400   :  { %3271 = vrot.lane.b32.xlu0 %v3089_v23, %s5311_s23 }
 0x401   :  { %v3232_v57 = vpop.permute.xlu1 %3231  ;;  %v3617_v63 = vpop.permute.xlu0 %3616 }
 0x402   :  { %3390 = vst.msk [vmem:[#allocation3 + $0x110] sm:$0xff] %vm3355_vm12, %v3232_v57  ;;  %v3829_v9 = vld [vmem:[#allocation3 + $0xc0] sm:$0xff]  ;;  %v3098_v57 = vld [vmem:[#allocation2 + $0x351] sm:$0xff] }
 0x403   :  { %3775 = vst.msk [vmem:[#allocation3 + $0x110] sm:$0xff] %vm3740_vm13, %v3617_v63  ;;  %2888 = vrot.lane.b32.xlu1 %v2705_v42, %s5310_s18  ;;  %5198 = vmatprep.mubr.msk.f32.mxu0 %vm3885_vm14, %v3829_v9 }
 0x404   :  { %3656 = vrot.lane.b32.xlu0 %v3474_v58, %s5312_s12 }
 0x405   :  { %v3234_v15 = vpop.permute.xlu1 %3233  ;;  %v3619_v46 = vpop.permute.xlu0 %3618 }
 0x406   :  { %3391 = vst.msk [vmem:[#allocation3 + $0x118] sm:$0xff] %vm3355_vm12, %v3234_v15  ;;  %v3830_v51 = vld [vmem:[#allocation3 + $0xc8] sm:$0xff] }
 0x407   :  { %3776 = vst.msk [vmem:[#allocation3 + $0x118] sm:$0xff] %vm3740_vm13, %v3619_v46  ;;  %3273 = vrot.lane.b32.xlu1 %v3090_v14, %s5311_s23  ;;  %5199 = vmatmul.mubr.msk.f32.gmra.mrb[24].mxu0 %vm3885_vm14, %v3830_v51  ;;  %v3483_v14 = vld [vmem:[#allocation2 + $0x352] sm:$0xff] }
 0x408   :  { %2890 = vrot.lane.b32.xlu0 %v2706_v31, %s5310_s18 }
 0x409   :  { %v3216_v29 = vpop.permute.xlu1 %3215  ;;  %v3601_v59 = vpop.permute.xlu0 %3600 }
 0x40a   :  { %3382 = vst.msk [vmem:[#allocation3 + $0xd0] sm:$0xff] %vm3355_vm12, %v3216_v29  ;;  %v3839_v17 = vld [vmem:[#allocation3 + $0x110] sm:$0xff] }
 0x40b   :  { %3767 = vst.msk [vmem:[#allocation3 + $0xd0] sm:$0xff] %vm3740_vm13, %v3601_v59  ;;  %3658 = vrot.lane.b32.xlu1 %v3475_v62, %s5312_s12  ;;  %5213 = vmatprep.mubr.msk.f32.mxu1 %vm3885_vm14, %v3839_v17 }
 0x40c   :  { %3275 = vrot.lane.b32.xlu0 %v3091_v50, %s5311_s23 }
 0x40d   :  { %v3218_v27 = vpop.permute.xlu1 %3217 }
 0x40e   :  { %3383 = vst.msk [vmem:[#allocation3 + $0xd8] sm:$0xff] %vm3355_vm12, %v3218_v27  ;;  %v3603_v13 = vpop.permute.xlu0 %3602  ;;  %v3840_v7 = vld [vmem:[#allocation3 + $0x118] sm:$0xff] }
 0x40f   :  { %3768 = vst.msk [vmem:[#allocation3 + $0xd8] sm:$0xff] %vm3740_vm13, %v3603_v13  ;;  %2892 = vrot.lane.b32.xlu1 %v2707_v25, %s5310_s18  ;;  %5214 = vmatmul.mubr.msk.f32.gmra.mrb[2].mxu1 %vm3885_vm14, %v3840_v7 }
 0x410   :  { %3660 = vrot.lane.b32.xlu0 %v3476_v41, %s5312_s12 }
 0x411   :  { %v3236_v6 = vpop.permute.xlu1 %3235 }
 0x412   :  { %3392 = vst.msk [vmem:[#allocation3 + $0x120] sm:$0xff] %vm3355_vm12, %v3236_v6  ;;  %v3621_v61 = vpop.permute.xlu0 %3620  ;;  %v3831_v16 = vld [vmem:[#allocation3 + $0xd0] sm:$0xff] }
 0x413   :  { %3777 = vst.msk [vmem:[#allocation3 + $0x120] sm:$0xff] %vm3740_vm13, %v3621_v61  ;;  %3277 = vrot.lane.b32.xlu1 %v3092_v8, %s5311_s23  ;;  %5201 = vmatprep.mubr.msk.f32.mxu0 %vm3885_vm14, %v3831_v16 }
 0x414   :  { %2894 = vrot.lane.b32.xlu0 %v2708_v19, %s5310_s18 }
 0x415   :  { %v3238_v36 = vpop.permute.xlu1 %3237 }
 0x416   :  { %3393 = vst.msk [vmem:[#allocation3 + $0x128] sm:$0xff] %vm3355_vm12, %v3238_v36  ;;  %v3623_v54 = vpop.permute.xlu0 %3622  ;;  %v3832_v49 = vld [vmem:[#allocation3 + $0xd8] sm:$0xff] }
 0x417   :  { %3778 = vst.msk [vmem:[#allocation3 + $0x128] sm:$0xff] %vm3740_vm13, %v3623_v54  ;;  %3662 = vrot.lane.b32.xlu1 %v3477_v1, %s5312_s12  ;;  %5202 = vmatmul.mubr.msk.f32.gmra.mrb[26].mxu0 %vm3885_vm14, %v3832_v49 }
 0x418   :  { %3279 = vrot.lane.b32.xlu0 %v3093_v45, %s5311_s23 }
 0x419   :  { %v3220_v32 = vpop.permute.xlu1 %3219 }
 0x41a   :  { %3384 = vst.msk [vmem:[#allocation3 + $0xe0] sm:$0xff] %vm3355_vm12, %v3220_v32  ;;  %v3605_v24 = vpop.permute.xlu0 %3604  ;;  %v3841_v33 = vld [vmem:[#allocation3 + $0x120] sm:$0xff] }
 0x41b   :  { %3769 = vst.msk [vmem:[#allocation3 + $0xe0] sm:$0xff] %vm3740_vm13, %v3605_v24  ;;  %2896 = vrot.lane.b32.xlu1 %v2709_v56, %s5310_s18  ;;  %5216 = vmatprep.mubr.msk.f32.mxu1 %vm3885_vm14, %v3841_v33 }
 0x41c   :  { %3664 = vrot.lane.b32.xlu0 %v3478_v21, %s5312_s12 }
 0x41d   :  { %v3222_v35 = vpop.permute.xlu1 %3221 }
 0x41e   :  { %3385 = vst.msk [vmem:[#allocation3 + $0xe8] sm:$0xff] %vm3355_vm12, %v3222_v35  ;;  %v3607_v43 = vpop.permute.xlu0 %3606  ;;  %v3842_v47 = vld [vmem:[#allocation3 + $0x128] sm:$0xff] }
 0x41f   :  { %3770 = vst.msk [vmem:[#allocation3 + $0xe8] sm:$0xff] %vm3740_vm13, %v3607_v43  ;;  %3281 = vrot.lane.b32.xlu1 %v3094_v34, %s5311_s23  ;;  %5217 = vmatmul.mubr.msk.f32.gmra.mrb[4].mxu1 %vm3885_vm14, %v3842_v47 }
 0x420   :  { %2898 = vrot.lane.b32.xlu0 %v2710_v40, %s5310_s18 }
 0x421   :  { %v3240_v55 = vpop.permute.xlu1 %3239 }
 0x422   :  { %3394 = vst.msk [vmem:[#allocation3 + $0x130] sm:$0xff] %vm3355_vm12, %v3240_v55  ;;  %v3625_v5 = vpop.permute.xlu0 %3624  ;;  %v3833_v10 = vld [vmem:[#allocation3 + $0xe0] sm:$0xff] }
 0x423   :  { %3779 = vst.msk [vmem:[#allocation3 + $0x130] sm:$0xff] %vm3740_vm13, %v3625_v5  ;;  %3666 = vrot.lane.b32.xlu1 %v3479_v52, %s5312_s12  ;;  %5204 = vmatprep.mubr.msk.f32.mxu0 %vm3885_vm14, %v3833_v10 }
 0x424   :  { %3283 = vrot.lane.b32.xlu0 %v3095_v3, %s5311_s23 }
 0x425   :  { %v3242_v18 = vpop.permute.xlu1 %3241 }
 0x426   :  { %3395 = vst.msk [vmem:[#allocation3 + $0x138] sm:$0xff] %vm3355_vm12, %v3242_v18  ;;  %v3627_v30 = vpop.permute.xlu0 %3626  ;;  %v3834_v39 = vld [vmem:[#allocation3 + $0xe8] sm:$0xff] }
 0x427   :  { %3780 = vst.msk [vmem:[#allocation3 + $0x138] sm:$0xff] %vm3740_vm13, %v3627_v30  ;;  %2900 = vrot.lane.b32.xlu1 %v2711_v12, %s5310_s18  ;;  %5205 = vmatmul.mubr.msk.f32.gmra.mrb[28].mxu0 %vm3885_vm14, %v3834_v39  ;;  %v7400_v39 = vld [vmem:[%s7709_s4] ss:$0 sm:$0xff] }
 0x428   :  { %3668 = vrot.lane.b32.xlu0 %v3480_v26, %s5312_s12 }
 0x429   :  { %v3224_v37 = vpop.permute.xlu1 %3223 }
 0x42a   :  { %3386 = vst.msk [vmem:[#allocation3 + $0xf0] sm:$0xff] %vm3355_vm12, %v3224_v37  ;;  %v3609_v11 = vpop.permute.xlu0 %3608  ;;  %v3843_v0 = vld [vmem:[#allocation3 + $0x130] sm:$0xff] }
 0x42b   :  { %3771 = vst.msk [vmem:[#allocation3 + $0xf0] sm:$0xff] %vm3740_vm13, %v3609_v11  ;;  %3285 = vrot.lane.b32.xlu1 %v3096_v28, %s5311_s23  ;;  %5219 = vmatprep.mubr.msk.f32.mxu1 %vm3885_vm14, %v3843_v0 }
 0x42c   :  { %2902 = vrot.lane.b32.xlu0 %v2712_v44, %s5310_s18 }
 0x42d   :  { %v3226_v53 = vpop.permute.xlu1 %3225 }
 0x42e   :  { %3387 = vst.msk [vmem:[#allocation3 + $0xf8] sm:$0xff] %vm3355_vm12, %v3226_v53  ;;  %v3611_v48 = vpop.permute.xlu0 %3610  ;;  %v3844_v22 = vld [vmem:[#allocation3 + $0x138] sm:$0xff] }
 0x42f   :  { %3772 = vst.msk [vmem:[#allocation3 + $0xf8] sm:$0xff] %vm3740_vm13, %v3611_v48  ;;  %3670 = vrot.lane.b32.xlu1 %v3481_v2, %s5312_s12  ;;  %5220 = vmatmul.mubr.msk.f32.gmra.mrb[6].mxu1 %vm3885_vm14, %v3844_v22 }
 0x430   :  { %3287 = vrot.lane.b32.xlu0 %v3097_v60, %s5311_s23 }
 0x431   :  { %v3244_v23 = vpop.permute.xlu1 %3243 }
 0x432   :  { %3396 = vst.msk [vmem:[#allocation3 + $0x140] sm:$0xff] %vm3355_vm12, %v3244_v23  ;;  %v3835_v38 = vld [vmem:[#allocation3 + $0xf0] sm:$0xff]  ;;  %v3629_v42 = vpop.permute.xlu0 %3628 }
 0x433   :  { %2904 = vrot.lane.b32.xlu1 %v2713_v20, %s5310_s18  ;;  %5207 = vmatprep.mubr.msk.f32.mxu0 %vm3885_vm14, %v3835_v38  ;;  %3781 = vst.msk [vmem:[#allocation3 + $0x140] sm:$0xff] %vm3740_vm13, %v3629_v42 }
 0x434   :  { %3672 = vrot.lane.b32.xlu0 %v3482_v4, %s5312_s12 }
 0x435   :  { %v3246_v58 = vpop.permute.xlu1 %3245 }
 0x436   :  { %3397 = vst.msk [vmem:[#allocation3 + $0x148] sm:$0xff] %vm3355_vm12, %v3246_v58  ;;  %v3836_v63 = vld [vmem:[#allocation3 + $0xf8] sm:$0xff]  ;;  %v3248_v9 = vpop.permute.xlu0 %3247 }
 0x437   :  { %3289 = vrot.lane.b32.xlu1 %v3098_v57, %s5311_s23  ;;  %5208 = vmatmul.mubr.msk.f32.gmra.mrb[30].mxu0 %vm3885_vm14, %v3836_v63  ;;  %3398 = vst.msk [vmem:[#allocation3 + $0x150] sm:$0xff] %vm3355_vm12, %v3248_v9 }
 0x439   :  { %v3631_v15 = vpop.permute.xlu1 %3630 }
 0x43a   :  { %3782 = vst.msk [vmem:[#allocation3 + $0x148] sm:$0xff] %vm3740_vm13, %v3631_v15  ;;  %v3633_v31 = vpop.permute.xlu0 %3632  ;;  %v3845_v46 = vld [vmem:[#allocation3 + $0x140] sm:$0xff] }
 0x43b   :  { %3674 = vrot.lane.b32.xlu1 %v3483_v14, %s5312_s12  ;;  %3783 = vst.msk [vmem:[#allocation3 + $0x150] sm:$0xff] %vm3740_vm13, %v3633_v31  ;;  %5222 = vmatprep.mubr.msk.f32.mxu1 %vm3885_vm14, %v3845_v46 }
 0x43d   :  { %v3250_v51 = vpop.permute.xlu1 %3249 }
 0x43e   :  { %3399 = vst.msk [vmem:[#allocation3 + $0x158] sm:$0xff] %vm3355_vm12, %v3250_v51  ;;  %v3252_v62 = vpop.permute.xlu0 %3251 }
 0x43f   :  { %3400 = vst.msk [vmem:[#allocation3 + $0x160] sm:$0xff] %vm3355_vm12, %v3252_v62 }
 0x441   :  { %v3635_v29 = vpop.permute.xlu1 %3634  ;;  %v3846_v50 = vld [vmem:[#allocation3 + $0x148] sm:$0xff] }
 0x442   :  { %3784 = vst.msk [vmem:[#allocation3 + $0x158] sm:$0xff] %vm3740_vm13, %v3635_v29  ;;  %5223 = vmatmul.mubr.msk.f32.gmra.mrb[8].mxu1 %vm3885_vm14, %v3846_v50  ;;  %v3637_v59 = vpop.permute.xlu0 %3636  ;;  %v3847_v17 = vld [vmem:[#allocation3 + $0x150] sm:$0xff] }
 0x443   :  { %3785 = vst.msk [vmem:[#allocation3 + $0x160] sm:$0xff] %vm3740_vm13, %v3637_v59  ;;  %5225 = vmatprep.mubr.msk.f32.mxu1 %vm3885_vm14, %v3847_v17 }
 0x445   :  { %v3254_v25 = vpop.permute.xlu1 %3253 }
 0x446   :  { %3401 = vst.msk [vmem:[#allocation3 + $0x168] sm:$0xff] %vm3355_vm12, %v3254_v25  ;;  %v3256_v27 = vpop.permute.xlu0 %3255 }
 0x447   :  { %3402 = vst.msk [vmem:[#allocation3 + $0x170] sm:$0xff] %vm3355_vm12, %v3256_v27 }
 0x449   :  { %v3639_v41 = vpop.permute.xlu1 %3638  ;;  %v3848_v13 = vld [vmem:[#allocation3 + $0x158] sm:$0xff] }
 0x44a   :  { %3786 = vst.msk [vmem:[#allocation3 + $0x168] sm:$0xff] %vm3740_vm13, %v3639_v41  ;;  %5226 = vmatmul.mubr.msk.f32.gmra.mrb[10].mxu1 %vm3885_vm14, %v3848_v13  ;;  %v3641_v7 = vpop.permute.xlu0 %3640  ;;  %v3849_v8 = vld [vmem:[#allocation3 + $0x160] sm:$0xff] }
 0x44b   :  { %3787 = vst.msk [vmem:[#allocation3 + $0x170] sm:$0xff] %vm3740_vm13, %v3641_v7  ;;  %5228 = vmatprep.mubr.msk.f32.mxu1 %vm3885_vm14, %v3849_v8 }
 0x44d   :  { %v3258_v6 = vpop.permute.xlu1 %3257 }
 0x44e   :  { %3403 = vst.msk [vmem:[#allocation3 + $0x178] sm:$0xff] %vm3355_vm12, %v3258_v6  ;;  %v3260_v19 = vpop.permute.xlu0 %3259 }
 0x44f   :  { %3404 = vst.msk [vmem:[#allocation3 + $0x180] sm:$0xff] %vm3355_vm12, %v3260_v19 }
 0x451   :  { %v3643_v61 = vpop.permute.xlu1 %3642  ;;  %v3850_v16 = vld [vmem:[#allocation3 + $0x168] sm:$0xff] }
 0x452   :  { %3788 = vst.msk [vmem:[#allocation3 + $0x178] sm:$0xff] %vm3740_vm13, %v3643_v61  ;;  %5229 = vmatmul.mubr.msk.f32.gmra.mrb[12].mxu1 %vm3885_vm14, %v3850_v16  ;;  %v3645_v1 = vpop.permute.xlu0 %3644  ;;  %v3851_v36 = vld [vmem:[#allocation3 + $0x170] sm:$0xff] }
 0x453   :  { %3789 = vst.msk [vmem:[#allocation3 + $0x180] sm:$0xff] %vm3740_vm13, %v3645_v1  ;;  %5231 = vmatprep.mubr.msk.f32.mxu1 %vm3885_vm14, %v3851_v36 }
 0x455   :  { %v3262_v45 = vpop.permute.xlu1 %3261 }
 0x456   :  { %3405 = vst.msk [vmem:[#allocation3 + $0x188] sm:$0xff] %vm3355_vm12, %v3262_v45  ;;  %v2879_v54 = vpop.permute.xlu0 %2878 }
 0x457   :  { %3021 = vst.msk [vmem:[#allocation3 + $0x190] sm:$0xff] %vm2970_vm11, %v2879_v54 }
 0x459   :  { %v3647_v49 = vpop.permute.xlu1 %3646  ;;  %v3852_v56 = vld [vmem:[#allocation3 + $0x178] sm:$0xff] }
 0x45a   :  { %3790 = vst.msk [vmem:[#allocation3 + $0x188] sm:$0xff] %vm3740_vm13, %v3647_v49  ;;  %5232 = vmatmul.mubr.msk.f32.gmra.mrb[14].mxu1 %vm3885_vm14, %v3852_v56  ;;  %v3264_v32 = vpop.permute.xlu0 %3263  ;;  %v3853_v21 = vld [vmem:[#allocation3 + $0x180] sm:$0xff] }
 0x45b   :  { %3406 = vst.msk [vmem:[#allocation3 + $0x190] sm:$0xff] %vm3355_vm12, %v3264_v32  ;;  %5234 = vmatprep.mubr.msk.f32.mxu1 %vm3885_vm14, %v3853_v21 }
 0x45d   :  { %v2881_v24 = vpop.permute.xlu1 %2880 }
 0x45e   :  { %3022 = vst.msk [vmem:[#allocation3 + $0x198] sm:$0xff] %vm2970_vm11, %v2881_v24  ;;  %v3649_v33 = vpop.permute.xlu0 %3648 }
 0x45f   :  { %3791 = vst.msk [vmem:[#allocation3 + $0x190] sm:$0xff] %vm3740_vm13, %v3649_v33 }
 0x461   :  { %v3266_v34 = vpop.permute.xlu1 %3265  ;;  %v3854_v35 = vld [vmem:[#allocation3 + $0x188] sm:$0xff] }
 0x462   :  { %3407 = vst.msk [vmem:[#allocation3 + $0x198] sm:$0xff] %vm3355_vm12, %v3266_v34  ;;  %5235 = vmatmul.mubr.msk.f32.gmra.mrb[16].mxu1 %vm3885_vm14, %v3854_v35  ;;  %v2883_v40 = vpop.permute.xlu0 %2882 }
 0x463   :  { %3023 = vst.msk [vmem:[#allocation3 + $0x1a0] sm:$0xff] %vm2970_vm11, %v2883_v40 }
 0x465   :  { %v3651_v43 = vpop.permute.xlu1 %3650 }
 0x466   :  { %3792 = vst.msk [vmem:[#allocation3 + $0x198] sm:$0xff] %vm3740_vm13, %v3651_v43  ;;  %v3268_v47 = vpop.permute.xlu0 %3267  ;;  %v3855_v52 = vld [vmem:[#allocation3 + $0x190] sm:$0xff] }
 0x467   :  { %3408 = vst.msk [vmem:[#allocation3 + $0x1a0] sm:$0xff] %vm3355_vm12, %v3268_v47  ;;  %5237 = vmatprep.mubr.msk.f32.mxu1 %vm3885_vm14, %v3855_v52 }
 0x469   :  { %v2885_v55 = vpop.permute.xlu1 %2884 }
 0x46a   :  { %3024 = vst.msk [vmem:[#allocation3 + $0x1a8] sm:$0xff] %vm2970_vm11, %v2885_v55  ;;  %v3653_v3 = vpop.permute.xlu0 %3652 }
 0x46b   :  { %3793 = vst.msk [vmem:[#allocation3 + $0x1a0] sm:$0xff] %vm3740_vm13, %v3653_v3 }
 0x46d   :  { %v3270_v5 = vpop.permute.xlu1 %3269  ;;  %v3856_v10 = vld [vmem:[#allocation3 + $0x198] sm:$0xff] }
 0x46e   :  { %3409 = vst.msk [vmem:[#allocation3 + $0x1a8] sm:$0xff] %vm3355_vm12, %v3270_v5  ;;  %5238 = vmatmul.mubr.msk.f32.gmra.mrb[18].mxu1 %vm3885_vm14, %v3856_v10  ;;  %v2887_v12 = vpop.permute.xlu0 %2886 }
 0x46f   :  { %3025 = vst.msk [vmem:[#allocation3 + $0x1b0] sm:$0xff] %vm2970_vm11, %v2887_v12 }
 0x471   :  { %v3655_v18 = vpop.permute.xlu1 %3654 }
 0x472   :  { %3794 = vst.msk [vmem:[#allocation3 + $0x1a8] sm:$0xff] %vm3740_vm13, %v3655_v18  ;;  %v3272_v26 = vpop.permute.xlu0 %3271  ;;  %v3857_v30 = vld [vmem:[#allocation3 + $0x1a0] sm:$0xff] }
 0x473   :  { %3410 = vst.msk [vmem:[#allocation3 + $0x1b0] sm:$0xff] %vm3355_vm12, %v3272_v26  ;;  %5240 = vmatprep.mubr.msk.f32.mxu1 %vm3885_vm14, %v3857_v30 }
 0x475   :  { %v5164_v28 = vpop.f32.mrb[0].mxu0  ;;  %v2889_v37 = vpop.permute.xlu1 %2888 }
 0x476   :  { %v4150_v44 = vadd.f32 %v5164_v28, %v7400_v39  ;;  %3026 = vst.msk [vmem:[#allocation3 + $0x1b8] sm:$0xff] %vm2970_vm11, %v2889_v37  ;;  %v4144_v11 = vpop.f32.mrb[1].mxu0  ;;  %v3657_v0 = vpop.permute.xlu0 %3656 }
 0x477   :  { %v4145_v2 = vadd.f32 %v7400_v39, %v4144_v11  ;;  %3795 = vst.msk [vmem:[#allocation3 + $0x1b0] sm:$0xff] %vm3740_vm13, %v3657_v0 }
 0x478   :  { %v4465_v53 = vsel %vm24_vm0, %v4150_v44, 0.0  ;;  %v4600_v60 = vmul.f32 %v4150_v44, %v4150_v44 }
 0x479   :  { %v4464_v48 = vsel %vm24_vm0, %v4145_v2, 0.0  ;;  %v4599_v22 = vmul.f32 %v4145_v2, %v4145_v2  ;;  %4797 = vxpose.xlu0.b32.start [1/16] (narrow) %v4145_v2, 8  ;;  %v3274_v20 = vpop.permute.xlu1 %3273  ;;  %v3858_v23 = vld [vmem:[#allocation3 + $0x1a8] sm:$0xff] }
 0x47a   :  { %v4664_v4 = vsel %vm24_vm0, %v4600_v60, 0.0  ;;  %v4466_v38 = vadd.f32 %v4465_v53, %v4464_v48  ;;  %3411 = vst.msk [vmem:[#allocation3 + $0x1b8] sm:$0xff] %vm3355_vm12, %v3274_v20  ;;  %5241 = vmatmul.mubr.msk.f32.gmra.mrb[20].mxu1 %vm3885_vm14, %v3858_v23  ;;  %v2891_v42 = vpop.permute.xlu0 %2890 }
 0x47b   :  { %v4663_v57 = vsel %vm24_vm0, %v4599_v22, 0.0  ;;  %3027 = vst.msk [vmem:[#allocation3 + $0x1c0] sm:$0xff] %vm2970_vm11, %v2891_v42 }
 0x47c   :  { %v4665_v58 = vadd.f32 %v4664_v4, %v4663_v57 }
 0x47d   :  { %4798 = vxpose.xlu0.b32.cont [2/16] (narrow) %v4150_v44, 8  ;;  %v3659_v63 = vpop.permute.xlu1 %3658  ;;  %v5167_v9 = vpop.f32.mrb[2].mxu0 }
 0x47e   :  { %3796 = vst.msk [vmem:[#allocation3 + $0x1b8] sm:$0xff] %vm3740_vm13, %v3659_v63  ;;  %v4160_v14 = vadd.f32 %v5167_v9, %v7400_v39  ;;  %v4154_v15 = vpop.f32.mrb[3].mxu0  ;;  %v3276_v31 = vpop.permute.xlu0 %3275  ;;  %v3859_v46 = vld [vmem:[#allocation3 + $0x1b0] sm:$0xff] }
 0x47f   :  { %v4155_v51 = vadd.f32 %v7400_v39, %v4154_v15  ;;  %3412 = vst.msk [vmem:[#allocation3 + $0x1c0] sm:$0xff] %vm3355_vm12, %v3276_v31  ;;  %5243 = vmatprep.mubr.msk.f32.mxu1 %vm3885_vm14, %v3859_v46 }
 0x480   :  { %v4602_v62 = vmul.f32 %v4160_v14, %v4160_v14  ;;  %v4469_v27 = vsel %vm24_vm0, %v4160_v14, 0.0 }
 0x481   :  { %v4467_v29 = vsel %vm24_vm0, %v4155_v51, 0.0  ;;  %v4601_v50 = vmul.f32 %v4155_v51, %v4155_v51  ;;  %v2893_v59 = vpop.permute.xlu1 %2892  ;;  %4799 = vxpose.xlu0.b32.cont [3/16] (narrow) %v4155_v51, 8 }
 0x482   :  { %v4468_v17 = vadd.f32 %v4467_v29, %v4466_v38  ;;  %3028 = vst.msk [vmem:[#allocation3 + $0x1c8] sm:$0xff] %vm2970_vm11, %v2893_v59  ;;  %v3661_v25 = vpop.permute.xlu0 %3660  ;;  %v4668_v8 = vsel %vm24_vm0, %v4602_v62, 0.0 }
 0x483   :  { %v4666_v41 = vsel %vm24_vm0, %v4601_v50, 0.0  ;;  %3797 = vst.msk [vmem:[#allocation3 + $0x1c0] sm:$0xff] %vm3740_vm13, %v3661_v25 }
 0x484   :  { %v4667_v13 = vadd.f32 %v4666_v41, %v4665_v58  ;;  %v4470_v7 = vadd.f32 %v4469_v27, %v4468_v17 }
 0x485   :  { %v3278_v6 = vpop.permute.xlu1 %3277  ;;  %v5170_v19 = vpop.f32.mrb[4].mxu0  ;;  %4800 = vxpose.xlu0.b32.cont [4/16] (narrow) %v4160_v14, 8  ;;  %v3860_v61 = vld [vmem:[#allocation3 + $0x1b8] sm:$0xff] }
 0x486   :  { %3413 = vst.msk [vmem:[#allocation3 + $0x1c8] sm:$0xff] %vm3355_vm12, %v3278_v6  ;;  %v4170_v16 = vadd.f32 %v5170_v19, %v7400_v39  ;;  %v4164_v1 = vpop.f32.mrb[5].mxu0  ;;  %v4669_v36 = vadd.f32 %v4668_v8, %v4667_v13  ;;  %5244 = vmatmul.mubr.msk.f32.gmra.mrb[22].mxu1 %vm3885_vm14, %v3860_v61  ;;  %v2895_v45 = vpop.permute.xlu0 %2894 }
 0x487   :  { %v4165_v54 = vadd.f32 %v7400_v39, %v4164_v1  ;;  %3029 = vst.msk [vmem:[#allocation3 + $0x1d0] sm:$0xff] %vm2970_vm11, %v2895_v45 }
 0x488   :  { %v4604_v49 = vmul.f32 %v4170_v16, %v4170_v16  ;;  %v4473_v35 = vsel %vm24_vm0, %v4170_v16, 0.0 }
 0x489   :  { %v4471_v56 = vsel %vm24_vm0, %v4165_v54, 0.0  ;;  %v4603_v32 = vmul.f32 %v4165_v54, %v4165_v54  ;;  %v3663_v21 = vpop.permute.xlu1 %3662  ;;  %4801 = vxpose.xlu0.b32.cont [5/16] (narrow) %v4165_v54, 8 }
 0x48a   :  { %v4472_v24 = vadd.f32 %v4471_v56, %v4470_v7  ;;  %3798 = vst.msk [vmem:[#allocation3 + $0x1c8] sm:$0xff] %vm3740_vm13, %v3663_v21  ;;  %v3280_v33 = vpop.permute.xlu0 %3279  ;;  %v3861_v34 = vld [vmem:[#allocation3 + $0x1c0] sm:$0xff]  ;;  %v4672_v52 = vsel %vm24_vm0, %v4604_v49, 0.0 }
 0x48b   :  { %v4670_v40 = vsel %vm24_vm0, %v4603_v32, 0.0  ;;  %3414 = vst.msk [vmem:[#allocation3 + $0x1d0] sm:$0xff] %vm3355_vm12, %v3280_v33  ;;  %5246 = vmatprep.mubr.msk.f32.mxu1 %vm3885_vm14, %v3861_v34 }
 0x48c   :  { %v4671_v43 = vadd.f32 %v4670_v40, %v4669_v36  ;;  %v4474_v47 = vadd.f32 %v4473_v35, %v4472_v24 }
 0x48d   :  { %v2897_v55 = vpop.permute.xlu1 %2896  ;;  %v5173_v3 = vpop.f32.mrb[6].mxu0  ;;  %4802 = vxpose.xlu0.b32.cont [6/16] (narrow) %v4170_v16, 8 }
 0x48e   :  { %3030 = vst.msk [vmem:[#allocation3 + $0x1d8] sm:$0xff] %vm2970_vm11, %v2897_v55  ;;  %v4180_v5 = vadd.f32 %v5173_v3, %v7400_v39  ;;  %v4174_v10 = vpop.f32.mrb[7].mxu0  ;;  %v4673_v12 = vadd.f32 %v4672_v52, %v4671_v43  ;;  %v3665_v18 = vpop.permute.xlu0 %3664 }
 0x48f   :  { %v4175_v26 = vadd.f32 %v7400_v39, %v4174_v10  ;;  %3799 = vst.msk [vmem:[#allocation3 + $0x1d0] sm:$0xff] %vm3740_vm13, %v3665_v18 }
 0x490   :  { %v4606_v30 = vmul.f32 %v4180_v5, %v4180_v5  ;;  %v4477_v53 = vsel %vm24_vm0, %v4180_v5, 0.0 }
 0x491   :  { %v4475_v28 = vsel %vm24_vm0, %v4175_v26, 0.0  ;;  %v4605_v37 = vmul.f32 %v4175_v26, %v4175_v26  ;;  %v3282_v44 = vpop.permute.xlu1 %3281  ;;  %4803 = vxpose.xlu0.b32.cont [7/16] (narrow) %v4175_v26, 8  ;;  %v3862_v11 = vld [vmem:[#allocation3 + $0x1c8] sm:$0xff] }
 0x492   :  { %v4476_v0 = vadd.f32 %v4475_v28, %v4474_v47  ;;  %3415 = vst.msk [vmem:[#allocation3 + $0x1d8] sm:$0xff] %vm3355_vm12, %v3282_v44  ;;  %5247 = vmatmul.mubr.msk.f32.gmra.mrb[24].mxu1 %vm3885_vm14, %v3862_v11  ;;  %v2899_v2 = vpop.permute.xlu0 %2898  ;;  %v4676_v20 = vsel %vm24_vm0, %v4606_v30, 0.0 }
 0x493   :  { %v4674_v60 = vsel %vm24_vm0, %v4605_v37, 0.0  ;;  %3031 = vst.msk [vmem:[#allocation3 + $0x1e0] sm:$0xff] %vm2970_vm11, %v2899_v2 }
 0x494   :  { %v4675_v48 = vadd.f32 %v4674_v60, %v4673_v12  ;;  %v4478_v22 = vadd.f32 %v4477_v53, %v4476_v0 }
 0x495   :  { %v3667_v23 = vpop.permute.xlu1 %3666  ;;  %v5176_v4 = vpop.f32.mrb[8].mxu0  ;;  %4804 = vxpose.xlu0.b32.cont [8/16] (narrow) %v4180_v5, 8 }
 0x496   :  { %3800 = vst.msk [vmem:[#allocation3 + $0x1d8] sm:$0xff] %vm3740_vm13, %v3667_v23  ;;  %v4190_v38 = vadd.f32 %v5176_v4, %v7400_v39  ;;  %v4184_v42 = vpop.f32.mrb[9].mxu0  ;;  %v4677_v57 = vadd.f32 %v4676_v20, %v4675_v48  ;;  %v3284_v58 = vpop.permute.xlu0 %3283  ;;  %v3863_v63 = vld [vmem:[#allocation3 + $0x1d0] sm:$0xff] }
 0x497   :  { %v4185_v9 = vadd.f32 %v7400_v39, %v4184_v42  ;;  %3416 = vst.msk [vmem:[#allocation3 + $0x1e0] sm:$0xff] %vm3355_vm12, %v3284_v58  ;;  %5249 = vmatprep.mubr.msk.f32.mxu1 %vm3885_vm14, %v3863_v63 }
 0x498   :  { %v4608_v14 = vmul.f32 %v4190_v38, %v4190_v38  ;;  %v4481_v29 = vsel %vm24_vm0, %v4190_v38, 0.0 }
 0x499   :  { %v4479_v15 = vsel %vm24_vm0, %v4185_v9, 0.0  ;;  %v4607_v31 = vmul.f32 %v4185_v9, %v4185_v9  ;;  %v2901_v46 = vpop.permute.xlu1 %2900  ;;  %4805 = vxpose.xlu0.b32.cont [9/16] (narrow) %v4185_v9, 8 }
 0x49a   :  { %v4480_v51 = vadd.f32 %v4479_v15, %v4478_v22  ;;  %3032 = vst.msk [vmem:[#allocation3 + $0x1e8] sm:$0xff] %vm2970_vm11, %v2901_v46  ;;  %v3669_v62 = vpop.permute.xlu0 %3668  ;;  %v4680_v25 = vsel %vm24_vm0, %v4608_v14, 0.0 }
 0x49b   :  { %v4678_v50 = vsel %vm24_vm0, %v4607_v31, 0.0  ;;  %3801 = vst.msk [vmem:[#allocation3 + $0x1e0] sm:$0xff] %vm3740_vm13, %v3669_v62 }
 0x49c   :  { %v4679_v59 = vadd.f32 %v4678_v50, %v4677_v57  ;;  %v4482_v17 = vadd.f32 %v4481_v29, %v4480_v51 }
 0x49d   :  { %v3286_v27 = vpop.permute.xlu1 %3285  ;;  %v5179_v41 = vpop.f32.mrb[10].mxu0  ;;  %4806 = vxpose.xlu0.b32.cont [10/16] (narrow) %v4190_v38, 8  ;;  %v3864_v13 = vld [vmem:[#allocation3 + $0x1d8] sm:$0xff] }
 0x49e   :  { %3417 = vst.msk [vmem:[#allocation3 + $0x1e8] sm:$0xff] %vm3355_vm12, %v3286_v27  ;;  %v4200_v7 = vadd.f32 %v5179_v41, %v7400_v39  ;;  %v4194_v8 = vpop.f32.mrb[11].mxu0  ;;  %v4681_v6 = vadd.f32 %v4680_v25, %v4679_v59  ;;  %5250 = vmatmul.mubr.msk.f32.gmra.mrb[26].mxu1 %vm3885_vm14, %v3864_v13  ;;  %v2903_v19 = vpop.permute.xlu0 %2902 }
 0x49f   :  { %v4195_v61 = vadd.f32 %v7400_v39, %v4194_v8  ;;  %3033 = vst.msk [vmem:[#allocation3 + $0x1f0] sm:$0xff] %vm2970_vm11, %v2903_v19 }
 0x4a0   :  { %v4610_v16 = vmul.f32 %v4200_v7, %v4200_v7  ;;  %v4485_v32 = vsel %vm24_vm0, %v4200_v7, 0.0 }
 0x4a1   :  { %v4483_v1 = vsel %vm24_vm0, %v4195_v61, 0.0  ;;  %v4609_v36 = vmul.f32 %v4195_v61, %v4195_v61  ;;  %v3671_v45 = vpop.permute.xlu1 %3670  ;;  %4807 = vxpose.xlu0.b32.cont [11/16] (narrow) %v4195_v61, 8 }
 0x4a2   :  { %v4484_v54 = vadd.f32 %v4483_v1, %v4482_v17  ;;  %3802 = vst.msk [vmem:[#allocation3 + $0x1e8] sm:$0xff] %vm3740_vm13, %v3671_v45  ;;  %v3288_v49 = vpop.permute.xlu0 %3287  ;;  %v3865_v56 = vld [vmem:[#allocation3 + $0x1e0] sm:$0xff]  ;;  %v4684_v34 = vsel %vm24_vm0, %v4610_v16, 0.0 }
 0x4a3   :  { %v4682_v21 = vsel %vm24_vm0, %v4609_v36, 0.0  ;;  %3418 = vst.msk [vmem:[#allocation3 + $0x1f0] sm:$0xff] %vm3355_vm12, %v3288_v49  ;;  %5252 = vmatprep.mubr.msk.f32.mxu1 %vm3885_vm14, %v3865_v56 }
 0x4a4   :  { %v4683_v24 = vadd.f32 %v4682_v21, %v4681_v6  ;;  %v4486_v33 = vadd.f32 %v4485_v32, %v4484_v54 }
 0x4a5   :  { %v2905_v35 = vpop.permute.xlu1 %2904  ;;  %v5182_v40 = vpop.f32.mrb[12].mxu0  ;;  %4808 = vxpose.xlu0.b32.cont [12/16] (narrow) %v4200_v7, 8 }
 0x4a6   :  { %3034 = vst.msk [vmem:[#allocation3 + $0x1f8] sm:$0xff] %vm2970_vm11, %v2905_v35  ;;  %v4210_v43 = vadd.f32 %v5182_v40, %v7400_v39  ;;  %v4204_v47 = vpop.f32.mrb[13].mxu0  ;;  %v4685_v52 = vadd.f32 %v4684_v34, %v4683_v24  ;;  %v3673_v55 = vpop.permute.xlu0 %3672 }
 0x4a7   :  { %v4205_v3 = vadd.f32 %v7400_v39, %v4204_v47  ;;  %3803 = vst.msk [vmem:[#allocation3 + $0x1f0] sm:$0xff] %vm3740_vm13, %v3673_v55 }
 0x4a8   :  { %v4612_v5 = vmul.f32 %v4210_v43, %v4210_v43  ;;  %v4489_v28 = vsel %vm24_vm0, %v4210_v43, 0.0 }
 0x4a9   :  { %v4487_v10 = vsel %vm24_vm0, %v4205_v3, 0.0  ;;  %v4611_v12 = vmul.f32 %v4205_v3, %v4205_v3  ;;  %v3290_v18 = vpop.permute.xlu1 %3289  ;;  %4809 = vxpose.xlu0.b32.cont [13/16] (narrow) %v4205_v3, 8  ;;  %v3866_v26 = vld [vmem:[#allocation3 + $0x1e8] sm:$0xff] }
 0x4aa   :  { %v4488_v30 = vadd.f32 %v4487_v10, %v4486_v33  ;;  %3419 = vst.msk [vmem:[#allocation3 + $0x1f8] sm:$0xff] %vm3355_vm12, %v3290_v18  ;;  %5253 = vmatmul.mubr.msk.f32.gmra.mrb[28].mxu1 %vm3885_vm14, %v3866_v26  ;;  %v4688_v0 = vsel %vm24_vm0, %v4612_v5, 0.0 }
 0x4ab   :  { %v4686_v37 = vsel %vm24_vm0, %v4611_v12, 0.0 }
 0x4ac   :  { %v4687_v44 = vadd.f32 %v4686_v37, %v4685_v52  ;;  %v4490_v11 = vadd.f32 %v4489_v28, %v4488_v30 }
 0x4ad   :  { %v3675_v2 = vpop.permute.xlu1 %3674  ;;  %v5185_v53 = vpop.f32.mrb[14].mxu0  ;;  %4810 = vxpose.xlu0.b32.cont [14/16] (narrow) %v4210_v43, 8 }
 0x4ae   :  { %3804 = vst.msk [vmem:[#allocation3 + $0x1f8] sm:$0xff] %vm3740_vm13, %v3675_v2  ;;  %v4220_v60 = vadd.f32 %v5185_v53, %v7400_v39  ;;  %v4214_v48 = vpop.f32.mrb[15].mxu0  ;;  %v4689_v22 = vadd.f32 %v4688_v0, %v4687_v44  ;;  %v3867_v20 = vld [vmem:[#allocation3 + $0x1f0] sm:$0xff] }
 0x4af   :  { %v4215_v23 = vadd.f32 %v7400_v39, %v4214_v48  ;;  %5255 = vmatprep.mubr.msk.f32.mxu1 %vm3885_vm14, %v3867_v20 }
 0x4b0   :  { %v4614_v4 = vmul.f32 %v4220_v60, %v4220_v60  ;;  %v4493_v58 = vsel %vm24_vm0, %v4220_v60, 0.0 }
 0x4b1   :  { %v4491_v38 = vsel %vm24_vm0, %v4215_v23, 0.0  ;;  %v4613_v42 = vmul.f32 %v4215_v23, %v4215_v23  ;;  %4811 = vxpose.xlu0.b32.cont [15/16] (narrow) %v4215_v23, 8 }
 0x4b2   :  { %v4492_v57 = vadd.f32 %v4491_v38, %v4490_v11  ;;  %v4692_v15 = vsel %vm24_vm0, %v4614_v4, 0.0 }
 0x4b3   :  { %v4690_v63 = vsel %vm24_vm0, %v4613_v42, 0.0 }
 0x4b4   :  { %v4691_v9 = vadd.f32 %v4690_v63, %v4689_v22  ;;  %v4494_v14 = vadd.f32 %v4493_v58, %v4492_v57 }
 0x4b5   :  { %v5188_v31 = vpop.f32.mrb[16].mxu0  ;;  %4812 = vxpose.xlu0.b32.end [16/16] (narrow) %v4220_v60, 8  ;;  %v3868_v46 = vld [vmem:[#allocation3 + $0x1f8] sm:$0xff] }
 0x4b6   :  { %v4230_v51 = vadd.f32 %v5188_v31, %v7400_v39  ;;  %v4224_v62 = vpop.f32.mrb[17].mxu0  ;;  %v4693_v29 = vadd.f32 %v4692_v15, %v4691_v9  ;;  %5256 = vmatmul.mubr.msk.f32.gmra.mrb[30].mxu1 %vm3885_vm14, %v3868_v46 }
 0x4b7   :  { %v4225_v50 = vadd.f32 %v7400_v39, %v4224_v62 }
 0x4b8   :  { %v4616_v59 = vmul.f32 %v4230_v51, %v4230_v51  ;;  %v4497_v41 = vsel %vm24_vm0, %v4230_v51, 0.0 }
 0x4b9   :  { %v4495_v17 = vsel %vm24_vm0, %v4225_v50, 0.0  ;;  %v4615_v25 = vmul.f32 %v4225_v50, %v4225_v50  ;;  %4829 = vxpose.xlu1.b32.start [1/16] (narrow) %v4225_v50, 8 }
 0x4ba   :  { %v4496_v27 = vadd.f32 %v4495_v17, %v4494_v14  ;;  %v4696_v6 = vsel %vm24_vm0, %v4616_v59, 0.0 }
 0x4bb   :  { %v4694_v13 = vsel %vm24_vm0, %v4615_v25, 0.0 }
 0x4bc   :  { %v4695_v7 = vadd.f32 %v4694_v13, %v4693_v29  ;;  %v4498_v8 = vadd.f32 %v4497_v41, %v4496_v27 }
 0x4bd   :  { %v5191_v19 = vpop.f32.mrb[18].mxu0  ;;  %4830 = vxpose.xlu1.b32.cont [2/16] (narrow) %v4230_v51, 8 }
 0x4be   :  { %v4240_v61 = vadd.f32 %v5191_v19, %v7400_v39  ;;  %v4234_v16 = vpop.f32.mrb[19].mxu0  ;;  %v4697_v1 = vadd.f32 %v4696_v6, %v4695_v7 }
 0x4bf   :  { %v4235_v36 = vadd.f32 %v7400_v39, %v4234_v16 }
 0x4c0   :  { %v4618_v45 = vmul.f32 %v4240_v61, %v4240_v61  ;;  %v4501_v32 = vsel %vm24_vm0, %v4240_v61, 0.0 }
 0x4c1   :  { %v4499_v54 = vsel %vm24_vm0, %v4235_v36, 0.0  ;;  %v4617_v49 = vmul.f32 %v4235_v36, %v4235_v36  ;;  %4831 = vxpose.xlu1.b32.cont [3/16] (narrow) %v4235_v36, 8 }
 0x4c2   :  { %v4500_v56 = vadd.f32 %v4499_v54, %v4498_v8  ;;  %v4700_v34 = vsel %vm24_vm0, %v4618_v45, 0.0 }
 0x4c3   :  { %v4698_v21 = vsel %vm24_vm0, %v4617_v49, 0.0 }
 0x4c4   :  { %v4699_v24 = vadd.f32 %v4698_v21, %v4697_v1  ;;  %v4502_v33 = vadd.f32 %v4501_v32, %v4500_v56 }
 0x4c5   :  { %v5194_v35 = vpop.f32.mrb[20].mxu0  ;;  %4832 = vxpose.xlu1.b32.cont [4/16] (narrow) %v4240_v61, 8 }
 0x4c6   :  { %v4250_v40 = vadd.f32 %v5194_v35, %v7400_v39  ;;  %v4244_v43 = vpop.f32.mrb[21].mxu0  ;;  %v4701_v47 = vadd.f32 %v4700_v34, %v4699_v24 }
 0x4c7   :  { %v4245_v52 = vadd.f32 %v7400_v39, %v4244_v43 }
 0x4c8   :  { %v4620_v55 = vmul.f32 %v4250_v40, %v4250_v40  ;;  %v4505_v18 = vsel %vm24_vm0, %v4250_v40, 0.0 }
 0x4c9   :  { %v4503_v3 = vsel %vm24_vm0, %v4245_v52, 0.0  ;;  %v4619_v5 = vmul.f32 %v4245_v52, %v4245_v52  ;;  %4833 = vxpose.xlu1.b32.cont [5/16] (narrow) %v4245_v52, 8 }
 0x4ca   :  { %v4504_v10 = vadd.f32 %v4503_v3, %v4502_v33  ;;  %v5197_v12 = vpop.f32.mrb[22].mxu0  ;;  %v4704_v0 = vsel %vm24_vm0, %v4620_v55, 0.0 }
 0x4cb   :  { %v4702_v26 = vsel %vm24_vm0, %v4619_v5, 0.0  ;;  %v4260_v30 = vadd.f32 %v5197_v12, %v7400_v39  ;;  %v4254_v28 = vpop.f32.mrb[23].mxu0 }
 0x4cc   :  { %v4703_v37 = vadd.f32 %v4702_v26, %v4701_v47  ;;  %v4255_v44 = vadd.f32 %v7400_v39, %v4254_v28  ;;  %v4506_v11 = vadd.f32 %v4505_v18, %v4504_v10 }
 0x4cd   :  { %v4622_v2 = vmul.f32 %v4260_v30, %v4260_v30  ;;  %4834 = vxpose.xlu1.b32.cont [6/16] (narrow) %v4250_v40, 8  ;;  %v4509_v53 = vsel %vm24_vm0, %v4260_v30, 0.0 }
 0x4ce   :  { %v4507_v60 = vsel %vm24_vm0, %v4255_v44, 0.0  ;;  %v4621_v48 = vmul.f32 %v4255_v44, %v4255_v44  ;;  %v4705_v22 = vadd.f32 %v4704_v0, %v4703_v37 }
 0x4cf   :  { %v4508_v20 = vadd.f32 %v4507_v60, %v4506_v11  ;;  %v4708_v23 = vsel %vm24_vm0, %v4622_v2, 0.0 }
 0x4d0   :  { %v4706_v4 = vsel %vm24_vm0, %v4621_v48, 0.0 }
 0x4d1   :  { %v4707_v38 = vadd.f32 %v4706_v4, %v4705_v22  ;;  %4835 = vxpose.xlu1.b32.cont [7/16] (narrow) %v4255_v44, 8  ;;  %v4510_v42 = vadd.f32 %v4509_v53, %v4508_v20 }
 0x4d2   :  { %v5212_v57 = vpop.f32.mrb[0].mxu1 }
 0x4d3   :  { %v4304_v58 = vpop.f32.mrb[1].mxu1  ;;  %v4709_v63 = vadd.f32 %v4708_v23, %v4707_v38  ;;  %v7519_v14 = vadd.f32 %v5212_v57, %v7400_v39 }
 0x4d4   :  { %v7516_v9 = vadd.f32 %v7400_v39, %v4304_v58 }
 0x4d5   :  { %4836 = vxpose.xlu1.b32.cont [8/16] (narrow) %v4260_v30, 8 }
 0x4d6   :  { %4863 = vxpose.xlu0.b32.start [1/16] (narrow) %v7516_v9, 8 }
 0x4da   :  { %v5200_v15 = vpop.f32.mrb[24].mxu0  ;;  %4864 = vxpose.xlu0.b32.cont [2/16] (narrow) %v7519_v14, 8 }
 0x4db   :  { %v4270_v31 = vadd.f32 %v5200_v15, %v7400_v39  ;;  %v4264_v46 = vpop.f32.mrb[25].mxu0 }
 0x4dc   :  { %v4265_v51 = vadd.f32 %v7400_v39, %v4264_v46  ;;  %v7743_v46 = vmov 0.0  }
 0x4dd   :  { %v4624_v62 = vmul.f32 %v4270_v31, %v4270_v31  ;;  %v4513_v29 = vsel %vm24_vm0, %v4270_v31, 0.0  ;;  %4463 = vst.msk [vmem:[%s7710_s6] sm:$0xff] %vm24_vm0, %v7743_v46 }
 0x4de   :  { %v4511_v50 = vsel %vm24_vm0, %v4265_v51, 0.0  ;;  %v4623_v59 = vmul.f32 %v4265_v51, %v4265_v51  ;;  %4837 = vxpose.xlu1.b32.cont [9/16] (narrow) %v4265_v51, 8  ;;  %v4631_v51 = vmul.f32 %v7516_v9, %v7516_v9 }
 0x4df   :  { %v4512_v17 = vadd.f32 %v4511_v50, %v4510_v42  ;;  %v4712_v25 = vsel %vm24_vm0, %v4624_v62, 0.0 }
 0x4e0   :  { %v4710_v27 = vsel %vm24_vm0, %v4623_v59, 0.0 }
 0x4e1   :  { %v4711_v41 = vadd.f32 %v4710_v27, %v4709_v63  ;;  %v4514_v13 = vadd.f32 %v4513_v29, %v4512_v17  ;;  %v4632_v17 = vmul.f32 %v7519_v14, %v7519_v14 }
 0x4e2   :  { %v5215_v7 = vpop.f32.mrb[2].mxu1  ;;  %4838 = vxpose.xlu1.b32.cont [10/16] (narrow) %v4270_v31, 8 }
 0x4e3   :  { %v4314_v8 = vpop.f32.mrb[3].mxu1  ;;  %v4713_v6 = vadd.f32 %v4712_v25, %v4711_v41  ;;  %v7533_v61 = vadd.f32 %v5215_v7, %v7400_v39  ;;  %v4527_v25 = vsel %vm24_vm0, %v7516_v9, 0.0  ;;  %v4726_v7 = vsel %vm24_vm0, %v4631_v51, 0.0 }
 0x4e4   :  { %v7530_v19 = vadd.f32 %v7400_v39, %v4314_v8 }
 0x4e6   :  { %4865 = vxpose.xlu0.b32.cont [3/16] (narrow) %v7530_v19, 8  ;;  %v4633_v8 = vmul.f32 %v7530_v19, %v7530_v19  ;;  %v4531_v9 = vsel %vm24_vm0, %v7530_v19, 0.0 }
 0x4ea   :  { %v5203_v16 = vpop.f32.mrb[26].mxu0  ;;  %4866 = vxpose.xlu0.b32.cont [4/16] (narrow) %v7533_v61, 8 }
 0x4eb   :  { %v4280_v1 = vadd.f32 %v5203_v16, %v7400_v39  ;;  %v4274_v36 = vpop.f32.mrb[27].mxu0 }
 0x4ec   :  { %v4275_v45 = vadd.f32 %v7400_v39, %v4274_v36  ;;  %v4728_v36 = vsel %vm24_vm0, %v4632_v17, 0.0 }
 0x4ed   :  { %v4626_v54 = vmul.f32 %v4280_v1, %v4280_v1  ;;  %v4517_v49 = vsel %vm24_vm0, %v4280_v1, 0.0 }
 0x4ee   :  { %v4515_v56 = vsel %vm24_vm0, %v4275_v45, 0.0  ;;  %v4625_v32 = vmul.f32 %v4275_v45, %v4275_v45  ;;  %4839 = vxpose.xlu1.b32.cont [11/16] (narrow) %v4275_v45, 8  ;;  %v4634_v45 = vmul.f32 %v7533_v61, %v7533_v61 }
 0x4ef   :  { %v4516_v21 = vadd.f32 %v4515_v56, %v4514_v13  ;;  %v4716_v24 = vsel %vm24_vm0, %v4626_v54, 0.0  ;;  %v4529_v13 = vsel %vm24_vm0, %v7519_v14, 0.0 }
 0x4f0   :  { %v4714_v33 = vsel %vm24_vm0, %v4625_v32, 0.0  ;;  %v4533_v32 = vsel %vm24_vm0, %v7533_v61, 0.0 }
 0x4f1   :  { %v4715_v34 = vadd.f32 %v4714_v33, %v4713_v6  ;;  %v4518_v35 = vadd.f32 %v4517_v49, %v4516_v21  ;;  %v4730_v21 = vsel %vm24_vm0, %v4633_v8, 0.0 }
 0x4f2   :  { %v5218_v40 = vpop.f32.mrb[4].mxu1  ;;  %4840 = vxpose.xlu1.b32.cont [12/16] (narrow) %v4280_v1, 8 }
 0x4f3   :  { %v4324_v43 = vpop.f32.mrb[5].mxu1  ;;  %v4717_v47 = vadd.f32 %v4716_v24, %v4715_v34  ;;  %v7547_v55 = vadd.f32 %v5218_v40, %v7400_v39 }
 0x4f4   :  { %v7544_v52 = vadd.f32 %v7400_v39, %v4324_v43 }
 0x4f5   :  { %v4636_v19 = vmul.f32 %v7547_v55, %v7547_v55 }
 0x4f6   :  { %4867 = vxpose.xlu0.b32.cont [5/16] (narrow) %v7544_v52, 8  ;;  %v4635_v24 = vmul.f32 %v7544_v52, %v7544_v52  ;;  %v4535_v40 = vsel %vm24_vm0, %v7544_v52, 0.0 }
 0x4fa   :  { %v5206_v3 = vpop.f32.mrb[28].mxu0  ;;  %4868 = vxpose.xlu0.b32.cont [6/16] (narrow) %v7547_v55, 8 }
 0x4fb   :  { %v4290_v5 = vadd.f32 %v5206_v3, %v7400_v39  ;;  %v4284_v10 = vpop.f32.mrb[29].mxu0  ;;  %v4537_v3 = vsel %vm24_vm0, %v7547_v55, 0.0 }
 0x4fc   :  { %v4285_v12 = vadd.f32 %v7400_v39, %v4284_v10 }
 0x4fd   :  { %v4628_v18 = vmul.f32 %v4290_v5, %v4290_v5  ;;  %v4521_v26 = vsel %vm24_vm0, %v4290_v5, 0.0 }
 0x4fe   :  { %v4519_v30 = vsel %vm24_vm0, %v4285_v12, 0.0  ;;  %v4627_v28 = vmul.f32 %v4285_v12, %v4285_v12  ;;  %4841 = vxpose.xlu1.b32.cont [13/16] (narrow) %v4285_v12, 8 }
 0x4ff   :  { %v4520_v37 = vadd.f32 %v4519_v30, %v4518_v35  ;;  %v4720_v44 = vsel %vm24_vm0, %v4628_v18, 0.0  ;;  %v4732_v35 = vsel %vm24_vm0, %v4634_v45, 0.0  ;;  %v4736_v30 = vsel %vm24_vm0, %v4636_v19, 0.0 }
 0x500   :  { %v4718_v11 = vsel %vm24_vm0, %v4627_v28, 0.0 }
 0x501   :  { %v4719_v0 = vadd.f32 %v4718_v11, %v4717_v47  ;;  %v4522_v2 = vadd.f32 %v4521_v26, %v4520_v37 }
 0x502   :  { %v5221_v53 = vpop.f32.mrb[6].mxu1  ;;  %4842 = vxpose.xlu1.b32.cont [14/16] (narrow) %v4290_v5, 8  ;;  %v4734_v5 = vsel %vm24_vm0, %v4635_v24, 0.0 }
 0x503   :  { %v4334_v60 = vpop.f32.mrb[7].mxu1  ;;  %v4721_v48 = vadd.f32 %v4720_v44, %v4719_v0  ;;  %v7559_v20 = vadd.f32 %v5221_v53, %v7400_v39 }
 0x504   :  { %v4335_v22 = vadd.f32 %v7400_v39, %v4334_v60  ;;  %v4813_v60 = vpop.trf.xlu0 }
 0x505   :  { %v4638_v28 = vmul.f32 %v7559_v20, %v7559_v20  ;;  %v4541_v55 = vsel %vm24_vm0, %v7559_v20, 0.0  ;;  %4861 = vst [vmem:[%s7711_s5] sm:$0xff] %v4813_v60 }
 0x506   :  { %4869 = vxpose.xlu0.b32.cont [7/16] (narrow) %v4335_v22, 8  ;;  %v4637_v10 = vmul.f32 %v4335_v22, %v4335_v22  ;;  %v4539_v52 = vsel %vm24_vm0, %v4335_v22, 0.0 }
 0x507   :  { %v4740_v22 = vsel %vm24_vm0, %v4638_v28, 0.0 }
 0x50a   :  { %v5209_v23 = vpop.f32.mrb[30].mxu0  ;;  %4870 = vxpose.xlu0.b32.cont [8/16] (narrow) %v7559_v20, 8 }
 0x50b   :  { %v4300_v4 = vadd.f32 %v5209_v23, %v7400_v39  ;;  %v4294_v38 = vpop.f32.mrb[31].mxu0 }
 0x50c   :  { %v4295_v42 = vadd.f32 %v7400_v39, %v4294_v38 }
 0x50d   :  { %v4630_v57 = vmul.f32 %v4300_v4, %v4300_v4  ;;  %v4525_v58 = vsel %vm24_vm0, %v4300_v4, 0.0 }
 0x50e   :  { %v4523_v63 = vsel %vm24_vm0, %v4295_v42, 0.0  ;;  %v4629_v15 = vmul.f32 %v4295_v42, %v4295_v42  ;;  %4843 = vxpose.xlu1.b32.cont [15/16] (narrow) %v4295_v42, 8 }
 0x50f   :  { %v4524_v31 = vadd.f32 %v4523_v63, %v4522_v2  ;;  %v4724_v62 = vsel %vm24_vm0, %v4630_v57, 0.0  ;;  %v4738_v2 = vsel %vm24_vm0, %v4637_v10, 0.0 }
 0x510   :  { %v4722_v29 = vsel %vm24_vm0, %v4629_v15, 0.0 }
 0x511   :  { %v4526_v50 = vadd.f32 %v4525_v58, %v4524_v31  ;;  %v4723_v59 = vadd.f32 %v4722_v29, %v4721_v48 }
 0x512   :  { %4844 = vxpose.xlu1.b32.end [16/16] (narrow) %v4300_v4, 8 }
 0x513   :  { %v4528_v27 = vadd.f32 %v4527_v25, %v4526_v50  ;;  %v4725_v41 = vadd.f32 %v4724_v62, %v4723_v59 }
 0x515   :  { %v4530_v6 = vadd.f32 %v4529_v13, %v4528_v27  ;;  %v4727_v16 = vadd.f32 %v4726_v7, %v4725_v41  ;;  %v5224_v1 = vpop.f32.mrb[8].mxu1 }
 0x516   :  { %v4344_v54 = vpop.f32.mrb[9].mxu1  ;;  %v4350_v43 = vadd.f32 %v5224_v1, %v7400_v39 }
 0x517   :  { %v4532_v49 = vadd.f32 %v4531_v9, %v4530_v6  ;;  %v4729_v56 = vadd.f32 %v4728_v36, %v4727_v16  ;;  %v4345_v14 = vadd.f32 %v7400_v39, %v4344_v54 }
 0x518   :  { %v4640_v4 = vmul.f32 %v4350_v43, %v4350_v43  ;;  %v4545_v58 = vsel %vm24_vm0, %v4350_v43, 0.0 }
 0x519   :  { %v4731_v33 = vadd.f32 %v4730_v21, %v4729_v56  ;;  %v4534_v34 = vadd.f32 %v4533_v32, %v4532_v49  ;;  %4871 = vxpose.xlu0.b32.cont [9/16] (narrow) %v4345_v14, 8  ;;  %v4639_v53 = vmul.f32 %v4345_v14, %v4345_v14  ;;  %v4543_v38 = vsel %vm24_vm0, %v4345_v14, 0.0 }
 0x51a   :  { %v4744_v62 = vsel %vm24_vm0, %v4640_v4, 0.0 }
 0x51b   :  { %v4536_v47 = vadd.f32 %v4535_v40, %v4534_v34  ;;  %v4733_v61 = vadd.f32 %v4732_v35, %v4731_v33  ;;  %v4742_v63 = vsel %vm24_vm0, %v4639_v53, 0.0 }
 0x51d   :  { %v4538_v12 = vadd.f32 %v4537_v3, %v4536_v47  ;;  %v4735_v18 = vadd.f32 %v4734_v5, %v4733_v61  ;;  %v5227_v26 = vpop.f32.mrb[10].mxu1  ;;  %4872 = vxpose.xlu0.b32.cont [10/16] (narrow) %v4350_v43, 8 }
 0x51e   :  { %v4354_v37 = vpop.f32.mrb[11].mxu1  ;;  %v4360_v42 = vadd.f32 %v5227_v26, %v7400_v39 }
 0x51f   :  { %v4540_v44 = vadd.f32 %v4539_v52, %v4538_v12  ;;  %v4737_v11 = vadd.f32 %v4736_v30, %v4735_v18  ;;  %v4355_v0 = vadd.f32 %v7400_v39, %v4354_v37 }
 0x520   :  { %v4642_v29 = vmul.f32 %v4360_v42, %v4360_v42  ;;  %v4549_v13 = vsel %vm24_vm0, %v4360_v42, 0.0 }
 0x521   :  { %v4542_v48 = vadd.f32 %v4541_v55, %v4540_v44  ;;  %v4739_v23 = vadd.f32 %v4738_v2, %v4737_v11  ;;  %4873 = vxpose.xlu0.b32.cont [11/16] (narrow) %v4355_v0, 8  ;;  %v4641_v15 = vmul.f32 %v4355_v0, %v4355_v0  ;;  %v4547_v50 = vsel %vm24_vm0, %v4355_v0, 0.0 }
 0x522   :  { %v4748_v36 = vsel %vm24_vm0, %v4642_v29, 0.0 }
 0x523   :  { %v4544_v57 = vadd.f32 %v4543_v38, %v4542_v48  ;;  %v4741_v20 = vadd.f32 %v4740_v22, %v4739_v23  ;;  %v4746_v7 = vsel %vm24_vm0, %v4641_v15, 0.0 }
 0x525   :  { %v4743_v31 = vadd.f32 %v4742_v63, %v4741_v20  ;;  %v4546_v46 = vadd.f32 %v4545_v58, %v4544_v57  ;;  %v5230_v51 = vpop.f32.mrb[12].mxu1  ;;  %4874 = vxpose.xlu0.b32.cont [12/16] (narrow) %v4360_v42, 8 }
 0x526   :  { %v4370_v59 = vadd.f32 %v5230_v51, %v7400_v39  ;;  %v4364_v17 = vpop.f32.mrb[13].mxu1 }
 0x527   :  { %v4548_v25 = vadd.f32 %v4547_v50, %v4546_v46  ;;  %v4745_v27 = vadd.f32 %v4744_v62, %v4743_v31  ;;  %v4365_v41 = vadd.f32 %v7400_v39, %v4364_v17 }
 0x528   :  { %v4644_v45 = vmul.f32 %v4370_v59, %v4370_v59  ;;  %v4553_v56 = vsel %vm24_vm0, %v4370_v59, 0.0 }
 0x529   :  { %v4747_v8 = vadd.f32 %v4746_v7, %v4745_v27  ;;  %v4550_v6 = vadd.f32 %v4549_v13, %v4548_v25  ;;  %v4551_v16 = vsel %vm24_vm0, %v4365_v41, 0.0  ;;  %v4643_v1 = vmul.f32 %v4365_v41, %v4365_v41  ;;  %4875 = vxpose.xlu0.b32.cont [13/16] (narrow) %v4365_v41, 8 }
 0x52a   :  { %v4752_v24 = vsel %vm24_vm0, %v4644_v45, 0.0 }
 0x52b   :  { %v4552_v9 = vadd.f32 %v4551_v16, %v4550_v6  ;;  %v4749_v54 = vadd.f32 %v4748_v36, %v4747_v8  ;;  %v4750_v49 = vsel %vm24_vm0, %v4643_v1, 0.0 }
 0x52d   :  { %v4751_v14 = vadd.f32 %v4750_v49, %v4749_v54  ;;  %v5233_v32 = vpop.f32.mrb[14].mxu1  ;;  %4876 = vxpose.xlu0.b32.cont [14/16] (narrow) %v4370_v59, 8  ;;  %v4554_v21 = vadd.f32 %v4553_v56, %v4552_v9  ;;  %v7661_v49 = vld [vmem:[%s7709_s4] ss:$0 sm:$0xff] }
 0x52e   :  { %v4380_v33 = vadd.f32 %v5233_v32, %v7400_v39  ;;  %v4374_v34 = vpop.f32.mrb[15].mxu1 }
 0x52f   :  { %v4375_v35 = vadd.f32 %v7400_v39, %v4374_v34  ;;  %v4753_v19 = vadd.f32 %v4752_v24, %v4751_v14 }
 0x530   :  { %v4646_v40 = vmul.f32 %v4380_v33, %v4380_v33  ;;  %v4557_v3 = vsel %vm24_vm0, %v4380_v33, 0.0 }
 0x531   :  { %v4555_v43 = vsel %vm24_vm0, %v4375_v35, 0.0  ;;  %v4645_v47 = vmul.f32 %v4375_v35, %v4375_v35  ;;  %4877 = vxpose.xlu0.b32.cont [15/16] (narrow) %v4375_v35, 8 }
 0x532   :  { %v4556_v61 = vadd.f32 %v4555_v43, %v4554_v21  ;;  %v4756_v18 = vsel %vm24_vm0, %v4646_v40, 0.0 }
 0x533   :  { %v4754_v5 = vsel %vm24_vm0, %v4645_v47, 0.0 }
 0x534   :  { %v4755_v10 = vadd.f32 %v4754_v5, %v4753_v19  ;;  %v4558_v12 = vadd.f32 %v4557_v3, %v4556_v61 }
 0x535   :  { %v5236_v26 = vpop.f32.mrb[16].mxu1  ;;  %4878 = vxpose.xlu0.b32.end [16/16] (narrow) %v4380_v33, 8 }
 0x536   :  { %v4390_v30 = vadd.f32 %v5236_v26, %v7400_v39  ;;  %v4384_v28 = vpop.f32.mrb[17].mxu1  ;;  %v4757_v52 = vadd.f32 %v4756_v18, %v4755_v10 }
 0x537   :  { %v4385_v37 = vadd.f32 %v7400_v39, %v4384_v28 }
 0x538   :  { %v4648_v44 = vmul.f32 %v4390_v30, %v4390_v30  ;;  %v4561_v2 = vsel %vm24_vm0, %v4390_v30, 0.0 }
 0x539   :  { %v4559_v11 = vsel %vm24_vm0, %v4385_v37, 0.0  ;;  %v4647_v0 = vmul.f32 %v4385_v37, %v4385_v37  ;;  %4895 = vxpose.xlu1.b32.start [1/16] (narrow) %v4385_v37, 8 }
 0x53a   :  { %v4560_v55 = vadd.f32 %v4559_v11, %v4558_v12  ;;  %v4760_v23 = vsel %vm24_vm0, %v4648_v44, 0.0 }
 0x53b   :  { %v4758_v53 = vsel %vm24_vm0, %v4647_v0, 0.0 }
 0x53c   :  { %v4759_v60 = vadd.f32 %v4758_v53, %v4757_v52  ;;  %v4562_v48 = vadd.f32 %v4561_v2, %v4560_v55 }
 0x53d   :  { %4896 = vxpose.xlu1.b32.cont [2/16] (narrow) %v4390_v30, 8 }
 0x53e   :  { %v4761_v22 = vadd.f32 %v4760_v23, %v4759_v60 }
 0x541   :  { %v5239_v4 = vpop.f32.mrb[18].mxu1 }
 0x542   :  { %v4400_v38 = vadd.f32 %v5239_v4, %v7400_v39  ;;  %v4394_v42 = vpop.f32.mrb[19].mxu1 }
 0x543   :  { %v4395_v57 = vadd.f32 %v7400_v39, %v4394_v42 }
 0x544   :  { %v4650_v20 = vmul.f32 %v4400_v38, %v4400_v38  ;;  %v4565_v31 = vsel %vm24_vm0, %v4400_v38, 0.0 }
 0x545   :  { %v4563_v58 = vsel %vm24_vm0, %v4395_v57, 0.0  ;;  %v4649_v63 = vmul.f32 %v4395_v57, %v4395_v57  ;;  %4897 = vxpose.xlu1.b32.cont [3/16] (narrow) %v4395_v57, 8 }
 0x546   :  { %v4564_v15 = vadd.f32 %v4563_v58, %v4562_v48  ;;  %v4764_v29 = vsel %vm24_vm0, %v4650_v20, 0.0 }
 0x547   :  { %v4762_v46 = vsel %vm24_vm0, %v4649_v63, 0.0 }
 0x548   :  { %v4763_v51 = vadd.f32 %v4762_v46, %v4761_v22  ;;  %v4566_v62 = vadd.f32 %v4565_v31, %v4564_v15 }
 0x549   :  { %4898 = vxpose.xlu1.b32.cont [4/16] (narrow) %v4400_v38, 8 }
 0x54a   :  { %v4765_v50 = vadd.f32 %v4764_v29, %v4763_v51 }
 0x54d   :  { %v5242_v59 = vpop.f32.mrb[20].mxu1 }
 0x54e   :  { %v4410_v17 = vadd.f32 %v5242_v59, %v7400_v39  ;;  %v4404_v25 = vpop.f32.mrb[21].mxu1 }
 0x54f   :  { %v4405_v27 = vadd.f32 %v7400_v39, %v4404_v25 }
 0x550   :  { %v4652_v41 = vmul.f32 %v4410_v17, %v4410_v17  ;;  %v4569_v6 = vsel %vm24_vm0, %v4410_v17, 0.0 }
 0x551   :  { %v4567_v13 = vsel %vm24_vm0, %v4405_v27, 0.0  ;;  %v4651_v7 = vmul.f32 %v4405_v27, %v4405_v27  ;;  %4899 = vxpose.xlu1.b32.cont [5/16] (narrow) %v4405_v27, 8 }
 0x552   :  { %v4568_v8 = vadd.f32 %v4567_v13, %v4566_v62  ;;  %v4768_v45 = vsel %vm24_vm0, %v4652_v41, 0.0 }
 0x553   :  { %v4766_v16 = vsel %vm24_vm0, %v4651_v7, 0.0 }
 0x554   :  { %v4767_v1 = vadd.f32 %v4766_v16, %v4765_v50  ;;  %v4570_v36 = vadd.f32 %v4569_v6, %v4568_v8 }
 0x555   :  { %4900 = vxpose.xlu1.b32.cont [6/16] (narrow) %v4410_v17, 8 }
 0x556   :  { %v4769_v9 = vadd.f32 %v4768_v45, %v4767_v1  ;;  %v4845_v54 = vpop.trf.xlu1 }
 0x557   :  { %4862 = vst [vmem:[%s7711_s5 + $0x8] sm:$0xff] %v4845_v54 }
 0x559   :  { %v5245_v39 = vpop.f32.mrb[22].mxu1 }
 0x55a   :  { %v4420_v56 = vadd.f32 %v7661_v49, %v5245_v39  ;;  %v4414_v14 = vpop.f32.mrb[23].mxu1 }
 0x55b   :  { %v4415_v32 = vadd.f32 %v7661_v49, %v4414_v14 }
 0x55c   :  { %v4654_v21 = vmul.f32 %v4420_v56, %v4420_v56  ;;  %v4573_v35 = vsel %vm24_vm0, %v4420_v56, 0.0 }
 0x55d   :  { %v4571_v24 = vsel %vm24_vm0, %v4415_v32, 0.0  ;;  %v4653_v33 = vmul.f32 %v4415_v32, %v4415_v32  ;;  %4901 = vxpose.xlu1.b32.cont [7/16] (narrow) %v4415_v32, 8 }
 0x55e   :  { %v4572_v34 = vadd.f32 %v4571_v24, %v4570_v36  ;;  %v4772_v47 = vsel %vm24_vm0, %v4654_v21, 0.0 }
 0x55f   :  { %v4770_v19 = vsel %vm24_vm0, %v4653_v33, 0.0 }
 0x560   :  { %v4771_v40 = vadd.f32 %v4770_v19, %v4769_v9  ;;  %v4574_v43 = vadd.f32 %v4573_v35, %v4572_v34 }
 0x561   :  { %4902 = vxpose.xlu1.b32.cont [8/16] (narrow) %v4420_v56, 8 }
 0x562   :  { %v4773_v61 = vadd.f32 %v4772_v47, %v4771_v40 }
 0x565   :  { %v5248_v3 = vpop.f32.mrb[24].mxu1 }
 0x566   :  { %v4430_v5 = vadd.f32 %v7661_v49, %v5248_v3  ;;  %v4424_v10 = vpop.f32.mrb[25].mxu1 }
 0x567   :  { %v4425_v12 = vadd.f32 %v7661_v49, %v4424_v10 }
 0x568   :  { %v4656_v18 = vmul.f32 %v4430_v5, %v4430_v5  ;;  %v4577_v52 = vsel %vm24_vm0, %v4430_v5, 0.0 }
 0x569   :  { %v4575_v26 = vsel %vm24_vm0, %v4425_v12, 0.0  ;;  %v4655_v30 = vmul.f32 %v4425_v12, %v4425_v12  ;;  %4903 = vxpose.xlu1.b32.cont [9/16] (narrow) %v4425_v12, 8 }
 0x56a   :  { %v4576_v28 = vadd.f32 %v4575_v26, %v4574_v43  ;;  %v4776_v0 = vsel %vm24_vm0, %v4656_v18, 0.0 }
 0x56b   :  { %v4774_v37 = vsel %vm24_vm0, %v4655_v30, 0.0 }
 0x56c   :  { %v4775_v44 = vadd.f32 %v4774_v37, %v4773_v61  ;;  %v4578_v11 = vadd.f32 %v4577_v52, %v4576_v28 }
 0x56d   :  { %4904 = vxpose.xlu1.b32.cont [10/16] (narrow) %v4430_v5, 8 }
 0x56e   :  { %v4777_v55 = vadd.f32 %v4776_v0, %v4775_v44 }
 0x571   :  { %v5251_v2 = vpop.f32.mrb[26].mxu1 }
 0x572   :  { %v4440_v53 = vadd.f32 %v7661_v49, %v5251_v2  ;;  %v4434_v60 = vpop.f32.mrb[27].mxu1 }
 0x573   :  { %v4435_v48 = vadd.f32 %v7661_v49, %v4434_v60 }
 0x574   :  { %v4658_v23 = vmul.f32 %v4440_v53, %v4440_v53  ;;  %v4581_v42 = vsel %vm24_vm0, %v4440_v53, 0.0 }
 0x575   :  { %v4579_v22 = vsel %vm24_vm0, %v4435_v48, 0.0  ;;  %v4657_v4 = vmul.f32 %v4435_v48, %v4435_v48  ;;  %4905 = vxpose.xlu1.b32.cont [11/16] (narrow) %v4435_v48, 8 }
 0x576   :  { %v4580_v38 = vadd.f32 %v4579_v22, %v4578_v11  ;;  %v4780_v63 = vsel %vm24_vm0, %v4658_v23, 0.0 }
 0x577   :  { %v4778_v57 = vsel %vm24_vm0, %v4657_v4, 0.0 }
 0x578   :  { %v4779_v20 = vadd.f32 %v4778_v57, %v4777_v55  ;;  %v4582_v58 = vadd.f32 %v4581_v42, %v4580_v38 }
 0x579   :  { %4906 = vxpose.xlu1.b32.cont [12/16] (narrow) %v4440_v53, 8  ;;  %v4879_v15 = vpop.trf.xlu0 }
 0x57a   :  { %v4781_v31 = vadd.f32 %v4780_v63, %v4779_v20  ;;  %5069 = vst [vmem:[%s7711_s5 + $0x10] sm:$0xff] %v4879_v15 }
 0x57d   :  { %v5254_v46 = vpop.f32.mrb[28].mxu1 }
 0x57e   :  { %v4450_v51 = vadd.f32 %v7661_v49, %v5254_v46  ;;  %v4444_v62 = vpop.f32.mrb[29].mxu1 }
 0x57f   :  { %v4445_v29 = vadd.f32 %v7661_v49, %v4444_v62 }
 0x580   :  { %v4660_v50 = vmul.f32 %v4450_v51, %v4450_v51  ;;  %v4585_v27 = vsel %vm24_vm0, %v4450_v51, 0.0 }
 0x581   :  { %v4583_v59 = vsel %vm24_vm0, %v4445_v29, 0.0  ;;  %v4659_v17 = vmul.f32 %v4445_v29, %v4445_v29  ;;  %4907 = vxpose.xlu1.b32.cont [13/16] (narrow) %v4445_v29, 8 }
 0x582   :  { %v4584_v25 = vadd.f32 %v4583_v59, %v4582_v58  ;;  %v4784_v8 = vsel %vm24_vm0, %v4660_v50, 0.0 }
 0x583   :  { %v4782_v41 = vsel %vm24_vm0, %v4659_v17, 0.0 }
 0x584   :  { %v4783_v13 = vadd.f32 %v4782_v41, %v4781_v31  ;;  %v4586_v7 = vadd.f32 %v4585_v27, %v4584_v25 }
 0x585   :  { %4908 = vxpose.xlu1.b32.cont [14/16] (narrow) %v4450_v51, 8 }
 0x586   :  { %v4785_v6 = vadd.f32 %v4784_v8, %v4783_v13 }
 0x589   :  { %v5257_v16 = vpop.f32.mrb[30].mxu1 }
 0x58a   :  { %v4460_v1 = vadd.f32 %v7661_v49, %v5257_v16  ;;  %v4454_v36 = vpop.f32.mrb[31].mxu1 }
 0x58b   :  { %v4455_v45 = vadd.f32 %v7661_v49, %v4454_v36 }
 0x58c   :  { %v4662_v9 = vmul.f32 %v4460_v1, %v4460_v1  ;;  %v4589_v14 = vsel %vm24_vm0, %v4460_v1, 0.0 }
 0x58d   :  { %v4587_v54 = vsel %vm24_vm0, %v4455_v45, 0.0  ;;  %v4661_v39 = vmul.f32 %v4455_v45, %v4455_v45  ;;  %4909 = vxpose.xlu1.b32.cont [15/16] (narrow) %v4455_v45, 8 }
 0x58e   :  { %v4588_v56 = vadd.f32 %v4587_v54, %v4586_v7  ;;  %v4788_v33 = vsel %vm24_vm0, %v4662_v9, 0.0 }
 0x58f   :  { %v4786_v32 = vsel %vm24_vm0, %v4661_v39, 0.0 }
 0x590   :  { %v4590_v21 = vadd.f32 %v4589_v14, %v4588_v56  ;;  %v4787_v24 = vadd.f32 %v4786_v32, %v4785_v6 }
 0x591   :  { %4910 = vxpose.xlu1.b32.end [16/16] (narrow) %v4460_v1, 8 }
 0x592   :  { %v4591_v34 = vrot.slane %v4590_v21, 4  ;;  %v4789_v35 = vadd.f32 %v4788_v33, %v4787_v24 }
 0x594   :  { %v4592_v19 = vadd.f32 %v4591_v34, %v4590_v21  ;;  %v4790_v40 = vrot.slane %v4789_v35, 4 }
 0x596   :  { %v4593_v49 = vrot.slane %v4592_v19, 2  ;;  %v4791_v43 = vadd.f32 %v4790_v40, %v4789_v35 }
 0x598   :  { %v4594_v47 = vadd.f32 %v4593_v49, %v4592_v19  ;;  %v4792_v61 = vrot.slane %v4791_v43, 2 }
 0x59a   :  { %v4595_v3 = vrot.slane %v4594_v47, 1  ;;  %v4793_v5 = vadd.f32 %v4792_v61, %v4791_v43 }
 0x59c   :  { %v4596_v10 = vadd.f32 %v4595_v3, %v4594_v47  ;;  %v4794_v12 = vrot.slane %v4793_v5, 1 }
 0x59e   :  { %4598 = vst.msk [vmem:[%s7710_s6] sm:$0x1] %vm4597_vm15, %v4596_v10  ;;  %v4795_v18 = vadd.f32 %v4794_v12, %v4793_v5 }
 0x5a0   :  { %4796 = vst.msk [vmem:[%s7710_s6 + $0x1] sm:$0x1] %vm4597_vm15, %v4795_v18 }
 0x5d5   :  { %v4911_v26 = vpop.trf.xlu1 }
 0x5d6   :  { %5070 = vst [vmem:[%s7711_s5 + $0x18] sm:$0xff] %v4911_v26 }

</bundles_post_ra>
